<compile_context>
chip_gen: v7x
topology: tpu7x:2x2x1
jax: 0.10.0
libtpu: 0.0.40
codegen_flags: <defaults>
</compile_context>

<pallas_src>
import jax
import jax.numpy as jnp
from jax import lax
from jax.experimental import pallas as pl
from jax.experimental.pallas import tpu as pltpu


# ----------------------------------------------------------------------------
# In-kernel helper: self-attention pooling + l2norm
#   attn  = x @ x.T ; score = softmax(attn, dim=1) ; out = score @ x
#   out   = out / (||out||_2(dim=-1) + 1e-8)
# ----------------------------------------------------------------------------
def _attn_l2norm(x):
    # contract feature dim of both operands -> x @ x.T without explicit transpose
    attn = lax.dot_general(x, x, (((1,), (1,)), ((), ())),
                           preferred_element_type=jnp.float32)
    m = jnp.max(attn, axis=1, keepdims=True)
    e = jnp.exp(attn - m)
    score = e * pl.reciprocal(jnp.sum(e, axis=1, keepdims=True), approx=True)
    out = jnp.dot(score, x, preferred_element_type=jnp.float32)
    norm = jnp.sqrt(jnp.sum(out * out, axis=-1, keepdims=True)) + 1e-8
    return out / norm


# ----------------------------------------------------------------------------
# Fused VAIPENet forward kernel.
#   img  x : (N, 2048) -> fc2 -> relu -> fc3 -> relu -> attn-pool -> l2norm
#   text y : (T, 768)  -> LSTM(768->256) -> fc1 -> relu -> attn-pool -> l2norm
# Linear weights are (in_features, out_features); biases are (1, out_features).
# fc2_w and w_ih_t arrive in bf16 (HBM-traffic halving), everything else f32.
# ----------------------------------------------------------------------------
def _vaipenet_kernel(x_ref, y_ref,
                     w_ih_ref, w_hh_ref, b_lstm_ref,
                     fc1w_ref, fc1b_ref, fc2w_ref, fc2b_ref, fc3w_ref, fc3b_ref,
                     img_ref, txt_ref,
                     hseq_scr):
    # ---------------- image branch ----------------
    x = x_ref[...]
    h = jnp.dot(x, fc2w_ref[...].astype(jnp.float32),
                preferred_element_type=jnp.float32) + fc2b_ref[...]
    h = jnp.maximum(h, 0.0)
    h = jnp.dot(h, fc3w_ref[...],
                preferred_element_type=jnp.float32) + fc3b_ref[...]
    h = jnp.maximum(h, 0.0)
    img_ref[...] = _attn_l2norm(h).astype(img_ref.dtype)

    # ---------------- text branch ----------------
    T = y_ref.shape[0]
    H = w_hh_ref.shape[0]
    y = y_ref[...]
    # input projection for the whole sequence (single big matmul, bias folded)
    gx = jnp.dot(y, w_ih_ref[...].astype(jnp.float32),
                 preferred_element_type=jnp.float32) + b_lstm_ref[...]
    w_hh = w_hh_ref[...]

    h_t = jnp.zeros((1, H), jnp.float32)
    c_t = jnp.zeros((1, H), jnp.float32)
    # fully unrolled recurrence; h/c live in vregs, gates in PyTorch order i,f,g,o
    for t in range(T):
        z = gx[t:t + 1, :] + jnp.dot(h_t, w_hh, preferred_element_type=jnp.float32)
        i_g = jax.nn.sigmoid(z[:, 0 * H:1 * H])
        f_g = jax.nn.sigmoid(z[:, 1 * H:2 * H])
        g_g = jnp.tanh(z[:, 2 * H:3 * H])
        o_g = jax.nn.sigmoid(z[:, 3 * H:4 * H])
        c_t = f_g * c_t + i_g * g_g
        h_t = o_g * jnp.tanh(c_t)
        hseq_scr[pl.ds(t, 1), :] = h_t          # static row index; VMEM only

    hseq = hseq_scr[...]                        # (T, H), one lane-dense read
    tfeat = jnp.dot(hseq, fc1w_ref[...],
                    preferred_element_type=jnp.float32) + fc1b_ref[...]
    tfeat = jnp.maximum(tfeat, 0.0)
    txt_ref[...] = _attn_l2norm(tfeat).astype(txt_ref.dtype)


@jax.jit
def vaipenet_forward(x, y, p):
    N = x.shape[0]
    T = y.shape[0]
    H = p["w_hh_t"].shape[0]
    vmem = pl.BlockSpec(memory_space=pltpu.MemorySpace.VMEM)
    b_lstm = (p["b_ih"] + p["b_hh"]).reshape(1, -1)

    kernel = pl.pallas_call(
        _vaipenet_kernel,
        out_shape=(jax.ShapeDtypeStruct((N, 128), jnp.float32),
                   jax.ShapeDtypeStruct((T, 128), jnp.float32)),
        in_specs=[vmem] * 11,
        out_specs=(vmem, vmem),
        scratch_shapes=[pltpu.VMEM((T, H), jnp.float32)],
        compiler_params=pltpu.CompilerParams(vmem_limit_bytes=32 * 1024 * 1024),
    )
    return kernel(
        x, y,
        p["w_ih_t"], p["w_hh_t"], b_lstm,
        p["fc1_w"], p["fc1_b"].reshape(1, -1),
        p["fc2_w"], p["fc2_b"].reshape(1, -1),
        p["fc3_w"], p["fc3_b"].reshape(1, -1),
    )


# ----------------------------------------------------------------------------
# Parameter construction (deterministic, mirrors __init__ shapes).
# weight_norm(Linear): effective weight = g * v / ||v||_row ; biases = 0.
# ----------------------------------------------------------------------------
def _weight_norm_linear_params(key, in_f, out_f):
    r = jnp.sqrt(6.0) / jnp.sqrt(in_f + out_f)
    v = jax.random.uniform(key, (out_f, in_f), jnp.float32, -r, r)
    g = jnp.sqrt(jnp.sum(v * v, axis=1, keepdims=True))          # weight_g (dim=0)
    w_eff = g * v / jnp.sqrt(jnp.sum(v * v, axis=1, keepdims=True))
    return w_eff.T, jnp.zeros((out_f,), jnp.float32)              # (in, out), bias=0


def make_params(seed=42):
    keys = jax.random.split(jax.random.PRNGKey(seed), 8)
    H, IN = 256, 768
    k = 1.0 / jnp.sqrt(H)
    params = {}
    # LSTM(768, 256) — input-projection weight stored bf16 (dominant HBM traffic)
    params["w_ih_t"] = jax.random.uniform(
        keys[0], (IN, 4 * H), jnp.float32, -k, k).astype(jnp.bfloat16)
    params["w_hh_t"] = jax.random.uniform(keys[1], (H, 4 * H), jnp.float32, -k, k)
    params["b_ih"] = jax.random.uniform(keys[2], (4 * H,), jnp.float32, -k, k)
    params["b_hh"] = jax.random.uniform(keys[3], (4 * H,), jnp.float32, -k, k)
    # weight-normed Linears; fc2 (2048x256) stored bf16 for the same reason
    params["fc1_w"], params["fc1_b"] = _weight_norm_linear_params(keys[4], 256, 128)
    fc2_w, params["fc2_b"] = _weight_norm_linear_params(keys[5], 2048, 256)
    params["fc2_w"] = fc2_w.astype(jnp.bfloat16)
    params["fc3_w"], params["fc3_b"] = _weight_norm_linear_params(keys[6], 256, 128)
    return params


# ----------------------------------------------------------------------------
# Pure-JAX reference (same math, same bf16-stored weights) for correctness.
# ----------------------------------------------------------------------------
def _ref_attn_l2norm(x):
    attn = x @ x.T
    score = jax.nn.softmax(attn, axis=1)
    out = score @ x
    norm = jnp.sqrt(jnp.sum(out * out, axis=-1, keepdims=True)) + 1e-8
    return out / norm


def _ref_forward(x, y, p):
    # img
    h = jnp.maximum(x @ p["fc2_w"].astype(jnp.float32) + p["fc2_b"], 0.0)
    h = jnp.maximum(h @ p["fc3_w"] + p["fc3_b"], 0.0)
    img = _ref_attn_l2norm(h)
    # text
    H = 256
    gx = y @ p["w_ih_t"].astype(jnp.float32) + p["b_ih"] + p["b_hh"]

    def step(carry, g_t):
        h_t, c_t = carry
        z = g_t + h_t @ p["w_hh_t"]
        i = jax.nn.sigmoid(z[0 * H:1 * H])
        f = jax.nn.sigmoid(z[1 * H:2 * H])
        g = jnp.tanh(z[2 * H:3 * H])
        o = jax.nn.sigmoid(z[3 * H:4 * H])
        c_n = f * c_t + i * g
        h_n = o * jnp.tanh(c_n)
        return (h_n, c_n), h_n

    (_, _), hs = lax.scan(step, (jnp.zeros((H,)), jnp.zeros((H,))), gx)
    t = jnp.maximum(hs @ p["fc1_w"] + p["fc1_b"], 0.0)
    txt = _ref_attn_l2norm(t)
    return img, txt


if __name__ == "__main__":
    key = jax.random.PRNGKey(0)
    kx, ky = jax.random.split(key)
    x_img = jax.random.normal(kx, (4, 2048), jnp.float32)   # img features
    y_txt = jax.random.normal(ky, (8, 768), jnp.float32)    # text sequence (T, 768)

    params = make_params()

    emb_img, emb_txt = vaipenet_forward(x_img, y_txt, params)
    jax.block_until_ready((emb_img, emb_txt))

    ref_img, ref_txt = _ref_forward(x_img, y_txt, params)
    assert emb_img.shape == (4, 128) and emb_txt.shape == (8, 128)
    assert jnp.allclose(emb_img, ref_img, rtol=1e-3, atol=1e-3)
    assert jnp.allclose(emb_txt, ref_txt, rtol=1e-3, atol=1e-3)

    print("KERNEL_OK")
</pallas_src>

<mosaic_0001>
module attributes {stable_mosaic.version = 11 : i64} {
  func.func @_vaipenet_kernel(%arg0: memref<4x2048xf32, #tpu.memory_space<vmem>>, %arg1: memref<8x768xf32, #tpu.memory_space<vmem>>, %arg2: memref<768x1024xbf16, #tpu.memory_space<vmem>>, %arg3: memref<256x1024xf32, #tpu.memory_space<vmem>>, %arg4: memref<1x1024xf32, #tpu.memory_space<vmem>>, %arg5: memref<256x128xf32, #tpu.memory_space<vmem>>, %arg6: memref<1x128xf32, #tpu.memory_space<vmem>>, %arg7: memref<2048x256xbf16, #tpu.memory_space<vmem>>, %arg8: memref<1x256xf32, #tpu.memory_space<vmem>>, %arg9: memref<256x128xf32, #tpu.memory_space<vmem>>, %arg10: memref<1x128xf32, #tpu.memory_space<vmem>>, %arg11: memref<4x128xf32, #tpu.memory_space<vmem>>, %arg12: memref<8x128xf32, #tpu.memory_space<vmem>>, %arg13: memref<8x256xf32, #tpu.memory_space<vmem>>) attributes {dimension_semantics = [], scalar_prefetch = 0 : i64, scratch_operands = 1 : i64, tpu.core_type = #tpu.core_type<tc>} {
    %c0 = arith.constant 0 : index
    %c0_0 = arith.constant 0 : index
    %0 = vector.load %arg0[%c0, %c0_0] : memref<4x2048xf32, #tpu.memory_space<vmem>>, vector<4x2048xf32>
    %c0_1 = arith.constant 0 : index
    %c0_2 = arith.constant 0 : index
    %1 = vector.load %arg7[%c0_1, %c0_2] : memref<2048x256xbf16, #tpu.memory_space<vmem>>, vector<2048x256xbf16>
    %2 = arith.extf %1 : vector<2048x256xbf16> to vector<2048x256xf32>
    %cst = arith.constant dense<0.000000e+00> : vector<4x256xf32>
    %3 = tpu.matmul %0, %2, %cst {dimension_numbers = #tpu.dot_dimension_numbers<[1], [0], [0], [1], [0, 0, 1, 1], [], []>} : vector<4x2048xf32>, vector<2048x256xf32>, vector<4x256xf32> -> vector<4x256xf32>
    %c0_3 = arith.constant 0 : index
    %c0_4 = arith.constant 0 : index
    %4 = vector.load %arg8[%c0_3, %c0_4] : memref<1x256xf32, #tpu.memory_space<vmem>>, vector<1x256xf32>
    %5 = vector.broadcast %4 : vector<1x256xf32> to vector<4x256xf32>
    %6 = arith.addf %3, %5 : vector<4x256xf32>
    %cst_5 = arith.constant 0.000000e+00 : f32
    %7 = vector.broadcast %cst_5 : f32 to vector<4x256xf32>
    %8 = arith.maximumf %6, %7 : vector<4x256xf32>
    %c0_6 = arith.constant 0 : index
    %c0_7 = arith.constant 0 : index
    %9 = vector.load %arg9[%c0_6, %c0_7] : memref<256x128xf32, #tpu.memory_space<vmem>>, vector<256x128xf32>
    %cst_8 = arith.constant dense<0.000000e+00> : vector<4x128xf32>
    %10 = tpu.matmul %8, %9, %cst_8 {dimension_numbers = #tpu.dot_dimension_numbers<[1], [0], [0], [1], [0, 0, 1, 1], [], []>} : vector<4x256xf32>, vector<256x128xf32>, vector<4x128xf32> -> vector<4x128xf32>
    %c0_9 = arith.constant 0 : index
    %c0_10 = arith.constant 0 : index
    %11 = vector.load %arg10[%c0_9, %c0_10] : memref<1x128xf32, #tpu.memory_space<vmem>>, vector<1x128xf32>
    %12 = vector.broadcast %11 : vector<1x128xf32> to vector<4x128xf32>
    %13 = arith.addf %10, %12 : vector<4x128xf32>
    %cst_11 = arith.constant 0.000000e+00 : f32
    %14 = vector.broadcast %cst_11 : f32 to vector<4x128xf32>
    %15 = arith.maximumf %13, %14 : vector<4x128xf32>
    %cst_12 = arith.constant dense<0.000000e+00> : vector<4x4xf32>
    %16 = tpu.matmul %15, %15, %cst_12 {dimension_numbers = #tpu.dot_dimension_numbers<[1], [1], [0], [0], [0, 0, 1, 0], [], []>} : vector<4x128xf32>, vector<4x128xf32>, vector<4x4xf32> -> vector<4x4xf32>
    %cst_13 = arith.constant dense<0xFF800000> : vector<4xf32>
    %17 = vector.multi_reduction <maximumf>, %16, %cst_13 [1] : vector<4x4xf32> to vector<4xf32>
    %18 = vector.shape_cast %17 : vector<4xf32> to vector<4x1xf32>
    %19 = vector.broadcast %18 : vector<4x1xf32> to vector<4x4xf32>
    %20 = arith.subf %16, %19 : vector<4x4xf32>
    %21 = math.exp %20 : vector<4x4xf32>
    %cst_14 = arith.constant dense<0.000000e+00> : vector<4xf32>
    %22 = vector.multi_reduction <add>, %21, %cst_14 [1] : vector<4x4xf32> to vector<4xf32>
    %23 = vector.shape_cast %22 : vector<4xf32> to vector<4x1xf32>
    %24 = tpu.reciprocal %23 {approx = true} : vector<4x1xf32> -> vector<4x1xf32>
    %25 = vector.broadcast %24 : vector<4x1xf32> to vector<4x4xf32>
    %26 = arith.mulf %21, %25 : vector<4x4xf32>
    %cst_15 = arith.constant dense<0.000000e+00> : vector<4x128xf32>
    %27 = tpu.matmul %26, %15, %cst_15 {dimension_numbers = #tpu.dot_dimension_numbers<[1], [0], [0], [1], [0, 0, 1, 1], [], []>} : vector<4x4xf32>, vector<4x128xf32>, vector<4x128xf32> -> vector<4x128xf32>
    %28 = arith.mulf %27, %27 : vector<4x128xf32>
    %cst_16 = arith.constant dense<0.000000e+00> : vector<4xf32>
    %29 = vector.multi_reduction <add>, %28, %cst_16 [1] : vector<4x128xf32> to vector<4xf32>
    %30 = vector.shape_cast %29 : vector<4xf32> to vector<4x1xf32>
    %31 = math.sqrt %30 : vector<4x1xf32>
    %cst_17 = arith.constant 9.99999993E-9 : f32
    %32 = vector.broadcast %cst_17 : f32 to vector<4x1xf32>
    %33 = arith.addf %31, %32 : vector<4x1xf32>
    %34 = vector.broadcast %33 : vector<4x1xf32> to vector<4x128xf32>
    %35 = arith.divf %27, %34 : vector<4x128xf32>
    %c0_18 = arith.constant 0 : index
    %c0_19 = arith.constant 0 : index
    %36 = vector.load %arg11[%c0_18, %c0_19] : memref<4x128xf32, #tpu.memory_space<vmem>>, vector<4x128xf32>
    tpu.vector_store %arg11[%c0_18, %c0_19], %35 {strides = array<i32>} : memref<4x128xf32, #tpu.memory_space<vmem>>, vector<4x128xf32>,
    %c0_20 = arith.constant 0 : index
    %c0_21 = arith.constant 0 : index
    %37 = vector.load %arg1[%c0_20, %c0_21] : memref<8x768xf32, #tpu.memory_space<vmem>>, vector<8x768xf32>
    %c0_22 = arith.constant 0 : index
    %c0_23 = arith.constant 0 : index
    %38 = vector.load %arg2[%c0_22, %c0_23] : memref<768x1024xbf16, #tpu.memory_space<vmem>>, vector<768x1024xbf16>
    %39 = arith.extf %38 : vector<768x1024xbf16> to vector<768x1024xf32>
    %cst_24 = arith.constant dense<0.000000e+00> : vector<8x1024xf32>
    %40 = tpu.matmul %37, %39, %cst_24 {dimension_numbers = #tpu.dot_dimension_numbers<[1], [0], [0], [1], [0, 0, 1, 1], [], []>} : vector<8x768xf32>, vector<768x1024xf32>, vector<8x1024xf32> -> vector<8x1024xf32>
    %c0_25 = arith.constant 0 : index
    %c0_26 = arith.constant 0 : index
    %41 = vector.load %arg4[%c0_25, %c0_26] : memref<1x1024xf32, #tpu.memory_space<vmem>>, vector<1x1024xf32>
    %42 = vector.broadcast %41 : vector<1x1024xf32> to vector<8x1024xf32>
    %43 = arith.addf %40, %42 : vector<8x1024xf32>
    %c0_27 = arith.constant 0 : index
    %c0_28 = arith.constant 0 : index
    %44 = vector.load %arg3[%c0_27, %c0_28] : memref<256x1024xf32, #tpu.memory_space<vmem>>, vector<256x1024xf32>
    %cst_29 = arith.constant 0.000000e+00 : f32
    %45 = vector.broadcast %cst_29 : f32 to vector<1x256xf32>
    %cst_30 = arith.constant 0.000000e+00 : f32
    %46 = vector.broadcast %cst_30 : f32 to vector<1x256xf32>
    %47 = vector.extract_strided_slice %43 {offsets = [0, 0], sizes = [1, 1024], strides = [1, 1]} : vector<8x1024xf32> to vector<1x1024xf32>
    %cst_31 = arith.constant dense<0.000000e+00> : vector<1x1024xf32>
    %48 = tpu.matmul %45, %44, %cst_31 {dimension_numbers = #tpu.dot_dimension_numbers<[1], [0], [0], [1], [0, 0, 1, 1], [], []>} : vector<1x256xf32>, vector<256x1024xf32>, vector<1x1024xf32> -> vector<1x1024xf32>
    %49 = arith.addf %47, %48 : vector<1x1024xf32>
    %50 = vector.extract_strided_slice %49 {offsets = [0, 0], sizes = [1, 256], strides = [1, 1]} : vector<1x1024xf32> to vector<1x256xf32>
    %51 = arith.negf %50 : vector<1x256xf32>
    %52 = math.exp %51 : vector<1x256xf32>
    %cst_32 = arith.constant 1.000000e+00 : f32
    %53 = vector.broadcast %cst_32 : f32 to vector<1x256xf32>
    %54 = arith.addf %53, %52 : vector<1x256xf32>
    %55 = arith.divf %53, %54 : vector<1x256xf32>
    %56 = vector.extract_strided_slice %49 {offsets = [0, 256], sizes = [1, 256], strides = [1, 1]} : vector<1x1024xf32> to vector<1x256xf32>
    %57 = arith.negf %56 : vector<1x256xf32>
    %58 = math.exp %57 : vector<1x256xf32>
    %cst_33 = arith.constant 1.000000e+00 : f32
    %59 = vector.broadcast %cst_33 : f32 to vector<1x256xf32>
    %60 = arith.addf %59, %58 : vector<1x256xf32>
    %61 = arith.divf %59, %60 : vector<1x256xf32>
    %62 = vector.extract_strided_slice %49 {offsets = [0, 512], sizes = [1, 256], strides = [1, 1]} : vector<1x1024xf32> to vector<1x256xf32>
    %63 = math.tanh %62 : vector<1x256xf32>
    %64 = vector.extract_strided_slice %49 {offsets = [0, 768], sizes = [1, 256], strides = [1, 1]} : vector<1x1024xf32> to vector<1x256xf32>
    %65 = arith.negf %64 : vector<1x256xf32>
    %66 = math.exp %65 : vector<1x256xf32>
    %cst_34 = arith.constant 1.000000e+00 : f32
    %67 = vector.broadcast %cst_34 : f32 to vector<1x256xf32>
    %68 = arith.addf %67, %66 : vector<1x256xf32>
    %69 = arith.divf %67, %68 : vector<1x256xf32>
    %70 = arith.mulf %61, %46 : vector<1x256xf32>
    %71 = arith.mulf %55, %63 : vector<1x256xf32>
    %72 = arith.addf %70, %71 : vector<1x256xf32>
    %73 = math.tanh %72 : vector<1x256xf32>
    %74 = arith.mulf %69, %73 : vector<1x256xf32>
    %c0_35 = arith.constant 0 : index
    %c0_36 = arith.constant 0 : index
    %75 = vector.load %arg13[%c0_35, %c0_36] : memref<8x256xf32, #tpu.memory_space<vmem>>, vector<1x256xf32>
    tpu.vector_store %arg13[%c0_35, %c0_36], %74 {strides = array<i32>} : memref<8x256xf32, #tpu.memory_space<vmem>>, vector<1x256xf32>,
    %76 = vector.extract_strided_slice %43 {offsets = [1, 0], sizes = [1, 1024], strides = [1, 1]} : vector<8x1024xf32> to vector<1x1024xf32>
    %cst_37 = arith.constant dense<0.000000e+00> : vector<1x1024xf32>
    %77 = tpu.matmul %74, %44, %cst_37 {dimension_numbers = #tpu.dot_dimension_numbers<[1], [0], [0], [1], [0, 0, 1, 1], [], []>} : vector<1x256xf32>, vector<256x1024xf32>, vector<1x1024xf32> -> vector<1x1024xf32>
    %78 = arith.addf %76, %77 : vector<1x1024xf32>
    %79 = vector.extract_strided_slice %78 {offsets = [0, 0], sizes = [1, 256], strides = [1, 1]} : vector<1x1024xf32> to vector<1x256xf32>
    %80 = arith.negf %79 : vector<1x256xf32>
    %81 = math.exp %80 : vector<1x256xf32>
    %cst_38 = arith.constant 1.000000e+00 : f32
    %82 = vector.broadcast %cst_38 : f32 to vector<1x256xf32>
    %83 = arith.addf %82, %81 : vector<1x256xf32>
    %84 = arith.divf %82, %83 : vector<1x256xf32>
    %85 = vector.extract_strided_slice %78 {offsets = [0, 256], sizes = [1, 256], strides = [1, 1]} : vector<1x1024xf32> to vector<1x256xf32>
    %86 = arith.negf %85 : vector<1x256xf32>
    %87 = math.exp %86 : vector<1x256xf32>
    %cst_39 = arith.constant 1.000000e+00 : f32
    %88 = vector.broadcast %cst_39 : f32 to vector<1x256xf32>
    %89 = arith.addf %88, %87 : vector<1x256xf32>
    %90 = arith.divf %88, %89 : vector<1x256xf32>
    %91 = vector.extract_strided_slice %78 {offsets = [0, 512], sizes = [1, 256], strides = [1, 1]} : vector<1x1024xf32> to vector<1x256xf32>
    %92 = math.tanh %91 : vector<1x256xf32>
    %93 = vector.extract_strided_slice %78 {offsets = [0, 768], sizes = [1, 256], strides = [1, 1]} : vector<1x1024xf32> to vector<1x256xf32>
    %94 = arith.negf %93 : vector<1x256xf32>
    %95 = math.exp %94 : vector<1x256xf32>
    %cst_40 = arith.constant 1.000000e+00 : f32
    %96 = vector.broadcast %cst_40 : f32 to vector<1x256xf32>
    %97 = arith.addf %96, %95 : vector<1x256xf32>
    %98 = arith.divf %96, %97 : vector<1x256xf32>
    %99 = arith.mulf %90, %72 : vector<1x256xf32>
    %100 = arith.mulf %84, %92 : vector<1x256xf32>
    %101 = arith.addf %99, %100 : vector<1x256xf32>
    %102 = math.tanh %101 : vector<1x256xf32>
    %103 = arith.mulf %98, %102 : vector<1x256xf32>
    %c1 = arith.constant 1 : index
    %c0_41 = arith.constant 0 : index
    %104 = vector.load %arg13[%c1, %c0_41] : memref<8x256xf32, #tpu.memory_space<vmem>>, vector<1x256xf32>
    tpu.vector_store %arg13[%c1, %c0_41], %103 {strides = array<i32>} : memref<8x256xf32, #tpu.memory_space<vmem>>, vector<1x256xf32>,
    %105 = vector.extract_strided_slice %43 {offsets = [2, 0], sizes = [1, 1024], strides = [1, 1]} : vector<8x1024xf32> to vector<1x1024xf32>
    %cst_42 = arith.constant dense<0.000000e+00> : vector<1x1024xf32>
    %106 = tpu.matmul %103, %44, %cst_42 {dimension_numbers = #tpu.dot_dimension_numbers<[1], [0], [0], [1], [0, 0, 1, 1], [], []>} : vector<1x256xf32>, vector<256x1024xf32>, vector<1x1024xf32> -> vector<1x1024xf32>
    %107 = arith.addf %105, %106 : vector<1x1024xf32>
    %108 = vector.extract_strided_slice %107 {offsets = [0, 0], sizes = [1, 256], strides = [1, 1]} : vector<1x1024xf32> to vector<1x256xf32>
    %109 = arith.negf %108 : vector<1x256xf32>
    %110 = math.exp %109 : vector<1x256xf32>
    %cst_43 = arith.constant 1.000000e+00 : f32
    %111 = vector.broadcast %cst_43 : f32 to vector<1x256xf32>
    %112 = arith.addf %111, %110 : vector<1x256xf32>
    %113 = arith.divf %111, %112 : vector<1x256xf32>
    %114 = vector.extract_strided_slice %107 {offsets = [0, 256], sizes = [1, 256], strides = [1, 1]} : vector<1x1024xf32> to vector<1x256xf32>
    %115 = arith.negf %114 : vector<1x256xf32>
    %116 = math.exp %115 : vector<1x256xf32>
    %cst_44 = arith.constant 1.000000e+00 : f32
    %117 = vector.broadcast %cst_44 : f32 to vector<1x256xf32>
    %118 = arith.addf %117, %116 : vector<1x256xf32>
    %119 = arith.divf %117, %118 : vector<1x256xf32>
    %120 = vector.extract_strided_slice %107 {offsets = [0, 512], sizes = [1, 256], strides = [1, 1]} : vector<1x1024xf32> to vector<1x256xf32>
    %121 = math.tanh %120 : vector<1x256xf32>
    %122 = vector.extract_strided_slice %107 {offsets = [0, 768], sizes = [1, 256], strides = [1, 1]} : vector<1x1024xf32> to vector<1x256xf32>
    %123 = arith.negf %122 : vector<1x256xf32>
    %124 = math.exp %123 : vector<1x256xf32>
    %cst_45 = arith.constant 1.000000e+00 : f32
    %125 = vector.broadcast %cst_45 : f32 to vector<1x256xf32>
    %126 = arith.addf %125, %124 : vector<1x256xf32>
    %127 = arith.divf %125, %126 : vector<1x256xf32>
    %128 = arith.mulf %119, %101 : vector<1x256xf32>
    %129 = arith.mulf %113, %121 : vector<1x256xf32>
    %130 = arith.addf %128, %129 : vector<1x256xf32>
    %131 = math.tanh %130 : vector<1x256xf32>
    %132 = arith.mulf %127, %131 : vector<1x256xf32>
    %c2 = arith.constant 2 : index
    %c0_46 = arith.constant 0 : index
    %133 = vector.load %arg13[%c2, %c0_46] : memref<8x256xf32, #tpu.memory_space<vmem>>, vector<1x256xf32>
    tpu.vector_store %arg13[%c2, %c0_46], %132 {strides = array<i32>} : memref<8x256xf32, #tpu.memory_space<vmem>>, vector<1x256xf32>,
    %134 = vector.extract_strided_slice %43 {offsets = [3, 0], sizes = [1, 1024], strides = [1, 1]} : vector<8x1024xf32> to vector<1x1024xf32>
    %cst_47 = arith.constant dense<0.000000e+00> : vector<1x1024xf32>
    %135 = tpu.matmul %132, %44, %cst_47 {dimension_numbers = #tpu.dot_dimension_numbers<[1], [0], [0], [1], [0, 0, 1, 1], [], []>} : vector<1x256xf32>, vector<256x1024xf32>, vector<1x1024xf32> -> vector<1x1024xf32>
    %136 = arith.addf %134, %135 : vector<1x1024xf32>
    %137 = vector.extract_strided_slice %136 {offsets = [0, 0], sizes = [1, 256], strides = [1, 1]} : vector<1x1024xf32> to vector<1x256xf32>
    %138 = arith.negf %137 : vector<1x256xf32>
    %139 = math.exp %138 : vector<1x256xf32>
    %cst_48 = arith.constant 1.000000e+00 : f32
    %140 = vector.broadcast %cst_48 : f32 to vector<1x256xf32>
    %141 = arith.addf %140, %139 : vector<1x256xf32>
    %142 = arith.divf %140, %141 : vector<1x256xf32>
    %143 = vector.extract_strided_slice %136 {offsets = [0, 256], sizes = [1, 256], strides = [1, 1]} : vector<1x1024xf32> to vector<1x256xf32>
    %144 = arith.negf %143 : vector<1x256xf32>
    %145 = math.exp %144 : vector<1x256xf32>
    %cst_49 = arith.constant 1.000000e+00 : f32
    %146 = vector.broadcast %cst_49 : f32 to vector<1x256xf32>
    %147 = arith.addf %146, %145 : vector<1x256xf32>
    %148 = arith.divf %146, %147 : vector<1x256xf32>
    %149 = vector.extract_strided_slice %136 {offsets = [0, 512], sizes = [1, 256], strides = [1, 1]} : vector<1x1024xf32> to vector<1x256xf32>
    %150 = math.tanh %149 : vector<1x256xf32>
    %151 = vector.extract_strided_slice %136 {offsets = [0, 768], sizes = [1, 256], strides = [1, 1]} : vector<1x1024xf32> to vector<1x256xf32>
    %152 = arith.negf %151 : vector<1x256xf32>
    %153 = math.exp %152 : vector<1x256xf32>
    %cst_50 = arith.constant 1.000000e+00 : f32
    %154 = vector.broadcast %cst_50 : f32 to vector<1x256xf32>
    %155 = arith.addf %154, %153 : vector<1x256xf32>
    %156 = arith.divf %154, %155 : vector<1x256xf32>
    %157 = arith.mulf %148, %130 : vector<1x256xf32>
    %158 = arith.mulf %142, %150 : vector<1x256xf32>
    %159 = arith.addf %157, %158 : vector<1x256xf32>
    %160 = math.tanh %159 : vector<1x256xf32>
    %161 = arith.mulf %156, %160 : vector<1x256xf32>
    %c3 = arith.constant 3 : index
    %c0_51 = arith.constant 0 : index
    %162 = vector.load %arg13[%c3, %c0_51] : memref<8x256xf32, #tpu.memory_space<vmem>>, vector<1x256xf32>
    tpu.vector_store %arg13[%c3, %c0_51], %161 {strides = array<i32>} : memref<8x256xf32, #tpu.memory_space<vmem>>, vector<1x256xf32>,
    %163 = vector.extract_strided_slice %43 {offsets = [4, 0], sizes = [1, 1024], strides = [1, 1]} : vector<8x1024xf32> to vector<1x1024xf32>
    %cst_52 = arith.constant dense<0.000000e+00> : vector<1x1024xf32>
    %164 = tpu.matmul %161, %44, %cst_52 {dimension_numbers = #tpu.dot_dimension_numbers<[1], [0], [0], [1], [0, 0, 1, 1], [], []>} : vector<1x256xf32>, vector<256x1024xf32>, vector<1x1024xf32> -> vector<1x1024xf32>
    %165 = arith.addf %163, %164 : vector<1x1024xf32>
    %166 = vector.extract_strided_slice %165 {offsets = [0, 0], sizes = [1, 256], strides = [1, 1]} : vector<1x1024xf32> to vector<1x256xf32>
    %167 = arith.negf %166 : vector<1x256xf32>
    %168 = math.exp %167 : vector<1x256xf32>
    %cst_53 = arith.constant 1.000000e+00 : f32
    %169 = vector.broadcast %cst_53 : f32 to vector<1x256xf32>
    %170 = arith.addf %169, %168 : vector<1x256xf32>
    %171 = arith.divf %169, %170 : vector<1x256xf32>
    %172 = vector.extract_strided_slice %165 {offsets = [0, 256], sizes = [1, 256], strides = [1, 1]} : vector<1x1024xf32> to vector<1x256xf32>
    %173 = arith.negf %172 : vector<1x256xf32>
    %174 = math.exp %173 : vector<1x256xf32>
    %cst_54 = arith.constant 1.000000e+00 : f32
    %175 = vector.broadcast %cst_54 : f32 to vector<1x256xf32>
    %176 = arith.addf %175, %174 : vector<1x256xf32>
    %177 = arith.divf %175, %176 : vector<1x256xf32>
    %178 = vector.extract_strided_slice %165 {offsets = [0, 512], sizes = [1, 256], strides = [1, 1]} : vector<1x1024xf32> to vector<1x256xf32>
    %179 = math.tanh %178 : vector<1x256xf32>
    %180 = vector.extract_strided_slice %165 {offsets = [0, 768], sizes = [1, 256], strides = [1, 1]} : vector<1x1024xf32> to vector<1x256xf32>
    %181 = arith.negf %180 : vector<1x256xf32>
    %182 = math.exp %181 : vector<1x256xf32>
    %cst_55 = arith.constant 1.000000e+00 : f32
    %183 = vector.broadcast %cst_55 : f32 to vector<1x256xf32>
    %184 = arith.addf %183, %182 : vector<1x256xf32>
    %185 = arith.divf %183, %184 : vector<1x256xf32>
    %186 = arith.mulf %177, %159 : vector<1x256xf32>
    %187 = arith.mulf %171, %179 : vector<1x256xf32>
    %188 = arith.addf %186, %187 : vector<1x256xf32>
    %189 = math.tanh %188 : vector<1x256xf32>
    %190 = arith.mulf %185, %189 : vector<1x256xf32>
    %c4 = arith.constant 4 : index
    %c0_56 = arith.constant 0 : index
    %191 = vector.load %arg13[%c4, %c0_56] : memref<8x256xf32, #tpu.memory_space<vmem>>, vector<1x256xf32>
    tpu.vector_store %arg13[%c4, %c0_56], %190 {strides = array<i32>} : memref<8x256xf32, #tpu.memory_space<vmem>>, vector<1x256xf32>,
    %192 = vector.extract_strided_slice %43 {offsets = [5, 0], sizes = [1, 1024], strides = [1, 1]} : vector<8x1024xf32> to vector<1x1024xf32>
    %cst_57 = arith.constant dense<0.000000e+00> : vector<1x1024xf32>
    %193 = tpu.matmul %190, %44, %cst_57 {dimension_numbers = #tpu.dot_dimension_numbers<[1], [0], [0], [1], [0, 0, 1, 1], [], []>} : vector<1x256xf32>, vector<256x1024xf32>, vector<1x1024xf32> -> vector<1x1024xf32>
    %194 = arith.addf %192, %193 : vector<1x1024xf32>
    %195 = vector.extract_strided_slice %194 {offsets = [0, 0], sizes = [1, 256], strides = [1, 1]} : vector<1x1024xf32> to vector<1x256xf32>
    %196 = arith.negf %195 : vector<1x256xf32>
    %197 = math.exp %196 : vector<1x256xf32>
    %cst_58 = arith.constant 1.000000e+00 : f32
    %198 = vector.broadcast %cst_58 : f32 to vector<1x256xf32>
    %199 = arith.addf %198, %197 : vector<1x256xf32>
    %200 = arith.divf %198, %199 : vector<1x256xf32>
    %201 = vector.extract_strided_slice %194 {offsets = [0, 256], sizes = [1, 256], strides = [1, 1]} : vector<1x1024xf32> to vector<1x256xf32>
    %202 = arith.negf %201 : vector<1x256xf32>
    %203 = math.exp %202 : vector<1x256xf32>
    %cst_59 = arith.constant 1.000000e+00 : f32
    %204 = vector.broadcast %cst_59 : f32 to vector<1x256xf32>
    %205 = arith.addf %204, %203 : vector<1x256xf32>
    %206 = arith.divf %204, %205 : vector<1x256xf32>
    %207 = vector.extract_strided_slice %194 {offsets = [0, 512], sizes = [1, 256], strides = [1, 1]} : vector<1x1024xf32> to vector<1x256xf32>
    %208 = math.tanh %207 : vector<1x256xf32>
    %209 = vector.extract_strided_slice %194 {offsets = [0, 768], sizes = [1, 256], strides = [1, 1]} : vector<1x1024xf32> to vector<1x256xf32>
    %210 = arith.negf %209 : vector<1x256xf32>
    %211 = math.exp %210 : vector<1x256xf32>
    %cst_60 = arith.constant 1.000000e+00 : f32
    %212 = vector.broadcast %cst_60 : f32 to vector<1x256xf32>
    %213 = arith.addf %212, %211 : vector<1x256xf32>
    %214 = arith.divf %212, %213 : vector<1x256xf32>
    %215 = arith.mulf %206, %188 : vector<1x256xf32>
    %216 = arith.mulf %200, %208 : vector<1x256xf32>
    %217 = arith.addf %215, %216 : vector<1x256xf32>
    %218 = math.tanh %217 : vector<1x256xf32>
    %219 = arith.mulf %214, %218 : vector<1x256xf32>
    %c5 = arith.constant 5 : index
    %c0_61 = arith.constant 0 : index
    %220 = vector.load %arg13[%c5, %c0_61] : memref<8x256xf32, #tpu.memory_space<vmem>>, vector<1x256xf32>
    tpu.vector_store %arg13[%c5, %c0_61], %219 {strides = array<i32>} : memref<8x256xf32, #tpu.memory_space<vmem>>, vector<1x256xf32>,
    %221 = vector.extract_strided_slice %43 {offsets = [6, 0], sizes = [1, 1024], strides = [1, 1]} : vector<8x1024xf32> to vector<1x1024xf32>
    %cst_62 = arith.constant dense<0.000000e+00> : vector<1x1024xf32>
    %222 = tpu.matmul %219, %44, %cst_62 {dimension_numbers = #tpu.dot_dimension_numbers<[1], [0], [0], [1], [0, 0, 1, 1], [], []>} : vector<1x256xf32>, vector<256x1024xf32>, vector<1x1024xf32> -> vector<1x1024xf32>
    %223 = arith.addf %221, %222 : vector<1x1024xf32>
    %224 = vector.extract_strided_slice %223 {offsets = [0, 0], sizes = [1, 256], strides = [1, 1]} : vector<1x1024xf32> to vector<1x256xf32>
    %225 = arith.negf %224 : vector<1x256xf32>
    %226 = math.exp %225 : vector<1x256xf32>
    %cst_63 = arith.constant 1.000000e+00 : f32
    %227 = vector.broadcast %cst_63 : f32 to vector<1x256xf32>
    %228 = arith.addf %227, %226 : vector<1x256xf32>
    %229 = arith.divf %227, %228 : vector<1x256xf32>
    %230 = vector.extract_strided_slice %223 {offsets = [0, 256], sizes = [1, 256], strides = [1, 1]} : vector<1x1024xf32> to vector<1x256xf32>
    %231 = arith.negf %230 : vector<1x256xf32>
    %232 = math.exp %231 : vector<1x256xf32>
    %cst_64 = arith.constant 1.000000e+00 : f32
    %233 = vector.broadcast %cst_64 : f32 to vector<1x256xf32>
    %234 = arith.addf %233, %232 : vector<1x256xf32>
    %235 = arith.divf %233, %234 : vector<1x256xf32>
    %236 = vector.extract_strided_slice %223 {offsets = [0, 512], sizes = [1, 256], strides = [1, 1]} : vector<1x1024xf32> to vector<1x256xf32>
    %237 = math.tanh %236 : vector<1x256xf32>
    %238 = vector.extract_strided_slice %223 {offsets = [0, 768], sizes = [1, 256], strides = [1, 1]} : vector<1x1024xf32> to vector<1x256xf32>
    %239 = arith.negf %238 : vector<1x256xf32>
    %240 = math.exp %239 : vector<1x256xf32>
    %cst_65 = arith.constant 1.000000e+00 : f32
    %241 = vector.broadcast %cst_65 : f32 to vector<1x256xf32>
    %242 = arith.addf %241, %240 : vector<1x256xf32>
    %243 = arith.divf %241, %242 : vector<1x256xf32>
    %244 = arith.mulf %235, %217 : vector<1x256xf32>
    %245 = arith.mulf %229, %237 : vector<1x256xf32>
    %246 = arith.addf %244, %245 : vector<1x256xf32>
    %247 = math.tanh %246 : vector<1x256xf32>
    %248 = arith.mulf %243, %247 : vector<1x256xf32>
    %c6 = arith.constant 6 : index
    %c0_66 = arith.constant 0 : index
    %249 = vector.load %arg13[%c6, %c0_66] : memref<8x256xf32, #tpu.memory_space<vmem>>, vector<1x256xf32>
    tpu.vector_store %arg13[%c6, %c0_66], %248 {strides = array<i32>} : memref<8x256xf32, #tpu.memory_space<vmem>>, vector<1x256xf32>,
    %250 = vector.extract_strided_slice %43 {offsets = [7, 0], sizes = [1, 1024], strides = [1, 1]} : vector<8x1024xf32> to vector<1x1024xf32>
    %cst_67 = arith.constant dense<0.000000e+00> : vector<1x1024xf32>
    %251 = tpu.matmul %248, %44, %cst_67 {dimension_numbers = #tpu.dot_dimension_numbers<[1], [0], [0], [1], [0, 0, 1, 1], [], []>} : vector<1x256xf32>, vector<256x1024xf32>, vector<1x1024xf32> -> vector<1x1024xf32>
    %252 = arith.addf %250, %251 : vector<1x1024xf32>
    %253 = vector.extract_strided_slice %252 {offsets = [0, 0], sizes = [1, 256], strides = [1, 1]} : vector<1x1024xf32> to vector<1x256xf32>
    %254 = arith.negf %253 : vector<1x256xf32>
    %255 = math.exp %254 : vector<1x256xf32>
    %cst_68 = arith.constant 1.000000e+00 : f32
    %256 = vector.broadcast %cst_68 : f32 to vector<1x256xf32>
    %257 = arith.addf %256, %255 : vector<1x256xf32>
    %258 = arith.divf %256, %257 : vector<1x256xf32>
    %259 = vector.extract_strided_slice %252 {offsets = [0, 256], sizes = [1, 256], strides = [1, 1]} : vector<1x1024xf32> to vector<1x256xf32>
    %260 = arith.negf %259 : vector<1x256xf32>
    %261 = math.exp %260 : vector<1x256xf32>
    %cst_69 = arith.constant 1.000000e+00 : f32
    %262 = vector.broadcast %cst_69 : f32 to vector<1x256xf32>
    %263 = arith.addf %262, %261 : vector<1x256xf32>
    %264 = arith.divf %262, %263 : vector<1x256xf32>
    %265 = vector.extract_strided_slice %252 {offsets = [0, 512], sizes = [1, 256], strides = [1, 1]} : vector<1x1024xf32> to vector<1x256xf32>
    %266 = math.tanh %265 : vector<1x256xf32>
    %267 = vector.extract_strided_slice %252 {offsets = [0, 768], sizes = [1, 256], strides = [1, 1]} : vector<1x1024xf32> to vector<1x256xf32>
    %268 = arith.negf %267 : vector<1x256xf32>
    %269 = math.exp %268 : vector<1x256xf32>
    %cst_70 = arith.constant 1.000000e+00 : f32
    %270 = vector.broadcast %cst_70 : f32 to vector<1x256xf32>
    %271 = arith.addf %270, %269 : vector<1x256xf32>
    %272 = arith.divf %270, %271 : vector<1x256xf32>
    %273 = arith.mulf %264, %246 : vector<1x256xf32>
    %274 = arith.mulf %258, %266 : vector<1x256xf32>
    %275 = arith.addf %273, %274 : vector<1x256xf32>
    %276 = math.tanh %275 : vector<1x256xf32>
    %277 = arith.mulf %272, %276 : vector<1x256xf32>
    %c7 = arith.constant 7 : index
    %c0_71 = arith.constant 0 : index
    %278 = vector.load %arg13[%c7, %c0_71] : memref<8x256xf32, #tpu.memory_space<vmem>>, vector<1x256xf32>
    tpu.vector_store %arg13[%c7, %c0_71], %277 {strides = array<i32>} : memref<8x256xf32, #tpu.memory_space<vmem>>, vector<1x256xf32>,
    %c0_72 = arith.constant 0 : index
    %c0_73 = arith.constant 0 : index
    %279 = vector.load %arg13[%c0_72, %c0_73] : memref<8x256xf32, #tpu.memory_space<vmem>>, vector<8x256xf32>
    %c0_74 = arith.constant 0 : index
    %c0_75 = arith.constant 0 : index
    %280 = vector.load %arg5[%c0_74, %c0_75] : memref<256x128xf32, #tpu.memory_space<vmem>>, vector<256x128xf32>
    %cst_76 = arith.constant dense<0.000000e+00> : vector<8x128xf32>
    %281 = tpu.matmul %279, %280, %cst_76 {dimension_numbers = #tpu.dot_dimension_numbers<[1], [0], [0], [1], [0, 0, 1, 1], [], []>} : vector<8x256xf32>, vector<256x128xf32>, vector<8x128xf32> -> vector<8x128xf32>
    %c0_77 = arith.constant 0 : index
    %c0_78 = arith.constant 0 : index
    %282 = vector.load %arg6[%c0_77, %c0_78] : memref<1x128xf32, #tpu.memory_space<vmem>>, vector<1x128xf32>
    %283 = vector.broadcast %282 : vector<1x128xf32> to vector<8x128xf32>
    %284 = arith.addf %281, %283 : vector<8x128xf32>
    %cst_79 = arith.constant 0.000000e+00 : f32
    %285 = vector.broadcast %cst_79 : f32 to vector<8x128xf32>
    %286 = arith.maximumf %284, %285 : vector<8x128xf32>
    %cst_80 = arith.constant dense<0.000000e+00> : vector<8x8xf32>
    %287 = tpu.matmul %286, %286, %cst_80 {dimension_numbers = #tpu.dot_dimension_numbers<[1], [1], [0], [0], [0, 0, 1, 0], [], []>} : vector<8x128xf32>, vector<8x128xf32>, vector<8x8xf32> -> vector<8x8xf32>
    %cst_81 = arith.constant dense<0xFF800000> : vector<8xf32>
    %288 = vector.multi_reduction <maximumf>, %287, %cst_81 [1] : vector<8x8xf32> to vector<8xf32>
    %289 = vector.shape_cast %288 : vector<8xf32> to vector<8x1xf32>
    %290 = vector.broadcast %289 : vector<8x1xf32> to vector<8x8xf32>
    %291 = arith.subf %287, %290 : vector<8x8xf32>
    %292 = math.exp %291 : vector<8x8xf32>
    %cst_82 = arith.constant dense<0.000000e+00> : vector<8xf32>
    %293 = vector.multi_reduction <add>, %292, %cst_82 [1] : vector<8x8xf32> to vector<8xf32>
    %294 = vector.shape_cast %293 : vector<8xf32> to vector<8x1xf32>
    %295 = tpu.reciprocal %294 {approx = true} : vector<8x1xf32> -> vector<8x1xf32>
    %296 = vector.broadcast %295 : vector<8x1xf32> to vector<8x8xf32>
    %297 = arith.mulf %292, %296 : vector<8x8xf32>
    %cst_83 = arith.constant dense<0.000000e+00> : vector<8x128xf32>
    %298 = tpu.matmul %297, %286, %cst_83 {dimension_numbers = #tpu.dot_dimension_numbers<[1], [0], [0], [1], [0, 0, 1, 1], [], []>} : vector<8x8xf32>, vector<8x128xf32>, vector<8x128xf32> -> vector<8x128xf32>
    %299 = arith.mulf %298, %298 : vector<8x128xf32>
    %cst_84 = arith.constant dense<0.000000e+00> : vector<8xf32>
    %300 = vector.multi_reduction <add>, %299, %cst_84 [1] : vector<8x128xf32> to vector<8xf32>
    %301 = vector.shape_cast %300 : vector<8xf32> to vector<8x1xf32>
    %302 = math.sqrt %301 : vector<8x1xf32>
    %cst_85 = arith.constant 9.99999993E-9 : f32
    %303 = vector.broadcast %cst_85 : f32 to vector<8x1xf32>
    %304 = arith.addf %302, %303 : vector<8x1xf32>
    %305 = vector.broadcast %304 : vector<8x1xf32> to vector<8x128xf32>
    %306 = arith.divf %298, %305 : vector<8x128xf32>
    %c0_86 = arith.constant 0 : index
    %c0_87 = arith.constant 0 : index
    %307 = vector.load %arg12[%c0_86, %c0_87] : memref<8x128xf32, #tpu.memory_space<vmem>>, vector<8x128xf32>
    tpu.vector_store %arg12[%c0_86, %c0_87], %306 {strides = array<i32>} : memref<8x128xf32, #tpu.memory_space<vmem>>, vector<8x128xf32>,
    return
  }
}

</mosaic_0001>

<bundles_post_ra>
// kernel: vaipenet_forward.1
= control target key start
LH: loop header
LB: loop body
LE: loop exit
PB: predicated region body
PF: predicated region fallthrough
CT: control target
= control target key end

     0   :  { %18 = vsyncpa [#allocation4], 0  ;;  %s14684_s0 = inlined_call_operand.hbm [shape: f32[4,2048], index: 0, kind: input, shape index: {}]   ;;  %s14685_s1 = inlined_call_operand.hbm [shape: f32[8,768], index: 1, kind: input, shape index: {}]   ;;  %s14686_s2 = inlined_call_operand.hbm [shape: bf16[768,1024], index: 2, kind: input, shape index: {}]   ;;  %s14687_s3 = inlined_call_operand.hbm [shape: f32[256,1024], index: 3, kind: input, shape index: {}]   ;;  %s14688_s4 = inlined_call_operand.vmem [shape: f32[1,1024], index: 4, kind: input, shape index: {}]   ;;  %s14689_s5 = inlined_call_operand.hbm [shape: f32[256,128], index: 5, kind: input, shape index: {}]   ;;  %s14690_s6 = inlined_call_operand.hbm [shape: f32[1,128], index: 6, kind: input, shape index: {}]   ;;  %s14691_s7 = inlined_call_operand.hbm [shape: bf16[2048,256], index: 7, kind: input, shape index: {}]   ;;  %s14692_s8 = inlined_call_operand.hbm [shape: f32[1,256], index: 8, kind: input, shape index: {}]   ;;  %s14693_s9 = inlined_call_operand.hbm [shape: f32[256,128], index: 9, kind: input, shape index: {}]   ;;  %s14694_s10 = inlined_call_operand.hbm [shape: f32[1,128], index: 10, kind: input, shape index: {}]   ;;  %s14695_s11 = inlined_call_operand.hbm [shape: f32[4,128], index: 11, kind: output, shape index: {0}]   ;;  %s14696_s12 = inlined_call_operand.hbm [shape: f32[8,128], index: 12, kind: output, shape index: {1}]  }
   0x1   :  { %19 = vsyncpa [#allocation7], 0 }
   0x2   :  { %20 = vsyncpa [#allocation10], 0 }
   0x3   :  { %21 = vsyncpa [#allocation13], 0 }
   0x4   :  { %22 = vsyncpa [#allocation16], 0 }
   0x5   :  { %23 = vsyncpa [#allocation19], 0 }
   0x6   :  { %24 = vsyncpa [#allocation5], 0 }
   0x7   :  { %25 = vsyncpa [#allocation22], 0  ;;  %s12788_s21 = smov [#allocation6]   ;;  %s12789_s23 = smov [#allocation9]  }
   0x8   :  { %s42_s22 = sshll.u32 %s12788_s21, 4  ;;  %s63_s24 = sshll.u32 %s12789_s23, 4  ;;  %s43_s22 = int_to_ptr.vmem [resolvable:$true] %s42_s22  ;;  %s12874_s24 = int_to_ptr.vmem [resolvable:$true] %s63_s24 }
   0x9   :  { %s12508_s27 = scalar_lea.hbm %s14685_s1, 768 }
   0xa   :  { %p12509_p0 = scmp.ne.s32.totalorder %s14685_s1, %s12508_s27  ;;  %p12512_p1 = scmp.lt.u32.totalorder %s12508_s27, %s14685_s1 }
   0xc   :  { %p12514_p2 = pnand %p12512_p1, %p12509_p0 }
   0xe   :  { %12517 = shalt.err (!%p12514_p2)
}
   0xf   :  { %s12518_s14 = scalar_lea.vmem %s43_s22, 768  ;;  %p12523_p4 = scmp.lt.s32.totalorder %s43_s22, %s43_s22 }
  0x10   :  { %p12519_p3 = scmp.ne.s32.totalorder %s43_s22, %s12518_s14  ;;  %p12524_p5 = scmp.lt.s32.totalorder %s12518_s14, %s12518_s14 }
  0x12   :  { %p12525_p6 = por %p12524_p5, %p12523_p4 }
  0x14   :  { %p12526_p7 = pnand %p12525_p6, %p12519_p3 }
  0x16   :  { %12529 = shalt.err (!%p12526_p7)
}
  0x17   :  { %45 = dma.hbm_to_vmem [thread:$0]  %s14685_s1, 768, %s43_s22, [#allocation7]  }
  0x18   :  { %s12530_s19 = scalar_lea.hbm %s14687_s3, 32768 }
  0x19   :  { %p12531_p8 = scmp.ne.s32.totalorder %s14687_s3, %s12530_s19  ;;  %p12534_p9 = scmp.lt.u32.totalorder %s12530_s19, %s14687_s3 }
  0x1b   :  { %p12536_p10 = pnand %p12534_p9, %p12531_p8 }
  0x1d   :  { %12539 = shalt.err (!%p12536_p10)
}
  0x1e   :  { %s12540_s26 = scalar_lea.vmem %s12874_s24, 32768  ;;  %p12545_p12 = scmp.lt.s32.totalorder %s12874_s24, %s12874_s24 }
  0x1f   :  { %p12541_p11 = scmp.ne.s32.totalorder %s12874_s24, %s12540_s26  ;;  %p12546_p13 = scmp.lt.s32.totalorder %s12540_s26, %s12540_s26 }
  0x21   :  { %p12547_p0 = por %p12546_p13, %p12545_p12 }
  0x23   :  { %p12548_p1 = pnand %p12547_p0, %p12541_p11 }
  0x25   :  { %12551 = shalt.err (!%p12548_p1)
}
  0x26   :  { %s12790_s1 = smov 1024   ;;  %s12791_s22 = smov 64  }
  0x27   :  { %69 = dma.hbm_to_vmem [thread:$0]  %s14687_s3, 32768, %s12874_s24, [#allocation10], %s12790_s1, %s12790_s1, %s12791_s22  }
  0x28   :  { %s12792_s29 = smov [#allocation12]   ;;  %s12793_s13 = smov [#allocation15]  }
  0x29   :  { %s90_s30 = sshll.u32 %s12792_s29, 4  ;;  %s112_s14 = sshll.u32 %s12793_s13, 4  ;;  %s91_s30 = int_to_ptr.vmem [resolvable:$true] %s90_s30  ;;  %s113_s14 = int_to_ptr.vmem [resolvable:$true] %s112_s14 }
  0x2a   :  { %s12552_s17 = scalar_lea.hbm %s14690_s6, 16 }
  0x2b   :  { %p12553_p2 = scmp.ne.s32.totalorder %s14690_s6, %s12552_s17  ;;  %p12556_p3 = scmp.lt.u32.totalorder %s12552_s17, %s14690_s6 }
  0x2d   :  { %p12558_p4 = pnand %p12556_p3, %p12553_p2 }
  0x2f   :  { %12561 = shalt.err (!%p12558_p4)
}
  0x30   :  { %s12562_s3 = scalar_lea.vmem %s91_s30, 16  ;;  %s12566_s24 = scalar_lea.vmem %s91_s30, 32 }
  0x31   :  { %p12563_p5 = scmp.ne.s32.totalorder %s91_s30, %s12562_s3  ;;  %p12567_p6 = scmp.lt.s32.totalorder %s91_s30, %s91_s30 }
  0x32   :  { %p12568_p7 = scmp.lt.s32.totalorder %s12566_s24, %s12562_s3 }
  0x34   :  { %p12569_p8 = por %p12568_p7, %p12567_p6 }
  0x36   :  { %p12570_p9 = pnand %p12569_p8, %p12563_p5 }
  0x38   :  { %12573 = shalt.err (!%p12570_p9)
}
  0x39   :  { %93 = dma.hbm_to_vmem [thread:$0]  %s14690_s6, 16, %s91_s30, [#allocation13]  }
  0x3a   :  { %s12574_s22 = scalar_lea.hbm %s14692_s8, 32 }
  0x3b   :  { %p12575_p10 = scmp.ne.s32.totalorder %s14692_s8, %s12574_s22  ;;  %p12578_p11 = scmp.lt.u32.totalorder %s12574_s22, %s14692_s8 }
  0x3d   :  { %p12580_p12 = pnand %p12578_p11, %p12575_p10 }
  0x3f   :  { %12583 = shalt.err (!%p12580_p12)
}
  0x40   :  { %s12584_s15 = scalar_lea.vmem %s113_s14, 32  ;;  %p12589_p0 = scmp.lt.s32.totalorder %s113_s14, %s113_s14 }
  0x41   :  { %p12585_p13 = scmp.ne.s32.totalorder %s113_s14, %s12584_s15  ;;  %p12590_p1 = scmp.lt.s32.totalorder %s12584_s15, %s12584_s15 }
  0x43   :  { %p12591_p2 = por %p12590_p1, %p12589_p0 }
  0x45   :  { %p12592_p3 = pnand %p12591_p2, %p12585_p13 }
  0x47   :  { %12595 = shalt.err (!%p12592_p3)
}
  0x48   :  { %115 = dma.hbm_to_vmem [thread:$0]  %s14692_s8, 32, %s113_s14, [#allocation16]  }
  0x49   :  { %s12794_s16 = smov [#allocation3]   ;;  %s12795_s18 = smov [#allocation8]  }
  0x4a   :  { %s32_s17 = sshll.u32 %s12794_s16, 4  ;;  %s51_s19 = sshll.u32 %s12795_s18, 4  ;;  %s33_s17 = int_to_ptr.vmem [resolvable:$true] %s32_s17  ;;  %s12929_s19 = int_to_ptr.vmem [resolvable:$true] %s51_s19 }
  0x4b   :  { %s12596_s3 = scalar_lea.hbm %s14684_s0, 1024 }
  0x4c   :  { %p12597_p4 = scmp.ne.s32.totalorder %s14684_s0, %s12596_s3  ;;  %p12600_p5 = scmp.lt.u32.totalorder %s12596_s3, %s14684_s0 }
  0x4e   :  { %p12602_p6 = pnand %p12600_p5, %p12597_p4 }
  0x50   :  { %12605 = shalt.err (!%p12602_p6)
}
  0x51   :  { %s12606_s8 = scalar_lea.vmem %s33_s17, 1024  ;;  %p12611_p8 = scmp.lt.s32.totalorder %s33_s17, %s33_s17 }
  0x52   :  { %p12607_p7 = scmp.ne.s32.totalorder %s33_s17, %s12606_s8  ;;  %p12612_p9 = scmp.lt.s32.totalorder %s12606_s8, %s12606_s8 }
  0x54   :  { %p12613_p10 = por %p12612_p9, %p12611_p8 }
  0x56   :  { %p12614_p11 = pnand %p12613_p10, %p12607_p7 }
  0x58   :  { %12617 = shalt.err (!%p12614_p11)
}
  0x59   :  { %35 = dma.hbm_to_vmem [thread:$0]  %s14684_s0, 1024, %s33_s17, [#allocation4]  }
  0x5a   :  { %s12618_s28 = scalar_lea.hbm %s14686_s2, 49152 }
  0x5b   :  { %p12619_p12 = scmp.ne.s32.totalorder %s14686_s2, %s12618_s28  ;;  %p12622_p13 = scmp.lt.u32.totalorder %s12618_s28, %s14686_s2 }
  0x5d   :  { %p12624_p0 = pnand %p12622_p13, %p12619_p12 }
  0x5f   :  { %12627 = shalt.err (!%p12624_p0)
}
  0x60   :  { %s12628_s30 = scalar_lea.vmem %s12929_s19, 49152  ;;  %p12633_p2 = scmp.lt.s32.totalorder %s12929_s19, %s12929_s19 }
  0x61   :  { %p12629_p1 = scmp.ne.s32.totalorder %s12929_s19, %s12628_s30  ;;  %p12634_p3 = scmp.lt.s32.totalorder %s12628_s30, %s12628_s30 }
  0x63   :  { %p12635_p4 = por %p12634_p3, %p12633_p2 }
  0x65   :  { %p12636_p5 = pnand %p12635_p4, %p12629_p1 }
  0x67   :  { %12639 = shalt.err (!%p12636_p5)
}
  0x68   :  { %s12796_s0 = smov 512   ;;  %s12797_s16 = smov 32  }
  0x69   :  { %57 = dma.hbm_to_vmem [thread:$0]  %s14686_s2, 49152, %s12929_s19, [#allocation7], %s12796_s0, %s12796_s0, %s12797_s16  }
  0x6a   :  { %s12798_s20 = smov [#allocation11]   ;;  %s12640_s23 = scalar_lea.hbm %s14689_s5, 4096 }
  0x6b   :  { %s77_s21 = sshll.u32 %s12798_s20, 4  ;;  %p12641_p6 = scmp.ne.s32.totalorder %s14689_s5, %s12640_s23  ;;  %s78_s21 = int_to_ptr.vmem [resolvable:$true] %s77_s21 }
  0x6c   :  { %p12644_p7 = scmp.lt.u32.totalorder %s12640_s23, %s14689_s5 }
  0x6e   :  { %p12646_p8 = pnand %p12644_p7, %p12641_p6 }
  0x70   :  { %12649 = shalt.err (!%p12646_p8)
}
  0x71   :  { %s12650_s1 = scalar_lea.vmem %s78_s21, 4096  ;;  %p12655_p10 = scmp.lt.s32.totalorder %s78_s21, %s78_s21 }
  0x72   :  { %p12651_p9 = scmp.ne.s32.totalorder %s78_s21, %s12650_s1  ;;  %p12656_p11 = scmp.lt.s32.totalorder %s12650_s1, %s12650_s1 }
  0x74   :  { %p12657_p12 = por %p12656_p11, %p12655_p10 }
  0x76   :  { %p12658_p13 = pnand %p12657_p12, %p12651_p9 }
  0x78   :  { %12661 = shalt.err (!%p12658_p13)
}
  0x79   :  { %s12799_s2 = smov 128   ;;  %s12800_s19 = smov 8  }
  0x7a   :  { %83 = dma.hbm_to_vmem [thread:$0]  %s14689_s5, 4096, %s78_s21, [#allocation10], %s12799_s2, %s12799_s2, %s12800_s19  }
  0x7b   :  { %s12801_s28 = smov [#allocation14]   ;;  %s12802_s13 = smov [#allocation17]  }
  0x7c   :  { %s99_s29 = sshll.u32 %s12801_s28, 4  ;;  %s121_s15 = sshll.u32 %s12802_s13, 4  ;;  %s100_s29 = int_to_ptr.vmem [resolvable:$true] %s99_s29  ;;  %s122_s15 = int_to_ptr.vmem [resolvable:$true] %s121_s15 }
  0x7d   :  { %s12662_s0 = scalar_lea.hbm %s14691_s7, 32768 }
  0x7e   :  { %p12663_p0 = scmp.ne.s32.totalorder %s14691_s7, %s12662_s0  ;;  %p12666_p1 = scmp.lt.u32.totalorder %s12662_s0, %s14691_s7 }
  0x80   :  { %p12668_p2 = pnand %p12666_p1, %p12663_p0 }
  0x82   :  { %12671 = shalt.err (!%p12668_p2)
}
  0x83   :  { %s12672_s5 = scalar_lea.vmem %s100_s29, 32768  ;;  %p12677_p4 = scmp.lt.s32.totalorder %s100_s29, %s100_s29 }
  0x84   :  { %p12673_p3 = scmp.ne.s32.totalorder %s100_s29, %s12672_s5  ;;  %p12678_p5 = scmp.lt.s32.totalorder %s12672_s5, %s12672_s5 }
  0x86   :  { %p12679_p6 = por %p12678_p5, %p12677_p4 }
  0x88   :  { %p12680_p7 = pnand %p12679_p6, %p12673_p3 }
  0x8a   :  { %12683 = shalt.err (!%p12680_p7)
}
  0x8b   :  { %105 = dma.hbm_to_vmem [thread:$0]  %s14691_s7, 32768, %s100_s29, [#allocation13], %s12799_s2, %s12799_s2, %s12800_s19  }
  0x8c   :  { %s12684_s25 = scalar_lea.hbm %s14693_s9, 4096 }
  0x8d   :  { %p12685_p8 = scmp.ne.s32.totalorder %s14693_s9, %s12684_s25  ;;  %p12688_p9 = scmp.lt.u32.totalorder %s12684_s25, %s14693_s9 }
  0x8f   :  { %p12690_p10 = pnand %p12688_p9, %p12685_p8 }
  0x91   :  { %12693 = shalt.err (!%p12690_p10)
}
  0x92   :  { %s12694_s22 = scalar_lea.vmem %s122_s15, 4096  ;;  %p12699_p12 = scmp.lt.s32.totalorder %s122_s15, %s122_s15 }
  0x93   :  { %p12695_p11 = scmp.ne.s32.totalorder %s122_s15, %s12694_s22  ;;  %p12700_p13 = scmp.lt.s32.totalorder %s12694_s22, %s12694_s22 }
  0x95   :  { %p12701_p0 = por %p12700_p13, %p12699_p12 }
  0x97   :  { %p12702_p1 = pnand %p12701_p0, %p12695_p11 }
  0x99   :  { %12705 = shalt.err (!%p12702_p1)
}
  0x9a   :  { %127 = dma.hbm_to_vmem [thread:$0]  %s14693_s9, 4096, %s122_s15, [#allocation16], %s12799_s2, %s12799_s2, %s12800_s19  }
  0x9b   :  { %s12803_s28 = smov [#allocation18]   ;;  %s12706_s30 = scalar_lea.hbm %s14694_s10, 16 }
  0x9c   :  { %s134_s29 = sshll.u32 %s12803_s28, 4  ;;  %p12707_p2 = scmp.ne.s32.totalorder %s14694_s10, %s12706_s30  ;;  %s135_s29 = int_to_ptr.vmem [resolvable:$true] %s134_s29 }
  0x9d   :  { %p12710_p3 = scmp.lt.u32.totalorder %s12706_s30, %s14694_s10 }
  0x9f   :  { %p12712_p4 = pnand %p12710_p3, %p12707_p2 }
  0xa1   :  { %12715 = shalt.err (!%p12712_p4)
}
  0xa2   :  { %s12716_s20 = scalar_lea.vmem %s135_s29, 16  ;;  %s12720_s9 = scalar_lea.vmem %s135_s29, 32 }
  0xa3   :  { %p12717_p5 = scmp.ne.s32.totalorder %s135_s29, %s12716_s20  ;;  %p12721_p6 = scmp.lt.s32.totalorder %s135_s29, %s135_s29 }
  0xa4   :  { %p12722_p7 = scmp.lt.s32.totalorder %s12720_s9, %s12716_s20 }
  0xa6   :  { %p12723_p8 = por %p12722_p7, %p12721_p6 }
  0xa8   :  { %p12724_p9 = pnand %p12723_p8, %p12717_p5 }
  0xaa   :  { %12727 = shalt.err (!%p12724_p9)
}
  0xab   :  { %137 = dma.hbm_to_vmem [thread:$0]  %s14694_s10, 16, %s135_s29, [#allocation19]  }
  0xac   :  { %12772 = dma.done.wait [#allocation4], 1024  }
  0xad   :  { %12773 = vsyncadd [#allocation4], 4294966272 }
  0xae   :  { %12774 = dma.done.wait [#allocation7], 49920  }
  0xaf   :  { %12775 = vsyncadd [#allocation7], 4294917376 }
  0xb0   :  { %12776 = dma.done.wait [#allocation10], 36864  }
  0xb1   :  { %12777 = vsyncadd [#allocation10], 4294930432 }
  0xb2   :  { %12778 = dma.done.wait [#allocation13], 32784  }
  0xb3   :  { %12779 = vsyncadd [#allocation13], 4294934512 }
  0xb4   :  { %12780 = dma.done.wait [#allocation16], 4128  }
  0xb5   :  { %12781 = vsyncadd [#allocation16], 4294963168 }
  0xb6   :  { %12782 = dma.done.wait [#allocation19], 16  }
  0xb7   :  { %12783 = vsyncadd [#allocation19], 4294967280  ;;  %v11835_v0 = vld [vmem:[#allocation14 + $0x4] ss:$8 sps:$4 sm:$0xff]   ;;  %v11837_v1 = vld [vmem:[#allocation14] ss:$8 sps:$4 sm:$0xff]  }
  0xb8   :  { %7743 = vmatprep.subr.bf16.mxu0 %v11835_v0  ;;  %v11838_v2 = vld [vmem:[#allocation14 + $0x14] ss:$8 sps:$4 sm:$0xff]   ;;  %v11840_v3 = vld [vmem:[#allocation14 + $0x10] ss:$8 sps:$4 sm:$0xff]   ;;  %v11841_v4 = vld [vmem:[#allocation14 + $0x24] ss:$8 sps:$4 sm:$0xff]  }
  0xb9   :  { %7745 = vmatpush1.bf16.msra.mxu0 %v11837_v1  ;;  %v11843_v5 = vld [vmem:[#allocation14 + $0x20] ss:$8 sps:$4 sm:$0xff]   ;;  %v11844_v6 = vld [vmem:[#allocation14 + $0x34] ss:$8 sps:$4 sm:$0xff]   ;;  %v11846_v7 = vld [vmem:[#allocation14 + $0x30] ss:$8 sps:$4 sm:$0xff]  }
  0xba   :  { %7747 = vmatprep.subr.bf16.mxu0 %v11838_v2  ;;  %v11847_v8 = vld [vmem:[#allocation14 + $0x44] ss:$8 sps:$4 sm:$0xff]   ;;  %v11849_v9 = vld [vmem:[#allocation14 + $0x40] ss:$8 sps:$4 sm:$0xff]   ;;  %v11850_v10 = vld [vmem:[#allocation14 + $0x54] ss:$8 sps:$4 sm:$0xff]  }
  0xbb   :  { %v11852_v11 = vld [vmem:[#allocation14 + $0x50] ss:$8 sps:$4 sm:$0xff]   ;;  %v11853_v12 = vld [vmem:[#allocation14 + $0x64] ss:$8 sps:$4 sm:$0xff]   ;;  %v11855_v15 = vld [vmem:[#allocation14 + $0x60] ss:$8 sps:$4 sm:$0xff]  }
  0xbc   :  { %v168_v13 = vld [vmem:[#allocation3] sm:$0xff]  ;;  %v11861_v19 = vld [vmem:[#allocation14 + $0x80] ss:$8 sps:$4 sm:$0xff]   ;;  %v13017_v35 = vld [vmem:[#allocation3 + $0x8] sm:$0xff]  ;;  %vm12805_vm0 = vmmov 0   ;;  %vm1746_vm1 = vcmask 1043456  }
  0xbd   :  { %7749 = vmatpush1.bf16.msra.mxu0 %v11840_v3  ;;  %v964_v14 = vcombine.high %v168_v13, %v168_v13  ;;  %v11856_v16 = vld [vmem:[#allocation14 + $0x74] ss:$8 sps:$4 sm:$0xff]   ;;  %v11858_v17 = vld [vmem:[#allocation14 + $0x70] ss:$8 sps:$4 sm:$0xff]   ;;  %v11859_v18 = vld [vmem:[#allocation14 + $0x84] ss:$8 sps:$4 sm:$0xff]   ;;  %v965_v37 = vcombine.high %v13017_v35, %v13017_v35 }
  0xbe   :  { %7751 = vmatprep.subr.bf16.mxu0 %v11841_v4  ;;  %v11862_v20 = vld [vmem:[#allocation14 + $0x94] ss:$8 sps:$4 sm:$0xff]   ;;  %v11864_v21 = vld [vmem:[#allocation14 + $0x90] ss:$8 sps:$4 sm:$0xff]   ;;  %v11865_v22 = vld [vmem:[#allocation14 + $0xa4] ss:$8 sps:$4 sm:$0xff]  }
  0xbf   :  { %1044 = vmatprep.mubr.f32.mxu0 %v964_v14  ;;  %v11867_v23 = vld [vmem:[#allocation14 + $0xa0] ss:$8 sps:$4 sm:$0xff]   ;;  %v11868_v24 = vld [vmem:[#allocation14 + $0xb4] ss:$8 sps:$4 sm:$0xff]   ;;  %v11870_v25 = vld [vmem:[#allocation14 + $0xb0] ss:$8 sps:$4 sm:$0xff]  }
  0xc0   :  { %v11871_v26 = vld [vmem:[#allocation14 + $0xc4] ss:$8 sps:$4 sm:$0xff]   ;;  %v11873_v27 = vld [vmem:[#allocation14 + $0xc0] ss:$8 sps:$4 sm:$0xff]   ;;  %v11874_v28 = vld [vmem:[#allocation14 + $0xd4] ss:$8 sps:$4 sm:$0xff]  }
  0xc1   :  { %7753 = vmatpush1.bf16.msra.mxu0 %v11843_v5  ;;  %v11876_v29 = vld [vmem:[#allocation14 + $0xd0] ss:$8 sps:$4 sm:$0xff]   ;;  %v11877_v30 = vld [vmem:[#allocation14 + $0xe4] ss:$8 sps:$4 sm:$0xff]   ;;  %v11879_v31 = vld [vmem:[#allocation14 + $0xe0] ss:$8 sps:$4 sm:$0xff]  }
  0xc2   :  { %7755 = vmatprep.subr.bf16.mxu0 %v11844_v6  ;;  %v11880_v32 = vld [vmem:[#allocation14 + $0xf4] ss:$8 sps:$4 sm:$0xff]   ;;  %v11882_v33 = vld [vmem:[#allocation14 + $0xf0] ss:$8 sps:$4 sm:$0xff]   ;;  %v11884_v34 = vld [vmem:[#allocation14 + $0x104] ss:$8 sps:$4 sm:$0xff]  }
  0xc3   :  { %v11886_v36 = vld [vmem:[#allocation14 + $0x100] ss:$8 sps:$4 sm:$0xff]   ;;  %v11887_v38 = vld [vmem:[#allocation14 + $0x114] ss:$8 sps:$4 sm:$0xff]   ;;  %v11889_v39 = vld [vmem:[#allocation14 + $0x110] ss:$8 sps:$4 sm:$0xff]  }
  0xc4   :  { %v11890_v40 = vld [vmem:[#allocation14 + $0x124] ss:$8 sps:$4 sm:$0xff]   ;;  %v11892_v41 = vld [vmem:[#allocation14 + $0x120] ss:$8 sps:$4 sm:$0xff]   ;;  %v11893_v42 = vld [vmem:[#allocation14 + $0x134] ss:$8 sps:$4 sm:$0xff]  }
  0xc5   :  { %7757 = vmatpush1.bf16.msra.mxu0 %v11846_v7  ;;  %v11895_v43 = vld [vmem:[#allocation14 + $0x130] ss:$8 sps:$4 sm:$0xff]   ;;  %v11896_v44 = vld [vmem:[#allocation14 + $0x144] ss:$8 sps:$4 sm:$0xff]   ;;  %v11898_v45 = vld [vmem:[#allocation14 + $0x140] ss:$8 sps:$4 sm:$0xff]  }
  0xc6   :  { %7759 = vmatprep.subr.bf16.mxu0 %v11847_v8  ;;  %v11899_v46 = vld [vmem:[#allocation14 + $0x154] ss:$8 sps:$4 sm:$0xff]   ;;  %v11901_v47 = vld [vmem:[#allocation14 + $0x150] ss:$8 sps:$4 sm:$0xff]   ;;  %v11902_v48 = vld [vmem:[#allocation14 + $0x164] ss:$8 sps:$4 sm:$0xff]  }
  0xc7   :  { %v11904_v49 = vld [vmem:[#allocation14 + $0x160] ss:$8 sps:$4 sm:$0xff]   ;;  %v11905_v50 = vld [vmem:[#allocation14 + $0x174] ss:$8 sps:$4 sm:$0xff]   ;;  %v11907_v51 = vld [vmem:[#allocation14 + $0x170] ss:$8 sps:$4 sm:$0xff]  }
  0xc8   :  { %v11908_v52 = vld [vmem:[#allocation14 + $0x184] ss:$8 sps:$4 sm:$0xff]   ;;  %v11910_v53 = vld [vmem:[#allocation14 + $0x180] ss:$8 sps:$4 sm:$0xff]   ;;  %v11911_v54 = vld [vmem:[#allocation14 + $0x194] ss:$8 sps:$4 sm:$0xff]  }
  0xc9   :  { %7761 = vmatpush1.bf16.msra.mxu0 %v11849_v9  ;;  %v11913_v55 = vld [vmem:[#allocation14 + $0x190] ss:$8 sps:$4 sm:$0xff]   ;;  %v11914_v56 = vld [vmem:[#allocation14 + $0x1a4] ss:$8 sps:$4 sm:$0xff]   ;;  %v11916_v57 = vld [vmem:[#allocation14 + $0x1a0] ss:$8 sps:$4 sm:$0xff]  }
  0xca   :  { %7763 = vmatprep.subr.bf16.mxu0 %v11850_v10  ;;  %v11917_v58 = vld [vmem:[#allocation14 + $0x1b4] ss:$8 sps:$4 sm:$0xff]   ;;  %v11919_v59 = vld [vmem:[#allocation14 + $0x1b0] ss:$8 sps:$4 sm:$0xff]   ;;  %v11920_v60 = vld [vmem:[#allocation14 + $0x1c4] ss:$8 sps:$4 sm:$0xff]  }
  0xcb   :  { %v11922_v61 = vld [vmem:[#allocation14 + $0x1c0] ss:$8 sps:$4 sm:$0xff]   ;;  %v11923_v62 = vld [vmem:[#allocation14 + $0x1d4] ss:$8 sps:$4 sm:$0xff]   ;;  %v11925_v63 = vld [vmem:[#allocation14 + $0x1d0] ss:$8 sps:$4 sm:$0xff]  }
  0xcc   :  { %v11926_v0 = vld [vmem:[#allocation14 + $0x1e4] ss:$8 sps:$4 sm:$0xff]   ;;  %v11928_v1 = vld [vmem:[#allocation14 + $0x1e0] ss:$8 sps:$4 sm:$0xff]   ;;  %v11929_v2 = vld [vmem:[#allocation14 + $0x1f4] ss:$8 sps:$4 sm:$0xff]  }
  0xcd   :  { %7765 = vmatpush1.bf16.msra.mxu0 %v11852_v11  ;;  %v11931_v3 = vld [vmem:[#allocation14 + $0x1f0] ss:$8 sps:$4 sm:$0xff]   ;;  %v11933_v4 = vld [vmem:[#allocation14 + $0x204] ss:$8 sps:$4 sm:$0xff]   ;;  %v11935_v6 = vld [vmem:[#allocation14 + $0x200] ss:$8 sps:$4 sm:$0xff]  }
  0xce   :  { %7767 = vmatprep.subr.bf16.mxu0 %v11853_v12  ;;  %v13021_v5 = vld [vmem:[#allocation3 + $0x10] sm:$0xff]  ;;  %v11938_v9 = vld [vmem:[#allocation14 + $0x210] ss:$8 sps:$4 sm:$0xff]   ;;  %vm1730_vm2 = vcmask 27648   ;;  %vm1742_vm3 = vcmask 31744   ;;  %vm7458_vm7 = vcmask 64512  }
  0xcf   :  { %v966_v7 = vcombine.high %v13021_v5, %v13021_v5  ;;  %v11936_v8 = vld [vmem:[#allocation14 + $0x214] ss:$8 sps:$4 sm:$0xff]   ;;  %v11939_v10 = vld [vmem:[#allocation14 + $0x224] ss:$8 sps:$4 sm:$0xff]   ;;  %v11941_v11 = vld [vmem:[#allocation14 + $0x220] ss:$8 sps:$4 sm:$0xff]  }
  0xd0   :  { %v11942_v12 = vld [vmem:[#allocation14 + $0x234] ss:$8 sps:$4 sm:$0xff]   ;;  %v11945_v14 = vld [vmem:[#allocation14 + $0x244] ss:$8 sps:$4 sm:$0xff]  }
  0xd1   :  { %7769 = vmatpush1.bf16.msra.mxu0 %v11855_v15  ;;  %v11947_v15 = vld [vmem:[#allocation14 + $0x240] ss:$8 sps:$4 sm:$0xff]  }
  0xd2   :  { %7771 = vmatprep.subr.bf16.mxu0 %v11856_v16  ;;  %v11948_v16 = vld [vmem:[#allocation14 + $0x254] ss:$8 sps:$4 sm:$0xff]  }
  0xd5   :  { %7773 = vmatpush1.bf16.msra.mxu0 %v11858_v17  ;;  %v11950_v17 = vld [vmem:[#allocation14 + $0x250] ss:$8 sps:$4 sm:$0xff]  }
  0xd6   :  { %7775 = vmatprep.subr.bf16.mxu0 %v11859_v18  ;;  %v11951_v18 = vld [vmem:[#allocation14 + $0x264] ss:$8 sps:$4 sm:$0xff]  }
  0xd9   :  { %7777 = vmatpush1.bf16.msra.mxu0 %v11861_v19  ;;  %v11953_v19 = vld [vmem:[#allocation14 + $0x260] ss:$8 sps:$4 sm:$0xff]  }
  0xda   :  { %7779 = vmatprep.subr.bf16.mxu0 %v11862_v20  ;;  %v11954_v20 = vld [vmem:[#allocation14 + $0x274] ss:$8 sps:$4 sm:$0xff]  }
  0xdd   :  { %7781 = vmatpush1.bf16.msra.mxu0 %v11864_v21  ;;  %v11956_v21 = vld [vmem:[#allocation14 + $0x270] ss:$8 sps:$4 sm:$0xff]  }
  0xde   :  { %7783 = vmatprep.subr.bf16.mxu0 %v11865_v22  ;;  %v11957_v22 = vld [vmem:[#allocation14 + $0x284] ss:$8 sps:$4 sm:$0xff]  }
  0xe1   :  { %7785 = vmatpush1.bf16.msra.mxu0 %v11867_v23  ;;  %v11959_v23 = vld [vmem:[#allocation14 + $0x280] ss:$8 sps:$4 sm:$0xff]  }
  0xe2   :  { %7787 = vmatprep.subr.bf16.mxu0 %v11868_v24  ;;  %v11960_v24 = vld [vmem:[#allocation14 + $0x294] ss:$8 sps:$4 sm:$0xff]  }
  0xe5   :  { %7789 = vmatpush1.bf16.msra.mxu0 %v11870_v25  ;;  %v11962_v25 = vld [vmem:[#allocation14 + $0x290] ss:$8 sps:$4 sm:$0xff]  }
  0xe6   :  { %7791 = vmatprep.subr.bf16.mxu0 %v11871_v26  ;;  %v11963_v26 = vld [vmem:[#allocation14 + $0x2a4] ss:$8 sps:$4 sm:$0xff]  }
  0xe9   :  { %7793 = vmatpush1.bf16.msra.mxu0 %v11873_v27  ;;  %v11965_v27 = vld [vmem:[#allocation14 + $0x2a0] ss:$8 sps:$4 sm:$0xff]  }
  0xea   :  { %7795 = vmatprep.subr.bf16.mxu0 %v11874_v28  ;;  %v11966_v28 = vld [vmem:[#allocation14 + $0x2b4] ss:$8 sps:$4 sm:$0xff]  }
  0xed   :  { %7797 = vmatpush1.bf16.msra.mxu0 %v11876_v29  ;;  %v11968_v29 = vld [vmem:[#allocation14 + $0x2b0] ss:$8 sps:$4 sm:$0xff]  }
  0xee   :  { %7799 = vmatprep.subr.bf16.mxu0 %v11877_v30  ;;  %v11969_v30 = vld [vmem:[#allocation14 + $0x2c4] ss:$8 sps:$4 sm:$0xff]  }
  0xf1   :  { %7801 = vmatpush1.bf16.msra.mxu0 %v11879_v31  ;;  %v11971_v31 = vld [vmem:[#allocation14 + $0x2c0] ss:$8 sps:$4 sm:$0xff]  }
  0xf2   :  { %7803 = vmatprep.subr.bf16.mxu0 %v11880_v32  ;;  %v11972_v32 = vld [vmem:[#allocation14 + $0x2d4] ss:$8 sps:$4 sm:$0xff]  }
  0xf5   :  { %7805 = vmatpush1.bf16.msra.mxu0 %v11882_v33  ;;  %v11974_v33 = vld [vmem:[#allocation14 + $0x2d0] ss:$8 sps:$4 sm:$0xff]  }
  0xf6   :  { %7807 = vmatprep.subr.bf16.mxu0 %v11884_v34  ;;  %v11975_v34 = vld [vmem:[#allocation14 + $0x2e4] ss:$8 sps:$4 sm:$0xff]  }
  0xf8   :  { %1045 = vmatmul.mubr.f32.vlgmr.msra.gmra.mrb[0].mxu0 %v168_v13  ;;  %v11944_v13 = vld [vmem:[#allocation14 + $0x230] ss:$8 sps:$4 sm:$0xff]  }
  0xf9   :  { %7809 = vmatpush1.bf16.msra.mxu0 %v11886_v36  ;;  %1115 = vmatprep.mubr.f32.mxu0 %v965_v37  ;;  %v11978_v36 = vld [vmem:[#allocation14 + $0x2f4] ss:$8 sps:$4 sm:$0xff]   ;;  %v11980_v37 = vld [vmem:[#allocation14 + $0x2f0] ss:$8 sps:$4 sm:$0xff]  }
  0xfa   :  { %7811 = vmatprep.subr.bf16.mxu0 %v11887_v38  ;;  %v11982_v38 = vld [vmem:[#allocation14 + $0x304] ss:$8 sps:$4 sm:$0xff]  }
  0xfd   :  { %7813 = vmatpush1.bf16.msra.mxu0 %v11889_v39  ;;  %v13026_v39 = vld [vmem:[#allocation3 + $0x18] sm:$0xff] }
  0xfe   :  { %7815 = vmatprep.subr.bf16.mxu0 %v11890_v40  ;;  %v11984_v40 = vld [vmem:[#allocation14 + $0x300] ss:$8 sps:$4 sm:$0xff]  }
 0x101   :  { %7817 = vmatpush1.bf16.msra.mxu0 %v11892_v41  ;;  %v967_v41 = vcombine.high %v13026_v39, %v13026_v39 }
 0x102   :  { %7819 = vmatprep.subr.bf16.mxu0 %v11893_v42  ;;  %v11985_v42 = vld [vmem:[#allocation14 + $0x314] ss:$8 sps:$4 sm:$0xff]  }
 0x105   :  { %7821 = vmatpush1.bf16.msra.mxu0 %v11895_v43  ;;  %v11987_v43 = vld [vmem:[#allocation14 + $0x310] ss:$8 sps:$4 sm:$0xff]  }
 0x106   :  { %7823 = vmatprep.subr.bf16.mxu0 %v11896_v44  ;;  %v11988_v44 = vld [vmem:[#allocation14 + $0x324] ss:$8 sps:$4 sm:$0xff]  }
 0x109   :  { %7825 = vmatpush1.bf16.msra.mxu0 %v11898_v45  ;;  %v11990_v45 = vld [vmem:[#allocation14 + $0x320] ss:$8 sps:$4 sm:$0xff]  }
 0x10a   :  { %7827 = vmatprep.subr.bf16.mxu0 %v11899_v46  ;;  %v11991_v46 = vld [vmem:[#allocation14 + $0x334] ss:$8 sps:$4 sm:$0xff]  }
 0x10d   :  { %7829 = vmatpush1.bf16.msra.mxu0 %v11901_v47  ;;  %v11993_v47 = vld [vmem:[#allocation14 + $0x330] ss:$8 sps:$4 sm:$0xff]  }
 0x10e   :  { %7831 = vmatprep.subr.bf16.mxu0 %v11902_v48  ;;  %v11994_v48 = vld [vmem:[#allocation14 + $0x344] ss:$8 sps:$4 sm:$0xff]  }
 0x111   :  { %7833 = vmatpush1.bf16.msra.mxu0 %v11904_v49  ;;  %v11996_v49 = vld [vmem:[#allocation14 + $0x340] ss:$8 sps:$4 sm:$0xff]  }
 0x112   :  { %7835 = vmatprep.subr.bf16.mxu0 %v11905_v50  ;;  %v11997_v50 = vld [vmem:[#allocation14 + $0x354] ss:$8 sps:$4 sm:$0xff]  }
 0x115   :  { %7837 = vmatpush1.bf16.msra.mxu0 %v11907_v51  ;;  %v11999_v51 = vld [vmem:[#allocation14 + $0x350] ss:$8 sps:$4 sm:$0xff]  }
 0x116   :  { %7839 = vmatprep.subr.bf16.mxu0 %v11908_v52  ;;  %v12000_v52 = vld [vmem:[#allocation14 + $0x364] ss:$8 sps:$4 sm:$0xff]  }
 0x119   :  { %7841 = vmatpush1.bf16.msra.mxu0 %v11910_v53  ;;  %v12002_v53 = vld [vmem:[#allocation14 + $0x360] ss:$8 sps:$4 sm:$0xff]  }
 0x11a   :  { %7843 = vmatprep.subr.bf16.mxu0 %v11911_v54  ;;  %v12003_v54 = vld [vmem:[#allocation14 + $0x374] ss:$8 sps:$4 sm:$0xff]  }
 0x11d   :  { %7845 = vmatpush1.bf16.msra.mxu0 %v11913_v55  ;;  %v12005_v55 = vld [vmem:[#allocation14 + $0x370] ss:$8 sps:$4 sm:$0xff]  }
 0x11e   :  { %7847 = vmatprep.subr.bf16.mxu0 %v11914_v56  ;;  %v12006_v56 = vld [vmem:[#allocation14 + $0x384] ss:$8 sps:$4 sm:$0xff]  }
 0x121   :  { %7849 = vmatpush1.bf16.msra.mxu0 %v11916_v57  ;;  %v12008_v57 = vld [vmem:[#allocation14 + $0x380] ss:$8 sps:$4 sm:$0xff]  }
 0x122   :  { %7851 = vmatprep.subr.bf16.mxu0 %v11917_v58  ;;  %v12009_v58 = vld [vmem:[#allocation14 + $0x394] ss:$8 sps:$4 sm:$0xff]  }
 0x125   :  { %7853 = vmatpush1.bf16.msra.mxu0 %v11919_v59  ;;  %v12011_v59 = vld [vmem:[#allocation14 + $0x390] ss:$8 sps:$4 sm:$0xff]  }
 0x126   :  { %7855 = vmatprep.subr.bf16.mxu0 %v11920_v60  ;;  %v12012_v60 = vld [vmem:[#allocation14 + $0x3a4] ss:$8 sps:$4 sm:$0xff]  }
 0x129   :  { %7857 = vmatpush1.bf16.msra.mxu0 %v11922_v61  ;;  %v12014_v61 = vld [vmem:[#allocation14 + $0x3a0] ss:$8 sps:$4 sm:$0xff]  }
 0x12a   :  { %7859 = vmatprep.subr.bf16.mxu0 %v11923_v62  ;;  %v12015_v62 = vld [vmem:[#allocation14 + $0x3b4] ss:$8 sps:$4 sm:$0xff]  }
 0x12d   :  { %7861 = vmatpush1.bf16.msra.mxu0 %v11925_v63  ;;  %v12017_v63 = vld [vmem:[#allocation14 + $0x3b0] ss:$8 sps:$4 sm:$0xff]  }
 0x12e   :  { %7863 = vmatprep.subr.bf16.mxu0 %v11926_v0  ;;  %v12018_v0 = vld [vmem:[#allocation14 + $0x3c4] ss:$8 sps:$4 sm:$0xff]  }
 0x131   :  { %7865 = vmatpush1.bf16.msra.mxu0 %v11928_v1  ;;  %v12020_v1 = vld [vmem:[#allocation14 + $0x3c0] ss:$8 sps:$4 sm:$0xff]  }
 0x132   :  { %7867 = vmatprep.subr.bf16.mxu0 %v11929_v2  ;;  %v12021_v2 = vld [vmem:[#allocation14 + $0x3d4] ss:$8 sps:$4 sm:$0xff]  }
 0x135   :  { %7869 = vmatpush1.bf16.msra.mxu0 %v11931_v3  ;;  %v12023_v3 = vld [vmem:[#allocation14 + $0x3d0] ss:$8 sps:$4 sm:$0xff]  }
 0x136   :  { %7871 = vmatprep.subr.bf16.mxu0 %v11933_v4  ;;  %v12024_v4 = vld [vmem:[#allocation14 + $0x3e4] ss:$8 sps:$4 sm:$0xff]  }
 0x138   :  { %1116 = vmatmul.mubr.f32.vlgmr.msra.gmra.mrb[0].mxu0 %v13017_v35  ;;  %v11977_v35 = vld [vmem:[#allocation14 + $0x2e0] ss:$8 sps:$4 sm:$0xff]  }
 0x139   :  { %7873 = vmatpush1.bf16.msra.mxu0 %v11935_v6  ;;  %1186 = vmatprep.mubr.f32.mxu0 %v966_v7  ;;  %v12027_v6 = vld [vmem:[#allocation14 + $0x3f4] ss:$8 sps:$4 sm:$0xff]   ;;  %v12029_v7 = vld [vmem:[#allocation14 + $0x3f0] ss:$8 sps:$4 sm:$0xff]  }
 0x13a   :  { %7875 = vmatprep.subr.bf16.mxu0 %v11936_v8  ;;  %v12031_v8 = vld [vmem:[#allocation14 + $0x404] ss:$8 sps:$4 sm:$0xff]  }
 0x13d   :  { %7877 = vmatpush1.bf16.msra.mxu0 %v11938_v9  ;;  %v13031_v9 = vld [vmem:[#allocation3 + $0x20] sm:$0xff] }
 0x13e   :  { %7879 = vmatprep.subr.bf16.mxu0 %v11939_v10  ;;  %v12033_v10 = vld [vmem:[#allocation14 + $0x400] ss:$8 sps:$4 sm:$0xff]  }
 0x141   :  { %7881 = vmatpush1.bf16.msra.mxu0 %v11941_v11  ;;  %v968_v11 = vcombine.high %v13031_v9, %v13031_v9 }
 0x142   :  { %7883 = vmatprep.subr.bf16.mxu0 %v11942_v12  ;;  %v12034_v12 = vld [vmem:[#allocation14 + $0x414] ss:$8 sps:$4 sm:$0xff]  }
 0x145   :  { %7885 = vmatpush1.bf16.msra.mxu0 %v11944_v13  ;;  %v12036_v13 = vld [vmem:[#allocation14 + $0x410] ss:$8 sps:$4 sm:$0xff]  }
 0x146   :  { %7887 = vmatprep.subr.bf16.mxu0 %v11945_v14  ;;  %v12037_v14 = vld [vmem:[#allocation14 + $0x424] ss:$8 sps:$4 sm:$0xff]  }
 0x149   :  { %7889 = vmatpush1.bf16.msra.mxu0 %v11947_v15  ;;  %v12039_v15 = vld [vmem:[#allocation14 + $0x420] ss:$8 sps:$4 sm:$0xff]  }
 0x14a   :  { %7891 = vmatprep.subr.bf16.mxu0 %v11948_v16  ;;  %v12040_v16 = vld [vmem:[#allocation14 + $0x434] ss:$8 sps:$4 sm:$0xff]  }
 0x14d   :  { %7893 = vmatpush1.bf16.msra.mxu0 %v11950_v17  ;;  %v12042_v17 = vld [vmem:[#allocation14 + $0x430] ss:$8 sps:$4 sm:$0xff]  }
 0x14e   :  { %7895 = vmatprep.subr.bf16.mxu0 %v11951_v18  ;;  %v12043_v18 = vld [vmem:[#allocation14 + $0x444] ss:$8 sps:$4 sm:$0xff]  }
 0x151   :  { %7897 = vmatpush1.bf16.msra.mxu0 %v11953_v19  ;;  %v12045_v19 = vld [vmem:[#allocation14 + $0x440] ss:$8 sps:$4 sm:$0xff]  }
 0x152   :  { %7899 = vmatprep.subr.bf16.mxu0 %v11954_v20  ;;  %v12046_v20 = vld [vmem:[#allocation14 + $0x454] ss:$8 sps:$4 sm:$0xff]  }
 0x155   :  { %7901 = vmatpush1.bf16.msra.mxu0 %v11956_v21  ;;  %v12048_v21 = vld [vmem:[#allocation14 + $0x450] ss:$8 sps:$4 sm:$0xff]  }
 0x156   :  { %7903 = vmatprep.subr.bf16.mxu0 %v11957_v22  ;;  %v12049_v22 = vld [vmem:[#allocation14 + $0x464] ss:$8 sps:$4 sm:$0xff]  }
 0x159   :  { %7905 = vmatpush1.bf16.msra.mxu0 %v11959_v23  ;;  %v12051_v23 = vld [vmem:[#allocation14 + $0x460] ss:$8 sps:$4 sm:$0xff]  }
 0x15a   :  { %7907 = vmatprep.subr.bf16.mxu0 %v11960_v24  ;;  %v12052_v24 = vld [vmem:[#allocation14 + $0x474] ss:$8 sps:$4 sm:$0xff]  }
 0x15d   :  { %7909 = vmatpush1.bf16.msra.mxu0 %v11962_v25  ;;  %v12054_v25 = vld [vmem:[#allocation14 + $0x470] ss:$8 sps:$4 sm:$0xff]  }
 0x15e   :  { %7911 = vmatprep.subr.bf16.mxu0 %v11963_v26  ;;  %v12055_v26 = vld [vmem:[#allocation14 + $0x484] ss:$8 sps:$4 sm:$0xff]  }
 0x161   :  { %7913 = vmatpush1.bf16.msra.mxu0 %v11965_v27  ;;  %v12057_v27 = vld [vmem:[#allocation14 + $0x480] ss:$8 sps:$4 sm:$0xff]  }
 0x162   :  { %7915 = vmatprep.subr.bf16.mxu0 %v11966_v28  ;;  %v12058_v28 = vld [vmem:[#allocation14 + $0x494] ss:$8 sps:$4 sm:$0xff]  }
 0x165   :  { %7917 = vmatpush1.bf16.msra.mxu0 %v11968_v29  ;;  %v12060_v29 = vld [vmem:[#allocation14 + $0x490] ss:$8 sps:$4 sm:$0xff]  }
 0x166   :  { %7919 = vmatprep.subr.bf16.mxu0 %v11969_v30  ;;  %v12061_v30 = vld [vmem:[#allocation14 + $0x4a4] ss:$8 sps:$4 sm:$0xff]  }
 0x169   :  { %7921 = vmatpush1.bf16.msra.mxu0 %v11971_v31  ;;  %v12063_v31 = vld [vmem:[#allocation14 + $0x4a0] ss:$8 sps:$4 sm:$0xff]  }
 0x16a   :  { %7923 = vmatprep.subr.bf16.mxu0 %v11972_v32  ;;  %v12064_v32 = vld [vmem:[#allocation14 + $0x4b4] ss:$8 sps:$4 sm:$0xff]  }
 0x16d   :  { %7925 = vmatpush1.bf16.msra.mxu0 %v11974_v33  ;;  %v12066_v33 = vld [vmem:[#allocation14 + $0x4b0] ss:$8 sps:$4 sm:$0xff]  }
 0x16e   :  { %7927 = vmatprep.subr.bf16.mxu0 %v11975_v34  ;;  %v12067_v34 = vld [vmem:[#allocation14 + $0x4c4] ss:$8 sps:$4 sm:$0xff]  }
 0x171   :  { %7929 = vmatpush1.bf16.msra.mxu0 %v11977_v35  ;;  %v12069_v35 = vld [vmem:[#allocation14 + $0x4c0] ss:$8 sps:$4 sm:$0xff]  }
 0x172   :  { %7931 = vmatprep.subr.bf16.mxu0 %v11978_v36  ;;  %v12070_v36 = vld [vmem:[#allocation14 + $0x4d4] ss:$8 sps:$4 sm:$0xff]  }
 0x175   :  { %7933 = vmatpush1.bf16.msra.mxu0 %v11980_v37  ;;  %v12072_v37 = vld [vmem:[#allocation14 + $0x4d0] ss:$8 sps:$4 sm:$0xff]  }
 0x176   :  { %7935 = vmatprep.subr.bf16.mxu0 %v11982_v38  ;;  %v12073_v38 = vld [vmem:[#allocation14 + $0x4e4] ss:$8 sps:$4 sm:$0xff]  }
 0x178   :  { %1187 = vmatmul.mubr.f32.vlgmr.msra.gmra.mrb[0].mxu0 %v13021_v5  ;;  %v12026_v5 = vld [vmem:[#allocation14 + $0x3e0] ss:$8 sps:$4 sm:$0xff]  }
 0x179   :  { %7937 = vmatpush1.bf16.msra.mxu0 %v11984_v40  ;;  %1257 = vmatprep.mubr.f32.mxu0 %v967_v41  ;;  %v12076_v40 = vld [vmem:[#allocation14 + $0x4f4] ss:$8 sps:$4 sm:$0xff]   ;;  %v12078_v41 = vld [vmem:[#allocation14 + $0x4f0] ss:$8 sps:$4 sm:$0xff]  }
 0x17a   :  { %7939 = vmatprep.subr.bf16.mxu0 %v11985_v42  ;;  %v12080_v42 = vld [vmem:[#allocation14 + $0x504] ss:$8 sps:$4 sm:$0xff]  }
 0x17d   :  { %7941 = vmatpush1.bf16.msra.mxu0 %v11987_v43  ;;  %v13036_v43 = vld [vmem:[#allocation3 + $0x28] sm:$0xff] }
 0x17e   :  { %7943 = vmatprep.subr.bf16.mxu0 %v11988_v44  ;;  %v12082_v44 = vld [vmem:[#allocation14 + $0x500] ss:$8 sps:$4 sm:$0xff]  }
 0x181   :  { %7945 = vmatpush1.bf16.msra.mxu0 %v11990_v45  ;;  %v969_v45 = vcombine.high %v13036_v43, %v13036_v43 }
 0x182   :  { %7947 = vmatprep.subr.bf16.mxu0 %v11991_v46  ;;  %v12083_v46 = vld [vmem:[#allocation14 + $0x514] ss:$8 sps:$4 sm:$0xff]  }
 0x185   :  { %7949 = vmatpush1.bf16.msra.mxu0 %v11993_v47  ;;  %v12085_v47 = vld [vmem:[#allocation14 + $0x510] ss:$8 sps:$4 sm:$0xff]  }
 0x186   :  { %7951 = vmatprep.subr.bf16.mxu0 %v11994_v48  ;;  %v12086_v48 = vld [vmem:[#allocation14 + $0x524] ss:$8 sps:$4 sm:$0xff]  }
 0x189   :  { %7953 = vmatpush1.bf16.msra.mxu0 %v11996_v49  ;;  %v12088_v49 = vld [vmem:[#allocation14 + $0x520] ss:$8 sps:$4 sm:$0xff]  }
 0x18a   :  { %7955 = vmatprep.subr.bf16.mxu0 %v11997_v50  ;;  %v12089_v50 = vld [vmem:[#allocation14 + $0x534] ss:$8 sps:$4 sm:$0xff]  }
 0x18d   :  { %7957 = vmatpush1.bf16.msra.mxu0 %v11999_v51  ;;  %v12091_v51 = vld [vmem:[#allocation14 + $0x530] ss:$8 sps:$4 sm:$0xff]  }
 0x18e   :  { %7959 = vmatprep.subr.bf16.mxu0 %v12000_v52  ;;  %v12092_v52 = vld [vmem:[#allocation14 + $0x544] ss:$8 sps:$4 sm:$0xff]  }
 0x191   :  { %7961 = vmatpush1.bf16.msra.mxu0 %v12002_v53  ;;  %v12094_v53 = vld [vmem:[#allocation14 + $0x540] ss:$8 sps:$4 sm:$0xff]  }
 0x192   :  { %7963 = vmatprep.subr.bf16.mxu0 %v12003_v54  ;;  %v12095_v54 = vld [vmem:[#allocation14 + $0x554] ss:$8 sps:$4 sm:$0xff]  }
 0x195   :  { %7965 = vmatpush1.bf16.msra.mxu0 %v12005_v55  ;;  %v12097_v55 = vld [vmem:[#allocation14 + $0x550] ss:$8 sps:$4 sm:$0xff]  }
 0x196   :  { %7967 = vmatprep.subr.bf16.mxu0 %v12006_v56  ;;  %v12098_v56 = vld [vmem:[#allocation14 + $0x564] ss:$8 sps:$4 sm:$0xff]  }
 0x199   :  { %7969 = vmatpush1.bf16.msra.mxu0 %v12008_v57  ;;  %v12100_v57 = vld [vmem:[#allocation14 + $0x560] ss:$8 sps:$4 sm:$0xff]  }
 0x19a   :  { %7971 = vmatprep.subr.bf16.mxu0 %v12009_v58  ;;  %v12101_v58 = vld [vmem:[#allocation14 + $0x574] ss:$8 sps:$4 sm:$0xff]  }
 0x19d   :  { %7973 = vmatpush1.bf16.msra.mxu0 %v12011_v59  ;;  %v12103_v59 = vld [vmem:[#allocation14 + $0x570] ss:$8 sps:$4 sm:$0xff]  }
 0x19e   :  { %7975 = vmatprep.subr.bf16.mxu0 %v12012_v60  ;;  %v12104_v60 = vld [vmem:[#allocation14 + $0x584] ss:$8 sps:$4 sm:$0xff]  }
 0x1a1   :  { %7977 = vmatpush1.bf16.msra.mxu0 %v12014_v61  ;;  %v12106_v61 = vld [vmem:[#allocation14 + $0x580] ss:$8 sps:$4 sm:$0xff]  }
 0x1a2   :  { %7979 = vmatprep.subr.bf16.mxu0 %v12015_v62  ;;  %v12107_v62 = vld [vmem:[#allocation14 + $0x594] ss:$8 sps:$4 sm:$0xff]  }
 0x1a5   :  { %7981 = vmatpush1.bf16.msra.mxu0 %v12017_v63  ;;  %v12109_v63 = vld [vmem:[#allocation14 + $0x590] ss:$8 sps:$4 sm:$0xff]  }
 0x1a6   :  { %7983 = vmatprep.subr.bf16.mxu0 %v12018_v0  ;;  %v12110_v0 = vld [vmem:[#allocation14 + $0x5a4] ss:$8 sps:$4 sm:$0xff]  }
 0x1a9   :  { %7985 = vmatpush1.bf16.msra.mxu0 %v12020_v1  ;;  %v12112_v1 = vld [vmem:[#allocation14 + $0x5a0] ss:$8 sps:$4 sm:$0xff]  }
 0x1aa   :  { %7987 = vmatprep.subr.bf16.mxu0 %v12021_v2  ;;  %v12113_v2 = vld [vmem:[#allocation14 + $0x5b4] ss:$8 sps:$4 sm:$0xff]  }
 0x1ad   :  { %7989 = vmatpush1.bf16.msra.mxu0 %v12023_v3  ;;  %v12115_v3 = vld [vmem:[#allocation14 + $0x5b0] ss:$8 sps:$4 sm:$0xff]  }
 0x1ae   :  { %7991 = vmatprep.subr.bf16.mxu0 %v12024_v4  ;;  %v12116_v4 = vld [vmem:[#allocation14 + $0x5c4] ss:$8 sps:$4 sm:$0xff]  }
 0x1b1   :  { %7993 = vmatpush1.bf16.msra.mxu0 %v12026_v5  ;;  %v12118_v5 = vld [vmem:[#allocation14 + $0x5c0] ss:$8 sps:$4 sm:$0xff]  }
 0x1b2   :  { %7995 = vmatprep.subr.bf16.mxu0 %v12027_v6  ;;  %v12119_v6 = vld [vmem:[#allocation14 + $0x5d4] ss:$8 sps:$4 sm:$0xff]  }
 0x1b5   :  { %7997 = vmatpush1.bf16.msra.mxu0 %v12029_v7  ;;  %v12121_v7 = vld [vmem:[#allocation14 + $0x5d0] ss:$8 sps:$4 sm:$0xff]  }
 0x1b6   :  { %7999 = vmatprep.subr.bf16.mxu0 %v12031_v8  ;;  %v12122_v8 = vld [vmem:[#allocation14 + $0x5e4] ss:$8 sps:$4 sm:$0xff]  }
 0x1b8   :  { %1258 = vmatmul.mubr.f32.vlgmr.msra.gmra.mrb[0].mxu0 %v13026_v39  ;;  %v12075_v39 = vld [vmem:[#allocation14 + $0x4e0] ss:$8 sps:$4 sm:$0xff]  }
 0x1b9   :  { %8001 = vmatpush1.bf16.msra.mxu0 %v12033_v10  ;;  %1328 = vmatprep.mubr.f32.mxu0 %v968_v11  ;;  %v12125_v10 = vld [vmem:[#allocation14 + $0x5f4] ss:$8 sps:$4 sm:$0xff]   ;;  %v12127_v11 = vld [vmem:[#allocation14 + $0x5f0] ss:$8 sps:$4 sm:$0xff]  }
 0x1ba   :  { %8003 = vmatprep.subr.bf16.mxu0 %v12034_v12  ;;  %v12129_v12 = vld [vmem:[#allocation14 + $0x604] ss:$8 sps:$4 sm:$0xff]  }
 0x1bd   :  { %8005 = vmatpush1.bf16.msra.mxu0 %v12036_v13  ;;  %v13041_v13 = vld [vmem:[#allocation3 + $0x30] sm:$0xff] }
 0x1be   :  { %8007 = vmatprep.subr.bf16.mxu0 %v12037_v14  ;;  %v12131_v14 = vld [vmem:[#allocation14 + $0x600] ss:$8 sps:$4 sm:$0xff]  }
 0x1c1   :  { %8009 = vmatpush1.bf16.msra.mxu0 %v12039_v15  ;;  %v970_v15 = vcombine.high %v13041_v13, %v13041_v13 }
 0x1c2   :  { %8011 = vmatprep.subr.bf16.mxu0 %v12040_v16  ;;  %v12132_v16 = vld [vmem:[#allocation14 + $0x614] ss:$8 sps:$4 sm:$0xff]  }
 0x1c5   :  { %8013 = vmatpush1.bf16.msra.mxu0 %v12042_v17  ;;  %v12134_v17 = vld [vmem:[#allocation14 + $0x610] ss:$8 sps:$4 sm:$0xff]  }
 0x1c6   :  { %8015 = vmatprep.subr.bf16.mxu0 %v12043_v18  ;;  %v12135_v18 = vld [vmem:[#allocation14 + $0x624] ss:$8 sps:$4 sm:$0xff]  }
 0x1c9   :  { %8017 = vmatpush1.bf16.msra.mxu0 %v12045_v19  ;;  %v1566_v19 = vld [vmem:[#allocation17 + $0x80] sm:$0xff] }
 0x1ca   :  { %8019 = vmatprep.subr.bf16.mxu0 %v12046_v20  ;;  %v1567_v20 = vld [vmem:[#allocation17 + $0x88] sm:$0xff] }
 0x1cd   :  { %8021 = vmatpush1.bf16.msra.mxu0 %v12048_v21  ;;  %v1550_v21 = vld [vmem:[#allocation17] sm:$0xff] }
 0x1ce   :  { %8023 = vmatprep.subr.bf16.mxu0 %v12049_v22  ;;  %v8254_v22 = vpack.c.bf16 %v1567_v20, %v1566_v19  ;;  %v12173_v19 = vld [vmem:[#allocation14 + $0x6e0] ss:$8 sps:$4 sm:$0xff]   ;;  %v12174_v20 = vld [vmem:[#allocation14 + $0x6f4] ss:$8 sps:$4 sm:$0xff]  }
 0x1d0   :  { %8255 = vmatprep.subr.bf16.mxu1 %v8254_v22  ;;  %v12178_v22 = vld [vmem:[#allocation14 + $0x704] ss:$8 sps:$4 sm:$0xff]  }
 0x1d1   :  { %8025 = vmatpush1.bf16.msra.mxu0 %v12051_v23  ;;  %v1551_v23 = vld [vmem:[#allocation17 + $0x8] sm:$0xff] }
 0x1d2   :  { %8027 = vmatprep.subr.bf16.mxu0 %v12052_v24  ;;  %v1568_v24 = vld [vmem:[#allocation17 + $0x90] sm:$0xff] }
 0x1d5   :  { %8029 = vmatpush1.bf16.msra.mxu0 %v12054_v25  ;;  %v1569_v25 = vld [vmem:[#allocation17 + $0x98] sm:$0xff] }
 0x1d6   :  { %8031 = vmatprep.subr.bf16.mxu0 %v12055_v26  ;;  %v8256_v26 = vpack.c.bf16 %v1551_v23, %v1550_v21  ;;  %v12176_v21 = vld [vmem:[#allocation14 + $0x6f0] ss:$8 sps:$4 sm:$0xff]   ;;  %v13046_v23 = vld [vmem:[#allocation3 + $0x38] sm:$0xff] }
 0x1d8   :  { %8257 = vmatpush3.bf16.msra.mxu1 %v8256_v26  ;;  %v12181_v26 = vld [vmem:[#allocation14 + $0x714] ss:$8 sps:$4 sm:$0xff]  }
 0x1d9   :  { %8033 = vmatpush1.bf16.msra.mxu0 %v12057_v27  ;;  %v8258_v27 = vpack.c.bf16 %v1569_v25, %v1568_v24  ;;  %v12180_v24 = vld [vmem:[#allocation14 + $0x700] ss:$8 sps:$4 sm:$0xff]   ;;  %v971_v25 = vcombine.high %v13046_v23, %v13046_v23 }
 0x1da   :  { %8035 = vmatprep.subr.bf16.mxu0 %v12058_v28  ;;  %v1552_v28 = vld [vmem:[#allocation17 + $0x10] sm:$0xff] }
 0x1db   :  { %8259 = vmatprep.subr.bf16.mxu1 %v8258_v27  ;;  %v12183_v27 = vld [vmem:[#allocation14 + $0x710] ss:$8 sps:$4 sm:$0xff]  }
 0x1dd   :  { %8037 = vmatpush1.bf16.msra.mxu0 %v12060_v29  ;;  %v1553_v29 = vld [vmem:[#allocation17 + $0x18] sm:$0xff] }
 0x1de   :  { %8039 = vmatprep.subr.bf16.mxu0 %v12061_v30  ;;  %v1570_v30 = vld [vmem:[#allocation17 + $0xa0] sm:$0xff] }
 0x1e1   :  { %8041 = vmatpush1.bf16.msra.mxu0 %v12063_v31  ;;  %v1571_v31 = vld [vmem:[#allocation17 + $0xa8] sm:$0xff] }
 0x1e2   :  { %8043 = vmatprep.subr.bf16.mxu0 %v12064_v32  ;;  %v8260_v32 = vpack.c.bf16 %v1553_v29, %v1552_v28  ;;  %v12184_v28 = vld [vmem:[#allocation14 + $0x724] ss:$8 sps:$4 sm:$0xff]   ;;  %v12186_v29 = vld [vmem:[#allocation14 + $0x720] ss:$8 sps:$4 sm:$0xff]  }
 0x1e4   :  { %8261 = vmatpush3.bf16.msra.mxu1 %v8260_v32  ;;  %v12190_v32 = vld [vmem:[#allocation14 + $0x744] ss:$8 sps:$4 sm:$0xff]  }
 0x1e5   :  { %8045 = vmatpush1.bf16.msra.mxu0 %v12066_v33  ;;  %v12137_v33 = vld [vmem:[#allocation14 + $0x620] ss:$8 sps:$4 sm:$0xff]  }
 0x1e6   :  { %8047 = vmatprep.subr.bf16.mxu0 %v12067_v34  ;;  %v8262_v34 = vpack.c.bf16 %v1571_v31, %v1570_v30  ;;  %v12187_v30 = vld [vmem:[#allocation14 + $0x734] ss:$8 sps:$4 sm:$0xff]   ;;  %v12189_v31 = vld [vmem:[#allocation14 + $0x730] ss:$8 sps:$4 sm:$0xff]  }
 0x1e8   :  { %8263 = vmatprep.subr.bf16.mxu1 %v8262_v34  ;;  %v12193_v34 = vld [vmem:[#allocation14 + $0x754] ss:$8 sps:$4 sm:$0xff]  }
 0x1e9   :  { %8049 = vmatpush1.bf16.msra.mxu0 %v12069_v35  ;;  %v1554_v35 = vld [vmem:[#allocation17 + $0x20] sm:$0xff] }
 0x1ea   :  { %8051 = vmatprep.subr.bf16.mxu0 %v12070_v36  ;;  %v1555_v36 = vld [vmem:[#allocation17 + $0x28] sm:$0xff] }
 0x1ed   :  { %8053 = vmatpush1.bf16.msra.mxu0 %v12072_v37  ;;  %v12138_v37 = vld [vmem:[#allocation14 + $0x634] ss:$8 sps:$4 sm:$0xff]  }
 0x1ee   :  { %8055 = vmatprep.subr.bf16.mxu0 %v12073_v38  ;;  %v1572_v38 = vld [vmem:[#allocation17 + $0xb0] sm:$0xff] }
 0x1f1   :  { %8057 = vmatpush1.bf16.msra.mxu0 %v12075_v39  ;;  %v1573_v39 = vld [vmem:[#allocation17 + $0xb8] sm:$0xff] }
 0x1f2   :  { %8059 = vmatprep.subr.bf16.mxu0 %v12076_v40  ;;  %v8264_v40 = vpack.c.bf16 %v1555_v36, %v1554_v35  ;;  %v12195_v35 = vld [vmem:[#allocation14 + $0x750] ss:$8 sps:$4 sm:$0xff]   ;;  %v12198_v36 = vld [vmem:[#allocation14 + $0x760] ss:$8 sps:$4 sm:$0xff]  }
 0x1f4   :  { %8265 = vmatpush3.bf16.msra.mxu1 %v8264_v40  ;;  %v12204_v40 = vld [vmem:[#allocation14 + $0x780] ss:$8 sps:$4 sm:$0xff]  }
 0x1f5   :  { %8061 = vmatpush1.bf16.msra.mxu0 %v12078_v41  ;;  %v12140_v41 = vld [vmem:[#allocation14 + $0x630] ss:$8 sps:$4 sm:$0xff]  }
 0x1f6   :  { %8063 = vmatprep.subr.bf16.mxu0 %v12080_v42  ;;  %v8266_v42 = vpack.c.bf16 %v1573_v39, %v1572_v38  ;;  %v12201_v38 = vld [vmem:[#allocation14 + $0x770] ss:$8 sps:$4 sm:$0xff]   ;;  %v12202_v39 = vld [vmem:[#allocation14 + $0x784] ss:$8 sps:$4 sm:$0xff]  }
 0x1f8   :  { %1329 = vmatmul.mubr.f32.vlgmr.msra.gmra.mrb[0].mxu0 %v13031_v9  ;;  %v12124_v9 = vld [vmem:[#allocation14 + $0x5e0] ss:$8 sps:$4 sm:$0xff]   ;;  %8267 = vmatprep.subr.bf16.mxu1 %v8266_v42  ;;  %v12207_v42 = vld [vmem:[#allocation14 + $0x790] ss:$8 sps:$4 sm:$0xff]  }
 0x1f9   :  { %8065 = vmatpush1.bf16.msra.mxu0 %v12082_v44  ;;  %1399 = vmatprep.mubr.f32.mxu0 %v969_v45  ;;  %v1557_v44 = vld [vmem:[#allocation17 + $0x38] sm:$0xff]  ;;  %v12141_v45 = vld [vmem:[#allocation14 + $0x644] ss:$8 sps:$4 sm:$0xff]  }
 0x1fa   :  { %8067 = vmatprep.subr.bf16.mxu0 %v12083_v46  ;;  %v1574_v46 = vld [vmem:[#allocation17 + $0xc0] sm:$0xff] }
 0x1fd   :  { %8069 = vmatpush1.bf16.msra.mxu0 %v12085_v47  ;;  %v1575_v47 = vld [vmem:[#allocation17 + $0xc8] sm:$0xff] }
 0x1fe   :  { %8071 = vmatprep.subr.bf16.mxu0 %v12086_v48 }
 0x201   :  { %8073 = vmatpush1.bf16.msra.mxu0 %v12088_v49  ;;  %v12143_v49 = vld [vmem:[#allocation14 + $0x640] ss:$8 sps:$4 sm:$0xff]  }
 0x202   :  { %8075 = vmatprep.subr.bf16.mxu0 %v12089_v50  ;;  %v8270_v50 = vpack.c.bf16 %v1575_v47, %v1574_v46  ;;  %v12213_v46 = vld [vmem:[#allocation14 + $0x7b0] ss:$8 sps:$4 sm:$0xff]   ;;  %v12214_v47 = vld [vmem:[#allocation14 + $0x7c4] ss:$8 sps:$4 sm:$0xff]  }
 0x205   :  { %8077 = vmatpush1.bf16.msra.mxu0 %v12091_v51  ;;  %v1558_v51 = vld [vmem:[#allocation17 + $0x40] sm:$0xff] }
 0x206   :  { %8079 = vmatprep.subr.bf16.mxu0 %v12092_v52  ;;  %v1559_v52 = vld [vmem:[#allocation17 + $0x48] sm:$0xff] }
 0x209   :  { %8081 = vmatpush1.bf16.msra.mxu0 %v12094_v53  ;;  %v12144_v53 = vld [vmem:[#allocation14 + $0x654] ss:$8 sps:$4 sm:$0xff]  }
 0x20a   :  { %8083 = vmatprep.subr.bf16.mxu0 %v12095_v54  ;;  %v1576_v54 = vld [vmem:[#allocation17 + $0xd0] sm:$0xff] }
 0x20d   :  { %8085 = vmatpush1.bf16.msra.mxu0 %v12097_v55  ;;  %v1577_v55 = vld [vmem:[#allocation17 + $0xd8] sm:$0xff] }
 0x20e   :  { %8087 = vmatprep.subr.bf16.mxu0 %v12098_v56  ;;  %v8272_v56 = vpack.c.bf16 %v1559_v52, %v1558_v51  ;;  %v12220_v51 = vld [vmem:[#allocation14 + $0x7e4] ss:$8 sps:$4 sm:$0xff]   ;;  %v12222_v52 = vld [vmem:[#allocation14 + $0x7e0] ss:$8 sps:$4 sm:$0xff]  }
 0x211   :  { %8089 = vmatpush1.bf16.msra.mxu0 %v12100_v57  ;;  %v12146_v57 = vld [vmem:[#allocation14 + $0x650] ss:$8 sps:$4 sm:$0xff]  }
 0x212   :  { %8091 = vmatprep.subr.bf16.mxu0 %v12101_v58  ;;  %v8274_v58 = vpack.c.bf16 %v1577_v55, %v1576_v54  ;;  %v12225_v54 = vld [vmem:[#allocation14 + $0x7f0] ss:$8 sps:$4 sm:$0xff]   ;;  %v1562_v55 = vld [vmem:[#allocation17 + $0x60] sm:$0xff] }
 0x215   :  { %8093 = vmatpush1.bf16.msra.mxu0 %v12103_v59  ;;  %v1560_v59 = vld [vmem:[#allocation17 + $0x50] sm:$0xff] }
 0x216   :  { %8095 = vmatprep.subr.bf16.mxu0 %v12104_v60  ;;  %v1561_v60 = vld [vmem:[#allocation17 + $0x58] sm:$0xff] }
 0x219   :  { %8097 = vmatpush1.bf16.msra.mxu0 %v12106_v61  ;;  %v12147_v61 = vld [vmem:[#allocation14 + $0x664] ss:$8 sps:$4 sm:$0xff]  }
 0x21a   :  { %8099 = vmatprep.subr.bf16.mxu0 %v12107_v62  ;;  %v1578_v62 = vld [vmem:[#allocation17 + $0xe0] sm:$0xff] }
 0x21d   :  { %8101 = vmatpush1.bf16.msra.mxu0 %v12109_v63  ;;  %v1579_v63 = vld [vmem:[#allocation17 + $0xe8] sm:$0xff] }
 0x21e   :  { %8103 = vmatprep.subr.bf16.mxu0 %v12110_v0  ;;  %v8276_v0 = vpack.c.bf16 %v1561_v60, %v1560_v59  ;;  %v1581_v59 = vld [vmem:[#allocation17 + $0xf8] sm:$0xff] }
 0x221   :  { %8105 = vmatpush1.bf16.msra.mxu0 %v12112_v1  ;;  %v12149_v1 = vld [vmem:[#allocation14 + $0x660] ss:$8 sps:$4 sm:$0xff]  }
 0x222   :  { %8107 = vmatprep.subr.bf16.mxu0 %v12113_v2  ;;  %v8278_v2 = vpack.c.bf16 %v1579_v63, %v1578_v62  ;;  %v1565_v62 = vld [vmem:[#allocation17 + $0x78] sm:$0xff] }
 0x225   :  { %8109 = vmatpush1.bf16.msra.mxu0 %v12115_v3  ;;  %v12150_v3 = vld [vmem:[#allocation14 + $0x674] ss:$8 sps:$4 sm:$0xff]  }
 0x226   :  { %8111 = vmatprep.subr.bf16.mxu0 %v12116_v4  ;;  %v12152_v4 = vld [vmem:[#allocation14 + $0x670] ss:$8 sps:$4 sm:$0xff]  }
 0x229   :  { %8113 = vmatpush1.bf16.msra.mxu0 %v12118_v5  ;;  %v12153_v5 = vld [vmem:[#allocation14 + $0x684] ss:$8 sps:$4 sm:$0xff]  }
 0x22a   :  { %8115 = vmatprep.subr.bf16.mxu0 %v12119_v6  ;;  %v12155_v6 = vld [vmem:[#allocation14 + $0x680] ss:$8 sps:$4 sm:$0xff]  }
 0x22d   :  { %8117 = vmatpush1.bf16.msra.mxu0 %v12121_v7  ;;  %v12156_v7 = vld [vmem:[#allocation14 + $0x694] ss:$8 sps:$4 sm:$0xff]  }
 0x22e   :  { %8119 = vmatprep.subr.bf16.mxu0 %v12122_v8  ;;  %v12158_v8 = vld [vmem:[#allocation14 + $0x690] ss:$8 sps:$4 sm:$0xff]  }
 0x231   :  { %8121 = vmatpush1.bf16.msra.mxu0 %v12124_v9  ;;  %v12159_v9 = vld [vmem:[#allocation14 + $0x6a4] ss:$8 sps:$4 sm:$0xff]  }
 0x232   :  { %8123 = vmatprep.subr.bf16.mxu0 %v12125_v10  ;;  %v12161_v10 = vld [vmem:[#allocation14 + $0x6a0] ss:$8 sps:$4 sm:$0xff]  }
 0x235   :  { %8125 = vmatpush1.bf16.msra.mxu0 %v12127_v11  ;;  %v12162_v11 = vld [vmem:[#allocation14 + $0x6b4] ss:$8 sps:$4 sm:$0xff]  }
 0x236   :  { %8127 = vmatprep.subr.bf16.mxu0 %v12129_v12  ;;  %v12164_v12 = vld [vmem:[#allocation14 + $0x6b0] ss:$8 sps:$4 sm:$0xff]  }
 0x238   :  { %1400 = vmatmul.mubr.f32.vlgmr.msra.gmra.mrb[0].mxu0 %v13036_v43  ;;  %v1556_v43 = vld [vmem:[#allocation17 + $0x30] sm:$0xff] }
 0x239   :  { %8129 = vmatpush1.bf16.msra.mxu0 %v12131_v14  ;;  %1470 = vmatprep.mubr.f32.mxu0 %v970_v15  ;;  %v8268_v48 = vpack.c.bf16 %v1557_v44, %v1556_v43  ;;  %v12165_v14 = vld [vmem:[#allocation14 + $0x6c4] ss:$8 sps:$4 sm:$0xff]   ;;  %v12167_v15 = vld [vmem:[#allocation14 + $0x6c0] ss:$8 sps:$4 sm:$0xff]  }
 0x23a   :  { %8131 = vmatprep.subr.bf16.mxu0 %v12132_v16  ;;  %v12168_v16 = vld [vmem:[#allocation14 + $0x6d4] ss:$8 sps:$4 sm:$0xff]   ;;  %v12208_v43 = vld [vmem:[#allocation14 + $0x7a4] ss:$8 sps:$4 sm:$0xff]   ;;  %v12210_v44 = vld [vmem:[#allocation14 + $0x7a0] ss:$8 sps:$4 sm:$0xff]  }
 0x23b   :  { %8269 = vmatpush3.bf16.msra.mxu1 %v8268_v48  ;;  %v12216_v48 = vld [vmem:[#allocation14 + $0x7c0] ss:$8 sps:$4 sm:$0xff]  }
 0x23c   :  { %8271 = vmatprep.subr.bf16.mxu1 %v8270_v50  ;;  %v12219_v50 = vld [vmem:[#allocation14 + $0x7d0] ss:$8 sps:$4 sm:$0xff]  }
 0x23d   :  { %8133 = vmatpush1.bf16.msra.mxu0 %v12134_v17  ;;  %v12170_v17 = vld [vmem:[#allocation14 + $0x6d0] ss:$8 sps:$4 sm:$0xff]  }
 0x23e   :  { %8135 = vmatprep.subr.bf16.mxu0 %v12135_v18  ;;  %v12171_v18 = vld [vmem:[#allocation14 + $0x6e4] ss:$8 sps:$4 sm:$0xff]  }
 0x23f   :  { %8273 = vmatpush3.bf16.msra.mxu1 %v8272_v56  ;;  %v1563_v56 = vld [vmem:[#allocation17 + $0x68] sm:$0xff] }
 0x240   :  { %8275 = vmatprep.subr.bf16.mxu1 %v8274_v58  ;;  %v1580_v58 = vld [vmem:[#allocation17 + $0xf0] sm:$0xff] }
 0x241   :  { %8137 = vmatpush1.bf16.msra.mxu0 %v12137_v33  ;;  %v12192_v33 = vld [vmem:[#allocation14 + $0x740] ss:$8 sps:$4 sm:$0xff]   ;;  %v8282_v60 = vpack.c.bf16 %v1581_v59, %v1580_v58 }
 0x242   :  { %8139 = vmatprep.subr.bf16.mxu0 %v12138_v37  ;;  %v12199_v37 = vld [vmem:[#allocation14 + $0x774] ss:$8 sps:$4 sm:$0xff]  }
 0x243   :  { %8277 = vmatpush3.bf16.msra.mxu1 %v8276_v0  ;;  %v14697_v0 = vlaneseq  ;;  %v1897_v59 = vld [vmem:[#allocation8 + $0x1c0] sm:$0xff] }
 0x244   :  { %8279 = vmatprep.subr.bf16.mxu1 %v8278_v2 }
 0x245   :  { %8141 = vmatpush1.bf16.msra.mxu0 %v12140_v41  ;;  %v12205_v41 = vld [vmem:[#allocation14 + $0x794] ss:$8 sps:$4 sm:$0xff]  }
 0x246   :  { %8143 = vmatprep.subr.bf16.mxu0 %v12141_v45  ;;  %v12211_v45 = vld [vmem:[#allocation14 + $0x7b4] ss:$8 sps:$4 sm:$0xff]  }
 0x249   :  { %8145 = vmatpush1.bf16.msra.mxu0 %v12143_v49  ;;  %v12217_v49 = vld [vmem:[#allocation14 + $0x7d4] ss:$8 sps:$4 sm:$0xff]  }
 0x24a   :  { %8147 = vmatprep.subr.bf16.mxu0 %v12144_v53  ;;  %v12223_v53 = vld [vmem:[#allocation14 + $0x7f4] ss:$8 sps:$4 sm:$0xff]  }
 0x24d   :  { %8149 = vmatpush1.bf16.msra.mxu0 %v12146_v57  ;;  %v8280_v57 = vpack.c.bf16 %v1563_v56, %v1562_v55  ;;  %v1889_v55 = vld [vmem:[#allocation8 + $0x180] sm:$0xff] }
 0x24e   :  { %8151 = vmatprep.subr.bf16.mxu0 %v12147_v61  ;;  %v1564_v61 = vld [vmem:[#allocation17 + $0x70] sm:$0xff]  ;;  %v1893_v56 = vld [vmem:[#allocation8 + $0x1a0] sm:$0xff] }
 0x24f   :  { %8281 = vmatpush3.bf16.msra.mxu1 %v8280_v57  ;;  %v8284_v63 = vpack.c.bf16 %v1565_v62, %v1564_v61  ;;  %v11442_v58 = vcombine.high %v1889_v55, %v1893_v56  ;;  %v11443_v61 = vcombine.low %v1889_v55, %v1893_v56  ;;  %v2001_v55 = vld [vmem:[#allocation8 + $0x500] sm:$0xff] }
 0x250   :  { %8283 = vmatprep.subr.bf16.mxu1 %v8282_v60  ;;  %v1901_v60 = vld [vmem:[#allocation8 + $0x1e0] sm:$0xff] }
 0x251   :  { %8153 = vmatpush1.bf16.msra.mxu0 %v12149_v1  ;;  %v13053_v1 = vshrl.u32 %v14697_v0, 7  ;;  %v11444_v62 = vcombine.high %v1897_v59, %v1901_v60  ;;  %v2005_v56 = vld [vmem:[#allocation8 + $0x520] sm:$0xff] }
 0x252   :  { %8155 = vmatprep.subr.bf16.mxu0 %v12150_v3  ;;  %v944_v3 = vld [vmem:[#allocation15] sm:$0x3] }
 0x253   :  { %8285 = vmatpush3.bf16.msra.mxu1 %v8284_v63  ;;  %v14699_v2 = vsub.s32 0, %v13053_v1  ;;  %v1905_v63 = vld [vmem:[#allocation8 + $0x200] sm:$0xff] }
 0x255   :  { %8157 = vmatpush1.bf16.msra.mxu0 %v12152_v4  ;;  %v14698_v4 = vsub.s32 1, %v13053_v1 }
 0x256   :  { %8159 = vmatprep.subr.bf16.mxu0 %v12153_v5  ;;  %v949_v5 = vrot.slane %v944_v3, %v14699_v2 }
 0x259   :  { %8161 = vmatpush1.bf16.msra.mxu0 %v12155_v6  ;;  %v953_v6 = vrot.slane %v944_v3, %v14698_v4  ;;  %v1909_v3 = vld [vmem:[#allocation8 + $0x220] sm:$0xff] }
 0x25a   :  { %8163 = vmatprep.subr.bf16.mxu0 %v12156_v7 }
 0x25d   :  { %8165 = vmatpush1.bf16.msra.mxu0 %v12158_v8 }
 0x25e   :  { %8167 = vmatprep.subr.bf16.mxu0 %v12159_v9 }
 0x261   :  { %8169 = vmatpush1.bf16.msra.mxu0 %v12161_v10 }
 0x262   :  { %8171 = vmatprep.subr.bf16.mxu0 %v12162_v11 }
 0x265   :  { %8173 = vmatpush1.bf16.msra.mxu0 %v12164_v12 }
 0x266   :  { %8175 = vmatprep.subr.bf16.mxu0 %v12165_v14  ;;  %v14700_v14 = vmov 0.0  }
 0x267   :  { %7722 = vmatprep.subr.mxu1 %v14700_v14 }
 0x269   :  { %8177 = vmatpush1.bf16.msra.mxu0 %v12167_v15 }
 0x26a   :  { %8179 = vmatprep.subr.bf16.mxu0 %v12168_v16  ;;  %v7591_v16 = vld [vmem:[#allocation18] ss:$0 sm:$0xff] }
 0x26d   :  { %8181 = vmatpush1.bf16.msra.mxu0 %v12170_v17 }
 0x26e   :  { %8183 = vmatprep.subr.bf16.mxu0 %v12171_v18 }
 0x271   :  { %8185 = vmatpush1.bf16.msra.mxu0 %v12173_v19 }
 0x272   :  { %8187 = vmatprep.subr.bf16.mxu0 %v12174_v20 }
 0x275   :  { %8189 = vmatpush1.bf16.msra.mxu0 %v12176_v21 }
 0x276   :  { %8191 = vmatprep.subr.bf16.mxu0 %v12178_v22 }
 0x278   :  { %1471 = vmatmul.mubr.f32.vlgmr.msra.gmra.mrb[0].mxu0 %v13041_v13  ;;  %v12196_v13 = vld [vmem:[#allocation14 + $0x764] ss:$8 sps:$4 sm:$0xff]  }
 0x279   :  { %8193 = vmatpush1.bf16.msra.mxu0 %v12180_v24  ;;  %1541 = vmatprep.mubr.f32.mxu0 %v971_v25 }
 0x27a   :  { %8195 = vmatprep.subr.bf16.mxu0 %v12181_v26 }
 0x27d   :  { %8197 = vmatpush1.bf16.msra.mxu0 %v12183_v27 }
 0x27e   :  { %8199 = vmatprep.subr.bf16.mxu0 %v12184_v28 }
 0x281   :  { %8201 = vmatpush1.bf16.msra.mxu0 %v12186_v29  ;;  %v1841_v29 = vld [vmem:[#allocation8] sm:$0xff] }
 0x282   :  { %8203 = vmatprep.subr.bf16.mxu0 %v12187_v30  ;;  %v1845_v30 = vld [vmem:[#allocation8 + $0x20] sm:$0xff] }
 0x285   :  { %8205 = vmatpush1.bf16.msra.mxu0 %v12189_v31  ;;  %v11430_v31 = vcombine.high %v1841_v29, %v1845_v30 }
 0x286   :  { %8207 = vmatprep.subr.bf16.mxu0 %v12190_v32  ;;  %v11431_v32 = vcombine.low %v1841_v29, %v1845_v30  ;;  %v1953_v29 = vld [vmem:[#allocation8 + $0x380] sm:$0xff] }
 0x287   :  { %v1957_v30 = vld [vmem:[#allocation8 + $0x3a0] sm:$0xff] }
 0x289   :  { %8209 = vmatpush1.bf16.msra.mxu0 %v12192_v33  ;;  %v13068_v33 = vld [vmem:[#allocation6 + $0x8] sm:$0xff] }
 0x28a   :  { %8211 = vmatprep.subr.bf16.mxu0 %v12193_v34 }
 0x28d   :  { %8213 = vmatpush1.bf16.msra.mxu0 %v12195_v35  ;;  %v1849_v35 = vld [vmem:[#allocation8 + $0x40] sm:$0xff] }
 0x28e   :  { %8215 = vmatprep.subr.bf16.mxu0 %v12196_v13  ;;  %v1853_v13 = vld [vmem:[#allocation8 + $0x60] sm:$0xff] }
 0x291   :  { %8217 = vmatpush1.bf16.msra.mxu0 %v12198_v36 }
 0x292   :  { %8219 = vmatprep.subr.bf16.mxu0 %v12199_v37 }
 0x295   :  { %8221 = vmatpush1.bf16.msra.mxu0 %v12201_v38  ;;  %v11432_v38 = vcombine.high %v1849_v35, %v1853_v13 }
 0x296   :  { %8223 = vmatprep.subr.bf16.mxu0 %v12202_v39  ;;  %v1857_v39 = vld [vmem:[#allocation8 + $0x80] sm:$0xff] }
 0x299   :  { %8225 = vmatpush1.bf16.msra.mxu0 %v12204_v40  ;;  %v1861_v40 = vld [vmem:[#allocation8 + $0xa0] sm:$0xff] }
 0x29a   :  { %8227 = vmatprep.subr.bf16.mxu0 %v12205_v41  ;;  %v11433_v41 = vcombine.low %v1849_v35, %v1853_v13  ;;  %v1965_v35 = vld [vmem:[#allocation8 + $0x3e0] sm:$0xff]  ;;  %v11459_v13 = vcombine.low %v1953_v29, %v1957_v30 }
 0x29d   :  { %8229 = vmatpush1.bf16.msra.mxu0 %v12207_v42  ;;  %v11434_v42 = vcombine.high %v1857_v39, %v1861_v40 }
 0x29e   :  { %8231 = vmatprep.subr.bf16.mxu0 %v12208_v43  ;;  %v1865_v43 = vld [vmem:[#allocation8 + $0xc0] sm:$0xff] }
 0x2a1   :  { %8233 = vmatpush1.bf16.msra.mxu0 %v12210_v44  ;;  %v1869_v44 = vld [vmem:[#allocation8 + $0xe0] sm:$0xff] }
 0x2a2   :  { %8235 = vmatprep.subr.bf16.mxu0 %v12211_v45  ;;  %v11435_v45 = vcombine.low %v1857_v39, %v1861_v40 }
 0x2a5   :  { %8237 = vmatpush1.bf16.msra.mxu0 %v12213_v46  ;;  %v11436_v46 = vcombine.high %v1865_v43, %v1869_v44 }
 0x2a6   :  { %8239 = vmatprep.subr.bf16.mxu0 %v12214_v47  ;;  %v1873_v47 = vld [vmem:[#allocation8 + $0x100] sm:$0xff] }
 0x2a9   :  { %8241 = vmatpush1.bf16.msra.mxu0 %v12216_v48  ;;  %v1877_v48 = vld [vmem:[#allocation8 + $0x120] sm:$0xff] }
 0x2aa   :  { %8243 = vmatprep.subr.bf16.mxu0 %v12217_v49  ;;  %v11437_v49 = vcombine.low %v1865_v43, %v1869_v44  ;;  %v13072_v44 = vld [vmem:[#allocation6] sm:$0xff] }
 0x2ad   :  { %8245 = vmatpush1.bf16.msra.mxu0 %v12219_v50  ;;  %v11438_v50 = vcombine.high %v1873_v47, %v1877_v48 }
 0x2ae   :  { %8247 = vmatprep.subr.bf16.mxu0 %v12220_v51  ;;  %v1881_v51 = vld [vmem:[#allocation8 + $0x140] sm:$0xff] }
 0x2b1   :  { %8249 = vmatpush1.bf16.msra.mxu0 %v12222_v52  ;;  %v1885_v52 = vld [vmem:[#allocation8 + $0x160] sm:$0xff] }
 0x2b2   :  { %8251 = vmatprep.subr.bf16.mxu0 %v12223_v53  ;;  %v11439_v53 = vcombine.low %v1873_v47, %v1877_v48  ;;  %v11441_v57 = vcombine.low %v1881_v51, %v1885_v52  ;;  %v1985_v47 = vld [vmem:[#allocation8 + $0x480] sm:$0xff] }
 0x2b3   :  { %v1989_v48 = vld [vmem:[#allocation8 + $0x4a0] sm:$0xff] }
 0x2b5   :  { %8253 = vmatpush1.bf16.msra.mxu0 %v12225_v54  ;;  %v11440_v54 = vcombine.high %v1881_v51, %v1885_v52  ;;  %v1993_v51 = vld [vmem:[#allocation8 + $0x4c0] sm:$0xff] }
 0x2b6   :  { %v1997_v52 = vld [vmem:[#allocation8 + $0x4e0] sm:$0xff] }
 0x2b8   :  { %1542 = vmatmul.mubr.f32.vlgmr.msra.gmra.mrb[0].mxu0 %v13046_v23 }
 0x2b9   :  { %3738 = vmatprep.mubr.f32.mxu0 %v13068_v33 }
 0x38b   :  { %v1543_v7 = vpop.f32.mrb[0].mxu0 }
 0x38c   :  { %v11134_v8 = vadd.f32 %v1543_v7, %v949_v5  ;;  %v1545_v9 = vpop.f32.mrb[1].mxu0  ;;  %v11445_v5 = vcombine.low %v1897_v59, %v1901_v60  ;;  %v1913_v7 = vld [vmem:[#allocation8 + $0x240] sm:$0xff] }
 0x38d   :  { %v11135_v10 = vadd.f32 %v1545_v9, %v953_v6  ;;  %v11446_v6 = vcombine.high %v1905_v63, %v1909_v3  ;;  %v11447_v9 = vcombine.low %v1905_v63, %v1909_v3  ;;  %v2009_v59 = vld [vmem:[#allocation8 + $0x540] sm:$0xff] }
 0x38e   :  { %v1548_v12 = vmax.f32 %v11134_v8, 0.0  ;;  %v1917_v8 = vld [vmem:[#allocation8 + $0x260] sm:$0xff] }
 0x38f   :  { %v1549_v11 = vmax.f32 %v11135_v10, 0.0  ;;  %v11448_v10 = vcombine.high %v1913_v7, %v1917_v8  ;;  %v2013_v60 = vld [vmem:[#allocation8 + $0x560] sm:$0xff] }
 0x390   :  { %v2017_v63 = vld [vmem:[#allocation8 + $0x580] sm:$0xff] }
 0x391   :  { %1653 = vmatprep.mubr.f32.mxu1 %v1549_v11  ;;  %v1921_v11 = vld [vmem:[#allocation8 + $0x280] sm:$0xff] }
 0x392   :  { %1654 = vmatmul.mubr.f32.vlgmr.msra.gmra.mrb[0].mxu1 %v1548_v12  ;;  %v1925_v12 = vld [vmem:[#allocation8 + $0x2a0] sm:$0xff] }
 0x393   :  { %7724 = vmatprep.mubr.msk.f32.mxu1 %vm12805_vm0, %v14700_v14  ;;  %v2021_v3 = vld [vmem:[#allocation8 + $0x5a0] sm:$0xff] }
 0x465   :  { %v7676_v15 = vpop.f32.mrb[0].mxu1 }
 0x466   :  { %v7677_v17 = vpop.f32.mrb[1].mxu1 }
 0x467   :  { %v7678_v18 = vadd.f32 %v7677_v17, %v7676_v15  ;;  %v11449_v15 = vcombine.low %v1913_v7, %v1917_v8  ;;  %v1929_v17 = vld [vmem:[#allocation8 + $0x2c0] sm:$0xff] }
 0x468   :  { %v2025_v7 = vld [vmem:[#allocation8 + $0x5c0] sm:$0xff] }
 0x469   :  { %v1656_v19 = vadd.f32 %v7678_v18, %v7591_v16  ;;  %v11450_v16 = vcombine.high %v1921_v11, %v1925_v12  ;;  %v1933_v18 = vld [vmem:[#allocation8 + $0x2e0] sm:$0xff] }
 0x46a   :  { %v2029_v8 = vld [vmem:[#allocation8 + $0x5e0] sm:$0xff] }
 0x46b   :  { %v1659_v20 = vmax.f32 %v1656_v19, 0.0  ;;  %v11451_v19 = vcombine.low %v1921_v11, %v1925_v12  ;;  %v2033_v11 = vld [vmem:[#allocation8 + $0x600] sm:$0xff] }
 0x46c   :  { %v2037_v12 = vld [vmem:[#allocation8 + $0x620] sm:$0xff] }
 0x46d   :  { %7723 = vmatpush3.xpose.msra.mxu1 %v1659_v20 }
 0x46e   :  { %7727 = vmatprep.subr.mxu1 %v14700_v14 }
 0x470   :  { %7725 = vmatmul.mubr.f32.vlgmr.msra.gmra.mrb[2].mxu1 %v1659_v20 }
 0x471   :  { %7728 = vmatpush3.msk.msra.mxu1 %vm1746_vm1, %v1659_v20  ;;  %7729 = vmatprep.mubr.msk.f32.mxu1 %vm12805_vm0, %v14700_v14  ;;  %v11452_v20 = vcombine.high %v1929_v17, %v1933_v18 }
 0x472   :  { %8287 = vmatprep.subr.bf16.mxu1 %v11430_v31 }
 0x543   :  { %v1726_v21 = vpop.f32.mrb[2].mxu1 }
 0x544   :  { %v7726_v22 = vpop.f32.mrb[3].mxu1  ;;  %v1731_v23 = vsel %vm1730_vm2, %v1726_v21, -inf }
 0x545   :  { %1732 = vmax.xlane.f32.xlu0 %v1731_v23  ;;  %v1941_v22 = vld [vmem:[#allocation8 + $0x320] sm:$0xff]  ;;  %v11453_v23 = vcombine.low %v1929_v17, %v1933_v18 }
 0x546   :  { %v2041_v17 = vld [vmem:[#allocation8 + $0x640] sm:$0xff] }
 0x547   :  { %v2045_v18 = vld [vmem:[#allocation8 + $0x660] sm:$0xff] }
 0x5d2   :  { %v1733_v24 = vpop.xlane.xlu0 %1732 }
 0x5d3   :  { %v1734_v25 = vsub.f32 %v1726_v21, %v1733_v24  ;;  %v1937_v21 = vld [vmem:[#allocation8 + $0x300] sm:$0xff] }
 0x5d4   :  { %v11454_v24 = vcombine.high %v1937_v21, %v1941_v22 }
 0x5d5   :  { %v1735_v26 = vmul.f32 1.442695, %v1734_v25  ;;  %v1945_v25 = vld [vmem:[#allocation8 + $0x340] sm:$0xff] }
 0x5d7   :  { %12227 = vpow2.f32 %v1735_v26  ;;  %v1949_v26 = vld [vmem:[#allocation8 + $0x360] sm:$0xff] }
 0x5d8   :  { %v11457_v31 = vcombine.low %v1945_v25, %v1949_v26 }
 0x5e1   :  { %v12228_v27 = vpop.eup %12227 }
 0x5e2   :  { %v1737_v28 = vsel %vm1730_vm2, %v12228_v27, 0.0 }
 0x5e3   :  { %1738 = vadd.xlane.f32.xlu0 %v1737_v28  ;;  %v11456_v28 = vcombine.high %v1945_v25, %v1949_v26  ;;  %v2057_v25 = vld [vmem:[#allocation8 + $0x6c0] sm:$0xff] }
 0x5e4   :  { %v2061_v26 = vld [vmem:[#allocation8 + $0x6e0] sm:$0xff] }
 0x670   :  { %v1739_v34 = vpop.xlane.xlu0 %1738 }
 0x671   :  { %12229 = vrcp.f32 %v1739_v34  ;;  %v1961_v34 = vld [vmem:[#allocation8 + $0x3c0] sm:$0xff] }
 0x672   :  { %v11461_v39 = vcombine.low %v1961_v34, %v1965_v35 }
 0x67b   :  { %v12230_v36 = vpop.eup %12229 }
 0x67c   :  { %v1741_v37 = vmul.f32 %v12230_v36, %v12228_v27  ;;  %v11455_v27 = vcombine.low %v1937_v21, %v1941_v22  ;;  %v11460_v36 = vcombine.high %v1961_v34, %v1965_v35  ;;  %v2049_v21 = vld [vmem:[#allocation8 + $0x680] sm:$0xff] }
 0x67d   :  { %v2053_v22 = vld [vmem:[#allocation8 + $0x6a0] sm:$0xff] }
 0x67e   :  { %7730 = vmatmul.mubr.msk.f32.vlgmr.msra.gmra.mrb[4].mxu1 %vm1742_vm3, %v1741_v37  ;;  %v1969_v37 = vld [vmem:[#allocation8 + $0x400] sm:$0xff] }
 0x67f   :  { %8289 = vmatpush1.bf16.msra.mxu1 %v11431_v32  ;;  %3099 = vmatprep.mubr.f32.mxu1 %v13068_v33  ;;  %v11458_v32 = vcombine.high %v1953_v29, %v1957_v30  ;;  %v2065_v29 = vld [vmem:[#allocation8 + $0x700] sm:$0xff] }
 0x680   :  { %8291 = vmatprep.subr.bf16.mxu1 %v11432_v38  ;;  %v1973_v38 = vld [vmem:[#allocation8 + $0x420] sm:$0xff] }
 0x681   :  { %v11462_v40 = vcombine.high %v1969_v37, %v1973_v38  ;;  %v11463_v43 = vcombine.low %v1969_v37, %v1973_v38  ;;  %v2069_v30 = vld [vmem:[#allocation8 + $0x720] sm:$0xff] }
 0x682   :  { %v2073_v34 = vld [vmem:[#allocation8 + $0x740] sm:$0xff] }
 0x683   :  { %8293 = vmatpush1.bf16.msra.mxu1 %v11433_v41  ;;  %v1977_v41 = vld [vmem:[#allocation8 + $0x440] sm:$0xff] }
 0x684   :  { %8295 = vmatprep.subr.bf16.mxu1 %v11434_v42  ;;  %v1981_v42 = vld [vmem:[#allocation8 + $0x460] sm:$0xff] }
 0x685   :  { %v2077_v35 = vld [vmem:[#allocation8 + $0x760] sm:$0xff] }
 0x686   :  { %v2081_v37 = vld [vmem:[#allocation8 + $0x780] sm:$0xff] }
 0x687   :  { %8297 = vmatpush1.bf16.msra.mxu1 %v11435_v45  ;;  %v11464_v45 = vcombine.high %v1977_v41, %v1981_v42  ;;  %v2085_v38 = vld [vmem:[#allocation8 + $0x7a0] sm:$0xff] }
 0x688   :  { %8299 = vmatprep.subr.bf16.mxu1 %v11436_v46  ;;  %v13074_v46 = vld [vmem:[#allocation6 + $0x18] sm:$0xff] }
 0x68b   :  { %8301 = vmatpush1.bf16.msra.mxu1 %v11437_v49  ;;  %v11465_v49 = vcombine.low %v1977_v41, %v1981_v42  ;;  %v2089_v41 = vld [vmem:[#allocation8 + $0x7c0] sm:$0xff] }
 0x68c   :  { %8303 = vmatprep.subr.bf16.mxu1 %v11438_v50  ;;  %v11466_v50 = vcombine.high %v1985_v47, %v1989_v48  ;;  %v2093_v42 = vld [vmem:[#allocation8 + $0x7e0] sm:$0xff] }
 0x68f   :  { %8305 = vmatpush1.bf16.msra.mxu1 %v11439_v53  ;;  %v11467_v53 = vcombine.low %v1985_v47, %v1989_v48  ;;  %v2097_v47 = vld [vmem:[#allocation8 + $0x800] sm:$0xff] }
 0x690   :  { %8307 = vmatprep.subr.bf16.mxu1 %v11440_v54  ;;  %v11468_v54 = vcombine.high %v1993_v51, %v1997_v52  ;;  %v2101_v48 = vld [vmem:[#allocation8 + $0x820] sm:$0xff] }
 0x693   :  { %8309 = vmatpush1.bf16.msra.mxu1 %v11441_v57  ;;  %v11469_v57 = vcombine.low %v1993_v51, %v1997_v52  ;;  %v2105_v51 = vld [vmem:[#allocation8 + $0x840] sm:$0xff] }
 0x694   :  { %8311 = vmatprep.subr.bf16.mxu1 %v11442_v58  ;;  %v11470_v58 = vcombine.high %v2001_v55, %v2005_v56  ;;  %v2109_v52 = vld [vmem:[#allocation8 + $0x860] sm:$0xff] }
 0x697   :  { %8313 = vmatpush1.bf16.msra.mxu1 %v11443_v61  ;;  %v11471_v61 = vcombine.low %v2001_v55, %v2005_v56  ;;  %v11496_v55 = vcombine.high %v2105_v51, %v2109_v52  ;;  %v13080_v56 = vld [vmem:[#allocation6 + $0x28] sm:$0xff] }
 0x698   :  { %8315 = vmatprep.subr.bf16.mxu1 %v11444_v62  ;;  %v11472_v62 = vcombine.high %v2009_v59, %v2013_v60 }
 0x69b   :  { %8317 = vmatpush1.bf16.msra.mxu1 %v11445_v5  ;;  %v11473_v5 = vcombine.low %v2009_v59, %v2013_v60  ;;  %v11497_v59 = vcombine.low %v2105_v51, %v2109_v52 }
 0x69c   :  { %8319 = vmatprep.subr.bf16.mxu1 %v11446_v6  ;;  %v11474_v6 = vcombine.high %v2017_v63, %v2021_v3 }
 0x69f   :  { %8321 = vmatpush1.bf16.msra.mxu1 %v11447_v9  ;;  %v11475_v9 = vcombine.low %v2017_v63, %v2021_v3 }
 0x6a0   :  { %8323 = vmatprep.subr.bf16.mxu1 %v11448_v10  ;;  %v11476_v10 = vcombine.high %v2025_v7, %v2029_v8 }
 0x6a3   :  { %8325 = vmatpush1.bf16.msra.mxu1 %v11449_v15  ;;  %v11477_v15 = vcombine.low %v2025_v7, %v2029_v8 }
 0x6a4   :  { %8327 = vmatprep.subr.bf16.mxu1 %v11450_v16  ;;  %v11478_v16 = vcombine.high %v2033_v11, %v2037_v12 }
 0x6a7   :  { %8329 = vmatpush1.bf16.msra.mxu1 %v11451_v19  ;;  %v11479_v19 = vcombine.low %v2033_v11, %v2037_v12 }
 0x6a8   :  { %8331 = vmatprep.subr.bf16.mxu1 %v11452_v20  ;;  %v11480_v20 = vcombine.high %v2041_v17, %v2045_v18 }
 0x6ab   :  { %8333 = vmatpush1.bf16.msra.mxu1 %v11453_v23  ;;  %v11481_v23 = vcombine.low %v2041_v17, %v2045_v18 }
 0x6ac   :  { %8335 = vmatprep.subr.bf16.mxu1 %v11454_v24  ;;  %v11482_v24 = vcombine.high %v2049_v21, %v2053_v22 }
 0x6af   :  { %8337 = vmatpush1.bf16.msra.mxu1 %v11455_v27  ;;  %v11483_v27 = vcombine.low %v2049_v21, %v2053_v22 }
 0x6b0   :  { %8339 = vmatprep.subr.bf16.mxu1 %v11456_v28  ;;  %v11484_v28 = vcombine.high %v2057_v25, %v2061_v26 }
 0x6b3   :  { %8341 = vmatpush1.bf16.msra.mxu1 %v11457_v31  ;;  %v11485_v31 = vcombine.low %v2057_v25, %v2061_v26 }
 0x6b4   :  { %8343 = vmatprep.subr.bf16.mxu1 %v11458_v32  ;;  %v11486_v32 = vcombine.high %v2065_v29, %v2069_v30 }
 0x6b7   :  { %8345 = vmatpush1.bf16.msra.mxu1 %v11459_v13  ;;  %v11487_v13 = vcombine.low %v2065_v29, %v2069_v30 }
 0x6b8   :  { %8347 = vmatprep.subr.bf16.mxu1 %v11460_v36  ;;  %v11488_v36 = vcombine.high %v2073_v34, %v2077_v35 }
 0x6bb   :  { %8349 = vmatpush1.bf16.msra.mxu1 %v11461_v39  ;;  %v11489_v39 = vcombine.low %v2073_v34, %v2077_v35 }
 0x6bc   :  { %8351 = vmatprep.subr.bf16.mxu1 %v11462_v40  ;;  %v11490_v40 = vcombine.high %v2081_v37, %v2085_v38 }
 0x6be   :  { %3100 = vmatmul.mubr.f32.vlgmr.msra.gmra.mrb[6].mxu1 %v13072_v44 }
 0x6bf   :  { %8353 = vmatpush1.bf16.msra.mxu1 %v11463_v43  ;;  %3170 = vmatprep.mubr.f32.mxu1 %v13074_v46  ;;  %v11491_v43 = vcombine.low %v2081_v37, %v2085_v38 }
 0x6c0   :  { %8355 = vmatprep.subr.bf16.mxu1 %v11464_v45  ;;  %v11492_v45 = vcombine.high %v2089_v41, %v2093_v42 }
 0x6c3   :  { %8357 = vmatpush1.bf16.msra.mxu1 %v11465_v49  ;;  %v11493_v49 = vcombine.low %v2089_v41, %v2093_v42 }
 0x6c4   :  { %8359 = vmatprep.subr.bf16.mxu1 %v11466_v50  ;;  %v11494_v50 = vcombine.high %v2097_v47, %v2101_v48 }
 0x6c7   :  { %8361 = vmatpush1.bf16.msra.mxu1 %v11467_v53  ;;  %v11495_v53 = vcombine.low %v2097_v47, %v2101_v48 }
 0x6c8   :  { %8363 = vmatprep.subr.bf16.mxu1 %v11468_v54  ;;  %v13078_v54 = vld [vmem:[#allocation6 + $0x10] sm:$0xff] }
 0x6cb   :  { %8365 = vmatpush1.bf16.msra.mxu1 %v11469_v57  ;;  %v2113_v57 = vld [vmem:[#allocation8 + $0x880] sm:$0xff] }
 0x6cc   :  { %8367 = vmatprep.subr.bf16.mxu1 %v11470_v58  ;;  %v2117_v58 = vld [vmem:[#allocation8 + $0x8a0] sm:$0xff] }
 0x6cd   :  { %v11498_v60 = vcombine.high %v2113_v57, %v2117_v58  ;;  %v11499_v63 = vcombine.low %v2113_v57, %v2117_v58 }
 0x6cf   :  { %8369 = vmatpush1.bf16.msra.mxu1 %v11471_v61  ;;  %v2121_v61 = vld [vmem:[#allocation8 + $0x8c0] sm:$0xff] }
 0x6d0   :  { %8371 = vmatprep.subr.bf16.mxu1 %v11472_v62  ;;  %v2125_v62 = vld [vmem:[#allocation8 + $0x8e0] sm:$0xff] }
 0x6d1   :  { %v11500_v3 = vcombine.high %v2121_v61, %v2125_v62  ;;  %v11501_v7 = vcombine.low %v2121_v61, %v2125_v62 }
 0x6d3   :  { %8373 = vmatpush1.bf16.msra.mxu1 %v11473_v5  ;;  %v2129_v5 = vld [vmem:[#allocation8 + $0x900] sm:$0xff] }
 0x6d4   :  { %8375 = vmatprep.subr.bf16.mxu1 %v11474_v6  ;;  %v2133_v6 = vld [vmem:[#allocation8 + $0x920] sm:$0xff] }
 0x6d5   :  { %v11502_v8 = vcombine.high %v2129_v5, %v2133_v6  ;;  %v11503_v11 = vcombine.low %v2129_v5, %v2133_v6  ;;  %v1839_v5 = vld [vmem:[#allocation6 + $0x20] sm:$0xff] }
 0x6d7   :  { %8377 = vmatpush1.bf16.msra.mxu1 %v11475_v9  ;;  %v2137_v9 = vld [vmem:[#allocation8 + $0x940] sm:$0xff] }
 0x6d8   :  { %8379 = vmatprep.subr.bf16.mxu1 %v11476_v10  ;;  %v2141_v10 = vld [vmem:[#allocation8 + $0x960] sm:$0xff] }
 0x6d9   :  { %v11504_v12 = vcombine.high %v2137_v9, %v2141_v10  ;;  %v11505_v17 = vcombine.low %v2137_v9, %v2141_v10  ;;  %v1862_v9 = vld [vmem:[#allocation8 + $0xa8] sm:$0xff]  ;;  %v1844_v10 = vld [vmem:[#allocation8 + $0x18] sm:$0xff] }
 0x6db   :  { %8381 = vmatpush1.bf16.msra.mxu1 %v11477_v15  ;;  %v2145_v15 = vld [vmem:[#allocation8 + $0x980] sm:$0xff] }
 0x6dc   :  { %8383 = vmatprep.subr.bf16.mxu1 %v11478_v16  ;;  %v2149_v16 = vld [vmem:[#allocation8 + $0x9a0] sm:$0xff] }
 0x6dd   :  { %v11506_v18 = vcombine.high %v2145_v15, %v2149_v16  ;;  %v11507_v21 = vcombine.low %v2145_v15, %v2149_v16 }
 0x6df   :  { %8385 = vmatpush1.bf16.msra.mxu1 %v11479_v19  ;;  %v2153_v19 = vld [vmem:[#allocation8 + $0x9c0] sm:$0xff] }
 0x6e0   :  { %8387 = vmatprep.subr.bf16.mxu1 %v11480_v20  ;;  %v2157_v20 = vld [vmem:[#allocation8 + $0x9e0] sm:$0xff] }
 0x6e1   :  { %v11508_v22 = vcombine.high %v2153_v19, %v2157_v20  ;;  %v11509_v25 = vcombine.low %v2153_v19, %v2157_v20  ;;  %v1870_v19 = vld [vmem:[#allocation8 + $0xe8] sm:$0xff]  ;;  %v1852_v20 = vld [vmem:[#allocation8 + $0x58] sm:$0xff] }
 0x6e3   :  { %8389 = vmatpush1.bf16.msra.mxu1 %v11481_v23  ;;  %v2161_v23 = vld [vmem:[#allocation8 + $0xa00] sm:$0xff] }
 0x6e4   :  { %8391 = vmatprep.subr.bf16.mxu1 %v11482_v24  ;;  %v2165_v24 = vld [vmem:[#allocation8 + $0xa20] sm:$0xff] }
 0x6e5   :  { %v11510_v26 = vcombine.high %v2161_v23, %v2165_v24  ;;  %v11511_v29 = vcombine.low %v2161_v23, %v2165_v24 }
 0x6e7   :  { %8393 = vmatpush1.bf16.msra.mxu1 %v11483_v27  ;;  %v2169_v27 = vld [vmem:[#allocation8 + $0xa40] sm:$0xff] }
 0x6e8   :  { %8395 = vmatprep.subr.bf16.mxu1 %v11484_v28  ;;  %v2173_v28 = vld [vmem:[#allocation8 + $0xa60] sm:$0xff] }
 0x6e9   :  { %v11512_v30 = vcombine.high %v2169_v27, %v2173_v28  ;;  %v11513_v34 = vcombine.low %v2169_v27, %v2173_v28  ;;  %v1878_v27 = vld [vmem:[#allocation8 + $0x128] sm:$0xff]  ;;  %v1864_v28 = vld [vmem:[#allocation8 + $0xb8] sm:$0xff] }
 0x6eb   :  { %8397 = vmatpush1.bf16.msra.mxu1 %v11485_v31  ;;  %v2177_v31 = vld [vmem:[#allocation8 + $0xa80] sm:$0xff] }
 0x6ec   :  { %8399 = vmatprep.subr.bf16.mxu1 %v11486_v32  ;;  %v2181_v32 = vld [vmem:[#allocation8 + $0xaa0] sm:$0xff] }
 0x6ed   :  { %v11514_v35 = vcombine.high %v2177_v31, %v2181_v32  ;;  %v11515_v37 = vcombine.low %v2177_v31, %v2181_v32 }
 0x6ef   :  { %8401 = vmatpush1.bf16.msra.mxu1 %v11487_v13  ;;  %v2185_v13 = vld [vmem:[#allocation8 + $0xac0] sm:$0xff] }
 0x6f0   :  { %8403 = vmatprep.subr.bf16.mxu1 %v11488_v36  ;;  %v2189_v36 = vld [vmem:[#allocation8 + $0xae0] sm:$0xff] }
 0x6f1   :  { %v11516_v38 = vcombine.high %v2185_v13, %v2189_v36  ;;  %v11517_v41 = vcombine.low %v2185_v13, %v2189_v36  ;;  %v1868_v13 = vld [vmem:[#allocation8 + $0xd8] sm:$0xff] }
 0x6f2   :  { %v1872_v36 = vld [vmem:[#allocation8 + $0xf8] sm:$0xff] }
 0x6f3   :  { %8405 = vmatpush1.bf16.msra.mxu1 %v11489_v39  ;;  %v2193_v39 = vld [vmem:[#allocation8 + $0xb00] sm:$0xff] }
 0x6f4   :  { %8407 = vmatprep.subr.bf16.mxu1 %v11490_v40  ;;  %v2197_v40 = vld [vmem:[#allocation8 + $0xb20] sm:$0xff] }
 0x6f5   :  { %v11518_v42 = vcombine.high %v2193_v39, %v2197_v40  ;;  %v11519_v47 = vcombine.low %v2193_v39, %v2197_v40  ;;  %v11725_v39 = vcombine.low %v1868_v13, %v1872_v36 }
 0x6f7   :  { %8409 = vmatpush1.bf16.msra.mxu1 %v11491_v43  ;;  %v2201_v43 = vld [vmem:[#allocation8 + $0xb40] sm:$0xff] }
 0x6f8   :  { %8411 = vmatprep.subr.bf16.mxu1 %v11492_v45  ;;  %v2205_v45 = vld [vmem:[#allocation8 + $0xb60] sm:$0xff] }
 0x6f9   :  { %v11520_v48 = vcombine.high %v2201_v43, %v2205_v45  ;;  %v11521_v51 = vcombine.low %v2201_v43, %v2205_v45  ;;  %v1876_v43 = vld [vmem:[#allocation8 + $0x118] sm:$0xff] }
 0x6fa   :  { %v1880_v45 = vld [vmem:[#allocation8 + $0x138] sm:$0xff] }
 0x6fb   :  { %8413 = vmatpush1.bf16.msra.mxu1 %v11493_v49  ;;  %v2209_v49 = vld [vmem:[#allocation8 + $0xb80] sm:$0xff] }
 0x6fc   :  { %8415 = vmatprep.subr.bf16.mxu1 %v11494_v50  ;;  %v2213_v50 = vld [vmem:[#allocation8 + $0xba0] sm:$0xff] }
 0x6fd   :  { %v11522_v52 = vcombine.high %v2209_v49, %v2213_v50  ;;  %v11523_v57 = vcombine.low %v2209_v49, %v2213_v50  ;;  %v11727_v49 = vcombine.low %v1876_v43, %v1880_v45 }
 0x6fe   :  { %3171 = vmatmul.mubr.f32.vlgmr.msra.gmra.mrb[6].mxu1 %v13078_v54 }
 0x6ff   :  { %8417 = vmatpush1.bf16.msra.mxu1 %v11495_v53  ;;  %3241 = vmatprep.mubr.f32.mxu1 %v13080_v56  ;;  %v2217_v53 = vld [vmem:[#allocation8 + $0xbc0] sm:$0xff] }
 0x700   :  { %8419 = vmatprep.subr.bf16.mxu1 %v11496_v55  ;;  %v2221_v55 = vld [vmem:[#allocation8 + $0xbe0] sm:$0xff] }
 0x701   :  { %v11524_v58 = vcombine.high %v2217_v53, %v2221_v55  ;;  %v11525_v61 = vcombine.low %v2217_v53, %v2221_v55  ;;  %v1902_v53 = vld [vmem:[#allocation8 + $0x1e8] sm:$0xff]  ;;  %v1884_v55 = vld [vmem:[#allocation8 + $0x158] sm:$0xff] }
 0x703   :  { %8421 = vmatpush1.bf16.msra.mxu1 %v11497_v59  ;;  %v1842_v59 = vld [vmem:[#allocation8 + $0x8] sm:$0xff] }
 0x704   :  { %8423 = vmatprep.subr.bf16.mxu1 %v11498_v60  ;;  %v1846_v60 = vld [vmem:[#allocation8 + $0x28] sm:$0xff] }
 0x705   :  { %v11526_v62 = vcombine.high %v1842_v59, %v1846_v60  ;;  %v11527_v6 = vcombine.low %v1842_v59, %v1846_v60 }
 0x707   :  { %8425 = vmatpush1.bf16.msra.mxu1 %v11499_v63  ;;  %v1850_v63 = vld [vmem:[#allocation8 + $0x48] sm:$0xff] }
 0x708   :  { %8427 = vmatprep.subr.bf16.mxu1 %v11500_v3  ;;  %v1854_v3 = vld [vmem:[#allocation8 + $0x68] sm:$0xff] }
 0x709   :  { %v11529_v15 = vcombine.low %v1850_v63, %v1854_v3 }
 0x70b   :  { %8429 = vmatpush1.bf16.msra.mxu1 %v11501_v7  ;;  %v11528_v7 = vcombine.high %v1850_v63, %v1854_v3 }
 0x70c   :  { %8431 = vmatprep.subr.bf16.mxu1 %v11502_v8  ;;  %v1858_v8 = vld [vmem:[#allocation8 + $0x88] sm:$0xff] }
 0x70d   :  { %v11531_v23 = vcombine.low %v1858_v8, %v1862_v9 }
 0x70f   :  { %8433 = vmatpush1.bf16.msra.mxu1 %v11503_v11  ;;  %v1848_v11 = vld [vmem:[#allocation8 + $0x38] sm:$0xff] }
 0x710   :  { %8435 = vmatprep.subr.bf16.mxu1 %v11504_v12  ;;  %v11718_v12 = vcombine.high %v1844_v10, %v1848_v11  ;;  %v11719_v16 = vcombine.low %v1844_v10, %v1848_v11 }
 0x712   :  { %8863 = vmatprep.subr.bf16.mxu0 %v11718_v12 }
 0x713   :  { %8437 = vmatpush1.bf16.msra.mxu1 %v11505_v17  ;;  %v11530_v17 = vcombine.high %v1858_v8, %v1862_v9  ;;  %8865 = vmatpush1.bf16.msra.mxu0 %v11719_v16  ;;  %v1896_v8 = vld [vmem:[#allocation8 + $0x1b8] sm:$0xff]  ;;  %v1918_v16 = vld [vmem:[#allocation8 + $0x268] sm:$0xff] }
 0x714   :  { %8439 = vmatprep.subr.bf16.mxu1 %v11506_v18  ;;  %v1866_v18 = vld [vmem:[#allocation8 + $0xc8] sm:$0xff] }
 0x717   :  { %8441 = vmatpush1.bf16.msra.mxu1 %v11507_v21  ;;  %v1856_v21 = vld [vmem:[#allocation8 + $0x78] sm:$0xff] }
 0x718   :  { %8443 = vmatprep.subr.bf16.mxu1 %v11508_v22  ;;  %v11720_v22 = vcombine.high %v1852_v20, %v1856_v21  ;;  %v11721_v24 = vcombine.low %v1852_v20, %v1856_v21 }
 0x71a   :  { %8867 = vmatprep.subr.bf16.mxu0 %v11720_v22 }
 0x71b   :  { %8445 = vmatpush1.bf16.msra.mxu1 %v11509_v25  ;;  %v11532_v25 = vcombine.high %v1866_v18, %v1870_v19  ;;  %8869 = vmatpush1.bf16.msra.mxu0 %v11721_v24  ;;  %v1926_v24 = vld [vmem:[#allocation8 + $0x2a8] sm:$0xff] }
 0x71c   :  { %8447 = vmatprep.subr.bf16.mxu1 %v11510_v26  ;;  %v1874_v26 = vld [vmem:[#allocation8 + $0x108] sm:$0xff] }
 0x71d   :  { %v11534_v32 = vcombine.high %v1874_v26, %v1878_v27 }
 0x71f   :  { %8449 = vmatpush1.bf16.msra.mxu1 %v11511_v29 }
 0x720   :  { %8451 = vmatprep.subr.bf16.mxu1 %v11512_v30  ;;  %v11533_v30 = vcombine.low %v1866_v18, %v1870_v19  ;;  %v1904_v18 = vld [vmem:[#allocation8 + $0x1f8] sm:$0xff] }
 0x723   :  { %8453 = vmatpush1.bf16.msra.mxu1 %v11513_v34  ;;  %v1882_v34 = vld [vmem:[#allocation8 + $0x148] sm:$0xff] }
 0x724   :  { %8455 = vmatprep.subr.bf16.mxu1 %v11514_v35  ;;  %v1886_v35 = vld [vmem:[#allocation8 + $0x168] sm:$0xff] }
 0x725   :  { %v11536_v40 = vcombine.high %v1882_v34, %v1886_v35 }
 0x727   :  { %8457 = vmatpush1.bf16.msra.mxu1 %v11515_v37  ;;  %v11724_v37 = vcombine.high %v1868_v13, %v1872_v36 }
 0x728   :  { %8459 = vmatprep.subr.bf16.mxu1 %v11516_v38  ;;  %v11535_v38 = vcombine.low %v1874_v26, %v1878_v27  ;;  %v1912_v26 = vld [vmem:[#allocation8 + $0x238] sm:$0xff] }
 0x72b   :  { %8461 = vmatpush1.bf16.msra.mxu1 %v11517_v41  ;;  %v1890_v41 = vld [vmem:[#allocation8 + $0x188] sm:$0xff] }
 0x72c   :  { %8463 = vmatprep.subr.bf16.mxu1 %v11518_v42  ;;  %v1894_v42 = vld [vmem:[#allocation8 + $0x1a8] sm:$0xff] }
 0x72d   :  { %v11538_v50 = vcombine.high %v1890_v41, %v1894_v42 }
 0x72f   :  { %8465 = vmatpush1.bf16.msra.mxu1 %v11519_v47  ;;  %v11726_v47 = vcombine.high %v1876_v43, %v1880_v45 }
 0x730   :  { %8467 = vmatprep.subr.bf16.mxu1 %v11520_v48  ;;  %v11537_v48 = vcombine.low %v1882_v34, %v1886_v35  ;;  %v1920_v34 = vld [vmem:[#allocation8 + $0x278] sm:$0xff] }
 0x733   :  { %8469 = vmatpush1.bf16.msra.mxu1 %v11521_v51  ;;  %v1898_v51 = vld [vmem:[#allocation8 + $0x1c8] sm:$0xff] }
 0x734   :  { %8471 = vmatprep.subr.bf16.mxu1 %v11522_v52  ;;  %v11540_v3 = vcombine.high %v1898_v51, %v1902_v53  ;;  %v11541_v10 = vcombine.low %v1898_v51, %v1902_v53  ;;  %v1936_v51 = vld [vmem:[#allocation8 + $0x2f8] sm:$0xff] }
 0x737   :  { %8473 = vmatpush1.bf16.msra.mxu1 %v11523_v57  ;;  %v1888_v57 = vld [vmem:[#allocation8 + $0x178] sm:$0xff] }
 0x738   :  { %8475 = vmatprep.subr.bf16.mxu1 %v11524_v58  ;;  %v11728_v60 = vcombine.high %v1884_v55, %v1888_v57 }
 0x73b   :  { %8477 = vmatpush1.bf16.msra.mxu1 %v11525_v61  ;;  %v11539_v61 = vcombine.low %v1890_v41, %v1894_v42  ;;  %v1928_v41 = vld [vmem:[#allocation8 + $0x2b8] sm:$0xff] }
 0x73c   :  { %8479 = vmatprep.subr.bf16.mxu1 %v11526_v62  ;;  %v11729_v62 = vcombine.low %v1884_v55, %v1888_v57 }
 0x73e   :  { %3242 = vmatmul.mubr.f32.vlgmr.msra.gmra.mrb[6].mxu1 %v1839_v5  ;;  %v1906_v5 = vld [vmem:[#allocation8 + $0x208] sm:$0xff] }
 0x73f   :  { %8481 = vmatpush1.bf16.msra.mxu1 %v11527_v6  ;;  %3312 = vmatprep.mubr.f32.mxu1 %v13068_v33  ;;  %v1860_v33 = vld [vmem:[#allocation8 + $0x98] sm:$0xff]  ;;  %v1910_v6 = vld [vmem:[#allocation8 + $0x228] sm:$0xff] }
 0x740   :  { %8483 = vmatprep.subr.bf16.mxu1 %v11528_v7  ;;  %v11722_v29 = vcombine.high %v1860_v33, %v1864_v28  ;;  %v11723_v31 = vcombine.low %v1860_v33, %v1864_v28  ;;  %v1892_v7 = vld [vmem:[#allocation8 + $0x198] sm:$0xff]  ;;  %v11542_v12 = vcombine.high %v1906_v5, %v1910_v6  ;;  %v11543_v20 = vcombine.low %v1906_v5, %v1910_v6 }
 0x741   :  { %v11730_v9 = vcombine.high %v1892_v7, %v1896_v8  ;;  %v11731_v11 = vcombine.low %v1892_v7, %v1896_v8  ;;  %v1962_v7 = vld [vmem:[#allocation8 + $0x3c8] sm:$0xff] }
 0x742   :  { %8871 = vmatprep.subr.bf16.mxu0 %v11722_v29  ;;  %v1966_v8 = vld [vmem:[#allocation8 + $0x3e8] sm:$0xff] }
 0x743   :  { %8485 = vmatpush1.bf16.msra.mxu1 %v11529_v15  ;;  %8873 = vmatpush1.bf16.msra.mxu0 %v11723_v31  ;;  %v1914_v15 = vld [vmem:[#allocation8 + $0x248] sm:$0xff] }
 0x744   :  { %8487 = vmatprep.subr.bf16.mxu1 %v11530_v17  ;;  %8875 = vmatprep.subr.bf16.mxu0 %v11724_v37  ;;  %v1900_v17 = vld [vmem:[#allocation8 + $0x1d8] sm:$0xff]  ;;  %v11544_v22 = vcombine.high %v1914_v15, %v1918_v16  ;;  %v11545_v33 = vcombine.low %v1914_v15, %v1918_v16  ;;  %v1934_v31 = vld [vmem:[#allocation8 + $0x2e8] sm:$0xff]  ;;  %v11556_v16 = vcombine.high %v1962_v7, %v1966_v8 }
 0x745   :  { %v11732_v19 = vcombine.high %v1900_v17, %v1904_v18  ;;  %v11733_v21 = vcombine.low %v1900_v17, %v1904_v18  ;;  %v1970_v17 = vld [vmem:[#allocation8 + $0x408] sm:$0xff] }
 0x746   :  { %v1974_v18 = vld [vmem:[#allocation8 + $0x428] sm:$0xff] }
 0x747   :  { %8489 = vmatpush1.bf16.msra.mxu1 %v11531_v23  ;;  %8877 = vmatpush1.bf16.msra.mxu0 %v11725_v39  ;;  %v1922_v23 = vld [vmem:[#allocation8 + $0x288] sm:$0xff] }
 0x748   :  { %8491 = vmatprep.subr.bf16.mxu1 %v11532_v25  ;;  %8879 = vmatprep.subr.bf16.mxu0 %v11726_v47  ;;  %v1908_v25 = vld [vmem:[#allocation8 + $0x218] sm:$0xff]  ;;  %v11546_v29 = vcombine.high %v1922_v23, %v1926_v24  ;;  %v11547_v13 = vcombine.low %v1922_v23, %v1926_v24  ;;  %v1942_v39 = vld [vmem:[#allocation8 + $0x328] sm:$0xff]  ;;  %v11558_v24 = vcombine.high %v1970_v17, %v1974_v18 }
 0x749   :  { %v11734_v27 = vcombine.high %v1908_v25, %v1912_v26  ;;  %v11735_v28 = vcombine.low %v1908_v25, %v1912_v26  ;;  %v1978_v25 = vld [vmem:[#allocation8 + $0x448] sm:$0xff] }
 0x74a   :  { %v1982_v26 = vld [vmem:[#allocation8 + $0x468] sm:$0xff] }
 0x74b   :  { %8493 = vmatpush1.bf16.msra.mxu1 %v11533_v30  ;;  %8881 = vmatpush1.bf16.msra.mxu0 %v11727_v49  ;;  %v1930_v30 = vld [vmem:[#allocation8 + $0x2c8] sm:$0xff] }
 0x74c   :  { %8495 = vmatprep.subr.bf16.mxu1 %v11534_v32  ;;  %8883 = vmatprep.subr.bf16.mxu0 %v11728_v60  ;;  %v1916_v32 = vld [vmem:[#allocation8 + $0x258] sm:$0xff]  ;;  %v11548_v37 = vcombine.high %v1930_v30, %v1934_v31  ;;  %v11549_v43 = vcombine.low %v1930_v30, %v1934_v31  ;;  %v1950_v49 = vld [vmem:[#allocation8 + $0x368] sm:$0xff]  ;;  %v11560_v31 = vcombine.high %v1978_v25, %v1982_v26 }
 0x74d   :  { %v11736_v35 = vcombine.high %v1916_v32, %v1920_v34  ;;  %v11737_v36 = vcombine.low %v1916_v32, %v1920_v34  ;;  %v1958_v60 = vld [vmem:[#allocation8 + $0x3a8] sm:$0xff] }
 0x74e   :  { %v1986_v32 = vld [vmem:[#allocation8 + $0x488] sm:$0xff] }
 0x74f   :  { %8497 = vmatpush1.bf16.msra.mxu1 %v11535_v38  ;;  %8885 = vmatpush1.bf16.msra.mxu0 %v11729_v62  ;;  %v1938_v38 = vld [vmem:[#allocation8 + $0x308] sm:$0xff]  ;;  %v1944_v62 = vld [vmem:[#allocation8 + $0x338] sm:$0xff] }
 0x750   :  { %8499 = vmatprep.subr.bf16.mxu1 %v11536_v40  ;;  %8887 = vmatprep.subr.bf16.mxu0 %v11730_v9  ;;  %v1924_v40 = vld [vmem:[#allocation8 + $0x298] sm:$0xff]  ;;  %v11550_v47 = vcombine.high %v1938_v38, %v1942_v39  ;;  %v11551_v55 = vcombine.low %v1938_v38, %v1942_v39  ;;  %v1990_v34 = vld [vmem:[#allocation8 + $0x4a8] sm:$0xff] }
 0x751   :  { %v13085_v52 = vpop.f32.mrb[4].mxu1  ;;  %v11738_v42 = vcombine.high %v1924_v40, %v1928_v41  ;;  %v11739_v45 = vcombine.low %v1924_v40, %v1928_v41  ;;  %v1948_v9 = vld [vmem:[#allocation8 + $0x358] sm:$0xff]  ;;  %v11562_v39 = vcombine.high %v1986_v32, %v1990_v34  ;;  %v1994_v40 = vld [vmem:[#allocation8 + $0x4c8] sm:$0xff] }
 0x752   :  { %v1820_v58 = vmul.f32 %v13085_v52, %v13085_v52  ;;  %v7731_v59 = vpop.f32.mrb[5].mxu1  ;;  %v1998_v41 = vld [vmem:[#allocation8 + $0x4e8] sm:$0xff] }
 0x753   :  { %8501 = vmatpush1.bf16.msra.mxu1 %v11537_v48  ;;  %8889 = vmatpush1.bf16.msra.mxu0 %v11731_v11  ;;  %v1946_v48 = vld [vmem:[#allocation8 + $0x348] sm:$0xff] }
 0x754   :  { %8503 = vmatprep.subr.bf16.mxu1 %v11538_v50  ;;  %v1821_v63 = vsel %vm1746_vm1, %v1820_v58, 0.0  ;;  %8891 = vmatprep.subr.bf16.mxu0 %v11732_v19  ;;  %v1932_v50 = vld [vmem:[#allocation8 + $0x2d8] sm:$0xff]  ;;  %v11552_v58 = vcombine.high %v1946_v48, %v1950_v49  ;;  %v1954_v59 = vld [vmem:[#allocation8 + $0x388] sm:$0xff] }
 0x755   :  { %1822 = vadd.xlane.f32.xlu0 %v1821_v63  ;;  %v11740_v53 = vcombine.high %v1932_v50, %v1936_v51  ;;  %v11741_v57 = vcombine.low %v1932_v50, %v1936_v51  ;;  %v11554_v6 = vcombine.high %v1954_v59, %v1958_v60  ;;  %v1956_v19 = vld [vmem:[#allocation8 + $0x398] sm:$0xff]  ;;  %v2002_v50 = vld [vmem:[#allocation8 + $0x508] sm:$0xff] }
 0x756   :  { %v2006_v51 = vld [vmem:[#allocation8 + $0x528] sm:$0xff] }
 0x757   :  { %8505 = vmatpush1.bf16.msra.mxu1 %v11539_v61  ;;  %8893 = vmatpush1.bf16.msra.mxu0 %v11733_v21  ;;  %v1940_v61 = vld [vmem:[#allocation8 + $0x318] sm:$0xff] }
 0x758   :  { %8507 = vmatprep.subr.bf16.mxu1 %v11540_v3  ;;  %8895 = vmatprep.subr.bf16.mxu0 %v11734_v27  ;;  %v11742_v63 = vcombine.high %v1940_v61, %v1944_v62  ;;  %v11553_v3 = vcombine.low %v1946_v48, %v1950_v49  ;;  %v11743_v5 = vcombine.low %v1940_v61, %v1944_v62  ;;  %v1964_v27 = vld [vmem:[#allocation8 + $0x3d8] sm:$0xff] }
 0x759   :  { %v11564_v49 = vcombine.high %v1994_v40, %v1998_v41  ;;  %v1996_v61 = vld [vmem:[#allocation8 + $0x4d8] sm:$0xff] }
 0x75a   :  { %v2000_v62 = vld [vmem:[#allocation8 + $0x4f8] sm:$0xff] }
 0x75b   :  { %8509 = vmatpush1.bf16.msra.mxu1 %v11541_v10  ;;  %8897 = vmatpush1.bf16.msra.mxu0 %v11735_v28  ;;  %v1952_v10 = vld [vmem:[#allocation8 + $0x378] sm:$0xff] }
 0x75c   :  { %8511 = vmatprep.subr.bf16.mxu1 %v11542_v12  ;;  %8899 = vmatprep.subr.bf16.mxu0 %v11736_v35  ;;  %v11744_v11 = vcombine.high %v1948_v9, %v1952_v10  ;;  %v11555_v12 = vcombine.low %v1954_v59, %v1958_v60  ;;  %v11745_v15 = vcombine.low %v1948_v9, %v1952_v10  ;;  %v1972_v35 = vld [vmem:[#allocation8 + $0x418] sm:$0xff]  ;;  %v2010_v60 = vld [vmem:[#allocation8 + $0x548] sm:$0xff] }
 0x75d   :  { %v11566_v59 = vcombine.high %v2002_v50, %v2006_v51  ;;  %v2004_v9 = vld [vmem:[#allocation8 + $0x518] sm:$0xff] }
 0x75e   :  { %v2008_v10 = vld [vmem:[#allocation8 + $0x538] sm:$0xff] }
 0x75f   :  { %8513 = vmatpush1.bf16.msra.mxu1 %v11543_v20  ;;  %8901 = vmatpush1.bf16.msra.mxu0 %v11737_v36  ;;  %v1960_v20 = vld [vmem:[#allocation8 + $0x3b8] sm:$0xff] }
 0x760   :  { %8515 = vmatprep.subr.bf16.mxu1 %v11544_v22  ;;  %8903 = vmatprep.subr.bf16.mxu0 %v11738_v42  ;;  %v11746_v21 = vcombine.high %v1956_v19, %v1960_v20  ;;  %v11557_v22 = vcombine.low %v1962_v7, %v1966_v8  ;;  %v11747_v23 = vcombine.low %v1956_v19, %v1960_v20  ;;  %v1980_v42 = vld [vmem:[#allocation8 + $0x458] sm:$0xff]  ;;  %v2018_v7 = vld [vmem:[#allocation8 + $0x588] sm:$0xff] }
 0x761   :  { %v2022_v8 = vld [vmem:[#allocation8 + $0x5a8] sm:$0xff]  ;;  %v2012_v19 = vld [vmem:[#allocation8 + $0x558] sm:$0xff] }
 0x762   :  { %v2016_v20 = vld [vmem:[#allocation8 + $0x578] sm:$0xff] }
 0x763   :  { %8517 = vmatpush1.bf16.msra.mxu1 %v11545_v33  ;;  %8905 = vmatpush1.bf16.msra.mxu0 %v11739_v45  ;;  %v1968_v33 = vld [vmem:[#allocation8 + $0x3f8] sm:$0xff] }
 0x764   :  { %8519 = vmatprep.subr.bf16.mxu1 %v11546_v29  ;;  %8907 = vmatprep.subr.bf16.mxu0 %v11740_v53  ;;  %v11748_v28 = vcombine.high %v1964_v27, %v1968_v33  ;;  %v11559_v29 = vcombine.low %v1970_v17, %v1974_v18  ;;  %v11749_v30 = vcombine.low %v1964_v27, %v1968_v33  ;;  %v1988_v53 = vld [vmem:[#allocation8 + $0x498] sm:$0xff]  ;;  %v2026_v17 = vld [vmem:[#allocation8 + $0x5c8] sm:$0xff] }
 0x765   :  { %v2030_v18 = vld [vmem:[#allocation8 + $0x5e8] sm:$0xff]  ;;  %v2020_v27 = vld [vmem:[#allocation8 + $0x598] sm:$0xff] }
 0x766   :  { %v2024_v33 = vld [vmem:[#allocation8 + $0x5b8] sm:$0xff] }
 0x767   :  { %8521 = vmatpush1.bf16.msra.mxu1 %v11547_v13  ;;  %8909 = vmatpush1.bf16.msra.mxu0 %v11741_v57  ;;  %v1976_v13 = vld [vmem:[#allocation8 + $0x438] sm:$0xff] }
 0x768   :  { %8523 = vmatprep.subr.bf16.mxu1 %v11548_v37  ;;  %8911 = vmatprep.subr.bf16.mxu0 %v11742_v63  ;;  %v11750_v36 = vcombine.high %v1972_v35, %v1976_v13  ;;  %v11561_v37 = vcombine.low %v1978_v25, %v1982_v26  ;;  %v11751_v38 = vcombine.low %v1972_v35, %v1976_v13  ;;  %v2034_v25 = vld [vmem:[#allocation8 + $0x608] sm:$0xff]  ;;  %v2028_v35 = vld [vmem:[#allocation8 + $0x5d8] sm:$0xff] }
 0x769   :  { %v11756_v63 = vcombine.high %v1996_v61, %v2000_v62  ;;  %v2038_v26 = vld [vmem:[#allocation8 + $0x628] sm:$0xff]  ;;  %v2032_v13 = vld [vmem:[#allocation8 + $0x5f8] sm:$0xff] }
 0x76b   :  { %8525 = vmatpush1.bf16.msra.mxu1 %v11549_v43  ;;  %8913 = vmatpush1.bf16.msra.mxu0 %v11743_v5  ;;  %v1984_v43 = vld [vmem:[#allocation8 + $0x478] sm:$0xff]  ;;  %v11757_v5 = vcombine.low %v1996_v61, %v2000_v62 }
 0x76c   :  { %8527 = vmatprep.subr.bf16.mxu1 %v11550_v47  ;;  %8915 = vmatprep.subr.bf16.mxu0 %v11744_v11  ;;  %v11752_v45 = vcombine.high %v1980_v42, %v1984_v43  ;;  %v11563_v47 = vcombine.low %v1986_v32, %v1990_v34  ;;  %v11753_v48 = vcombine.low %v1980_v42, %v1984_v43  ;;  %v2042_v32 = vld [vmem:[#allocation8 + $0x648] sm:$0xff]  ;;  %v2036_v42 = vld [vmem:[#allocation8 + $0x618] sm:$0xff] }
 0x76d   :  { %v11758_v11 = vcombine.high %v2004_v9, %v2008_v10  ;;  %v2046_v34 = vld [vmem:[#allocation8 + $0x668] sm:$0xff]  ;;  %v2040_v43 = vld [vmem:[#allocation8 + $0x638] sm:$0xff] }
 0x76e   :  { %v2052_v61 = vld [vmem:[#allocation8 + $0x698] sm:$0xff] }
 0x76f   :  { %8529 = vmatpush1.bf16.msra.mxu1 %v11551_v55  ;;  %8917 = vmatpush1.bf16.msra.mxu0 %v11745_v15  ;;  %v1992_v55 = vld [vmem:[#allocation8 + $0x4b8] sm:$0xff]  ;;  %v11759_v15 = vcombine.low %v2004_v9, %v2008_v10 }
 0x770   :  { %8531 = vmatprep.subr.bf16.mxu1 %v11552_v58  ;;  %8919 = vmatprep.subr.bf16.mxu0 %v11746_v21  ;;  %v11754_v57 = vcombine.high %v1988_v53, %v1992_v55  ;;  %v11755_v58 = vcombine.low %v1988_v53, %v1992_v55  ;;  %v11760_v21 = vcombine.high %v2012_v19, %v2016_v20  ;;  %v2044_v53 = vld [vmem:[#allocation8 + $0x658] sm:$0xff] }
 0x771   :  { %v2048_v55 = vld [vmem:[#allocation8 + $0x678] sm:$0xff] }
 0x772   :  { %v2056_v62 = vld [vmem:[#allocation8 + $0x6b8] sm:$0xff] }
 0x773   :  { %8533 = vmatpush1.bf16.msra.mxu1 %v11553_v3  ;;  %8921 = vmatpush1.bf16.msra.mxu0 %v11747_v23  ;;  %v11567_v3 = vcombine.low %v2002_v50, %v2006_v51  ;;  %v11761_v23 = vcombine.low %v2012_v19, %v2016_v20  ;;  %v2058_v50 = vld [vmem:[#allocation8 + $0x6c8] sm:$0xff]  ;;  %v2060_v9 = vld [vmem:[#allocation8 + $0x6d8] sm:$0xff] }
 0x774   :  { %8535 = vmatprep.subr.bf16.mxu1 %v11554_v6  ;;  %8923 = vmatprep.subr.bf16.mxu0 %v11748_v28  ;;  %v11762_v28 = vcombine.high %v2020_v27, %v2024_v33  ;;  %v2062_v51 = vld [vmem:[#allocation8 + $0x6e8] sm:$0xff]  ;;  %v2064_v10 = vld [vmem:[#allocation8 + $0x6f8] sm:$0xff] }
 0x775   :  { %v2068_v19 = vld [vmem:[#allocation8 + $0x718] sm:$0xff] }
 0x776   :  { %v2072_v20 = vld [vmem:[#allocation8 + $0x738] sm:$0xff] }
 0x777   :  { %8537 = vmatpush1.bf16.msra.mxu1 %v11555_v12  ;;  %8925 = vmatpush1.bf16.msra.mxu0 %v11749_v30  ;;  %v11763_v30 = vcombine.low %v2020_v27, %v2024_v33  ;;  %v2076_v27 = vld [vmem:[#allocation8 + $0x758] sm:$0xff] }
 0x778   :  { %8539 = vmatprep.subr.bf16.mxu1 %v11556_v16  ;;  %8927 = vmatprep.subr.bf16.mxu0 %v11750_v36  ;;  %v11570_v16 = vcombine.high %v2018_v7, %v2022_v8  ;;  %v11764_v36 = vcombine.high %v2028_v35, %v2032_v13  ;;  %v2080_v33 = vld [vmem:[#allocation8 + $0x778] sm:$0xff] }
 0x77a   :  { %3739 = vmatmul.mubr.f32.vlgmr.msra.gmra.mrb[2].mxu0 %v13072_v44 }
 0x77b   :  { %8541 = vmatpush1.bf16.msra.mxu1 %v11557_v22  ;;  %8929 = vmatpush1.bf16.msra.mxu0 %v11751_v38  ;;  %v11571_v22 = vcombine.low %v2018_v7, %v2022_v8  ;;  %v11765_v38 = vcombine.low %v2028_v35, %v2032_v13  ;;  %v2074_v7 = vld [vmem:[#allocation8 + $0x748] sm:$0xff]  ;;  %v2084_v35 = vld [vmem:[#allocation8 + $0x798] sm:$0xff] }
 0x77c   :  { %8543 = vmatprep.subr.bf16.mxu1 %v11558_v24  ;;  %3809 = vmatprep.mubr.f32.mxu0 %v13074_v46  ;;  %v11572_v24 = vcombine.high %v2026_v17, %v2030_v18  ;;  %v2078_v8 = vld [vmem:[#allocation8 + $0x768] sm:$0xff]  ;;  %v2088_v13 = vld [vmem:[#allocation8 + $0x7b8] sm:$0xff] }
 0x77d   :  { %8931 = vmatprep.subr.bf16.mxu0 %v11752_v45  ;;  %v11766_v45 = vcombine.high %v2036_v42, %v2040_v43 }
 0x77e   :  { %3313 = vmatmul.mubr.f32.vlgmr.msra.gmra.mrb[8].mxu1 %v13072_v44  ;;  %v11565_v44 = vcombine.low %v1994_v40, %v1998_v41  ;;  %v2050_v40 = vld [vmem:[#allocation8 + $0x688] sm:$0xff] }
 0x77f   :  { %8545 = vmatpush1.bf16.msra.mxu1 %v11559_v29  ;;  %3383 = vmatprep.mubr.f32.mxu1 %v13074_v46  ;;  %v2014_v46 = vld [vmem:[#allocation8 + $0x568] sm:$0xff]  ;;  %v11573_v29 = vcombine.low %v2026_v17, %v2030_v18 }
 0x780   :  { %8547 = vmatprep.subr.bf16.mxu1 %v11560_v31  ;;  %8933 = vmatpush1.bf16.msra.mxu0 %v11753_v48  ;;  %v11568_v6 = vcombine.high %v2010_v60, %v2014_v46  ;;  %v11569_v12 = vcombine.low %v2010_v60, %v2014_v46  ;;  %v11574_v31 = vcombine.high %v2034_v25, %v2038_v26  ;;  %v2054_v41 = vld [vmem:[#allocation8 + $0x6a8] sm:$0xff] }
 0x781   :  { %8935 = vmatprep.subr.bf16.mxu0 %v11754_v57  ;;  %v11767_v48 = vcombine.low %v2036_v42, %v2040_v43  ;;  %v11768_v57 = vcombine.high %v2044_v53, %v2048_v55  ;;  %v2066_v60 = vld [vmem:[#allocation8 + $0x708] sm:$0xff]  ;;  %v2092_v42 = vld [vmem:[#allocation8 + $0x7d8] sm:$0xff] }
 0x782   :  { %v2070_v46 = vld [vmem:[#allocation8 + $0x728] sm:$0xff]  ;;  %v2096_v43 = vld [vmem:[#allocation8 + $0x7f8] sm:$0xff] }
 0x783   :  { %8549 = vmatpush1.bf16.msra.mxu1 %v11561_v37  ;;  %v11575_v37 = vcombine.low %v2034_v25, %v2038_v26  ;;  %v2082_v17 = vld [vmem:[#allocation8 + $0x788] sm:$0xff] }
 0x784   :  { %8551 = vmatprep.subr.bf16.mxu1 %v11562_v39  ;;  %8937 = vmatpush1.bf16.msra.mxu0 %v11755_v58  ;;  %v11576_v39 = vcombine.high %v2042_v32, %v2046_v34  ;;  %v11769_v58 = vcombine.low %v2044_v53, %v2048_v55  ;;  %v2086_v18 = vld [vmem:[#allocation8 + $0x7a8] sm:$0xff]  ;;  %v2100_v53 = vld [vmem:[#allocation8 + $0x818] sm:$0xff] }
 0x785   :  { %8939 = vmatprep.subr.bf16.mxu0 %v11756_v63  ;;  %v11770_v63 = vcombine.high %v2052_v61, %v2056_v62  ;;  %v2090_v25 = vld [vmem:[#allocation8 + $0x7c8] sm:$0xff]  ;;  %v2104_v55 = vld [vmem:[#allocation8 + $0x838] sm:$0xff] }
 0x786   :  { %v2094_v26 = vld [vmem:[#allocation8 + $0x7e8] sm:$0xff] }
 0x787   :  { %8553 = vmatpush1.bf16.msra.mxu1 %v11563_v47  ;;  %v11577_v47 = vcombine.low %v2042_v32, %v2046_v34  ;;  %v2098_v32 = vld [vmem:[#allocation8 + $0x808] sm:$0xff] }
 0x788   :  { %8555 = vmatprep.subr.bf16.mxu1 %v11564_v49  ;;  %8941 = vmatpush1.bf16.msra.mxu0 %v11757_v5  ;;  %v11578_v49 = vcombine.high %v2050_v40, %v2054_v41  ;;  %v11771_v5 = vcombine.low %v2052_v61, %v2056_v62  ;;  %v2102_v34 = vld [vmem:[#allocation8 + $0x828] sm:$0xff]  ;;  %v12499_v61 = vld [vmem:[#allocation6 + $0x10] sm:$0xff]  ;;  %v2108_v62 = vld [vmem:[#allocation8 + $0x858] sm:$0xff] }
 0x789   :  { %8943 = vmatprep.subr.bf16.mxu0 %v11758_v11  ;;  %v11772_v11 = vcombine.high %v2060_v9, %v2064_v10 }
 0x78b   :  { %8557 = vmatpush1.bf16.msra.mxu1 %v11565_v44  ;;  %v11579_v44 = vcombine.low %v2050_v40, %v2054_v41  ;;  %v2106_v40 = vld [vmem:[#allocation8 + $0x848] sm:$0xff] }
 0x78c   :  { %8559 = vmatprep.subr.bf16.mxu1 %v11566_v59  ;;  %8945 = vmatpush1.bf16.msra.mxu0 %v11759_v15  ;;  %v11580_v59 = vcombine.high %v2058_v50, %v2062_v51  ;;  %v11773_v15 = vcombine.low %v2060_v9, %v2064_v10  ;;  %v2110_v41 = vld [vmem:[#allocation8 + $0x868] sm:$0xff]  ;;  %v2116_v9 = vld [vmem:[#allocation8 + $0x898] sm:$0xff] }
 0x78d   :  { %8947 = vmatprep.subr.bf16.mxu0 %v11760_v21  ;;  %v11774_v21 = vcombine.high %v2068_v19, %v2072_v20  ;;  %v2120_v10 = vld [vmem:[#allocation8 + $0x8b8] sm:$0xff] }
 0x78f   :  { %8561 = vmatpush1.bf16.msra.mxu1 %v11567_v3  ;;  %v11581_v3 = vcombine.low %v2058_v50, %v2062_v51  ;;  %v2114_v50 = vld [vmem:[#allocation8 + $0x888] sm:$0xff] }
 0x790   :  { %8563 = vmatprep.subr.bf16.mxu1 %v11568_v6  ;;  %8949 = vmatpush1.bf16.msra.mxu0 %v11761_v23  ;;  %v11582_v6 = vcombine.high %v2066_v60, %v2070_v46  ;;  %v11775_v23 = vcombine.low %v2068_v19, %v2072_v20  ;;  %v2118_v51 = vld [vmem:[#allocation8 + $0x8a8] sm:$0xff]  ;;  %v2124_v19 = vld [vmem:[#allocation8 + $0x8d8] sm:$0xff] }
 0x791   :  { %8951 = vmatprep.subr.bf16.mxu0 %v11762_v28  ;;  %v11776_v28 = vcombine.high %v2076_v27, %v2080_v33  ;;  %v2128_v20 = vld [vmem:[#allocation8 + $0x8f8] sm:$0xff] }
 0x793   :  { %8565 = vmatpush1.bf16.msra.mxu1 %v11569_v12  ;;  %v11583_v12 = vcombine.low %v2066_v60, %v2070_v46  ;;  %v2122_v60 = vld [vmem:[#allocation8 + $0x8c8] sm:$0xff] }
 0x794   :  { %8567 = vmatprep.subr.bf16.mxu1 %v11570_v16  ;;  %8953 = vmatpush1.bf16.msra.mxu0 %v11763_v30  ;;  %v11584_v16 = vcombine.high %v2074_v7, %v2078_v8  ;;  %v11777_v30 = vcombine.low %v2076_v27, %v2080_v33  ;;  %v2126_v46 = vld [vmem:[#allocation8 + $0x8e8] sm:$0xff]  ;;  %v2132_v27 = vld [vmem:[#allocation8 + $0x918] sm:$0xff] }
 0x795   :  { %8955 = vmatprep.subr.bf16.mxu0 %v11764_v36  ;;  %v11778_v36 = vcombine.high %v2084_v35, %v2088_v13  ;;  %v2136_v33 = vld [vmem:[#allocation8 + $0x938] sm:$0xff] }
 0x797   :  { %8569 = vmatpush1.bf16.msra.mxu1 %v11571_v22  ;;  %v11585_v22 = vcombine.low %v2074_v7, %v2078_v8  ;;  %v11596_v7 = vcombine.high %v2122_v60, %v2126_v46  ;;  %v2134_v8 = vld [vmem:[#allocation8 + $0x928] sm:$0xff] }
 0x798   :  { %8571 = vmatprep.subr.bf16.mxu1 %v11572_v24  ;;  %8957 = vmatpush1.bf16.msra.mxu0 %v11765_v38  ;;  %v11586_v24 = vcombine.high %v2082_v17, %v2086_v18  ;;  %v11779_v38 = vcombine.low %v2084_v35, %v2088_v13  ;;  %v2140_v35 = vld [vmem:[#allocation8 + $0x958] sm:$0xff] }
 0x799   :  { %8959 = vmatprep.subr.bf16.mxu0 %v11766_v45  ;;  %v11780_v45 = vcombine.high %v2092_v42, %v2096_v43  ;;  %v2144_v13 = vld [vmem:[#allocation8 + $0x978] sm:$0xff] }
 0x79b   :  { %8573 = vmatpush1.bf16.msra.mxu1 %v11573_v29  ;;  %v11587_v29 = vcombine.low %v2082_v17, %v2086_v18  ;;  %v2138_v17 = vld [vmem:[#allocation8 + $0x948] sm:$0xff] }
 0x79c   :  { %8575 = vmatprep.subr.bf16.mxu1 %v11574_v31  ;;  %8961 = vmatpush1.bf16.msra.mxu0 %v11767_v48  ;;  %v11588_v31 = vcombine.high %v2090_v25, %v2094_v26  ;;  %v11781_v48 = vcombine.low %v2092_v42, %v2096_v43  ;;  %v2142_v18 = vld [vmem:[#allocation8 + $0x968] sm:$0xff]  ;;  %v2148_v42 = vld [vmem:[#allocation8 + $0x998] sm:$0xff] }
 0x79d   :  { %8963 = vmatprep.subr.bf16.mxu0 %v11768_v57  ;;  %v11782_v57 = vcombine.high %v2100_v53, %v2104_v55  ;;  %v2152_v43 = vld [vmem:[#allocation8 + $0x9b8] sm:$0xff] }
 0x79f   :  { %8577 = vmatpush1.bf16.msra.mxu1 %v11575_v37  ;;  %v11589_v37 = vcombine.low %v2090_v25, %v2094_v26  ;;  %v2146_v25 = vld [vmem:[#allocation8 + $0x988] sm:$0xff] }
 0x7a0   :  { %8579 = vmatprep.subr.bf16.mxu1 %v11576_v39  ;;  %8965 = vmatpush1.bf16.msra.mxu0 %v11769_v58  ;;  %v11590_v39 = vcombine.high %v2098_v32, %v2102_v34  ;;  %v11783_v58 = vcombine.low %v2100_v53, %v2104_v55  ;;  %v2150_v26 = vld [vmem:[#allocation8 + $0x9a8] sm:$0xff]  ;;  %v2156_v53 = vld [vmem:[#allocation8 + $0x9d8] sm:$0xff] }
 0x7a1   :  { %8967 = vmatprep.subr.bf16.mxu0 %v11770_v63  ;;  %v2112_v63 = vld [vmem:[#allocation8 + $0x878] sm:$0xff] }
 0x7a2   :  { %v2160_v55 = vld [vmem:[#allocation8 + $0x9f8] sm:$0xff] }
 0x7a3   :  { %8581 = vmatpush1.bf16.msra.mxu1 %v11577_v47  ;;  %v11591_v47 = vcombine.low %v2098_v32, %v2102_v34  ;;  %v2154_v32 = vld [vmem:[#allocation8 + $0x9c8] sm:$0xff] }
 0x7a4   :  { %8583 = vmatprep.subr.bf16.mxu1 %v11578_v49  ;;  %8969 = vmatpush1.bf16.msra.mxu0 %v11771_v5  ;;  %v11592_v49 = vcombine.high %v2106_v40, %v2110_v41  ;;  %v12500_v5 = vld [vmem:[#allocation6 + $0x28] sm:$0xff]  ;;  %v2158_v34 = vld [vmem:[#allocation8 + $0x9e8] sm:$0xff] }
 0x7a5   :  { %8971 = vmatprep.subr.bf16.mxu0 %v11772_v11  ;;  %v11786_v11 = vcombine.high %v2116_v9, %v2120_v10 }
 0x7a7   :  { %8585 = vmatpush1.bf16.msra.mxu1 %v11579_v44  ;;  %v11593_v44 = vcombine.low %v2106_v40, %v2110_v41  ;;  %v2162_v40 = vld [vmem:[#allocation8 + $0xa08] sm:$0xff] }
 0x7a8   :  { %8587 = vmatprep.subr.bf16.mxu1 %v11580_v59  ;;  %8973 = vmatpush1.bf16.msra.mxu0 %v11773_v15  ;;  %v11594_v59 = vcombine.high %v2114_v50, %v2118_v51  ;;  %v11787_v15 = vcombine.low %v2116_v9, %v2120_v10  ;;  %v2166_v41 = vld [vmem:[#allocation8 + $0xa28] sm:$0xff] }
 0x7a9   :  { %8975 = vmatprep.subr.bf16.mxu0 %v11774_v21  ;;  %v11788_v21 = vcombine.high %v2124_v19, %v2128_v20 }
 0x7ab   :  { %8589 = vmatpush1.bf16.msra.mxu1 %v11581_v3  ;;  %v11784_v3 = vcombine.high %v2108_v62, %v2112_v63 }
 0x7ac   :  { %8591 = vmatprep.subr.bf16.mxu1 %v11582_v6  ;;  %8977 = vmatpush1.bf16.msra.mxu0 %v11775_v23  ;;  %v11785_v6 = vcombine.low %v2108_v62, %v2112_v63  ;;  %v11789_v23 = vcombine.low %v2124_v19, %v2128_v20  ;;  %v2168_v62 = vld [vmem:[#allocation8 + $0xa38] sm:$0xff] }
 0x7ad   :  { %8979 = vmatprep.subr.bf16.mxu0 %v11776_v28  ;;  %v11790_v28 = vcombine.high %v2132_v27, %v2136_v33  ;;  %v2184_v19 = vld [vmem:[#allocation8 + $0xab8] sm:$0xff] }
 0x7af   :  { %8593 = vmatpush1.bf16.msra.mxu1 %v11583_v12  ;;  %v11597_v12 = vcombine.low %v2122_v60, %v2126_v46  ;;  %v2178_v60 = vld [vmem:[#allocation8 + $0xa88] sm:$0xff] }
 0x7b0   :  { %8595 = vmatprep.subr.bf16.mxu1 %v11584_v16  ;;  %8981 = vmatpush1.bf16.msra.mxu0 %v11777_v30  ;;  %v11791_v30 = vcombine.low %v2132_v27, %v2136_v33  ;;  %v2182_v46 = vld [vmem:[#allocation8 + $0xaa8] sm:$0xff]  ;;  %v2192_v27 = vld [vmem:[#allocation8 + $0xaf8] sm:$0xff] }
 0x7b1   :  { %8983 = vmatprep.subr.bf16.mxu0 %v11778_v36  ;;  %v11792_v36 = vcombine.high %v2140_v35, %v2144_v13 }
 0x7b3   :  { %8597 = vmatpush1.bf16.msra.mxu1 %v11585_v22 }
 0x7b4   :  { %8599 = vmatprep.subr.bf16.mxu1 %v11586_v24  ;;  %8985 = vmatpush1.bf16.msra.mxu0 %v11779_v38  ;;  %v11600_v24 = vcombine.high %v2138_v17, %v2142_v18  ;;  %v11793_v38 = vcombine.low %v2140_v35, %v2144_v13  ;;  %v2196_v35 = vld [vmem:[#allocation8 + $0xb18] sm:$0xff] }
 0x7b5   :  { %8987 = vmatprep.subr.bf16.mxu0 %v11780_v45  ;;  %v11794_v45 = vcombine.high %v2148_v42, %v2152_v43  ;;  %v2200_v13 = vld [vmem:[#allocation8 + $0xb38] sm:$0xff] }
 0x7b7   :  { %8601 = vmatpush1.bf16.msra.mxu1 %v11587_v29  ;;  %v11601_v29 = vcombine.low %v2138_v17, %v2142_v18  ;;  %v2198_v17 = vld [vmem:[#allocation8 + $0xb28] sm:$0xff]  ;;  %v2180_v18 = vld [vmem:[#allocation8 + $0xa98] sm:$0xff] }
 0x7b8   :  { %8603 = vmatprep.subr.bf16.mxu1 %v11588_v31  ;;  %8989 = vmatpush1.bf16.msra.mxu0 %v11781_v48  ;;  %v11602_v31 = vcombine.high %v2146_v25, %v2150_v26  ;;  %v11795_v48 = vcombine.low %v2148_v42, %v2152_v43  ;;  %v11802_v20 = vcombine.high %v2180_v18, %v2184_v19  ;;  %v2218_v43 = vld [vmem:[#allocation8 + $0xbc8] sm:$0xff] }
 0x7b9   :  { %8991 = vmatprep.subr.bf16.mxu0 %v11782_v57  ;;  %v11796_v57 = vcombine.high %v2156_v53, %v2160_v55 }
 0x7bb   :  { %8605 = vmatpush1.bf16.msra.mxu1 %v11589_v37  ;;  %3810 = vmatmul.mubr.f32.vlgmr.msra.gmra.mrb[2].mxu0 %v12499_v61  ;;  %v11603_v37 = vcombine.low %v2146_v25, %v2150_v26  ;;  %v2164_v61 = vld [vmem:[#allocation8 + $0xa18] sm:$0xff]  ;;  %v2206_v25 = vld [vmem:[#allocation8 + $0xb68] sm:$0xff] }
 0x7bc   :  { %8607 = vmatprep.subr.bf16.mxu1 %v11590_v39  ;;  %8993 = vmatpush1.bf16.msra.mxu0 %v11783_v58  ;;  %v11604_v39 = vcombine.high %v2154_v32, %v2158_v34  ;;  %v11797_v58 = vcombine.low %v2156_v53, %v2160_v55  ;;  %v11798_v63 = vcombine.high %v2164_v61, %v2168_v62  ;;  %v2188_v26 = vld [vmem:[#allocation8 + $0xad8] sm:$0xff] }
 0x7bd   :  { %3880 = vmatprep.mubr.f32.mxu0 %v12500_v5  ;;  %8995 = vmatprep.subr.bf16.mxu0 %v11784_v3  ;;  %v11799_v5 = vcombine.low %v2164_v61, %v2168_v62  ;;  %v11804_v33 = vcombine.high %v2188_v26, %v2192_v27 }
 0x7be   :  { %3384 = vmatmul.mubr.f32.vlgmr.msra.gmra.mrb[8].mxu1 %v13078_v54  ;;  %v11595_v54 = vcombine.low %v2114_v50, %v2118_v51  ;;  %v2170_v50 = vld [vmem:[#allocation8 + $0xa48] sm:$0xff] }
 0x7bf   :  { %8609 = vmatpush1.bf16.msra.mxu1 %v11591_v47  ;;  %3454 = vmatprep.mubr.f32.mxu1 %v13080_v56  ;;  %v2130_v56 = vld [vmem:[#allocation8 + $0x908] sm:$0xff]  ;;  %v11605_v47 = vcombine.low %v2154_v32, %v2158_v34 }
 0x7c0   :  { %8611 = vmatprep.subr.bf16.mxu1 %v11592_v49  ;;  %8997 = vmatpush1.bf16.msra.mxu0 %v11785_v6  ;;  %v11598_v16 = vcombine.high %v2130_v56, %v2134_v8  ;;  %v11599_v22 = vcombine.low %v2130_v56, %v2134_v8  ;;  %v11606_v49 = vcombine.high %v2162_v40, %v2166_v41  ;;  %v2174_v51 = vld [vmem:[#allocation8 + $0xa68] sm:$0xff]  ;;  %v2172_v56 = vld [vmem:[#allocation8 + $0xa58] sm:$0xff] }
 0x7c1   :  { %8999 = vmatprep.subr.bf16.mxu0 %v11786_v11  ;;  %v11609_v3 = vcombine.low %v2170_v50, %v2174_v51  ;;  %v2186_v6 = vld [vmem:[#allocation8 + $0xac8] sm:$0xff]  ;;  %v2176_v8 = vld [vmem:[#allocation8 + $0xa78] sm:$0xff]  ;;  %v11611_v11 = vcombine.low %v2178_v60, %v2182_v46 }
 0x7c2   :  { %v11800_v10 = vcombine.high %v2172_v56, %v2176_v8  ;;  %v2214_v34 = vld [vmem:[#allocation8 + $0xba8] sm:$0xff] }
 0x7c3   :  { %8613 = vmatpush1.bf16.msra.mxu1 %v11593_v44  ;;  %v11607_v44 = vcombine.low %v2162_v40, %v2166_v41  ;;  %v11807_v40 = vcombine.low %v2196_v35, %v2200_v13 }
 0x7c4   :  { %8615 = vmatprep.subr.bf16.mxu1 %v11594_v59  ;;  %9001 = vmatpush1.bf16.msra.mxu0 %v11787_v15  ;;  %v11608_v59 = vcombine.high %v2170_v50, %v2174_v51  ;;  %v2194_v15 = vld [vmem:[#allocation8 + $0xb08] sm:$0xff] }
 0x7c5   :  { %9003 = vmatprep.subr.bf16.mxu0 %v11788_v21 }
 0x7c7   :  { %8617 = vmatpush1.bf16.msra.mxu1 %v11595_v54  ;;  %v11610_v54 = vcombine.high %v2178_v60, %v2182_v46  ;;  %v2216_v60 = vld [vmem:[#allocation8 + $0xbb8] sm:$0xff] }
 0x7c8   :  { %8619 = vmatprep.subr.bf16.mxu1 %v11596_v7  ;;  %9005 = vmatpush1.bf16.msra.mxu0 %v11789_v23  ;;  %v2190_v7 = vld [vmem:[#allocation8 + $0xae8] sm:$0xff]  ;;  %v11614_v23 = vcombine.high %v2194_v15, %v2198_v17 }
 0x7c9   :  { %9007 = vmatprep.subr.bf16.mxu0 %v11790_v28  ;;  %v11613_v21 = vcombine.low %v2186_v6, %v2190_v7  ;;  %v11615_v28 = vcombine.low %v2194_v15, %v2198_v17  ;;  %v3900_v15 = vld [vmem:[#allocation9 + $0x68] sm:$0xff]  ;;  %v12501_v17 = vld [vmem:[#allocation6 + $0x20] sm:$0xff] }
 0x7cb   :  { %8621 = vmatpush1.bf16.msra.mxu1 %v11597_v12  ;;  %v11612_v12 = vcombine.high %v2186_v6, %v2190_v7  ;;  %v2224_v6 = vld [vmem:[#allocation8 + $0xbf8] sm:$0xff] }
 0x7cc   :  { %8623 = vmatprep.subr.bf16.mxu1 %v11598_v16  ;;  %9009 = vmatpush1.bf16.msra.mxu0 %v11791_v30  ;;  %v11801_v16 = vcombine.low %v2172_v56, %v2176_v8 }
 0x7cd   :  { %9011 = vmatprep.subr.bf16.mxu0 %v11792_v36 }
 0x7cf   :  { %8625 = vmatpush1.bf16.msra.mxu1 %v11599_v22  ;;  %v11803_v22 = vcombine.low %v2180_v18, %v2184_v19  ;;  %v3891_v19 = vld [vmem:[#allocation9 + $0x20] sm:$0xff] }
 0x7d0   :  { %8627 = vmatprep.subr.bf16.mxu1 %v11600_v24  ;;  %9013 = vmatpush1.bf16.msra.mxu0 %v11793_v38  ;;  %v2202_v24 = vld [vmem:[#allocation8 + $0xb48] sm:$0xff] }
 0x7d1   :  { %9015 = vmatprep.subr.bf16.mxu0 %v11794_v45  ;;  %v11616_v30 = vcombine.high %v2202_v24, %v2206_v25 }
 0x7d3   :  { %8629 = vmatpush1.bf16.msra.mxu1 %v11601_v29  ;;  %v11805_v29 = vcombine.low %v2188_v26, %v2192_v27  ;;  %v1867_v26 = vld [vmem:[#allocation8 + $0xd0] sm:$0xff] }
 0x7d4   :  { %8631 = vmatprep.subr.bf16.mxu1 %v11602_v31  ;;  %9017 = vmatpush1.bf16.msra.mxu0 %v11795_v48  ;;  %v2210_v31 = vld [vmem:[#allocation8 + $0xb88] sm:$0xff]  ;;  %v2204_v48 = vld [vmem:[#allocation8 + $0xb58] sm:$0xff]  ;;  %v1871_v27 = vld [vmem:[#allocation8 + $0xf0] sm:$0xff] }
 0x7d5   :  { %9019 = vmatprep.subr.bf16.mxu0 %v11796_v57  ;;  %v11618_v42 = vcombine.high %v2210_v31, %v2214_v34  ;;  %v11619_v53 = vcombine.low %v2210_v31, %v2214_v34  ;;  %v3915_v31 = vld [vmem:[#allocation9 + $0xe0] sm:$0xff]  ;;  %v11628_v34 = vcombine.high %v1867_v26, %v1871_v27 }
 0x7d7   :  { %8633 = vmatpush1.bf16.msra.mxu1 %v11603_v37  ;;  %v11806_v37 = vcombine.high %v2196_v35, %v2200_v13  ;;  %v1875_v35 = vld [vmem:[#allocation8 + $0x110] sm:$0xff] }
 0x7d8   :  { %8635 = vmatprep.subr.bf16.mxu1 %v11604_v39  ;;  %9021 = vmatpush1.bf16.msra.mxu0 %v11797_v58  ;;  %v11617_v39 = vcombine.low %v2202_v24, %v2206_v25  ;;  %v1847_v58 = vld [vmem:[#allocation8 + $0x30] sm:$0xff] }
 0x7d9   :  { %9023 = vmatprep.subr.bf16.mxu0 %v11798_v63  ;;  %v1879_v13 = vld [vmem:[#allocation8 + $0x130] sm:$0xff] }
 0x7db   :  { %8637 = vmatpush1.bf16.msra.mxu1 %v11605_v47  ;;  %v2222_v47 = vld [vmem:[#allocation8 + $0xbe8] sm:$0xff] }
 0x7dc   :  { %8639 = vmatprep.subr.bf16.mxu1 %v11606_v49  ;;  %9025 = vmatpush1.bf16.msra.mxu0 %v11799_v5  ;;  %v2208_v49 = vld [vmem:[#allocation8 + $0xb78] sm:$0xff]  ;;  %v11620_v57 = vcombine.high %v2218_v43, %v2222_v47  ;;  %v11621_v61 = vcombine.low %v2218_v43, %v2222_v47  ;;  %v1855_v5 = vld [vmem:[#allocation8 + $0x70] sm:$0xff]  ;;  %v11630_v43 = vcombine.high %v1875_v35, %v1879_v13 }
 0x7dd   :  { %9027 = vmatprep.subr.bf16.mxu0 %v11800_v10  ;;  %v11808_v51 = vcombine.high %v2204_v48, %v2208_v49  ;;  %v11809_v55 = vcombine.low %v2204_v48, %v2208_v49  ;;  %v1859_v10 = vld [vmem:[#allocation8 + $0x90] sm:$0xff]  ;;  %v3940_v48 = vld [vmem:[#allocation9 + $0x1a8] sm:$0xff] }
 0x7de   :  { %v1887_v47 = vld [vmem:[#allocation8 + $0x170] sm:$0xff]  ;;  %v3948_v49 = vld [vmem:[#allocation9 + $0x1e8] sm:$0xff] }
 0x7df   :  { %8641 = vmatpush1.bf16.msra.mxu1 %v11607_v44  ;;  %v1843_v44 = vld [vmem:[#allocation8 + $0x10] sm:$0xff] }
 0x7e0   :  { %8643 = vmatprep.subr.bf16.mxu1 %v11608_v59  ;;  %9029 = vmatpush1.bf16.msra.mxu0 %v11801_v16  ;;  %v2212_v59 = vld [vmem:[#allocation8 + $0xb98] sm:$0xff]  ;;  %v11622_v63 = vcombine.high %v1843_v44, %v1847_v58  ;;  %v11623_v56 = vcombine.low %v1843_v44, %v1847_v58  ;;  %v1891_v58 = vld [vmem:[#allocation8 + $0x190] sm:$0xff] }
 0x7e1   :  { %9031 = vmatprep.subr.bf16.mxu0 %v11802_v20  ;;  %v11810_v46 = vcombine.high %v2212_v59, %v2216_v60  ;;  %v11811_v62 = vcombine.low %v2212_v59, %v2216_v60  ;;  %v3899_v20 = vld [vmem:[#allocation9 + $0x60] sm:$0xff]  ;;  %v1895_v59 = vld [vmem:[#allocation8 + $0x1b0] sm:$0xff]  ;;  %v3956_v60 = vld [vmem:[#allocation9 + $0x228] sm:$0xff] }
 0x7e2   :  { %v1823_v9 = vpop.xlane.xlu0 %1822 }
 0x7e3   :  { %8645 = vmatpush1.bf16.msra.mxu1 %v11609_v3  ;;  %12231 = vrsqrt.f32 %v1823_v9  ;;  %vm1826_vm4 = vcmp.eq.f32.partialorder %v1823_v9, inf  ;;  %v1829_v38 = vand.u32 2147483648, %v1823_v9  ;;  %vm1828_vm5 = vcmp.eq.f32.partialorder %v1823_v9, 0.0  ;;  %v1851_v3 = vld [vmem:[#allocation8 + $0x50] sm:$0xff] }
 0x7e4   :  { %8647 = vmatprep.subr.bf16.mxu1 %v11610_v54  ;;  %9033 = vmatpush1.bf16.msra.mxu0 %v11803_v22  ;;  %v2220_v54 = vld [vmem:[#allocation8 + $0xbd8] sm:$0xff] }
 0x7e5   :  { %9035 = vmatprep.subr.bf16.mxu0 %v11804_v33  ;;  %v11812_v7 = vcombine.high %v2220_v54, %v2224_v6  ;;  %v11813_v8 = vcombine.low %v2220_v54, %v2224_v6  ;;  %v12502_v22 = vld [vmem:[#allocation6 + $0x8] sm:$0xff]  ;;  %v3908_v33 = vld [vmem:[#allocation9 + $0xa8] sm:$0xff]  ;;  %v11634_v54 = vcombine.high %v1891_v58, %v1895_v59  ;;  %v1899_v6 = vld [vmem:[#allocation8 + $0x1d0] sm:$0xff] }
 0x7e7   :  { %8649 = vmatpush1.bf16.msra.mxu1 %v11611_v11  ;;  %v1863_v11 = vld [vmem:[#allocation8 + $0xb0] sm:$0xff] }
 0x7e8   :  { %8651 = vmatprep.subr.bf16.mxu1 %v11612_v12  ;;  %9037 = vmatpush1.bf16.msra.mxu0 %v11805_v29  ;;  %v3892_v12 = vld [vmem:[#allocation9 + $0x28] sm:$0xff]  ;;  %v11626_v25 = vcombine.high %v1859_v10, %v1863_v11 }
 0x7e9   :  { %9039 = vmatprep.subr.bf16.mxu0 %v11806_v37  ;;  %v13096_v18 = vpack.c.bf16 %v3900_v15, %v3892_v12  ;;  %v3932_v37 = vld [vmem:[#allocation9 + $0x168] sm:$0xff]  ;;  %v3971_v12 = vld [vmem:[#allocation9 + $0x2a0] sm:$0xff] }
 0x7ea   :  { %v3979_v15 = vld [vmem:[#allocation9 + $0x2e0] sm:$0xff] }
 0x7eb   :  { %8653 = vmatpush1.bf16.msra.mxu1 %v11613_v21  ;;  %14999 = vst [vmem:[#allocation31_spill] sm:$0xff] %v13096_v18  ;;  %v11625_v21 = vcombine.low %v1851_v3, %v1855_v5 }
 0x7ec   :  { %8655 = vmatprep.subr.bf16.mxu1 %v11614_v23  ;;  %9041 = vmatpush1.bf16.msra.mxu0 %v11807_v40  ;;  %v13098_v23 = vpack.c.bf16 %v3899_v20, %v3891_v19  ;;  %v3931_v40 = vld [vmem:[#allocation9 + $0x160] sm:$0xff]  ;;  %v1907_v20 = vld [vmem:[#allocation8 + $0x210] sm:$0xff] }
 0x7ed   :  { %v12232_v32 = vpop.eup %12231  ;;  %9043 = vmatprep.subr.bf16.mxu0 %v11808_v51  ;;  %v3939_v51 = vld [vmem:[#allocation9 + $0x1a0] sm:$0xff] }
 0x7ee   :  { %v1825_v36 = vmul.f32 %v12232_v32, %v1823_v9 }
 0x7ef   :  { %8657 = vmatpush1.bf16.msra.mxu1 %v11615_v28  ;;  %v3916_v28 = vld [vmem:[#allocation9 + $0xe8] sm:$0xff] }
 0x7f0   :  { %v1827_v41 = vsel %vm1826_vm4, %v1823_v9, %v1825_v36  ;;  %8659 = vmatprep.subr.bf16.mxu1 %v11616_v30  ;;  %9045 = vmatpush1.bf16.msra.mxu0 %v11809_v55  ;;  %v11624_v9 = vcombine.high %v1851_v3, %v1855_v5  ;;  %v13103_v29 = vpack.c.bf16 %v3916_v28, %v3908_v33  ;;  %v3907_v30 = vld [vmem:[#allocation9 + $0xa0] sm:$0xff]  ;;  %v3924_v36 = vld [vmem:[#allocation9 + $0x128] sm:$0xff] }
 0x7f1   :  { %v1830_v45 = vsel %vm1828_vm5, %v1829_v38, %v1827_v41  ;;  %9047 = vmatprep.subr.bf16.mxu0 %v11810_v46  ;;  %v13106_v32 = vpack.c.bf16 %v3915_v31, %v3907_v30  ;;  %v13110_v38 = vpack.c.bf16 %v3932_v37, %v3924_v36  ;;  %v11629_v41 = vcombine.low %v1867_v26, %v1871_v27  ;;  %v3964_v46 = vld [vmem:[#allocation9 + $0x268] sm:$0xff]  ;;  %v3987_v26 = vld [vmem:[#allocation9 + $0x320] sm:$0xff]  ;;  %v1915_v31 = vld [vmem:[#allocation8 + $0x250] sm:$0xff] }
 0x7f2   :  { %v1831_v50 = vadd.f32 1e-08, %v1830_v45  ;;  %v1883_v45 = vld [vmem:[#allocation8 + $0x150] sm:$0xff]  ;;  %v11631_v55 = vcombine.low %v1875_v35, %v1879_v13  ;;  %v3995_v27 = vld [vmem:[#allocation9 + $0x360] sm:$0xff]  ;;  %v4012_v35 = vld [vmem:[#allocation9 + $0x3e8] sm:$0xff] }
 0x7f3   :  { %8661 = vmatpush1.bf16.msra.mxu1 %v11617_v39  ;;  %15000 = vst [vmem:[#allocation32_spill] sm:$0xff] %v13110_v38  ;;  %v3923_v39 = vld [vmem:[#allocation9 + $0x120] sm:$0xff]  ;;  %v11632_v44 = vcombine.high %v1883_v45, %v1887_v47  ;;  %v11633_v3 = vcombine.low %v1883_v45, %v1887_v47  ;;  %v13140_v28 = vpack.c.bf16 %v3995_v27, %v3987_v26  ;;  %v1927_v45 = vld [vmem:[#allocation8 + $0x2b0] sm:$0xff]  ;;  %v4020_v47 = vld [vmem:[#allocation9 + $0x428] sm:$0xff] }
 0x7f4   :  { %12233 = vrcp.f32 %v1831_v50  ;;  %8663 = vmatprep.subr.bf16.mxu1 %v11618_v42  ;;  %9049 = vmatpush1.bf16.msra.mxu0 %v11811_v62  ;;  %v13112_v42 = vpack.c.bf16 %v3931_v40, %v3923_v39  ;;  %v13116_v50 = vpack.c.bf16 %v3948_v49, %v3940_v48  ;;  %v3955_v62 = vld [vmem:[#allocation9 + $0x220] sm:$0xff]  ;;  %v4028_v48 = vld [vmem:[#allocation9 + $0x468] sm:$0xff]  ;;  %v1947_v27 = vld [vmem:[#allocation8 + $0x350] sm:$0xff] }
 0x7f5   :  { %9051 = vmatprep.subr.bf16.mxu0 %v11812_v7  ;;  %15009 = vst [vmem:[#allocation41_spill] sm:$0xff] %v13140_v28  ;;  %v4003_v36 = vld [vmem:[#allocation9 + $0x3a0] sm:$0xff]  ;;  %v13150_v49 = vpack.c.bf16 %v4028_v48, %v4020_v47  ;;  %v4092_v47 = vld [vmem:[#allocation9 + $0x668] sm:$0xff] }
 0x7f6   :  { %15001 = vst [vmem:[#allocation33_spill] sm:$0xff] %v13112_v42  ;;  %15002 = vst [vmem:[#allocation34_spill] sm:$0xff] %v13116_v50  ;;  %v4011_v37 = vld [vmem:[#allocation9 + $0x3e0] sm:$0xff] }
 0x7f7   :  { %8665 = vmatpush1.bf16.msra.mxu1 %v11619_v53  ;;  %v3947_v53 = vld [vmem:[#allocation9 + $0x1e0] sm:$0xff]  ;;  %v13146_v40 = vpack.c.bf16 %v4011_v37, %v4003_v36  ;;  %15012 = vst [vmem:[#allocation44_spill] sm:$0xff] %v13150_v49 }
 0x7f8   :  { %8667 = vmatprep.subr.bf16.mxu1 %v11620_v57  ;;  %9053 = vmatpush1.bf16.msra.mxu0 %v11813_v8  ;;  %v13118_v57 = vpack.c.bf16 %v3947_v53, %v3939_v51  ;;  %v3972_v8 = vld [vmem:[#allocation9 + $0x2a8] sm:$0xff]  ;;  %v4019_v51 = vld [vmem:[#allocation9 + $0x420] sm:$0xff] }
 0x7f9   :  { %9183 = vmatprep.subr.bf16.mxu0 %v13096_v18  ;;  %15011 = vst [vmem:[#allocation43_spill] sm:$0xff] %v13146_v40  ;;  %v4027_v53 = vld [vmem:[#allocation9 + $0x460] sm:$0xff] }
 0x7fa   :  { %15003 = vst [vmem:[#allocation35_spill] sm:$0xff] %v13118_v57 }
 0x7fb   :  { %8669 = vmatpush1.bf16.msra.mxu1 %v11621_v61  ;;  %3881 = vmatmul.mubr.f32.vlgmr.msra.gmra.mrb[2].mxu0 %v12501_v17  ;;  %v13122_v61 = vpack.c.bf16 %v3964_v46, %v3956_v60  ;;  %v1935_v60 = vld [vmem:[#allocation8 + $0x2f0] sm:$0xff]  ;;  %v4036_v46 = vld [vmem:[#allocation9 + $0x4a8] sm:$0xff] }
 0x7fc   :  { %8671 = vmatprep.subr.bf16.mxu1 %v11622_v63  ;;  %9185 = vmatpush1.bf16.msra.mxu0 %v13098_v23  ;;  %v3963_v63 = vld [vmem:[#allocation9 + $0x260] sm:$0xff] }
 0x7fd   :  { %4349 = vmatprep.mubr.f32.mxu0 %v14700_v14  ;;  %9187 = vmatprep.subr.bf16.mxu0 %v13103_v29  ;;  %15004 = vst [vmem:[#allocation36_spill] sm:$0xff] %v13122_v61  ;;  %v13124_v5 = vpack.c.bf16 %v3963_v63, %v3955_v62  ;;  %v4044_v62 = vld [vmem:[#allocation9 + $0x4e8] sm:$0xff] }
 0x7fe   :  { %v12234_v16 = vpop.eup %12233  ;;  %3455 = vmatmul.mubr.f32.vlgmr.msra.gmra.mrb[8].mxu1 %v12501_v17  ;;  %v13134_v17 = vpack.c.bf16 %v3979_v15, %v3971_v12  ;;  %v13156_v63 = vpack.c.bf16 %v4044_v62, %v4036_v46  ;;  %v1943_v12 = vld [vmem:[#allocation8 + $0x330] sm:$0xff]  ;;  %v4052_v15 = vld [vmem:[#allocation9 + $0x528] sm:$0xff] }
 0x7ff   :  { %8673 = vmatpush1.bf16.msra.mxu1 %v11623_v56  ;;  %3525 = vmatprep.mubr.f32.mxu1 %v12502_v22  ;;  %v1833_v24 = vmul.f32 %v12234_v16, %v13085_v52  ;;  %v11627_v52 = vcombine.low %v1859_v10, %v1863_v11  ;;  %15005 = vst [vmem:[#allocation37_spill] sm:$0xff] %v13124_v5  ;;  %v1903_v56 = vld [vmem:[#allocation8 + $0x1f0] sm:$0xff]  ;;  %v3988_v22 = vld [vmem:[#allocation9 + $0x328] sm:$0xff] }
 0x800   :  { %8675 = vmatprep.subr.bf16.mxu1 %v11624_v9  ;;  %9189 = vmatpush1.bf16.msra.mxu0 %v13106_v32  ;;  %v3980_v9 = vld [vmem:[#allocation9 + $0x2e8] sm:$0xff]  ;;  %v11635_v16 = vcombine.low %v1891_v58, %v1895_v59  ;;  %15007 = vst [vmem:[#allocation39_spill] sm:$0xff] %v13134_v17  ;;  %v11636_v19 = vcombine.high %v1899_v6, %v1903_v56  ;;  %v1931_v59 = vld [vmem:[#allocation8 + $0x2d0] sm:$0xff]  ;;  %15014 = vst [vmem:[#allocation46_spill] sm:$0xff] %v13156_v63 }
 0x801   :  { %1834 = vst [vmem:[#allocation20] sm:$0xf] %v1833_v24  ;;  %9191 = vmatprep.subr.bf16.mxu0 %v13110_v38  ;;  %v13132_v11 = vpack.c.bf16 %v3980_v9, %v3972_v8  ;;  %v3996_v24 = vld [vmem:[#allocation9 + $0x368] sm:$0xff]  ;;  %v11637_v33 = vcombine.low %v1899_v6, %v1903_v56  ;;  %v11644_v8 = vcombine.high %v1931_v59, %v1935_v60  ;;  %v1939_v9 = vld [vmem:[#allocation8 + $0x310] sm:$0xff] }
 0x802   :  { %v11646_v26 = vcombine.high %v1939_v9, %v1943_v12  ;;  %v11647_v36 = vcombine.low %v1939_v9, %v1943_v12  ;;  %v1967_v46 = vld [vmem:[#allocation8 + $0x3f0] sm:$0xff]  ;;  %v4100_v62 = vld [vmem:[#allocation9 + $0x6a8] sm:$0xff] }
 0x803   :  { %8677 = vmatpush1.bf16.msra.mxu1 %v11625_v21  ;;  %15006 = vst [vmem:[#allocation38_spill] sm:$0xff] %v13132_v11  ;;  %v1911_v21 = vld [vmem:[#allocation8 + $0x230] sm:$0xff] }
 0x804   :  { %8679 = vmatprep.subr.bf16.mxu1 %v11626_v25  ;;  %9193 = vmatpush1.bf16.msra.mxu0 %v13112_v42  ;;  %v13138_v25 = vpack.c.bf16 %v3996_v24, %v3988_v22  ;;  %v11638_v30 = vcombine.high %v1907_v20, %v1911_v21  ;;  %v11639_v39 = vcombine.low %v1907_v20, %v1911_v21  ;;  %v4051_v20 = vld [vmem:[#allocation9 + $0x520] sm:$0xff]  ;;  %v3957_v42 = vld [vmem:[#allocation9 + $0x230] sm:$0xff] }
 0x805   :  { %9195 = vmatprep.subr.bf16.mxu0 %v13116_v50  ;;  %v4059_v21 = vld [vmem:[#allocation9 + $0x560] sm:$0xff]  ;;  %v11645_v22 = vcombine.low %v1931_v59, %v1935_v60  ;;  %v1963_v60 = vld [vmem:[#allocation8 + $0x3d0] sm:$0xff]  ;;  %v3966_v50 = vld [vmem:[#allocation9 + $0x278] sm:$0xff] }
 0x806   :  { %15008 = vst [vmem:[#allocation40_spill] sm:$0xff] %v13138_v25  ;;  %v13164_v24 = vpack.c.bf16 %v4059_v21, %v4051_v20  ;;  %v1975_v20 = vld [vmem:[#allocation8 + $0x430] sm:$0xff]  ;;  %v4116_v21 = vld [vmem:[#allocation9 + $0x728] sm:$0xff] }
 0x807   :  { %8681 = vmatpush1.bf16.msra.mxu1 %v11627_v52  ;;  %v1919_v52 = vld [vmem:[#allocation8 + $0x270] sm:$0xff] }
 0x808   :  { %8683 = vmatprep.subr.bf16.mxu1 %v11628_v34  ;;  %9197 = vmatpush1.bf16.msra.mxu0 %v13118_v57  ;;  %v4004_v34 = vld [vmem:[#allocation9 + $0x3a8] sm:$0xff]  ;;  %15017 = vst [vmem:[#allocation49_spill] sm:$0xff] %v13164_v24  ;;  %v3958_v57 = vld [vmem:[#allocation9 + $0x238] sm:$0xff]  ;;  %v3965_v38 = vld [vmem:[#allocation9 + $0x270] sm:$0xff] }
 0x809   :  { %9199 = vmatprep.subr.bf16.mxu0 %v13122_v61  ;;  %v13144_v13 = vpack.c.bf16 %v4012_v35, %v4004_v34  ;;  %v4067_v34 = vld [vmem:[#allocation9 + $0x5a0] sm:$0xff] }
 0x80a   :  { %v4075_v35 = vld [vmem:[#allocation9 + $0x5e0] sm:$0xff] }
 0x80b   :  { %8685 = vmatpush1.bf16.msra.mxu1 %v11629_v41  ;;  %15010 = vst [vmem:[#allocation42_spill] sm:$0xff] %v13144_v13  ;;  %v11640_v41 = vcombine.high %v1915_v31, %v1919_v52  ;;  %v13170_v37 = vpack.c.bf16 %v4075_v35, %v4067_v34  ;;  %v1979_v35 = vld [vmem:[#allocation8 + $0x450] sm:$0xff] }
 0x80c   :  { %8687 = vmatprep.subr.bf16.mxu1 %v11630_v43  ;;  %9201 = vmatpush1.bf16.msra.mxu0 %v13124_v5  ;;  %v1923_v43 = vld [vmem:[#allocation8 + $0x290] sm:$0xff] }
 0x80d   :  { %9203 = vmatprep.subr.bf16.mxu0 %v13132_v11  ;;  %v11642_v58 = vcombine.high %v1923_v43, %v1927_v45  ;;  %v11643_v6 = vcombine.low %v1923_v43, %v1927_v45  ;;  %15019 = vst [vmem:[#allocation51_spill] sm:$0xff] %v13170_v37  ;;  %v1959_v43 = vld [vmem:[#allocation8 + $0x3b0] sm:$0xff]  ;;  %v4084_v45 = vld [vmem:[#allocation9 + $0x628] sm:$0xff] }
 0x80e   :  { %v13174_v48 = vpack.c.bf16 %v4092_v47, %v4084_v45  ;;  %v4131_v45 = vld [vmem:[#allocation9 + $0x7a0] sm:$0xff]  ;;  %v3917_v11 = vld [vmem:[#allocation9 + $0xf0] sm:$0xff] }
 0x80f   :  { %8689 = vmatpush1.bf16.msra.mxu1 %v11631_v55  ;;  %v11641_v55 = vcombine.low %v1915_v31, %v1919_v52  ;;  %v4076_v31 = vld [vmem:[#allocation9 + $0x5e8] sm:$0xff]  ;;  %v4139_v47 = vld [vmem:[#allocation9 + $0x7e0] sm:$0xff] }
 0x810   :  { %8691 = vmatprep.subr.bf16.mxu1 %v11632_v44  ;;  %9205 = vmatpush1.bf16.msra.mxu0 %v13134_v17  ;;  %v13152_v44 = vpack.c.bf16 %v4027_v53, %v4019_v51  ;;  %15020 = vst [vmem:[#allocation52_spill] sm:$0xff] %v13174_v48  ;;  %v4083_v51 = vld [vmem:[#allocation9 + $0x620] sm:$0xff] }
 0x811   :  { %v13127_v7 = vpop.f32.mrb[6].mxu1  ;;  %9207 = vmatprep.subr.bf16.mxu0 %v13138_v25  ;;  %v4091_v53 = vld [vmem:[#allocation9 + $0x660] sm:$0xff] }
 0x812   :  { %v13129_v10 = vpop.f32.mrb[7].mxu1  ;;  %15013 = vst [vmem:[#allocation45_spill] sm:$0xff] %v13152_v44  ;;  %v12505_v25 = vld [vmem:[#allocation6 + $0x10] sm:$0xff] }
 0x813   :  { %8693 = vmatpush1.bf16.msra.mxu1 %v11633_v3  ;;  %v4035_v3 = vld [vmem:[#allocation9 + $0x4a0] sm:$0xff] }
 0x814   :  { %8695 = vmatprep.subr.bf16.mxu1 %v11634_v54  ;;  %9209 = vmatpush1.bf16.msra.mxu0 %v13140_v28  ;;  %v4043_v54 = vld [vmem:[#allocation9 + $0x4e0] sm:$0xff] }
 0x815   :  { %9211 = vmatprep.subr.bf16.mxu0 %v13144_v13  ;;  %v13158_v56 = vpack.c.bf16 %v4043_v54, %v4035_v3  ;;  %v4108_v3 = vld [vmem:[#allocation9 + $0x6e8] sm:$0xff] }
 0x816   :  { %v13180_v54 = vpack.c.bf16 %v4108_v3, %v4100_v62  ;;  %v1991_v62 = vld [vmem:[#allocation8 + $0x4b0] sm:$0xff]  ;;  %v3887_v3 = vld [vmem:[#allocation9] sm:$0xff] }
 0x817   :  { %8697 = vmatpush1.bf16.msra.mxu1 %v11635_v16  ;;  %15015 = vst [vmem:[#allocation47_spill] sm:$0xff] %v13158_v56  ;;  %v4060_v16 = vld [vmem:[#allocation9 + $0x568] sm:$0xff] }
 0x818   :  { %8699 = vmatprep.subr.bf16.mxu1 %v11636_v19  ;;  %9213 = vmatpush1.bf16.msra.mxu0 %v13146_v40  ;;  %v13162_v19 = vpack.c.bf16 %v4060_v16, %v4052_v15  ;;  %15022 = vst [vmem:[#allocation54_spill] sm:$0xff] %v13180_v54  ;;  %v11652_v15 = vcombine.high %v1963_v60, %v1967_v46  ;;  %v1971_v16 = vld [vmem:[#allocation8 + $0x410] sm:$0xff] }
 0x819   :  { %9215 = vmatprep.subr.bf16.mxu0 %v13150_v49  ;;  %v11654_v34 = vcombine.high %v1971_v16, %v1975_v20 }
 0x81a   :  { %15016 = vst [vmem:[#allocation48_spill] sm:$0xff] %v13162_v19 }
 0x81b   :  { %8701 = vmatpush1.bf16.msra.mxu1 %v11637_v33  ;;  %v1951_v33 = vld [vmem:[#allocation8 + $0x370] sm:$0xff] }
 0x81c   :  { %8703 = vmatprep.subr.bf16.mxu1 %v11638_v30  ;;  %9217 = vmatpush1.bf16.msra.mxu0 %v13152_v44  ;;  %v4068_v30 = vld [vmem:[#allocation9 + $0x5a8] sm:$0xff] }
 0x81d   :  { %9219 = vmatprep.subr.bf16.mxu0 %v13156_v63  ;;  %v13168_v52 = vpack.c.bf16 %v4076_v31, %v4068_v30  ;;  %v11653_v30 = vcombine.low %v1963_v60, %v1967_v46  ;;  %v1987_v46 = vld [vmem:[#allocation8 + $0x490] sm:$0xff] }
 0x81f   :  { %8705 = vmatpush1.bf16.msra.mxu1 %v11639_v39  ;;  %15018 = vst [vmem:[#allocation50_spill] sm:$0xff] %v13168_v52  ;;  %v11648_v39 = vcombine.high %v1947_v27, %v1951_v33 }
 0x820   :  { %8707 = vmatprep.subr.bf16.mxu1 %v11640_v41  ;;  %9221 = vmatpush1.bf16.msra.mxu0 %v13158_v56  ;;  %v1955_v41 = vld [vmem:[#allocation8 + $0x390] sm:$0xff] }
 0x821   :  { %9223 = vmatprep.subr.bf16.mxu0 %v13162_v19  ;;  %v11650_v59 = vcombine.high %v1955_v41, %v1959_v43  ;;  %v11651_v9 = vcombine.low %v1955_v41, %v1959_v43  ;;  %v4140_v41 = vld [vmem:[#allocation9 + $0x7e8] sm:$0xff] }
 0x823   :  { %8709 = vmatpush1.bf16.msra.mxu1 %v11641_v55  ;;  %v11649_v55 = vcombine.low %v1947_v27, %v1951_v33  ;;  %v4115_v27 = vld [vmem:[#allocation9 + $0x720] sm:$0xff] }
 0x824   :  { %8711 = vmatprep.subr.bf16.mxu1 %v11642_v58  ;;  %9225 = vmatpush1.bf16.msra.mxu0 %v13164_v24  ;;  %v13176_v58 = vpack.c.bf16 %v4091_v53, %v4083_v51  ;;  %v4123_v33 = vld [vmem:[#allocation9 + $0x760] sm:$0xff]  ;;  %v11655_v51 = vcombine.low %v1971_v16, %v1975_v20  ;;  %v13194_v53 = vpack.c.bf16 %v4139_v47, %v4131_v45  ;;  %v12504_v16 = vld [vmem:[#allocation6 + $0x18] sm:$0xff] }
 0x825   :  { %9227 = vmatprep.subr.bf16.mxu0 %v13168_v52  ;;  %v13188_v31 = vpack.c.bf16 %v4123_v33, %v4115_v27  ;;  %v3904_v20 = vld [vmem:[#allocation9 + $0x88] sm:$0xff]  ;;  %v1995_v27 = vld [vmem:[#allocation8 + $0x4d0] sm:$0xff] }
 0x826   :  { %15021 = vst [vmem:[#allocation53_spill] sm:$0xff] %v13176_v58  ;;  %15027 = vst [vmem:[#allocation59_spill] sm:$0xff] %v13194_v53  ;;  %v3928_v45 = vld [vmem:[#allocation9 + $0x148] sm:$0xff] }
 0x827   :  { %8713 = vmatpush1.bf16.msra.mxu1 %v11643_v6  ;;  %v4099_v6 = vld [vmem:[#allocation9 + $0x6a0] sm:$0xff]  ;;  %15025 = vst [vmem:[#allocation57_spill] sm:$0xff] %v13188_v31 }
 0x828   :  { %8715 = vmatprep.subr.bf16.mxu1 %v11644_v8  ;;  %9229 = vmatpush1.bf16.msra.mxu0 %v13170_v37  ;;  %v4107_v8 = vld [vmem:[#allocation9 + $0x6e0] sm:$0xff] }
 0x829   :  { %9231 = vmatprep.subr.bf16.mxu0 %v13174_v48  ;;  %v13182_v12 = vpack.c.bf16 %v4107_v8, %v4099_v6  ;;  %v3895_v6 = vld [vmem:[#allocation9 + $0x40] sm:$0xff]  ;;  %v12503_v8 = vld [vmem:[#allocation6] sm:$0xff] }
 0x82a   :  { %v13200_v33 = vpack.c.bf16 %v3895_v6, %v3887_v3  ;;  %v3919_v3 = vld [vmem:[#allocation9 + $0x100] sm:$0xff] }
 0x82b   :  { %8717 = vmatpush1.bf16.msra.mxu1 %v11645_v22  ;;  %15023 = vst [vmem:[#allocation55_spill] sm:$0xff] %v13182_v12  ;;  %v4124_v22 = vld [vmem:[#allocation9 + $0x768] sm:$0xff]  ;;  %v3927_v6 = vld [vmem:[#allocation9 + $0x140] sm:$0xff] }
 0x82c   :  { %8719 = vmatprep.subr.bf16.mxu1 %v11646_v26  ;;  %9233 = vmatpush1.bf16.msra.mxu0 %v13176_v58  ;;  %v13186_v26 = vpack.c.bf16 %v4124_v22, %v4116_v21  ;;  %v3912_v21 = vld [vmem:[#allocation9 + $0xc8] sm:$0xff]  ;;  %v11658_v22 = vcombine.high %v1987_v46, %v1991_v62  ;;  %15029 = vst [vmem:[#allocation61_spill] sm:$0xff] %v13200_v33 }
 0x82d   :  { %9235 = vmatprep.subr.bf16.mxu0 %v13180_v54 }
 0x82e   :  { %15024 = vst [vmem:[#allocation56_spill] sm:$0xff] %v13186_v26 }
 0x82f   :  { %8721 = vmatpush1.bf16.msra.mxu1 %v11647_v36  ;;  %v1983_v36 = vld [vmem:[#allocation8 + $0x470] sm:$0xff] }
 0x830   :  { %8723 = vmatprep.subr.bf16.mxu1 %v11648_v39  ;;  %9237 = vmatpush1.bf16.msra.mxu0 %v13182_v12  ;;  %v4132_v39 = vld [vmem:[#allocation9 + $0x7a8] sm:$0xff]  ;;  %v11656_v60 = vcombine.high %v1979_v35, %v1983_v36 }
 0x831   :  { %9239 = vmatprep.subr.bf16.mxu0 %v13186_v26  ;;  %v13192_v43 = vpack.c.bf16 %v4140_v41, %v4132_v39  ;;  %v3903_v39 = vld [vmem:[#allocation9 + $0x80] sm:$0xff] }
 0x832   :  { %v3911_v41 = vld [vmem:[#allocation9 + $0xc0] sm:$0xff] }
 0x833   :  { %8725 = vmatpush1.bf16.msra.mxu1 %v11649_v55  ;;  %15026 = vst [vmem:[#allocation58_spill] sm:$0xff] %v13192_v43  ;;  %v3888_v55 = vld [vmem:[#allocation9 + $0x8] sm:$0xff] }
 0x834   :  { %8727 = vmatprep.subr.bf16.mxu1 %v11650_v59  ;;  %9241 = vmatpush1.bf16.msra.mxu0 %v13188_v31  ;;  %v3896_v59 = vld [vmem:[#allocation9 + $0x48] sm:$0xff] }
 0x835   :  { %9243 = vmatprep.subr.bf16.mxu0 %v13192_v43 }
 0x837   :  { %8729 = vmatpush1.bf16.msra.mxu1 %v11651_v9  ;;  %v13198_v9 = vpack.c.bf16 %v3896_v59, %v3888_v55  ;;  %v13208_v55 = vpack.c.bf16 %v3911_v41, %v3903_v39  ;;  %v2007_v59 = vld [vmem:[#allocation8 + $0x530] sm:$0xff]  ;;  %v3935_v39 = vld [vmem:[#allocation9 + $0x180] sm:$0xff] }
 0x838   :  { %8731 = vmatprep.subr.bf16.mxu1 %v11652_v15  ;;  %9245 = vmatpush1.bf16.msra.mxu0 %v13194_v53  ;;  %v11657_v15 = vcombine.low %v1979_v35, %v1983_v36  ;;  %v11659_v35 = vcombine.low %v1987_v46, %v1991_v62  ;;  %v3920_v36 = vld [vmem:[#allocation9 + $0x108] sm:$0xff]  ;;  %v3943_v41 = vld [vmem:[#allocation9 + $0x1c0] sm:$0xff] }
 0x839   :  { %15028 = vst [vmem:[#allocation60_spill] sm:$0xff] %v13198_v9  ;;  %9311 = vmatprep.subr.bf16.mxu0 %v13198_v9  ;;  %15031 = vst [vmem:[#allocation63_spill] sm:$0xff] %v13208_v55  ;;  %v3944_v46 = vld [vmem:[#allocation9 + $0x1c8] sm:$0xff] }
 0x83b   :  { %8733 = vmatpush1.bf16.msra.mxu1 %v11653_v30  ;;  %v1999_v30 = vld [vmem:[#allocation8 + $0x4f0] sm:$0xff]  ;;  %4350 = vmatmul.mubr.f32.vlgmr.msra.gmra.mrb[4].mxu0 %v14700_v14 }
 0x83c   :  { %8735 = vmatprep.subr.bf16.mxu1 %v11654_v34  ;;  %v13204_v34 = vpack.c.bf16 %v3912_v21, %v3904_v20  ;;  %9313 = vmatpush1.bf16.msra.mxu0 %v13200_v33  ;;  %v11660_v47 = vcombine.high %v1995_v27, %v1999_v30  ;;  %v13214_v20 = vpack.c.bf16 %v3927_v6, %v3919_v3  ;;  %v2015_v21 = vld [vmem:[#allocation8 + $0x570] sm:$0xff] }
 0x83d   :  { %v2023_v3 = vld [vmem:[#allocation8 + $0x5b0] sm:$0xff] }
 0x83e   :  { %3526 = vmatmul.mubr.f32.vlgmr.msra.gmra.mrb[10].mxu1 %v12503_v8  ;;  %15030 = vst [vmem:[#allocation62_spill] sm:$0xff] %v13204_v34  ;;  %9315 = vmatprep.subr.bf16.mxu0 %v13204_v34  ;;  %v11661_v8 = vcombine.low %v1995_v27, %v1999_v30  ;;  %15033 = vst [vmem:[#allocation65_spill] sm:$0xff] %v13214_v20  ;;  %v3960_v27 = vld [vmem:[#allocation9 + $0x248] sm:$0xff] }
 0x83f   :  { %8737 = vmatpush1.bf16.msra.mxu1 %v11655_v51  ;;  %3596 = vmatprep.mubr.f32.mxu1 %v12504_v16  ;;  %v2003_v51 = vld [vmem:[#allocation8 + $0x510] sm:$0xff] }
 0x840   :  { %8739 = vmatprep.subr.bf16.mxu1 %v11656_v60  ;;  %v13210_v60 = vpack.c.bf16 %v3928_v45, %v3920_v36  ;;  %9317 = vmatpush1.bf16.msra.mxu0 %v13208_v55  ;;  %v11662_v62 = vcombine.high %v2003_v51, %v2007_v59  ;;  %v2011_v16 = vld [vmem:[#allocation8 + $0x550] sm:$0xff]  ;;  %v11663_v36 = vcombine.low %v2003_v51, %v2007_v59  ;;  %v3976_v51 = vld [vmem:[#allocation9 + $0x2c8] sm:$0xff] }
 0x841   :  { %v11664_v30 = vcombine.high %v2011_v16, %v2015_v21  ;;  %v2019_v45 = vld [vmem:[#allocation8 + $0x590] sm:$0xff]  ;;  %v11665_v0 = vcombine.low %v2011_v16, %v2015_v21  ;;  %v3992_v16 = vld [vmem:[#allocation9 + $0x348] sm:$0xff] }
 0x842   :  { %15032 = vst [vmem:[#allocation64_spill] sm:$0xff] %v13210_v60  ;;  %9319 = vmatprep.subr.bf16.mxu0 %v13210_v60  ;;  %v11666_v59 = vcombine.high %v2019_v45, %v2023_v3  ;;  %v11667_v2 = vcombine.low %v2019_v45, %v2023_v3  ;;  %v4008_v45 = vld [vmem:[#allocation9 + $0x3c8] sm:$0xff] }
 0x843   :  { %8741 = vmatpush1.bf16.msra.mxu1 %v11657_v15  ;;  %v3936_v15 = vld [vmem:[#allocation9 + $0x188] sm:$0xff] }
 0x844   :  { %8743 = vmatprep.subr.bf16.mxu1 %v11658_v22  ;;  %v13216_v22 = vpack.c.bf16 %v3944_v46, %v3936_v15  ;;  %9321 = vmatpush1.bf16.msra.mxu0 %v13214_v20  ;;  %v3951_v15 = vld [vmem:[#allocation9 + $0x200] sm:$0xff] }
 0x845   :  { %v3959_v46 = vld [vmem:[#allocation9 + $0x240] sm:$0xff] }
 0x846   :  { %15034 = vst [vmem:[#allocation66_spill] sm:$0xff] %v13216_v22  ;;  %9323 = vmatprep.subr.bf16.mxu0 %v13216_v22  ;;  %v13226_v4 = vpack.c.bf16 %v3959_v46, %v3951_v15  ;;  %v2039_v15 = vld [vmem:[#allocation8 + $0x630] sm:$0xff] }
 0x847   :  { %8745 = vmatpush1.bf16.msra.mxu1 %v11659_v35  ;;  %v3952_v35 = vld [vmem:[#allocation9 + $0x208] sm:$0xff] }
 0x848   :  { %8747 = vmatprep.subr.bf16.mxu1 %v11660_v47  ;;  %v13220_v47 = vpack.c.bf16 %v3943_v41, %v3935_v39  ;;  %v13222_v6 = vpack.c.bf16 %v3960_v27, %v3952_v35  ;;  %15037 = vst [vmem:[#allocation69_spill] sm:$0xff] %v13226_v4  ;;  %v2031_v39 = vld [vmem:[#allocation8 + $0x5f0] sm:$0xff]  ;;  %v3967_v35 = vld [vmem:[#allocation9 + $0x280] sm:$0xff] }
 0x849   :  { %v3975_v27 = vld [vmem:[#allocation9 + $0x2c0] sm:$0xff] }
 0x84a   :  { %15035 = vst [vmem:[#allocation67_spill] sm:$0xff] %v13220_v47  ;;  %15036 = vst [vmem:[#allocation68_spill] sm:$0xff] %v13222_v6  ;;  %9325 = vmatpush1.bf16.msra.mxu0 %v13220_v47  ;;  %v13232_v14 = vpack.c.bf16 %v3975_v27, %v3967_v35  ;;  %v2047_v35 = vld [vmem:[#allocation8 + $0x670] sm:$0xff] }
 0x84b   :  { %8749 = vmatpush1.bf16.msra.mxu1 %v11661_v8  ;;  %v3968_v8 = vld [vmem:[#allocation9 + $0x288] sm:$0xff]  ;;  %9327 = vmatprep.subr.bf16.mxu0 %v13222_v6 }
 0x84c   :  { %8751 = vmatprep.subr.bf16.mxu1 %v11662_v62  ;;  %v2027_v62 = vld [vmem:[#allocation8 + $0x5d0] sm:$0xff]  ;;  %v13228_v41 = vpack.c.bf16 %v3976_v51, %v3968_v8  ;;  %15039 = vst [vmem:[#allocation71_spill] sm:$0xff] %v13232_v14  ;;  %v3983_v8 = vld [vmem:[#allocation9 + $0x300] sm:$0xff] }
 0x84d   :  { %v11668_v21 = vcombine.high %v2027_v62, %v2031_v39  ;;  %v3991_v51 = vld [vmem:[#allocation9 + $0x340] sm:$0xff]  ;;  %v11669_v53 = vcombine.low %v2027_v62, %v2031_v39  ;;  %v4024_v62 = vld [vmem:[#allocation9 + $0x448] sm:$0xff] }
 0x84e   :  { %15038 = vst [vmem:[#allocation70_spill] sm:$0xff] %v13228_v41  ;;  %9329 = vmatpush1.bf16.msra.mxu0 %v13226_v4  ;;  %v13238_v43 = vpack.c.bf16 %v3991_v51, %v3983_v8  ;;  %v2055_v8 = vld [vmem:[#allocation8 + $0x6b0] sm:$0xff] }
 0x84f   :  { %8753 = vmatpush1.bf16.msra.mxu1 %v11663_v36  ;;  %v3984_v36 = vld [vmem:[#allocation9 + $0x308] sm:$0xff]  ;;  %9331 = vmatprep.subr.bf16.mxu0 %v13228_v41 }
 0x850   :  { %8755 = vmatprep.subr.bf16.mxu1 %v11664_v30  ;;  %v2035_v30 = vld [vmem:[#allocation8 + $0x610] sm:$0xff]  ;;  %v13234_v46 = vpack.c.bf16 %v3992_v16, %v3984_v36  ;;  %15041 = vst [vmem:[#allocation73_spill] sm:$0xff] %v13238_v43  ;;  %v3999_v36 = vld [vmem:[#allocation9 + $0x380] sm:$0xff] }
 0x851   :  { %v11670_v3 = vcombine.high %v2035_v30, %v2039_v15  ;;  %v4007_v16 = vld [vmem:[#allocation9 + $0x3c0] sm:$0xff]  ;;  %v11671_v31 = vcombine.low %v2035_v30, %v2039_v15  ;;  %v4040_v30 = vld [vmem:[#allocation9 + $0x4c8] sm:$0xff] }
 0x852   :  { %15040 = vst [vmem:[#allocation72_spill] sm:$0xff] %v13234_v46  ;;  %9333 = vmatpush1.bf16.msra.mxu0 %v13232_v14  ;;  %v13244_v26 = vpack.c.bf16 %v4007_v16, %v3999_v36  ;;  %v2063_v36 = vld [vmem:[#allocation8 + $0x6f0] sm:$0xff] }
 0x853   :  { %8757 = vmatpush1.bf16.msra.mxu1 %v11665_v0  ;;  %v4000_v0 = vld [vmem:[#allocation9 + $0x388] sm:$0xff]  ;;  %9335 = vmatprep.subr.bf16.mxu0 %v13234_v46 }
 0x854   :  { %8759 = vmatprep.subr.bf16.mxu1 %v11666_v59  ;;  %v2043_v59 = vld [vmem:[#allocation8 + $0x650] sm:$0xff]  ;;  %v13240_v27 = vpack.c.bf16 %v4008_v45, %v4000_v0  ;;  %15043 = vst [vmem:[#allocation75_spill] sm:$0xff] %v13244_v26  ;;  %v4015_v0 = vld [vmem:[#allocation9 + $0x400] sm:$0xff] }
 0x855   :  { %v11672_v39 = vcombine.high %v2043_v59, %v2047_v35  ;;  %v4023_v45 = vld [vmem:[#allocation9 + $0x440] sm:$0xff]  ;;  %v11673_v12 = vcombine.low %v2043_v59, %v2047_v35  ;;  %v4056_v59 = vld [vmem:[#allocation9 + $0x548] sm:$0xff] }
 0x856   :  { %15042 = vst [vmem:[#allocation74_spill] sm:$0xff] %v13240_v27  ;;  %9337 = vmatpush1.bf16.msra.mxu0 %v13238_v43  ;;  %v13250_v54 = vpack.c.bf16 %v4023_v45, %v4015_v0  ;;  %v2071_v0 = vld [vmem:[#allocation8 + $0x730] sm:$0xff] }
 0x857   :  { %8761 = vmatpush1.bf16.msra.mxu1 %v11667_v2  ;;  %v4016_v2 = vld [vmem:[#allocation9 + $0x408] sm:$0xff]  ;;  %9339 = vmatprep.subr.bf16.mxu0 %v13240_v27 }
 0x858   :  { %8763 = vmatprep.subr.bf16.mxu1 %v11668_v21  ;;  %v2051_v21 = vld [vmem:[#allocation8 + $0x690] sm:$0xff]  ;;  %v13246_v51 = vpack.c.bf16 %v4024_v62, %v4016_v2  ;;  %15045 = vst [vmem:[#allocation77_spill] sm:$0xff] %v13250_v54  ;;  %v4031_v2 = vld [vmem:[#allocation9 + $0x480] sm:$0xff] }
 0x859   :  { %v11674_v15 = vcombine.high %v2051_v21, %v2055_v8  ;;  %v4039_v62 = vld [vmem:[#allocation9 + $0x4c0] sm:$0xff]  ;;  %v11675_v58 = vcombine.low %v2051_v21, %v2055_v8  ;;  %v4072_v21 = vld [vmem:[#allocation9 + $0x5c8] sm:$0xff] }
 0x85a   :  { %15044 = vst [vmem:[#allocation76_spill] sm:$0xff] %v13246_v51  ;;  %9341 = vmatpush1.bf16.msra.mxu0 %v13244_v26  ;;  %v13256_v48 = vpack.c.bf16 %v4039_v62, %v4031_v2  ;;  %v2079_v2 = vld [vmem:[#allocation8 + $0x770] sm:$0xff] }
 0x85b   :  { %8765 = vmatpush1.bf16.msra.mxu1 %v11669_v53  ;;  %v4032_v53 = vld [vmem:[#allocation9 + $0x488] sm:$0xff]  ;;  %9343 = vmatprep.subr.bf16.mxu0 %v13246_v51 }
 0x85c   :  { %8767 = vmatprep.subr.bf16.mxu1 %v11670_v3  ;;  %v2059_v3 = vld [vmem:[#allocation8 + $0x6d0] sm:$0xff]  ;;  %v13252_v16 = vpack.c.bf16 %v4040_v30, %v4032_v53  ;;  %15047 = vst [vmem:[#allocation79_spill] sm:$0xff] %v13256_v48  ;;  %v4047_v53 = vld [vmem:[#allocation9 + $0x500] sm:$0xff] }
 0x85d   :  { %v11676_v35 = vcombine.high %v2059_v3, %v2063_v36  ;;  %v4055_v30 = vld [vmem:[#allocation9 + $0x540] sm:$0xff]  ;;  %v11677_v37 = vcombine.low %v2059_v3, %v2063_v36  ;;  %v4088_v3 = vld [vmem:[#allocation9 + $0x648] sm:$0xff] }
 0x85e   :  { %15046 = vst [vmem:[#allocation78_spill] sm:$0xff] %v13252_v16  ;;  %9345 = vmatpush1.bf16.msra.mxu0 %v13250_v54  ;;  %v13262_v52 = vpack.c.bf16 %v4055_v30, %v4047_v53  ;;  %v2087_v53 = vld [vmem:[#allocation8 + $0x7b0] sm:$0xff] }
 0x85f   :  { %8769 = vmatpush1.bf16.msra.mxu1 %v11671_v31  ;;  %v4048_v31 = vld [vmem:[#allocation9 + $0x508] sm:$0xff]  ;;  %9347 = vmatprep.subr.bf16.mxu0 %v13252_v16 }
 0x860   :  { %8771 = vmatprep.subr.bf16.mxu1 %v11672_v39  ;;  %v2067_v39 = vld [vmem:[#allocation8 + $0x710] sm:$0xff]  ;;  %v13258_v45 = vpack.c.bf16 %v4056_v59, %v4048_v31  ;;  %15049 = vst [vmem:[#allocation81_spill] sm:$0xff] %v13262_v52  ;;  %v4063_v31 = vld [vmem:[#allocation9 + $0x580] sm:$0xff] }
 0x861   :  { %v11678_v8 = vcombine.high %v2067_v39, %v2071_v0  ;;  %v4071_v59 = vld [vmem:[#allocation9 + $0x5c0] sm:$0xff]  ;;  %v11679_v24 = vcombine.low %v2067_v39, %v2071_v0  ;;  %v4104_v39 = vld [vmem:[#allocation9 + $0x6c8] sm:$0xff] }
 0x862   :  { %15048 = vst [vmem:[#allocation80_spill] sm:$0xff] %v13258_v45  ;;  %9349 = vmatpush1.bf16.msra.mxu0 %v13256_v48  ;;  %v13268_v19 = vpack.c.bf16 %v4071_v59, %v4063_v31  ;;  %v2095_v31 = vld [vmem:[#allocation8 + $0x7f0] sm:$0xff] }
 0x863   :  { %8773 = vmatpush1.bf16.msra.mxu1 %v11673_v12  ;;  %v4064_v12 = vld [vmem:[#allocation9 + $0x588] sm:$0xff]  ;;  %9351 = vmatprep.subr.bf16.mxu0 %v13258_v45 }
 0x864   :  { %8775 = vmatprep.subr.bf16.mxu1 %v11674_v15  ;;  %v2075_v15 = vld [vmem:[#allocation8 + $0x750] sm:$0xff]  ;;  %v13264_v62 = vpack.c.bf16 %v4072_v21, %v4064_v12  ;;  %15051 = vst [vmem:[#allocation83_spill] sm:$0xff] %v13268_v19  ;;  %v4079_v12 = vld [vmem:[#allocation9 + $0x600] sm:$0xff] }
 0x865   :  { %v11680_v36 = vcombine.high %v2075_v15, %v2079_v2  ;;  %v4087_v21 = vld [vmem:[#allocation9 + $0x640] sm:$0xff]  ;;  %v11681_v56 = vcombine.low %v2075_v15, %v2079_v2  ;;  %v4120_v15 = vld [vmem:[#allocation9 + $0x748] sm:$0xff] }
 0x866   :  { %15050 = vst [vmem:[#allocation82_spill] sm:$0xff] %v13264_v62  ;;  %9353 = vmatpush1.bf16.msra.mxu0 %v13262_v52  ;;  %v13274_v63 = vpack.c.bf16 %v4087_v21, %v4079_v12  ;;  %v2103_v12 = vld [vmem:[#allocation8 + $0x830] sm:$0xff] }
 0x867   :  { %8777 = vmatpush1.bf16.msra.mxu1 %v11675_v58  ;;  %v4080_v58 = vld [vmem:[#allocation9 + $0x608] sm:$0xff]  ;;  %9355 = vmatprep.subr.bf16.mxu0 %v13264_v62 }
 0x868   :  { %8779 = vmatprep.subr.bf16.mxu1 %v11676_v35  ;;  %v2083_v35 = vld [vmem:[#allocation8 + $0x790] sm:$0xff]  ;;  %v13270_v30 = vpack.c.bf16 %v4088_v3, %v4080_v58  ;;  %15053 = vst [vmem:[#allocation85_spill] sm:$0xff] %v13274_v63  ;;  %v4095_v58 = vld [vmem:[#allocation9 + $0x680] sm:$0xff] }
 0x869   :  { %v11682_v0 = vcombine.high %v2083_v35, %v2087_v53  ;;  %v4103_v3 = vld [vmem:[#allocation9 + $0x6c0] sm:$0xff]  ;;  %v11683_v44 = vcombine.low %v2083_v35, %v2087_v53  ;;  %v4136_v35 = vld [vmem:[#allocation9 + $0x7c8] sm:$0xff] }
 0x86a   :  { %15052 = vst [vmem:[#allocation84_spill] sm:$0xff] %v13270_v30  ;;  %9357 = vmatpush1.bf16.msra.mxu0 %v13268_v19  ;;  %v13280_v49 = vpack.c.bf16 %v4103_v3, %v4095_v58  ;;  %v2111_v58 = vld [vmem:[#allocation8 + $0x870] sm:$0xff] }
 0x86b   :  { %8781 = vmatpush1.bf16.msra.mxu1 %v11677_v37  ;;  %v4096_v37 = vld [vmem:[#allocation9 + $0x688] sm:$0xff]  ;;  %9359 = vmatprep.subr.bf16.mxu0 %v13270_v30 }
 0x86c   :  { %8783 = vmatprep.subr.bf16.mxu1 %v11678_v8  ;;  %v2091_v8 = vld [vmem:[#allocation8 + $0x7d0] sm:$0xff]  ;;  %v13276_v59 = vpack.c.bf16 %v4104_v39, %v4096_v37  ;;  %15055 = vst [vmem:[#allocation87_spill] sm:$0xff] %v13280_v49  ;;  %v4111_v37 = vld [vmem:[#allocation9 + $0x700] sm:$0xff] }
 0x86d   :  { %v11684_v2 = vcombine.high %v2091_v8, %v2095_v31  ;;  %v4119_v39 = vld [vmem:[#allocation9 + $0x740] sm:$0xff]  ;;  %v11685_v40 = vcombine.low %v2091_v8, %v2095_v31  ;;  %v2115_v31 = vld [vmem:[#allocation8 + $0x890] sm:$0xff] }
 0x86e   :  { %15054 = vst [vmem:[#allocation86_spill] sm:$0xff] %v13276_v59  ;;  %9361 = vmatpush1.bf16.msra.mxu0 %v13274_v63  ;;  %v13286_v13 = vpack.c.bf16 %v4119_v39, %v4111_v37  ;;  %v12506_v39 = vld [vmem:[#allocation6 + $0x28] sm:$0xff] }
 0x86f   :  { %8785 = vmatpush1.bf16.msra.mxu1 %v11679_v24  ;;  %v4112_v24 = vld [vmem:[#allocation9 + $0x708] sm:$0xff]  ;;  %9363 = vmatprep.subr.bf16.mxu0 %v13276_v59 }
 0x870   :  { %8787 = vmatprep.subr.bf16.mxu1 %v11680_v36  ;;  %v2099_v36 = vld [vmem:[#allocation8 + $0x810] sm:$0xff]  ;;  %v13282_v21 = vpack.c.bf16 %v4120_v15, %v4112_v24  ;;  %15057 = vst [vmem:[#allocation89_spill] sm:$0xff] %v13286_v13  ;;  %v4127_v24 = vld [vmem:[#allocation9 + $0x780] sm:$0xff] }
 0x871   :  { %v11686_v53 = vcombine.high %v2099_v36, %v2103_v12  ;;  %v4135_v15 = vld [vmem:[#allocation9 + $0x7c0] sm:$0xff]  ;;  %v11687_v28 = vcombine.low %v2099_v36, %v2103_v12  ;;  %v2127_v36 = vld [vmem:[#allocation8 + $0x8f0] sm:$0xff] }
 0x872   :  { %15056 = vst [vmem:[#allocation88_spill] sm:$0xff] %v13282_v21  ;;  %9365 = vmatpush1.bf16.msra.mxu0 %v13280_v49  ;;  %v13292_v8 = vpack.c.bf16 %v4135_v15, %v4127_v24  ;;  %v2135_v24 = vld [vmem:[#allocation8 + $0x930] sm:$0xff] }
 0x873   :  { %8789 = vmatpush1.bf16.msra.mxu1 %v11681_v56  ;;  %v4128_v56 = vld [vmem:[#allocation9 + $0x788] sm:$0xff]  ;;  %9367 = vmatprep.subr.bf16.mxu0 %v13282_v21 }
 0x874   :  { %8791 = vmatprep.subr.bf16.mxu1 %v11682_v0  ;;  %v2107_v0 = vld [vmem:[#allocation8 + $0x850] sm:$0xff]  ;;  %v13288_v3 = vpack.c.bf16 %v4136_v35, %v4128_v56  ;;  %15059 = vst [vmem:[#allocation91_spill] sm:$0xff] %v13292_v8 }
 0x875   :  { %v11689_v37 = vcombine.low %v2107_v0, %v2111_v58 }
 0x876   :  { %15058 = vst [vmem:[#allocation90_spill] sm:$0xff] %v13288_v3  ;;  %9369 = vmatpush1.bf16.msra.mxu0 %v13286_v13 }
 0x877   :  { %8793 = vmatpush1.bf16.msra.mxu1 %v11683_v44  ;;  %9371 = vmatprep.subr.bf16.mxu0 %v13288_v3  ;;  %v11688_v44 = vcombine.high %v2107_v0, %v2111_v58  ;;  %v2143_v0 = vld [vmem:[#allocation8 + $0x970] sm:$0xff] }
 0x878   :  { %8795 = vmatprep.subr.bf16.mxu1 %v11684_v2  ;;  %v2119_v2 = vld [vmem:[#allocation8 + $0x8b0] sm:$0xff] }
 0x879   :  { %v11690_v56 = vcombine.high %v2115_v31, %v2119_v2  ;;  %v11691_v12 = vcombine.low %v2115_v31, %v2119_v2  ;;  %v2155_v2 = vld [vmem:[#allocation8 + $0x9d0] sm:$0xff] }
 0x87a   :  { %9373 = vmatpush1.bf16.msra.mxu0 %v13292_v8 }
 0x87b   :  { %8797 = vmatpush1.bf16.msra.mxu1 %v11685_v40  ;;  %9439 = vmatprep.subr.bf16.mxu0 %v13096_v18  ;;  %v2123_v40 = vld [vmem:[#allocation8 + $0x8d0] sm:$0xff] }
 0x87c   :  { %8799 = vmatprep.subr.bf16.mxu1 %v11686_v53  ;;  %v11692_v35 = vcombine.high %v2123_v40, %v2127_v36  ;;  %v2131_v53 = vld [vmem:[#allocation8 + $0x910] sm:$0xff] }
 0x87d   :  { %v11694_v15 = vcombine.high %v2131_v53, %v2135_v24  ;;  %v11695_v58 = vcombine.low %v2131_v53, %v2135_v24  ;;  %v2151_v18 = vld [vmem:[#allocation8 + $0x9b0] sm:$0xff] }
 0x87e   :  { %3597 = vmatmul.mubr.f32.vlgmr.msra.gmra.mrb[10].mxu1 %v12505_v25  ;;  %v11693_v25 = vcombine.low %v2123_v40, %v2127_v36  ;;  %v2163_v36 = vld [vmem:[#allocation8 + $0xa10] sm:$0xff] }
 0x87f   :  { %8801 = vmatpush1.bf16.msra.mxu1 %v11687_v28  ;;  %3667 = vmatprep.mubr.f32.mxu1 %v12506_v39  ;;  %v2139_v28 = vld [vmem:[#allocation8 + $0x950] sm:$0xff] }
 0x880   :  { %8803 = vmatprep.subr.bf16.mxu1 %v11688_v44  ;;  %v11696_v44 = vcombine.high %v2139_v28, %v2143_v0  ;;  %v2147_v39 = vld [vmem:[#allocation8 + $0x990] sm:$0xff]  ;;  %v11697_v17 = vcombine.low %v2139_v28, %v2143_v0 }
 0x881   :  { %v11698_v31 = vcombine.high %v2147_v39, %v2151_v18  ;;  %v2171_v24 = vld [vmem:[#allocation8 + $0xa50] sm:$0xff] }
 0x882   :  { %v2179_v0 = vld [vmem:[#allocation8 + $0xa90] sm:$0xff] }
 0x883   :  { %8805 = vmatpush1.bf16.msra.mxu1 %v11689_v37  ;;  %v2159_v37 = vld [vmem:[#allocation8 + $0x9f0] sm:$0xff] }
 0x884   :  { %8807 = vmatprep.subr.bf16.mxu1 %v11690_v56  ;;  %v11699_v56 = vcombine.low %v2147_v39, %v2151_v18  ;;  %v11700_v40 = vcombine.high %v2155_v2, %v2159_v37  ;;  %v2191_v39 = vld [vmem:[#allocation8 + $0xaf0] sm:$0xff] }
 0x887   :  { %8809 = vmatpush1.bf16.msra.mxu1 %v11691_v12  ;;  %v2167_v12 = vld [vmem:[#allocation8 + $0xa30] sm:$0xff] }
 0x888   :  { %8811 = vmatprep.subr.bf16.mxu1 %v11692_v35  ;;  %v11701_v35 = vcombine.low %v2155_v2, %v2159_v37  ;;  %v11702_v53 = vcombine.high %v2163_v36, %v2167_v12  ;;  %v2195_v37 = vld [vmem:[#allocation8 + $0xb10] sm:$0xff] }
 0x88b   :  { %8813 = vmatpush1.bf16.msra.mxu1 %v11693_v25  ;;  %v2175_v25 = vld [vmem:[#allocation8 + $0xa70] sm:$0xff] }
 0x88c   :  { %8815 = vmatprep.subr.bf16.mxu1 %v11694_v15  ;;  %v11703_v15 = vcombine.low %v2163_v36, %v2167_v12  ;;  %v11704_v28 = vcombine.high %v2171_v24, %v2175_v25  ;;  %v2203_v12 = vld [vmem:[#allocation8 + $0xb50] sm:$0xff] }
 0x88f   :  { %8817 = vmatpush1.bf16.msra.mxu1 %v11695_v58  ;;  %v2183_v58 = vld [vmem:[#allocation8 + $0xab0] sm:$0xff] }
 0x890   :  { %8819 = vmatprep.subr.bf16.mxu1 %v11696_v44  ;;  %v11705_v44 = vcombine.low %v2171_v24, %v2175_v25  ;;  %v11706_v18 = vcombine.high %v2179_v0, %v2183_v58  ;;  %v2211_v25 = vld [vmem:[#allocation8 + $0xb90] sm:$0xff] }
 0x893   :  { %8821 = vmatpush1.bf16.msra.mxu1 %v11697_v17  ;;  %v2187_v17 = vld [vmem:[#allocation8 + $0xad0] sm:$0xff] }
 0x894   :  { %8823 = vmatprep.subr.bf16.mxu1 %v11698_v31  ;;  %v11707_v31 = vcombine.low %v2179_v0, %v2183_v58  ;;  %v11708_v2 = vcombine.high %v2187_v17, %v2191_v39  ;;  %v2219_v58 = vld [vmem:[#allocation8 + $0xbd0] sm:$0xff] }
 0x897   :  { %8825 = vmatpush1.bf16.msra.mxu1 %v11699_v56  ;;  %v2199_v56 = vld [vmem:[#allocation8 + $0xb30] sm:$0xff] }
 0x898   :  { %8827 = vmatprep.subr.bf16.mxu1 %v11700_v40  ;;  %v11709_v40 = vcombine.low %v2187_v17, %v2191_v39  ;;  %v11710_v36 = vcombine.high %v2195_v37, %v2199_v56 }
 0x89b   :  { %8829 = vmatpush1.bf16.msra.mxu1 %v11701_v35  ;;  %v2207_v35 = vld [vmem:[#allocation8 + $0xb70] sm:$0xff] }
 0x89c   :  { %8831 = vmatprep.subr.bf16.mxu1 %v11702_v53  ;;  %v11711_v53 = vcombine.low %v2195_v37, %v2199_v56  ;;  %v11712_v24 = vcombine.high %v2203_v12, %v2207_v35 }
 0x89f   :  { %8833 = vmatpush1.bf16.msra.mxu1 %v11703_v15  ;;  %v2215_v15 = vld [vmem:[#allocation8 + $0xbb0] sm:$0xff] }
 0x8a0   :  { %8835 = vmatprep.subr.bf16.mxu1 %v11704_v28  ;;  %v11713_v28 = vcombine.low %v2203_v12, %v2207_v35  ;;  %v11714_v0 = vcombine.high %v2211_v25, %v2215_v15  ;;  %v3889_v35 = vld [vmem:[#allocation9 + $0x10] sm:$0xff] }
 0x8a3   :  { %8837 = vmatpush1.bf16.msra.mxu1 %v11705_v44  ;;  %v2223_v44 = vld [vmem:[#allocation8 + $0xbf0] sm:$0xff] }
 0x8a4   :  { %8839 = vmatprep.subr.bf16.mxu1 %v11706_v18  ;;  %v11715_v18 = vcombine.low %v2211_v25, %v2215_v15  ;;  %v11716_v17 = vcombine.high %v2219_v58, %v2223_v44  ;;  %v11717_v39 = vcombine.low %v2219_v58, %v2223_v44  ;;  %v3914_v25 = vld [vmem:[#allocation9 + $0xd8] sm:$0xff]  ;;  %v3913_v58 = vld [vmem:[#allocation9 + $0xd0] sm:$0xff] }
 0x8a5   :  { %v3922_v44 = vld [vmem:[#allocation9 + $0x118] sm:$0xff] }
 0x8a7   :  { %8841 = vmatpush1.bf16.msra.mxu1 %v11707_v31  ;;  %v12507_v31 = vld [vmem:[#allocation6 + $0x20] sm:$0xff] }
 0x8a8   :  { %8843 = vmatprep.subr.bf16.mxu1 %v11708_v2  ;;  %v15060_v2 = vmov 0.0  }
 0x8ab   :  { %8845 = vmatpush1.bf16.msra.mxu1 %v11709_v40  ;;  %v3890_v40 = vld [vmem:[#allocation9 + $0x18] sm:$0xff] }
 0x8ac   :  { %8847 = vmatprep.subr.bf16.mxu1 %v11710_v36  ;;  %v3898_v36 = vld [vmem:[#allocation9 + $0x58] sm:$0xff] }
 0x8ad   :  { %v13332_v12 = vpack.c.bf16 %v3898_v36, %v3890_v40  ;;  %v3929_v40 = vld [vmem:[#allocation9 + $0x150] sm:$0xff]  ;;  %v3938_v36 = vld [vmem:[#allocation9 + $0x198] sm:$0xff] }
 0x8af   :  { %8849 = vmatpush1.bf16.msra.mxu1 %v11711_v53  ;;  %15061 = vst [vmem:[#allocation92_spill] sm:$0xff] %v13332_v12  ;;  %v3897_v53 = vld [vmem:[#allocation9 + $0x50] sm:$0xff] }
 0x8b0   :  { %8851 = vmatprep.subr.bf16.mxu1 %v11712_v24  ;;  %v3906_v24 = vld [vmem:[#allocation9 + $0x98] sm:$0xff]  ;;  %v13335_v15 = vpack.c.bf16 %v3897_v53, %v3889_v35 }
 0x8b1   :  { %v3946_v35 = vld [vmem:[#allocation9 + $0x1d8] sm:$0xff] }
 0x8b2   :  { %15062 = vst [vmem:[#allocation93_spill] sm:$0xff] %v13335_v15 }
 0x8b3   :  { %8853 = vmatpush1.bf16.msra.mxu1 %v11713_v28  ;;  %v13338_v28 = vpack.c.bf16 %v3914_v25, %v3906_v24  ;;  %v13352_v24 = vpack.c.bf16 %v3946_v35, %v3938_v36  ;;  %v3937_v25 = vld [vmem:[#allocation9 + $0x190] sm:$0xff] }
 0x8b4   :  { %8855 = vmatprep.subr.bf16.mxu1 %v11714_v0  ;;  %v3905_v0 = vld [vmem:[#allocation9 + $0x90] sm:$0xff] }
 0x8b5   :  { %15063 = vst [vmem:[#allocation94_spill] sm:$0xff] %v13338_v28  ;;  %15067 = vst [vmem:[#allocation98_spill] sm:$0xff] %v13352_v24 }
 0x8b7   :  { %8857 = vmatpush1.bf16.msra.mxu1 %v11715_v18  ;;  %v3930_v18 = vld [vmem:[#allocation9 + $0x158] sm:$0xff] }
 0x8b8   :  { %8859 = vmatprep.subr.bf16.mxu1 %v11716_v17  ;;  %v13342_v17 = vpack.c.bf16 %v3913_v58, %v3905_v0  ;;  %v3945_v0 = vld [vmem:[#allocation9 + $0x1d0] sm:$0xff]  ;;  %v3954_v58 = vld [vmem:[#allocation9 + $0x218] sm:$0xff] }
 0x8ba   :  { %15064 = vst [vmem:[#allocation95_spill] sm:$0xff] %v13342_v17 }
 0x8bb   :  { %8861 = vmatpush1.bf16.msra.mxu1 %v11717_v39  ;;  %v13346_v39 = vpack.c.bf16 %v3930_v18, %v3922_v44  ;;  %v13355_v44 = vpack.c.bf16 %v3945_v0, %v3937_v25  ;;  %v3986_v25 = vld [vmem:[#allocation9 + $0x318] sm:$0xff] }
 0x8bc   :  { %9055 = vmatprep.subr.bf16.mxu1 %v13198_v9  ;;  %v3994_v0 = vld [vmem:[#allocation9 + $0x358] sm:$0xff]  ;;  %v3909_v9 = vld [vmem:[#allocation9 + $0xb0] sm:$0xff] }
 0x8bd   :  { %15065 = vst [vmem:[#allocation96_spill] sm:$0xff] %v13346_v39  ;;  %15068 = vst [vmem:[#allocation99_spill] sm:$0xff] %v13355_v44 }
 0x8be   :  { %3668 = vmatmul.mubr.f32.vlgmr.msra.gmra.mrb[10].mxu1 %v12507_v31  ;;  %v3921_v31 = vld [vmem:[#allocation9 + $0x110] sm:$0xff] }
 0x8bf   :  { %9057 = vmatpush1.bf16.msra.mxu1 %v13200_v33  ;;  %4207 = vmatprep.mubr.f32.mxu1 %v15060_v2  ;;  %v13349_v53 = vpack.c.bf16 %v3929_v40, %v3921_v31  ;;  %v3970_v31 = vld [vmem:[#allocation9 + $0x298] sm:$0xff]  ;;  %v3901_v33 = vld [vmem:[#allocation9 + $0x70] sm:$0xff] }
 0x8c0   :  { %9059 = vmatprep.subr.bf16.mxu1 %v13204_v34  ;;  %v3978_v40 = vld [vmem:[#allocation9 + $0x2d8] sm:$0xff]  ;;  %v3893_v34 = vld [vmem:[#allocation9 + $0x30] sm:$0xff] }
 0x8c1   :  { %15066 = vst [vmem:[#allocation97_spill] sm:$0xff] %v13349_v53  ;;  %v13364_v35 = vpack.c.bf16 %v3978_v40, %v3970_v31 }
 0x8c3   :  { %9061 = vmatpush1.bf16.msra.mxu1 %v13208_v55  ;;  %15071 = vst [vmem:[#allocation102_spill] sm:$0xff] %v13364_v35  ;;  %v4137_v55 = vld [vmem:[#allocation9 + $0x7d0] sm:$0xff] }
 0x8c4   :  { %9063 = vmatprep.subr.bf16.mxu1 %v13210_v60  ;;  %v4129_v60 = vld [vmem:[#allocation9 + $0x790] sm:$0xff] }
 0x8c7   :  { %9065 = vmatpush1.bf16.msra.mxu1 %v13214_v20  ;;  %v4121_v20 = vld [vmem:[#allocation9 + $0x750] sm:$0xff] }
 0x8c8   :  { %9067 = vmatprep.subr.bf16.mxu1 %v13216_v22  ;;  %v4113_v22 = vld [vmem:[#allocation9 + $0x710] sm:$0xff] }
 0x8cb   :  { %9069 = vmatpush1.bf16.msra.mxu1 %v13220_v47  ;;  %v4105_v47 = vld [vmem:[#allocation9 + $0x6d0] sm:$0xff] }
 0x8cc   :  { %9071 = vmatprep.subr.bf16.mxu1 %v13222_v6  ;;  %v4097_v6 = vld [vmem:[#allocation9 + $0x690] sm:$0xff] }
 0x8cf   :  { %9073 = vmatpush1.bf16.msra.mxu1 %v13226_v4  ;;  %v4089_v4 = vld [vmem:[#allocation9 + $0x650] sm:$0xff] }
 0x8d0   :  { %9075 = vmatprep.subr.bf16.mxu1 %v13228_v41  ;;  %v4081_v41 = vld [vmem:[#allocation9 + $0x610] sm:$0xff] }
 0x8d1   :  { %v13308_v37 = vpop.f32.mrb[8].mxu1 }
 0x8d2   :  { %v13310_v56 = vpop.f32.mrb[9].mxu1 }
 0x8d3   :  { %9077 = vmatpush1.bf16.msra.mxu1 %v13232_v14  ;;  %v4073_v14 = vld [vmem:[#allocation9 + $0x5d0] sm:$0xff] }
 0x8d4   :  { %9079 = vmatprep.subr.bf16.mxu1 %v13234_v46  ;;  %v4065_v46 = vld [vmem:[#allocation9 + $0x590] sm:$0xff] }
 0x8d7   :  { %9081 = vmatpush1.bf16.msra.mxu1 %v13238_v43  ;;  %v4057_v43 = vld [vmem:[#allocation9 + $0x550] sm:$0xff] }
 0x8d8   :  { %9083 = vmatprep.subr.bf16.mxu1 %v13240_v27  ;;  %v4049_v27 = vld [vmem:[#allocation9 + $0x510] sm:$0xff] }
 0x8db   :  { %9085 = vmatpush1.bf16.msra.mxu1 %v13244_v26  ;;  %v4041_v26 = vld [vmem:[#allocation9 + $0x4d0] sm:$0xff] }
 0x8dc   :  { %9087 = vmatprep.subr.bf16.mxu1 %v13246_v51  ;;  %v4033_v51 = vld [vmem:[#allocation9 + $0x490] sm:$0xff] }
 0x8df   :  { %9089 = vmatpush1.bf16.msra.mxu1 %v13250_v54 }
 0x8e0   :  { %9091 = vmatprep.subr.bf16.mxu1 %v13252_v16 }
 0x8e3   :  { %9093 = vmatpush1.bf16.msra.mxu1 %v13256_v48  ;;  %v4025_v48 = vld [vmem:[#allocation9 + $0x450] sm:$0xff] }
 0x8e4   :  { %9095 = vmatprep.subr.bf16.mxu1 %v13258_v45 }
 0x8e7   :  { %9097 = vmatpush1.bf16.msra.mxu1 %v13262_v52 }
 0x8e8   :  { %9099 = vmatprep.subr.bf16.mxu1 %v13264_v62  ;;  %v4026_v62 = vld [vmem:[#allocation9 + $0x458] sm:$0xff] }
 0x8eb   :  { %9101 = vmatpush1.bf16.msra.mxu1 %v13268_v19  ;;  %v4009_v19 = vld [vmem:[#allocation9 + $0x3d0] sm:$0xff] }
 0x8ec   :  { %9103 = vmatprep.subr.bf16.mxu1 %v13270_v30  ;;  %v13372_v30 = vpop.f32.mrb[2].mxu0 }
 0x8ed   :  { %v13374_v31 = vpop.f32.mrb[3].mxu0 }
 0x8ef   :  { %9105 = vmatpush1.bf16.msra.mxu1 %v13274_v63  ;;  %v3993_v63 = vld [vmem:[#allocation9 + $0x350] sm:$0xff] }
 0x8f0   :  { %9107 = vmatprep.subr.bf16.mxu1 %v13276_v59  ;;  %v3985_v59 = vld [vmem:[#allocation9 + $0x310] sm:$0xff] }
 0x8f1   :  { %v13377_v40 = vpack.c.bf16 %v3993_v63, %v3985_v59  ;;  %v4017_v59 = vld [vmem:[#allocation9 + $0x410] sm:$0xff] }
 0x8f2   :  { %v13393_v16 = vpack.c.bf16 %v4025_v48, %v4017_v59  ;;  %v4066_v48 = vld [vmem:[#allocation9 + $0x598] sm:$0xff] }
 0x8f3   :  { %9109 = vmatpush1.bf16.msra.mxu1 %v13280_v49  ;;  %v3977_v49 = vld [vmem:[#allocation9 + $0x2d0] sm:$0xff]  ;;  %15074 = vst [vmem:[#allocation105_spill] sm:$0xff] %v13377_v40  ;;  %v4074_v59 = vld [vmem:[#allocation9 + $0x5d8] sm:$0xff] }
 0x8f4   :  { %9111 = vmatprep.subr.bf16.mxu1 %v13282_v21  ;;  %v3969_v21 = vld [vmem:[#allocation9 + $0x290] sm:$0xff]  ;;  %15078 = vst [vmem:[#allocation109_spill] sm:$0xff] %v13393_v16 }
 0x8f7   :  { %9113 = vmatpush1.bf16.msra.mxu1 %v13286_v13  ;;  %v3961_v13 = vld [vmem:[#allocation9 + $0x250] sm:$0xff] }
 0x8f8   :  { %9115 = vmatprep.subr.bf16.mxu1 %v13288_v3  ;;  %v3953_v3 = vld [vmem:[#allocation9 + $0x210] sm:$0xff] }
 0x8f9   :  { %v13361_v36 = vpack.c.bf16 %v3961_v13, %v3953_v3  ;;  %v4002_v13 = vld [vmem:[#allocation9 + $0x398] sm:$0xff] }
 0x8fa   :  { %v4010_v3 = vld [vmem:[#allocation9 + $0x3d8] sm:$0xff] }
 0x8fb   :  { %9117 = vmatpush1.bf16.msra.mxu1 %v13292_v8  ;;  %v3962_v8 = vld [vmem:[#allocation9 + $0x258] sm:$0xff]  ;;  %15070 = vst [vmem:[#allocation101_spill] sm:$0xff] %v13361_v36 }
 0x8fc   :  { %9119 = vmatprep.subr.bf16.mxu1 %v13332_v12  ;;  %v13358_v18 = vpack.c.bf16 %v3962_v8, %v3954_v58  ;;  %v13367_v8 = vpack.c.bf16 %v3977_v49, %v3969_v21  ;;  %v13370_v58 = vpack.c.bf16 %v3994_v0, %v3986_v25  ;;  %v13380_v49 = vpack.c.bf16 %v4010_v3, %v4002_v13  ;;  %v4001_v21 = vld [vmem:[#allocation9 + $0x390] sm:$0xff]  ;;  %v4018_v0 = vld [vmem:[#allocation9 + $0x418] sm:$0xff] }
 0x8fd   :  { %v13387_v45 = vpack.c.bf16 %v4009_v19, %v4001_v21  ;;  %v13390_v63 = vpack.c.bf16 %v4026_v62, %v4018_v0  ;;  %v4034_v13 = vld [vmem:[#allocation9 + $0x498] sm:$0xff]  ;;  %v13399_v62 = vpack.c.bf16 %v4041_v26, %v4033_v51 }
 0x8fe   :  { %4208 = vmatmul.mubr.f32.vlgmr.msra.gmra.mrb[12].mxu1 %v15060_v2  ;;  %15069 = vst [vmem:[#allocation100_spill] sm:$0xff] %v13358_v18  ;;  %15072 = vst [vmem:[#allocation103_spill] sm:$0xff] %v13367_v8  ;;  %v4042_v3 = vld [vmem:[#allocation9 + $0x4d8] sm:$0xff] }
 0x8ff   :  { %9121 = vmatpush1.bf16.msra.mxu1 %v13335_v15  ;;  %4278 = vmatprep.mubr.f32.mxu1 %v15060_v2  ;;  %15073 = vst [vmem:[#allocation104_spill] sm:$0xff] %v13370_v58  ;;  %15075 = vst [vmem:[#allocation106_spill] sm:$0xff] %v13380_v49  ;;  %v13396_v54 = vpack.c.bf16 %v4042_v3, %v4034_v13  ;;  %v4050_v19 = vld [vmem:[#allocation9 + $0x518] sm:$0xff]  ;;  %v13405_v13 = vpack.c.bf16 %v4057_v43, %v4049_v27 }
 0x900   :  { %9123 = vmatprep.subr.bf16.mxu1 %v13338_v28  ;;  %15076 = vst [vmem:[#allocation107_spill] sm:$0xff] %v13387_v45  ;;  %15077 = vst [vmem:[#allocation108_spill] sm:$0xff] %v13390_v63  ;;  %v4058_v21 = vld [vmem:[#allocation9 + $0x558] sm:$0xff]  ;;  %v13408_v3 = vpack.c.bf16 %v4074_v59, %v4066_v48  ;;  %v13417_v48 = vpack.c.bf16 %v4089_v4, %v4081_v41 }
 0x901   :  { %15079 = vst [vmem:[#allocation110_spill] sm:$0xff] %v13396_v54  ;;  %15080 = vst [vmem:[#allocation111_spill] sm:$0xff] %v13399_v62  ;;  %v13402_v0 = vpack.c.bf16 %v4058_v21, %v4050_v19  ;;  %v4082_v26 = vld [vmem:[#allocation9 + $0x618] sm:$0xff]  ;;  %v13411_v19 = vpack.c.bf16 %v4073_v14, %v4065_v46 }
 0x902   :  { %15082 = vst [vmem:[#allocation113_spill] sm:$0xff] %v13405_v13  ;;  %15083 = vst [vmem:[#allocation114_spill] sm:$0xff] %v13408_v3  ;;  %v4090_v51 = vld [vmem:[#allocation9 + $0x658] sm:$0xff] }
 0x903   :  { %9125 = vmatpush1.bf16.msra.mxu1 %v13342_v17  ;;  %15081 = vst [vmem:[#allocation112_spill] sm:$0xff] %v13402_v0  ;;  %15084 = vst [vmem:[#allocation115_spill] sm:$0xff] %v13411_v19  ;;  %v13414_v21 = vpack.c.bf16 %v4090_v51, %v4082_v26  ;;  %v4098_v43 = vld [vmem:[#allocation9 + $0x698] sm:$0xff]  ;;  %v13423_v26 = vpack.c.bf16 %v4105_v47, %v4097_v6 }
 0x904   :  { %9127 = vmatprep.subr.bf16.mxu1 %v13346_v39  ;;  %v4106_v27 = vld [vmem:[#allocation9 + $0x6d8] sm:$0xff]  ;;  %15086 = vst [vmem:[#allocation117_spill] sm:$0xff] %v13417_v48 }
 0x905   :  { %15085 = vst [vmem:[#allocation116_spill] sm:$0xff] %v13414_v21  ;;  %v13420_v59 = vpack.c.bf16 %v4106_v27, %v4098_v43  ;;  %v4114_v14 = vld [vmem:[#allocation9 + $0x718] sm:$0xff]  ;;  %15088 = vst [vmem:[#allocation119_spill] sm:$0xff] %v13423_v26  ;;  %v13429_v43 = vpack.c.bf16 %v4121_v20, %v4113_v22 }
 0x906   :  { %v4122_v46 = vld [vmem:[#allocation9 + $0x758] sm:$0xff] }
 0x907   :  { %9129 = vmatpush1.bf16.msra.mxu1 %v13349_v53  ;;  %15087 = vst [vmem:[#allocation118_spill] sm:$0xff] %v13420_v59  ;;  %v13426_v51 = vpack.c.bf16 %v4122_v46, %v4114_v14  ;;  %v4130_v4 = vld [vmem:[#allocation9 + $0x798] sm:$0xff]  ;;  %15090 = vst [vmem:[#allocation121_spill] sm:$0xff] %v13429_v43  ;;  %v13435_v14 = vpack.c.bf16 %v4137_v55, %v4129_v60 }
 0x908   :  { %9131 = vmatprep.subr.bf16.mxu1 %v13352_v24  ;;  %v4138_v41 = vld [vmem:[#allocation9 + $0x7d8] sm:$0xff] }
 0x909   :  { %15089 = vst [vmem:[#allocation120_spill] sm:$0xff] %v13426_v51  ;;  %v13432_v27 = vpack.c.bf16 %v4138_v41, %v4130_v4  ;;  %v3894_v47 = vld [vmem:[#allocation9 + $0x38] sm:$0xff]  ;;  %15092 = vst [vmem:[#allocation123_spill] sm:$0xff] %v13435_v14  ;;  %v13441_v4 = vpack.c.bf16 %v3901_v33, %v3893_v34  ;;  %v3925_v34 = vld [vmem:[#allocation9 + $0x130] sm:$0xff] }
 0x90a   :  { %v3902_v6 = vld [vmem:[#allocation9 + $0x78] sm:$0xff] }
 0x90b   :  { %9133 = vmatpush1.bf16.msra.mxu1 %v13355_v44  ;;  %15091 = vst [vmem:[#allocation122_spill] sm:$0xff] %v13432_v27  ;;  %v13438_v46 = vpack.c.bf16 %v3902_v6, %v3894_v47  ;;  %v3910_v20 = vld [vmem:[#allocation9 + $0xb8] sm:$0xff]  ;;  %v13448_v47 = vpack.c.bf16 %v3917_v11, %v3909_v9  ;;  %v3933_v6 = vld [vmem:[#allocation9 + $0x170] sm:$0xff] }
 0x90c   :  { %9135 = vmatprep.subr.bf16.mxu1 %v13358_v18  ;;  %v3918_v22 = vld [vmem:[#allocation9 + $0xf8] sm:$0xff]  ;;  %v13455_v5 = vpack.c.bf16 %v3933_v6, %v3925_v34  ;;  %v3941_v11 = vld [vmem:[#allocation9 + $0x1b0] sm:$0xff] }
 0x90d   :  { %15093 = vst [vmem:[#allocation124_spill] sm:$0xff] %v13438_v46  ;;  %v13444_v41 = vpack.c.bf16 %v3918_v22, %v3910_v20  ;;  %v3926_v55 = vld [vmem:[#allocation9 + $0x138] sm:$0xff]  ;;  %v3949_v9 = vld [vmem:[#allocation9 + $0x1f0] sm:$0xff] }
 0x90e   :  { %v13382_v25 = vpop.f32.mrb[4].mxu0  ;;  %v3934_v60 = vld [vmem:[#allocation9 + $0x178] sm:$0xff]  ;;  %15095 = vst [vmem:[#allocation126_spill] sm:$0xff] %v13455_v5 }
 0x90f   :  { %9137 = vmatpush1.bf16.msra.mxu1 %v13361_v36  ;;  %v13384_v52 = vpop.f32.mrb[5].mxu0  ;;  %v13452_v33 = vpack.c.bf16 %v3934_v60, %v3926_v55  ;;  %v3942_v20 = vld [vmem:[#allocation9 + $0x1b8] sm:$0xff]  ;;  %v13461_v55 = vpack.c.bf16 %v3949_v9, %v3941_v11  ;;  %v13464_v60 = vpack.c.bf16 %v3966_v50, %v3958_v57 }
 0x910   :  { %9139 = vmatprep.subr.bf16.mxu1 %v13364_v35  ;;  %v3950_v22 = vld [vmem:[#allocation9 + $0x1f8] sm:$0xff] }
 0x911   :  { %15094 = vst [vmem:[#allocation125_spill] sm:$0xff] %v13452_v33  ;;  %v13458_v61 = vpack.c.bf16 %v3950_v22, %v3942_v20  ;;  %15097 = vst [vmem:[#allocation128_spill] sm:$0xff] %v13461_v55  ;;  %v3974_v34 = vld [vmem:[#allocation9 + $0x2b8] sm:$0xff]  ;;  %v13467_v20 = vpack.c.bf16 %v3965_v38, %v3957_v42 }
 0x912   :  { %15098 = vst [vmem:[#allocation129_spill] sm:$0xff] %v13464_v60  ;;  %v3982_v6 = vld [vmem:[#allocation9 + $0x2f8] sm:$0xff] }
 0x913   :  { %9141 = vmatpush1.bf16.msra.mxu1 %v13367_v8  ;;  %15096 = vst [vmem:[#allocation127_spill] sm:$0xff] %v13458_v61  ;;  %15099 = vst [vmem:[#allocation130_spill] sm:$0xff] %v13467_v20  ;;  %v13470_v22 = vpack.c.bf16 %v3982_v6, %v3974_v34  ;;  %v3990_v11 = vld [vmem:[#allocation9 + $0x338] sm:$0xff] }
 0x914   :  { %9143 = vmatprep.subr.bf16.mxu1 %v13370_v58  ;;  %v3998_v9 = vld [vmem:[#allocation9 + $0x378] sm:$0xff] }
 0x915   :  { %15100 = vst [vmem:[#allocation131_spill] sm:$0xff] %v13470_v22  ;;  %v13476_v57 = vpack.c.bf16 %v3998_v9, %v3990_v11  ;;  %v4006_v38 = vld [vmem:[#allocation9 + $0x3b8] sm:$0xff] }
 0x916   :  { %v4014_v42 = vld [vmem:[#allocation9 + $0x3f8] sm:$0xff] }
 0x917   :  { %9145 = vmatpush1.bf16.msra.mxu1 %v13377_v40  ;;  %15102 = vst [vmem:[#allocation133_spill] sm:$0xff] %v13476_v57  ;;  %v13482_v6 = vpack.c.bf16 %v4014_v42, %v4006_v38 }
 0x918   :  { %9147 = vmatprep.subr.bf16.mxu1 %v13380_v49 }
 0x919   :  { %15104 = vst [vmem:[#allocation135_spill] sm:$0xff] %v13482_v6 }
 0x91b   :  { %9149 = vmatpush1.bf16.msra.mxu1 %v13387_v45 }
 0x91c   :  { %9151 = vmatprep.subr.bf16.mxu1 %v13390_v63 }
 0x91f   :  { %9153 = vmatpush1.bf16.msra.mxu1 %v13393_v16 }
 0x920   :  { %9155 = vmatprep.subr.bf16.mxu1 %v13396_v54 }
 0x923   :  { %9157 = vmatpush1.bf16.msra.mxu1 %v13399_v62 }
 0x924   :  { %9159 = vmatprep.subr.bf16.mxu1 %v13402_v0 }
 0x927   :  { %9161 = vmatpush1.bf16.msra.mxu1 %v13405_v13 }
 0x928   :  { %9163 = vmatprep.subr.bf16.mxu1 %v13408_v3 }
 0x92b   :  { %9165 = vmatpush1.bf16.msra.mxu1 %v13411_v19 }
 0x92c   :  { %9167 = vmatprep.subr.bf16.mxu1 %v13414_v21 }
 0x92f   :  { %9169 = vmatpush1.bf16.msra.mxu1 %v13417_v48 }
 0x930   :  { %9171 = vmatprep.subr.bf16.mxu1 %v13420_v59 }
 0x933   :  { %9173 = vmatpush1.bf16.msra.mxu1 %v13423_v26 }
 0x934   :  { %9175 = vmatprep.subr.bf16.mxu1 %v13426_v51 }
 0x937   :  { %9177 = vmatpush1.bf16.msra.mxu1 %v13429_v43 }
 0x938   :  { %9179 = vmatprep.subr.bf16.mxu1 %v13432_v27 }
 0x93b   :  { %9181 = vmatpush1.bf16.msra.mxu1 %v13435_v14 }
 0x93c   :  { %9247 = vmatprep.subr.bf16.mxu1 %v13438_v46 }
 0x93e   :  { %4279 = vmatmul.mubr.f32.vlgmr.msra.gmra.mrb[14].mxu1 %v15060_v2 }
 0x93f   :  { %9249 = vmatpush1.bf16.msra.mxu1 %v13441_v4  ;;  %4420 = vmatprep.mubr.f32.mxu1 %v15060_v2 }
 0x940   :  { %9251 = vmatprep.subr.bf16.mxu1 %v13444_v41 }
 0x943   :  { %9253 = vmatpush1.bf16.msra.mxu1 %v13448_v47 }
 0x944   :  { %9255 = vmatprep.subr.bf16.mxu1 %v13452_v33  ;;  %v3973_v33 = vld [vmem:[#allocation9 + $0x2b0] sm:$0xff] }
 0x947   :  { %9257 = vmatpush1.bf16.msra.mxu1 %v13455_v5  ;;  %v3981_v5 = vld [vmem:[#allocation9 + $0x2f0] sm:$0xff] }
 0x948   :  { %9259 = vmatprep.subr.bf16.mxu1 %v13458_v61  ;;  %v13473_v50 = vpack.c.bf16 %v3981_v5, %v3973_v33  ;;  %v3989_v61 = vld [vmem:[#allocation9 + $0x330] sm:$0xff]  ;;  %v4022_v5 = vld [vmem:[#allocation9 + $0x438] sm:$0xff] }
 0x949   :  { %v4030_v33 = vld [vmem:[#allocation9 + $0x478] sm:$0xff] }
 0x94a   :  { %15101 = vst [vmem:[#allocation132_spill] sm:$0xff] %v13473_v50  ;;  %v13488_v9 = vpack.c.bf16 %v4030_v33, %v4022_v5 }
 0x94b   :  { %9261 = vmatpush1.bf16.msra.mxu1 %v13461_v55  ;;  %v3997_v55 = vld [vmem:[#allocation9 + $0x370] sm:$0xff] }
 0x94c   :  { %9263 = vmatprep.subr.bf16.mxu1 %v13464_v60  ;;  %v13479_v34 = vpack.c.bf16 %v3997_v55, %v3989_v61  ;;  %v4005_v60 = vld [vmem:[#allocation9 + $0x3b0] sm:$0xff]  ;;  %15106 = vst [vmem:[#allocation137_spill] sm:$0xff] %v13488_v9  ;;  %v4038_v61 = vld [vmem:[#allocation9 + $0x4b8] sm:$0xff] }
 0x94d   :  { %v4046_v55 = vld [vmem:[#allocation9 + $0x4f8] sm:$0xff] }
 0x94e   :  { %15103 = vst [vmem:[#allocation134_spill] sm:$0xff] %v13479_v34  ;;  %v13494_v42 = vpack.c.bf16 %v4046_v55, %v4038_v61 }
 0x94f   :  { %9265 = vmatpush1.bf16.msra.mxu1 %v13467_v20  ;;  %v4013_v20 = vld [vmem:[#allocation9 + $0x3f0] sm:$0xff] }
 0x950   :  { %9267 = vmatprep.subr.bf16.mxu1 %v13470_v22  ;;  %v13485_v11 = vpack.c.bf16 %v4013_v20, %v4005_v60  ;;  %v4021_v22 = vld [vmem:[#allocation9 + $0x430] sm:$0xff]  ;;  %15108 = vst [vmem:[#allocation139_spill] sm:$0xff] %v13494_v42  ;;  %v4054_v60 = vld [vmem:[#allocation9 + $0x538] sm:$0xff] }
 0x951   :  { %v4062_v20 = vld [vmem:[#allocation9 + $0x578] sm:$0xff] }
 0x952   :  { %15105 = vst [vmem:[#allocation136_spill] sm:$0xff] %v13485_v11  ;;  %v13500_v33 = vpack.c.bf16 %v4062_v20, %v4054_v60 }
 0x953   :  { %9269 = vmatpush1.bf16.msra.mxu1 %v13473_v50  ;;  %v4029_v50 = vld [vmem:[#allocation9 + $0x470] sm:$0xff] }
 0x954   :  { %9271 = vmatprep.subr.bf16.mxu1 %v13476_v57  ;;  %v13491_v38 = vpack.c.bf16 %v4029_v50, %v4021_v22  ;;  %v4037_v57 = vld [vmem:[#allocation9 + $0x4b0] sm:$0xff]  ;;  %15110 = vst [vmem:[#allocation141_spill] sm:$0xff] %v13500_v33  ;;  %v4070_v22 = vld [vmem:[#allocation9 + $0x5b8] sm:$0xff] }
 0x955   :  { %v4078_v50 = vld [vmem:[#allocation9 + $0x5f8] sm:$0xff] }
 0x956   :  { %15107 = vst [vmem:[#allocation138_spill] sm:$0xff] %v13491_v38  ;;  %v13506_v55 = vpack.c.bf16 %v4078_v50, %v4070_v22 }
 0x957   :  { %9273 = vmatpush1.bf16.msra.mxu1 %v13479_v34  ;;  %v4045_v34 = vld [vmem:[#allocation9 + $0x4f0] sm:$0xff] }
 0x958   :  { %9275 = vmatprep.subr.bf16.mxu1 %v13482_v6  ;;  %v13497_v5 = vpack.c.bf16 %v4045_v34, %v4037_v57  ;;  %v4053_v6 = vld [vmem:[#allocation9 + $0x530] sm:$0xff]  ;;  %15112 = vst [vmem:[#allocation143_spill] sm:$0xff] %v13506_v55  ;;  %v4086_v57 = vld [vmem:[#allocation9 + $0x638] sm:$0xff] }
 0x959   :  { %v4094_v34 = vld [vmem:[#allocation9 + $0x678] sm:$0xff] }
 0x95a   :  { %15109 = vst [vmem:[#allocation140_spill] sm:$0xff] %v13497_v5  ;;  %v13512_v20 = vpack.c.bf16 %v4094_v34, %v4086_v57 }
 0x95b   :  { %9277 = vmatpush1.bf16.msra.mxu1 %v13485_v11  ;;  %v4061_v11 = vld [vmem:[#allocation9 + $0x570] sm:$0xff] }
 0x95c   :  { %9279 = vmatprep.subr.bf16.mxu1 %v13488_v9  ;;  %v13503_v61 = vpack.c.bf16 %v4061_v11, %v4053_v6  ;;  %v4069_v9 = vld [vmem:[#allocation9 + $0x5b0] sm:$0xff]  ;;  %15114 = vst [vmem:[#allocation145_spill] sm:$0xff] %v13512_v20  ;;  %v4102_v6 = vld [vmem:[#allocation9 + $0x6b8] sm:$0xff] }
 0x95d   :  { %v4110_v11 = vld [vmem:[#allocation9 + $0x6f8] sm:$0xff] }
 0x95e   :  { %15111 = vst [vmem:[#allocation142_spill] sm:$0xff] %v13503_v61  ;;  %v13518_v50 = vpack.c.bf16 %v4110_v11, %v4102_v6 }
 0x95f   :  { %9281 = vmatpush1.bf16.msra.mxu1 %v13491_v38  ;;  %v4077_v38 = vld [vmem:[#allocation9 + $0x5f0] sm:$0xff] }
 0x960   :  { %9283 = vmatprep.subr.bf16.mxu1 %v13494_v42  ;;  %v13509_v60 = vpack.c.bf16 %v4077_v38, %v4069_v9  ;;  %v4085_v42 = vld [vmem:[#allocation9 + $0x630] sm:$0xff]  ;;  %15116 = vst [vmem:[#allocation147_spill] sm:$0xff] %v13518_v50  ;;  %v4118_v9 = vld [vmem:[#allocation9 + $0x738] sm:$0xff] }
 0x961   :  { %v4126_v38 = vld [vmem:[#allocation9 + $0x778] sm:$0xff] }
 0x962   :  { %15113 = vst [vmem:[#allocation144_spill] sm:$0xff] %v13509_v60  ;;  %v13524_v34 = vpack.c.bf16 %v4126_v38, %v4118_v9  ;;  %v15123_v9 = vsub.s32 1, %v13053_v1 }
 0x963   :  { %9285 = vmatpush1.bf16.msra.mxu1 %v13497_v5  ;;  %v4093_v5 = vld [vmem:[#allocation9 + $0x670] sm:$0xff] }
 0x964   :  { %9287 = vmatprep.subr.bf16.mxu1 %v13500_v33  ;;  %v13515_v22 = vpack.c.bf16 %v4093_v5, %v4085_v42  ;;  %v4101_v33 = vld [vmem:[#allocation9 + $0x6b0] sm:$0xff]  ;;  %15118 = vst [vmem:[#allocation149_spill] sm:$0xff] %v13524_v34  ;;  %v4134_v42 = vld [vmem:[#allocation9 + $0x7b8] sm:$0xff] }
 0x965   :  { %v4142_v5 = vld [vmem:[#allocation9 + $0x7f8] sm:$0xff] }
 0x966   :  { %15115 = vst [vmem:[#allocation146_spill] sm:$0xff] %v13515_v22  ;;  %v13530_v11 = vpack.c.bf16 %v4142_v5, %v4134_v42 }
 0x967   :  { %9289 = vmatpush1.bf16.msra.mxu1 %v13503_v61  ;;  %v4109_v61 = vld [vmem:[#allocation9 + $0x6f0] sm:$0xff] }
 0x968   :  { %9291 = vmatprep.subr.bf16.mxu1 %v13506_v55  ;;  %v13521_v57 = vpack.c.bf16 %v4109_v61, %v4101_v33  ;;  %v4117_v55 = vld [vmem:[#allocation9 + $0x730] sm:$0xff]  ;;  %15120 = vst [vmem:[#allocation151_spill] sm:$0xff] %v13530_v11 }
 0x96a   :  { %15117 = vst [vmem:[#allocation148_spill] sm:$0xff] %v13521_v57 }
 0x96b   :  { %9293 = vmatpush1.bf16.msra.mxu1 %v13509_v60  ;;  %v4125_v60 = vld [vmem:[#allocation9 + $0x770] sm:$0xff] }
 0x96c   :  { %9295 = vmatprep.subr.bf16.mxu1 %v13512_v20  ;;  %v13527_v6 = vpack.c.bf16 %v4125_v60, %v4117_v55  ;;  %v4133_v20 = vld [vmem:[#allocation9 + $0x7b0] sm:$0xff]  ;;  %v13574_v60 = vld [vmem:[%s14688_s4] sm:$0xff]  ;;  %s12807_s4 = smov [#allocation20]  }
 0x96d   :  { %v3002_v38 = vrot.slane %v13574_v60, %v15123_v9  ;;  %s7563_s5 = sshll.u32 %s12807_s4, 4  ;;  %s7564_s5 = int_to_ptr.vmem [resolvable:$true] %s7563_s5 }
 0x96e   :  { %15119 = vst [vmem:[#allocation150_spill] sm:$0xff] %v13527_v6  ;;  %s12728_s21 = scalar_lea.vmem %s7564_s5, 64  ;;  %p12733_p11 = scmp.lt.s32.totalorder %s7564_s5, %s7564_s5 }
 0x96f   :  { %9297 = vmatpush1.bf16.msra.mxu1 %v13515_v22  ;;  %v4141_v22 = vld [vmem:[#allocation9 + $0x7f0] sm:$0xff]  ;;  %v13586_v5 = vadd.f32 %v13129_v10, %v3002_v38  ;;  %p12729_p10 = scmp.ne.s32.totalorder %s7564_s5, %s12728_s21  ;;  %p12734_p12 = scmp.lt.s32.totalorder %s12728_s21, %s12728_s21 }
 0x970   :  { %9299 = vmatprep.subr.bf16.mxu1 %v13518_v50  ;;  %v13533_v33 = vpack.c.bf16 %v4141_v22, %v4133_v20  ;;  %v15122_v20 = vsub.s32 0, %v13053_v1 }
 0x971   :  { %p12735_p13 = por %p12734_p12, %p12733_p11 }
 0x972   :  { %15121 = vst [vmem:[#allocation152_spill] sm:$0xff] %v13533_v33  ;;  %v2998_v22 = vrot.slane %v13574_v60, %v15122_v20 }
 0x973   :  { %9301 = vmatpush1.bf16.msra.mxu1 %v13521_v57  ;;  %p12736_p0 = pnand %p12735_p13, %p12729_p10 }
 0x974   :  { %9303 = vmatprep.subr.bf16.mxu1 %v13524_v34  ;;  %v13583_v42 = vadd.f32 %v13127_v7, %v2998_v22 }
 0x976   :  { %15124 = vst [vmem:[#allocation153_spill] sm:$0xff] %v13583_v42 }
 0x977   :  { %9305 = vmatpush1.bf16.msra.mxu1 %v13527_v6 }
 0x978   :  { %9307 = vmatprep.subr.bf16.mxu1 %v13530_v11 }
 0x97b   :  { %9309 = vmatpush1.bf16.msra.mxu1 %v13533_v33 }
 0x97c   :  { %9375 = vmatprep.subr.bf16.mxu1 %v13332_v12 }
 0x97e   :  { %4421 = vmatmul.mubr.f32.vlgmr.msra.gmra.mrb[16].mxu1 %v15060_v2  ;;  %v3013_v2 = vsub.s32 4, %v13053_v1 }
 0x97f   :  { %9377 = vmatpush1.bf16.msra.mxu1 %v13335_v15 }
 0x980   :  { %9379 = vmatprep.subr.bf16.mxu1 %v13338_v28 }
 0x983   :  { %9381 = vmatpush1.bf16.msra.mxu1 %v13342_v17 }
 0x984   :  { %9383 = vmatprep.subr.bf16.mxu1 %v13346_v39 }
 0x987   :  { %9385 = vmatpush1.bf16.msra.mxu1 %v13349_v53 }
 0x988   :  { %9387 = vmatprep.subr.bf16.mxu1 %v13352_v24 }
 0x98b   :  { %9389 = vmatpush1.bf16.msra.mxu1 %v13355_v44 }
 0x98c   :  { %9391 = vmatprep.subr.bf16.mxu1 %v13358_v18 }
 0x98f   :  { %9393 = vmatpush1.bf16.msra.mxu1 %v13361_v36 }
 0x990   :  { %9395 = vmatprep.subr.bf16.mxu1 %v13364_v35 }
 0x991   :  { %v3669_v61 = vpop.f32.mrb[10].mxu1 }
 0x992   :  { %v3671_v55 = vpop.f32.mrb[11].mxu1 }
 0x993   :  { %9397 = vmatpush1.bf16.msra.mxu1 %v13367_v8 }
 0x994   :  { %9399 = vmatprep.subr.bf16.mxu1 %v13370_v58 }
 0x997   :  { %9401 = vmatpush1.bf16.msra.mxu1 %v13377_v40 }
 0x998   :  { %9403 = vmatprep.subr.bf16.mxu1 %v13380_v49 }
 0x99b   :  { %9405 = vmatpush1.bf16.msra.mxu1 %v13387_v45 }
 0x99c   :  { %9407 = vmatprep.subr.bf16.mxu1 %v13390_v63 }
 0x99f   :  { %9409 = vmatpush1.bf16.msra.mxu1 %v13393_v16 }
 0x9a0   :  { %9411 = vmatprep.subr.bf16.mxu1 %v13396_v54 }
 0x9a3   :  { %9413 = vmatpush1.bf16.msra.mxu1 %v13399_v62 }
 0x9a4   :  { %9415 = vmatprep.subr.bf16.mxu1 %v13402_v0 }
 0x9a7   :  { %9417 = vmatpush1.bf16.msra.mxu1 %v13405_v13 }
 0x9a8   :  { %9419 = vmatprep.subr.bf16.mxu1 %v13408_v3 }
 0x9ab   :  { %9421 = vmatpush1.bf16.msra.mxu1 %v13411_v19 }
 0x9ac   :  { %9423 = vmatprep.subr.bf16.mxu1 %v13414_v21 }
 0x9af   :  { %9425 = vmatpush1.bf16.msra.mxu1 %v13417_v48 }
 0x9b0   :  { %9427 = vmatprep.subr.bf16.mxu1 %v13420_v59 }
 0x9b3   :  { %9429 = vmatpush1.bf16.msra.mxu1 %v13423_v26  ;;  %v3014_v26 = vrot.slane %v13574_v60, %v3013_v2 }
 0x9b4   :  { %9431 = vmatprep.subr.bf16.mxu1 %v13426_v51 }
 0x9b5   :  { %v13594_v10 = vadd.f32 %v3669_v61, %v3014_v26 }
 0x9b7   :  { %9433 = vmatpush1.bf16.msra.mxu1 %v13429_v43  ;;  %v4431_v38 = vadd.f32 %v13594_v10, %v13382_v25  ;;  %v3009_v25 = vsub.s32 3, %v13053_v1 }
 0x9b8   :  { %9435 = vmatprep.subr.bf16.mxu1 %v13432_v27 }
 0x9bb   :  { %9437 = vmatpush1.bf16.msra.mxu1 %v13435_v14  ;;  %v3017_v14 = vsub.s32 5, %v13053_v1 }
 0x9bc   :  { %9503 = vmatprep.subr.bf16.mxu1 %v13438_v46 }
 0x9bd   :  { %v3018_v7 = vrot.slane %v13574_v60, %v3017_v14 }
 0x9bf   :  { %v13596_v22 = vadd.f32 %v3671_v55, %v3018_v7  ;;  %v3010_v7 = vrot.slane %v13574_v60, %v3009_v25 }
 0x9c1   :  { %15125 = vst [vmem:[#allocation154_spill] sm:$0xff] %v13596_v22 }
 0x9d1   :  { %v4209_v46 = vpop.f32.mrb[12].mxu1 }
 0x9d2   :  { %v4427_v27 = vadd.f32 %v13583_v42, %v4209_v46  ;;  %v4211_v43 = vpop.f32.mrb[13].mxu1  ;;  %v4432_v46 = vadd.f32 %v13596_v22, %v13384_v52 }
 0x9d3   :  { %v4428_v20 = vadd.f32 %v13586_v5, %v4211_v43 }
 0x9d4   :  { %v7594_v51 = vmul.f32 -1.442695, %v4427_v27 }
 0x9d5   :  { %v7595_v9 = vmul.f32 -1.442695, %v4428_v20 }
 0x9d6   :  { %12235 = vpow2.f32 %v7594_v51 }
 0x9d7   :  { %12237 = vpow2.f32 %v7595_v9  ;;  %v3005_v9 = vsub.s32 2, %v13053_v1 }
 0x9d8   :  { %12239 = vtanh.f32 %v4431_v38  ;;  %v13610_v38 = vadd.f32 %v13310_v56, %v3010_v7 }
 0x9d9   :  { %12241 = vtanh.f32 %v4432_v46  ;;  %v3006_v52 = vrot.slane %v13574_v60, %v3005_v9 }
 0x9da   :  { %15127 = vst [vmem:[#allocation156_spill] sm:$0xff] %v13610_v38 }
 0x9e0   :  { %v12236_v42 = vpop.eup %12235 }
 0x9e1   :  { %v12238_v43 = vpop.eup %12237  ;;  %v4441_v27 = vadd.f32 1.0, %v12236_v42  ;;  %v13607_v42 = vadd.f32 %v13308_v37, %v3006_v52 }
 0x9e2   :  { %v4442_v2 = vadd.f32 1.0, %v12238_v43  ;;  %v12240_v51 = vpop.eup %12239 }
 0x9e3   :  { %12243 = vrcp.f32 %v4441_v27  ;;  %v12242_v14 = vpop.eup %12241  ;;  %15126 = vst [vmem:[#allocation155_spill] sm:$0xff] %v13607_v42 }
 0x9e4   :  { %12245 = vrcp.f32 %v4442_v2 }
 0x9ed   :  { %v12244_v26 = vpop.eup %12243 }
 0x9ee   :  { %v12246_v61 = vpop.eup %12245  ;;  %v4475_v55 = vmul.f32 %v12244_v26, %v12240_v51 }
 0x9ef   :  { %v4476_v20 = vmul.f32 %v12246_v61, %v12242_v14 }
 0xa11   :  { %v4280_v46 = vpop.f32.mrb[14].mxu1 }
 0xa12   :  { %v4429_v43 = vadd.f32 %v13607_v42, %v4280_v46  ;;  %v4282_v27 = vpop.f32.mrb[15].mxu1 }
 0xa13   :  { %v4430_v2 = vadd.f32 %v13610_v38, %v4282_v27  ;;  %v3021_v27 = vsub.s32 6, %v13053_v1 }
 0xa14   :  { %v7596_v51 = vmul.f32 -1.442695, %v4429_v43  ;;  %v3025_v43 = vsub.s32 7, %v13053_v1 }
 0xa15   :  { %v7597_v14 = vmul.f32 -1.442695, %v4430_v2  ;;  %v3022_v2 = vrot.slane %v13574_v60, %v3021_v27 }
 0xa16   :  { %12247 = vpow2.f32 %v7596_v51  ;;  %v3026_v51 = vrot.slane %v13574_v60, %v3025_v43 }
 0xa17   :  { %12249 = vpow2.f32 %v7597_v14  ;;  %v13623_v14 = vadd.f32 %v13372_v30, %v3022_v2 }
 0xa20   :  { %v12248_v26 = vpop.eup %12247 }
 0xa21   :  { %v12250_v61 = vpop.eup %12249  ;;  %v4453_v9 = vadd.f32 1.0, %v12248_v26  ;;  %v13626_v26 = vadd.f32 %v13374_v31, %v3026_v51  ;;  %v12806_v31 = vmov 1966171168  }
 0xa22   :  { %v4454_v25 = vadd.f32 1.0, %v12250_v61 }
 0xa23   :  { %12251 = vrcp.f32 %v4453_v9 }
 0xa24   :  { %12253 = vrcp.f32 %v4454_v25 }
 0xa2d   :  { %v12252_v37 = vpop.eup %12251 }
 0xa2e   :  { %v12254_v52 = vpop.eup %12253  ;;  %v4473_v56 = vmul.f32 0.0, %v12252_v37 }
 0xa2f   :  { %v4474_v7 = vmul.f32 0.0, %v12254_v52 }
 0xa30   :  { %v13614_v22 = vadd.f32 %v4475_v55, %v4473_v56 }
 0xa31   :  { %v13616_v46 = vadd.f32 %v4476_v20, %v4474_v7  ;;  %v4487_v7 = vunpack.c.l.s4 %v12806_v31  ;;  %v15133_v31 = vld [vmem:[#allocation33_spill] sm:$0xff] }
 0xa33   :  { %v4488_v43 = vunpack.c.0.s8 %v4487_v7  ;;  %v15134_v7 = vld [vmem:[#allocation126_spill] sm:$0xff] }
 0xa51   :  { %v4422_v61 = vpop.f32.mrb[16].mxu1 }
 0xa52   :  { %v4433_v55 = vadd.f32 %v13623_v14, %v4422_v61  ;;  %v4424_v9 = vpop.f32.mrb[17].mxu1 }
 0xa53   :  { %v4434_v20 = vadd.f32 %v13626_v26, %v4424_v9  ;;  %v13635_v9 = vsub.s32 %v4488_v43, %v13053_v1  ;;  %v15136_v43 = vld [vmem:[#allocation127_spill] sm:$0xff] }
 0xa54   :  { %v7598_v25 = vmul.f32 -1.442695, %v4433_v55 }
 0xa55   :  { %v7599_v37 = vmul.f32 -1.442695, %v4434_v20 }
 0xa56   :  { %12255 = vpow2.f32 %v7598_v25 }
 0xa57   :  { %12257 = vpow2.f32 %v7599_v37 }
 0xa58   :  { %12259 = vtanh.f32 %v13614_v22 }
 0xa59   :  { %12261 = vtanh.f32 %v13616_v46 }
 0xa60   :  { %v12256_v52 = vpop.eup %12255 }
 0xa61   :  { %v12258_v56 = vpop.eup %12257  ;;  %v4467_v60 = vadd.f32 1.0, %v12256_v52  ;;  %v15128_v52 = vlaneseq }
 0xa62   :  { %v4468_v30 = vadd.f32 1.0, %v12258_v56  ;;  %v12260_v27 = vpop.eup %12259 }
 0xa63   :  { %12263 = vrcp.f32 %v4467_v60  ;;  %v12262_v2 = vpop.eup %12261  ;;  %vm13644_vm6 = vcmp.lt.s32.totalorder %v15128_v52, 256  ;;  %v15131_v60 = vld [vmem:[#allocation32_spill] sm:$0xff]  ;;  %v15143_v52 = vld [vmem:[#allocation38_spill] sm:$0xff] }
 0xa64   :  { %12265 = vrcp.f32 %v4468_v30  ;;  %v15132_v30 = vld [vmem:[#allocation125_spill] sm:$0xff] }
 0xa6d   :  { %v12264_v51 = vpop.eup %12263 }
 0xa6e   :  { %v12266_v61 = vpop.eup %12265  ;;  %v13632_v55 = vmul.f32 %v12264_v51, %v12260_v27  ;;  %v15135_v27 = vld [vmem:[#allocation34_spill] sm:$0xff]  ;;  %v15138_v51 = vld [vmem:[#allocation128_spill] sm:$0xff] }
 0xa6f   :  { %v4482_v20 = vmul.f32 %v12266_v61, %v12262_v2  ;;  %v15137_v2 = vld [vmem:[#allocation35_spill] sm:$0xff]  ;;  %v15139_v61 = vld [vmem:[#allocation36_spill] sm:$0xff] }
 0xa71   :  { %4571 = vmatprep.mubr.f32.mxu0 %v4482_v20  ;;  %4642 = vmatprep.mubr.f32.mxu1 %v4482_v20  ;;  %v4485_v25 = vcombine.low %v13632_v55, %v4482_v20 }
 0xa72   :  { %4572 = vmatmul.mubr.f32.vlgmr.msra.gmra.mrb[6].mxu0 %v13632_v55  ;;  %4643 = vmatmul.mubr.f32.vlgmr.msra.gmra.mrb[18].mxu1 %v13632_v55 }
 0xa73   :  { %v4492_v37 = vrot.slane %v4485_v25, %v13635_v9  ;;  %9441 = vmatpush1.bf16.msra.mxu0 %v13098_v23  ;;  %9505 = vmatpush1.bf16.msra.mxu1 %v13441_v4  ;;  %v15141_v25 = vld [vmem:[#allocation37_spill] sm:$0xff] }
 0xa74   :  { %4713 = vmatprep.mubr.f32.mxu0 %v4482_v20  ;;  %4784 = vmatprep.mubr.f32.mxu1 %v4482_v20  ;;  %v15140_v20 = vld [vmem:[#allocation129_spill] sm:$0xff] }
 0xa75   :  { %v4499_v1 = vrot.slane %v4492_v37, %v13635_v9  ;;  %9443 = vmatprep.subr.bf16.mxu0 %v13103_v29  ;;  %9507 = vmatprep.subr.bf16.mxu1 %v13444_v41  ;;  %v15142_v37 = vld [vmem:[#allocation130_spill] sm:$0xff] }
 0xa77   :  { %4505 = vst.msk [vmem:[#allocation2] ss:$8 sm:$0x3] %vm13644_vm6, %v4499_v1  ;;  %9445 = vmatpush1.bf16.msra.mxu0 %v13106_v32  ;;  %9509 = vmatpush1.bf16.msra.mxu1 %v13448_v47  ;;  %v15144_v1 = vld [vmem:[#allocation131_spill] sm:$0xff] }
 0xa78   :  { %9447 = vmatprep.subr.bf16.mxu0 %v15131_v60  ;;  %9511 = vmatprep.subr.bf16.mxu1 %v15132_v30 }
 0xa7b   :  { %9449 = vmatpush1.bf16.msra.mxu0 %v15133_v31  ;;  %9513 = vmatpush1.bf16.msra.mxu1 %v15134_v7  ;;  %v15145_v7 = vld [vmem:[#allocation39_spill] sm:$0xff] }
 0xa7c   :  { %9451 = vmatprep.subr.bf16.mxu0 %v15135_v27  ;;  %9515 = vmatprep.subr.bf16.mxu1 %v15136_v43  ;;  %v15146_v27 = vld [vmem:[#allocation132_spill] sm:$0xff] }
 0xa7d   :  { %v15147_v43 = vld [vmem:[#allocation40_spill] sm:$0xff] }
 0xa7f   :  { %9453 = vmatpush1.bf16.msra.mxu0 %v15137_v2  ;;  %9517 = vmatpush1.bf16.msra.mxu1 %v15138_v51  ;;  %v15148_v2 = vld [vmem:[#allocation133_spill] sm:$0xff] }
 0xa80   :  { %9455 = vmatprep.subr.bf16.mxu0 %v15139_v61  ;;  %9519 = vmatprep.subr.bf16.mxu1 %v15140_v20  ;;  %v15149_v51 = vld [vmem:[#allocation41_spill] sm:$0xff]  ;;  %v15150_v61 = vld [vmem:[#allocation134_spill] sm:$0xff] }
 0xa81   :  { %v15151_v20 = vld [vmem:[#allocation42_spill] sm:$0xff] }
 0xa83   :  { %9457 = vmatpush1.bf16.msra.mxu0 %v15141_v25  ;;  %9521 = vmatpush1.bf16.msra.mxu1 %v15142_v37  ;;  %v15152_v25 = vld [vmem:[#allocation135_spill] sm:$0xff] }
 0xa84   :  { %9459 = vmatprep.subr.bf16.mxu0 %v15143_v52  ;;  %9523 = vmatprep.subr.bf16.mxu1 %v15144_v1  ;;  %v15153_v37 = vld [vmem:[#allocation43_spill] sm:$0xff]  ;;  %v15154_v52 = vld [vmem:[#allocation136_spill] sm:$0xff] }
 0xa85   :  { %v15155_v1 = vld [vmem:[#allocation44_spill] sm:$0xff] }
 0xa87   :  { %9461 = vmatpush1.bf16.msra.mxu0 %v15145_v7  ;;  %9525 = vmatpush1.bf16.msra.mxu1 %v15146_v27  ;;  %v15156_v7 = vld [vmem:[#allocation137_spill] sm:$0xff] }
 0xa88   :  { %9463 = vmatprep.subr.bf16.mxu0 %v15147_v43  ;;  %9527 = vmatprep.subr.bf16.mxu1 %v15148_v2  ;;  %v15157_v27 = vld [vmem:[#allocation45_spill] sm:$0xff]  ;;  %v15158_v43 = vld [vmem:[#allocation138_spill] sm:$0xff] }
 0xa89   :  { %v15159_v2 = vld [vmem:[#allocation46_spill] sm:$0xff] }
 0xa8b   :  { %9465 = vmatpush1.bf16.msra.mxu0 %v15149_v51  ;;  %9529 = vmatpush1.bf16.msra.mxu1 %v15150_v61  ;;  %v15160_v51 = vld [vmem:[#allocation139_spill] sm:$0xff] }
 0xa8c   :  { %9467 = vmatprep.subr.bf16.mxu0 %v15151_v20  ;;  %9531 = vmatprep.subr.bf16.mxu1 %v15152_v25  ;;  %v15161_v61 = vld [vmem:[#allocation47_spill] sm:$0xff]  ;;  %v15162_v20 = vld [vmem:[#allocation140_spill] sm:$0xff] }
 0xa8d   :  { %v15163_v25 = vld [vmem:[#allocation48_spill] sm:$0xff] }
 0xa8f   :  { %9469 = vmatpush1.bf16.msra.mxu0 %v15153_v37  ;;  %9533 = vmatpush1.bf16.msra.mxu1 %v15154_v52  ;;  %v15164_v37 = vld [vmem:[#allocation141_spill] sm:$0xff] }
 0xa90   :  { %9471 = vmatprep.subr.bf16.mxu0 %v15155_v1  ;;  %9535 = vmatprep.subr.bf16.mxu1 %v15156_v7  ;;  %v15165_v52 = vld [vmem:[#allocation49_spill] sm:$0xff]  ;;  %v15166_v1 = vld [vmem:[#allocation142_spill] sm:$0xff] }
 0xa91   :  { %v15167_v7 = vld [vmem:[#allocation50_spill] sm:$0xff] }
 0xa93   :  { %9473 = vmatpush1.bf16.msra.mxu0 %v15157_v27  ;;  %9537 = vmatpush1.bf16.msra.mxu1 %v15158_v43  ;;  %v15168_v27 = vld [vmem:[#allocation143_spill] sm:$0xff] }
 0xa94   :  { %9475 = vmatprep.subr.bf16.mxu0 %v15159_v2  ;;  %9539 = vmatprep.subr.bf16.mxu1 %v15160_v51  ;;  %v15169_v43 = vld [vmem:[#allocation51_spill] sm:$0xff]  ;;  %v15170_v2 = vld [vmem:[#allocation144_spill] sm:$0xff] }
 0xa95   :  { %v15171_v51 = vld [vmem:[#allocation52_spill] sm:$0xff] }
 0xa97   :  { %9477 = vmatpush1.bf16.msra.mxu0 %v15161_v61  ;;  %9541 = vmatpush1.bf16.msra.mxu1 %v15162_v20  ;;  %v15172_v61 = vld [vmem:[#allocation145_spill] sm:$0xff] }
 0xa98   :  { %9479 = vmatprep.subr.bf16.mxu0 %v15163_v25  ;;  %9543 = vmatprep.subr.bf16.mxu1 %v15164_v37  ;;  %v15173_v20 = vld [vmem:[#allocation53_spill] sm:$0xff]  ;;  %v15174_v25 = vld [vmem:[#allocation146_spill] sm:$0xff] }
 0xa99   :  { %v15175_v37 = vld [vmem:[#allocation54_spill] sm:$0xff] }
 0xa9b   :  { %9481 = vmatpush1.bf16.msra.mxu0 %v15165_v52  ;;  %9545 = vmatpush1.bf16.msra.mxu1 %v15166_v1  ;;  %v15176_v1 = vld [vmem:[#allocation55_spill] sm:$0xff] }
 0xa9c   :  { %9483 = vmatprep.subr.bf16.mxu0 %v15167_v7  ;;  %9547 = vmatprep.subr.bf16.mxu1 %v15168_v27  ;;  %v15177_v27 = vld [vmem:[#allocation56_spill] sm:$0xff] }
 0xa9f   :  { %9485 = vmatpush1.bf16.msra.mxu0 %v15169_v43  ;;  %9549 = vmatpush1.bf16.msra.mxu1 %v15170_v2  ;;  %v15178_v2 = vld [vmem:[#allocation57_spill] sm:$0xff] }
 0xaa0   :  { %9487 = vmatprep.subr.bf16.mxu0 %v15171_v51  ;;  %9551 = vmatprep.subr.bf16.mxu1 %v15172_v61  ;;  %v15179_v61 = vld [vmem:[#allocation58_spill] sm:$0xff] }
 0xaa3   :  { %9489 = vmatpush1.bf16.msra.mxu0 %v15173_v20  ;;  %9553 = vmatpush1.bf16.msra.mxu1 %v15174_v25  ;;  %v15180_v25 = vld [vmem:[#allocation59_spill] sm:$0xff] }
 0xaa4   :  { %9491 = vmatprep.subr.bf16.mxu0 %v15175_v37  ;;  %9555 = vmatprep.subr.bf16.mxu1 %v13518_v50  ;;  %v15181_v50 = vld [vmem:[#allocation60_spill] sm:$0xff] }
 0xaa7   :  { %9493 = vmatpush1.bf16.msra.mxu0 %v15176_v1  ;;  %9557 = vmatpush1.bf16.msra.mxu1 %v13521_v57 }
 0xaa8   :  { %9495 = vmatprep.subr.bf16.mxu0 %v15177_v27  ;;  %9559 = vmatprep.subr.bf16.mxu1 %v13524_v34  ;;  %v15182_v34 = vld [vmem:[#allocation61_spill] sm:$0xff] }
 0xaab   :  { %9497 = vmatpush1.bf16.msra.mxu0 %v15178_v2  ;;  %9561 = vmatpush1.bf16.msra.mxu1 %v13527_v6  ;;  %v15183_v6 = vld [vmem:[#allocation62_spill] sm:$0xff] }
 0xaac   :  { %9499 = vmatprep.subr.bf16.mxu0 %v15179_v61  ;;  %9563 = vmatprep.subr.bf16.mxu1 %v13530_v11  ;;  %v15184_v11 = vld [vmem:[#allocation63_spill] sm:$0xff] }
 0xaaf   :  { %9501 = vmatpush1.bf16.msra.mxu0 %v15180_v25  ;;  %9565 = vmatpush1.bf16.msra.mxu1 %v13533_v33  ;;  %v15185_v33 = vld [vmem:[#allocation64_spill] sm:$0xff] }
 0xab0   :  { %9567 = vmatprep.subr.bf16.mxu0 %v15181_v50  ;;  %9631 = vmatprep.subr.bf16.mxu1 %v13332_v12  ;;  %v15186_v12 = vld [vmem:[#allocation65_spill] sm:$0xff] }
 0xab2   :  { %4714 = vmatmul.mubr.f32.vlgmr.msra.gmra.mrb[8].mxu0 %v13632_v55  ;;  %4785 = vmatmul.mubr.f32.vlgmr.msra.gmra.mrb[20].mxu1 %v13632_v55  ;;  %v15187_v55 = vld [vmem:[#allocation66_spill] sm:$0xff] }
 0xab3   :  { %9569 = vmatpush1.bf16.msra.mxu0 %v15182_v34  ;;  %9633 = vmatpush1.bf16.msra.mxu1 %v13335_v15  ;;  %v15188_v15 = vld [vmem:[#allocation67_spill] sm:$0xff] }
 0xab4   :  { %9571 = vmatprep.subr.bf16.mxu0 %v15183_v6  ;;  %9635 = vmatprep.subr.bf16.mxu1 %v13338_v28  ;;  %v15189_v28 = vld [vmem:[#allocation68_spill] sm:$0xff] }
 0xab7   :  { %9573 = vmatpush1.bf16.msra.mxu0 %v15184_v11  ;;  %9637 = vmatpush1.bf16.msra.mxu1 %v13342_v17  ;;  %v15190_v17 = vld [vmem:[#allocation69_spill] sm:$0xff] }
 0xab8   :  { %9575 = vmatprep.subr.bf16.mxu0 %v15185_v33  ;;  %9639 = vmatprep.subr.bf16.mxu1 %v13346_v39  ;;  %v15191_v39 = vld [vmem:[#allocation70_spill] sm:$0xff] }
 0xabb   :  { %9577 = vmatpush1.bf16.msra.mxu0 %v15186_v12  ;;  %9641 = vmatpush1.bf16.msra.mxu1 %v13349_v53  ;;  %v15192_v53 = vld [vmem:[#allocation71_spill] sm:$0xff] }
 0xabc   :  { %9579 = vmatprep.subr.bf16.mxu0 %v15187_v55  ;;  %9643 = vmatprep.subr.bf16.mxu1 %v13352_v24  ;;  %v15193_v24 = vld [vmem:[#allocation72_spill] sm:$0xff] }
 0xabf   :  { %9581 = vmatpush1.bf16.msra.mxu0 %v15188_v15  ;;  %9645 = vmatpush1.bf16.msra.mxu1 %v13355_v44  ;;  %v15194_v44 = vld [vmem:[#allocation73_spill] sm:$0xff] }
 0xac0   :  { %9583 = vmatprep.subr.bf16.mxu0 %v15189_v28  ;;  %9647 = vmatprep.subr.bf16.mxu1 %v13358_v18  ;;  %v15195_v18 = vld [vmem:[#allocation74_spill] sm:$0xff] }
 0xac3   :  { %9585 = vmatpush1.bf16.msra.mxu0 %v15190_v17  ;;  %9649 = vmatpush1.bf16.msra.mxu1 %v13361_v36  ;;  %v15196_v36 = vld [vmem:[#allocation75_spill] sm:$0xff] }
 0xac4   :  { %9587 = vmatprep.subr.bf16.mxu0 %v15191_v39  ;;  %9651 = vmatprep.subr.bf16.mxu1 %v13364_v35  ;;  %v15197_v35 = vld [vmem:[#allocation76_spill] sm:$0xff] }
 0xac7   :  { %9589 = vmatpush1.bf16.msra.mxu0 %v15192_v53  ;;  %9653 = vmatpush1.bf16.msra.mxu1 %v13367_v8  ;;  %v15198_v8 = vld [vmem:[#allocation77_spill] sm:$0xff] }
 0xac8   :  { %9591 = vmatprep.subr.bf16.mxu0 %v15193_v24  ;;  %9655 = vmatprep.subr.bf16.mxu1 %v13370_v58  ;;  %v15199_v58 = vld [vmem:[#allocation78_spill] sm:$0xff] }
 0xacb   :  { %9593 = vmatpush1.bf16.msra.mxu0 %v15194_v44  ;;  %9657 = vmatpush1.bf16.msra.mxu1 %v13377_v40  ;;  %v15200_v40 = vld [vmem:[#allocation79_spill] sm:$0xff] }
 0xacc   :  { %9595 = vmatprep.subr.bf16.mxu0 %v15195_v18  ;;  %9659 = vmatprep.subr.bf16.mxu1 %v13380_v49  ;;  %v15201_v49 = vld [vmem:[#allocation80_spill] sm:$0xff] }
 0xacf   :  { %9597 = vmatpush1.bf16.msra.mxu0 %v15196_v36  ;;  %9661 = vmatpush1.bf16.msra.mxu1 %v13387_v45  ;;  %v15202_v45 = vld [vmem:[#allocation81_spill] sm:$0xff] }
 0xad0   :  { %9599 = vmatprep.subr.bf16.mxu0 %v15197_v35  ;;  %9663 = vmatprep.subr.bf16.mxu1 %v13390_v63  ;;  %v15203_v63 = vld [vmem:[#allocation82_spill] sm:$0xff] }
 0xad3   :  { %9601 = vmatpush1.bf16.msra.mxu0 %v15198_v8  ;;  %9665 = vmatpush1.bf16.msra.mxu1 %v13393_v16  ;;  %v15204_v16 = vld [vmem:[#allocation83_spill] sm:$0xff]  ;;  %v4864_v8 = vrot.slane %v13616_v46, 7 }
 0xad4   :  { %9603 = vmatprep.subr.bf16.mxu0 %v15199_v58  ;;  %9667 = vmatprep.subr.bf16.mxu1 %v13396_v54  ;;  %v15205_v54 = vld [vmem:[#allocation84_spill] sm:$0xff] }
 0xad7   :  { %9605 = vmatpush1.bf16.msra.mxu0 %v15200_v40  ;;  %9669 = vmatpush1.bf16.msra.mxu1 %v13399_v62  ;;  %v15206_v62 = vld [vmem:[#allocation85_spill] sm:$0xff] }
 0xad8   :  { %9607 = vmatprep.subr.bf16.mxu0 %v15201_v49  ;;  %9671 = vmatprep.subr.bf16.mxu1 %v13402_v0  ;;  %v15207_v0 = vld [vmem:[#allocation86_spill] sm:$0xff] }
 0xadb   :  { %9609 = vmatpush1.bf16.msra.mxu0 %v15202_v45  ;;  %9673 = vmatpush1.bf16.msra.mxu1 %v13405_v13  ;;  %v15208_v13 = vld [vmem:[#allocation87_spill] sm:$0xff] }
 0xadc   :  { %9611 = vmatprep.subr.bf16.mxu0 %v15203_v63  ;;  %9675 = vmatprep.subr.bf16.mxu1 %v13408_v3  ;;  %v15209_v63 = vld [vmem:[#allocation119_spill] sm:$0xff]  ;;  %v15210_v3 = vld [vmem:[#allocation88_spill] sm:$0xff] }
 0xadf   :  { %9613 = vmatpush1.bf16.msra.mxu0 %v15204_v16  ;;  %9677 = vmatpush1.bf16.msra.mxu1 %v13411_v19  ;;  %v15211_v16 = vld [vmem:[#allocation120_spill] sm:$0xff]  ;;  %v15212_v19 = vld [vmem:[#allocation89_spill] sm:$0xff] }
 0xae0   :  { %9615 = vmatprep.subr.bf16.mxu0 %v15205_v54  ;;  %9679 = vmatprep.subr.bf16.mxu1 %v13414_v21  ;;  %v15213_v54 = vld [vmem:[#allocation121_spill] sm:$0xff]  ;;  %v15214_v21 = vld [vmem:[#allocation90_spill] sm:$0xff] }
 0xae3   :  { %9617 = vmatpush1.bf16.msra.mxu0 %v15206_v62  ;;  %9681 = vmatpush1.bf16.msra.mxu1 %v13417_v48  ;;  %v15215_v62 = vld [vmem:[#allocation122_spill] sm:$0xff]  ;;  %v15216_v48 = vld [vmem:[#allocation91_spill] sm:$0xff] }
 0xae4   :  { %9619 = vmatprep.subr.bf16.mxu0 %v15207_v0  ;;  %9683 = vmatprep.subr.bf16.mxu1 %v13420_v59  ;;  %v15217_v0 = vld [vmem:[#allocation123_spill] sm:$0xff] }
 0xae5   :  { %v15218_v59 = vld [vmem:[#allocation31_spill] sm:$0xff] }
 0xae7   :  { %9621 = vmatpush1.bf16.msra.mxu0 %v15208_v13  ;;  %9685 = vmatpush1.bf16.msra.mxu1 %v15209_v63  ;;  %v15219_v13 = vld [vmem:[#allocation124_spill] sm:$0xff] }
 0xae8   :  { %9623 = vmatprep.subr.bf16.mxu0 %v15210_v3  ;;  %9687 = vmatprep.subr.bf16.mxu1 %v15211_v16 }
 0xaeb   :  { %9625 = vmatpush1.bf16.msra.mxu0 %v15212_v19  ;;  %9689 = vmatpush1.bf16.msra.mxu1 %v15213_v54 }
 0xaec   :  { %9627 = vmatprep.subr.bf16.mxu0 %v15214_v21  ;;  %9691 = vmatprep.subr.bf16.mxu1 %v15215_v62 }
 0xaef   :  { %9629 = vmatpush1.bf16.msra.mxu0 %v15216_v48  ;;  %9693 = vmatpush1.bf16.msra.mxu1 %v15217_v0 }
 0xaf0   :  { %9695 = vmatprep.subr.bf16.mxu0 %v15218_v59  ;;  %9759 = vmatprep.subr.bf16.mxu1 %v15219_v13  ;;  %v4863_v13 = vrot.slane %v13614_v22, 7 }
 0xb45   :  { %v4573_v63 = vpop.f32.mrb[6].mxu0  ;;  %v4644_v3 = vpop.f32.mrb[18].mxu1 }
 0xb46   :  { %v4801_v45 = vrot.slane %v4644_v3, 7  ;;  %v4575_v16 = vpop.f32.mrb[7].mxu0  ;;  %v4646_v49 = vpop.f32.mrb[19].mxu1 }
 0xb47   :  { %v4802_v19 = vrot.slane %v4646_v49, 7 }
 0xb48   :  { %v4817_v54 = vadd.f32 %v13607_v42, %v4801_v45  ;;  %v4799_v42 = vrot.slane %v4573_v63, 7 }
 0xb49   :  { %v4818_v21 = vadd.f32 %v13610_v38, %v4802_v19  ;;  %v4800_v19 = vrot.slane %v4575_v16, 7 }
 0xb4a   :  { %v7602_v40 = vmul.f32 -1.442695, %v4817_v54  ;;  %v15220_v54 = vld [vmem:[#allocation153_spill] sm:$0xff] }
 0xb4b   :  { %v7603_v62 = vmul.f32 -1.442695, %v4818_v21  ;;  %v4815_v21 = vadd.f32 %v15220_v54, %v4799_v42 }
 0xb4c   :  { %12267 = vpow2.f32 %v7602_v40  ;;  %v4816_v40 = vadd.f32 %v13586_v5, %v4800_v19  ;;  %v15221_v19 = vld [vmem:[#allocation154_spill] sm:$0xff] }
 0xb4d   :  { %12269 = vpow2.f32 %v7603_v62  ;;  %v7600_v62 = vmul.f32 -1.442695, %v4815_v21 }
 0xb56   :  { %v12268_v48 = vpop.eup %12267 }
 0xb57   :  { %v4841_v0 = vadd.f32 1.0, %v12268_v48  ;;  %v12270_v58 = vpop.eup %12269  ;;  %v7601_v48 = vmul.f32 -1.442695, %v4816_v40 }
 0xb58   :  { %v4842_v59 = vadd.f32 1.0, %v12270_v58 }
 0xb59   :  { %12271 = vrcp.f32 %v4841_v0 }
 0xb5a   :  { %12273 = vrcp.f32 %v4842_v59 }
 0xb5b   :  { %12275 = vpow2.f32 %v7600_v62 }
 0xb5c   :  { %12277 = vpow2.f32 %v7601_v48 }
 0xb63   :  { %v12272_v3 = vpop.eup %12271 }
 0xb64   :  { %v4867_v49 = vmul.f32 %v12272_v3, %v4863_v13  ;;  %v12274_v35 = vpop.eup %12273 }
 0xb65   :  { %v4868_v45 = vmul.f32 %v12274_v35, %v4864_v8  ;;  %v12276_v58 = vpop.eup %12275 }
 0xb66   :  { %v12278_v0 = vpop.eup %12277  ;;  %v4829_v59 = vadd.f32 1.0, %v12276_v58 }
 0xb67   :  { %v4830_v22 = vadd.f32 1.0, %v12278_v0 }
 0xb68   :  { %12279 = vrcp.f32 %v4829_v59 }
 0xb69   :  { %12281 = vrcp.f32 %v4830_v22 }
 0xb85   :  { %v4715_v38 = vpop.f32.mrb[8].mxu0  ;;  %v4786_v36 = vpop.f32.mrb[20].mxu1 }
 0xb86   :  { %v4803_v46 = vrot.slane %v4715_v38, 7  ;;  %v4805_v13 = vrot.slane %v4786_v36, 7  ;;  %v4717_v3 = vpop.f32.mrb[9].mxu0  ;;  %v4788_v35 = vpop.f32.mrb[21].mxu1 }
 0xb87   :  { %v4804_v8 = vrot.slane %v4717_v3, 7  ;;  %v4806_v16 = vrot.slane %v4788_v35, 7  ;;  %v12280_v36 = vpop.eup %12279 }
 0xb88   :  { %v4819_v63 = vadd.f32 %v13594_v10, %v4803_v46  ;;  %v4821_v42 = vadd.f32 %v13623_v14, %v4805_v13  ;;  %v12282_v38 = vpop.eup %12281 }
 0xb89   :  { %v4820_v21 = vadd.f32 %v15221_v19, %v4804_v8  ;;  %v4822_v40 = vadd.f32 %v13626_v26, %v4806_v16 }
 0xb8a   :  { %12283 = vtanh.f32 %v4819_v63  ;;  %v7604_v62 = vmul.f32 -1.442695, %v4821_v42 }
 0xb8b   :  { %12285 = vtanh.f32 %v4820_v21  ;;  %v7605_v48 = vmul.f32 -1.442695, %v4822_v40 }
 0xb8c   :  { %12287 = vpow2.f32 %v7604_v62 }
 0xb8d   :  { %12289 = vpow2.f32 %v7605_v48 }
 0xb94   :  { %v12284_v58 = vpop.eup %12283 }
 0xb95   :  { %v12286_v0 = vpop.eup %12285  ;;  %v4869_v59 = vmul.f32 %v12284_v58, %v12280_v36 }
 0xb96   :  { %v12288_v3 = vpop.eup %12287  ;;  %v4870_v46 = vmul.f32 %v12286_v0, %v12282_v38 }
 0xb97   :  { %v12290_v35 = vpop.eup %12289  ;;  %v13789_v13 = vadd.f32 %v4869_v59, %v4867_v49  ;;  %v4855_v22 = vadd.f32 1.0, %v12288_v3  ;;  %v15222_v59 = vld [vmem:[#allocation126_spill] sm:$0xff] }
 0xb98   :  { %v13791_v8 = vadd.f32 %v4870_v46, %v4868_v45  ;;  %v4856_v16 = vadd.f32 1.0, %v12290_v35  ;;  %v15223_v3 = vld [vmem:[#allocation34_spill] sm:$0xff]  ;;  %v15224_v46 = vld [vmem:[#allocation127_spill] sm:$0xff] }
 0xb99   :  { %12291 = vtanh.f32 %v13789_v13  ;;  %v15225_v35 = vld [vmem:[#allocation35_spill] sm:$0xff] }
 0xb9a   :  { %12293 = vrcp.f32 %v4855_v22  ;;  %v15226_v22 = vld [vmem:[#allocation128_spill] sm:$0xff] }
 0xb9b   :  { %12295 = vtanh.f32 %v13791_v8 }
 0xb9c   :  { %12297 = vrcp.f32 %v4856_v16  ;;  %v15227_v16 = vld [vmem:[#allocation36_spill] sm:$0xff] }
 0xba3   :  { %v12292_v63 = vpop.eup %12291 }
 0xba4   :  { %v12294_v42 = vpop.eup %12293 }
 0xba5   :  { %v12296_v21 = vpop.eup %12295  ;;  %v4875_v40 = vmul.f32 %v12294_v42, %v12292_v63  ;;  %v15228_v63 = vld [vmem:[#allocation129_spill] sm:$0xff] }
 0xba6   :  { %v12298_v62 = vpop.eup %12297  ;;  %v15229_v42 = vld [vmem:[#allocation37_spill] sm:$0xff] }
 0xba7   :  { %v4876_v48 = vmul.f32 %v12298_v62, %v12296_v21  ;;  %v13795_v49 = vrot.slane %v4875_v40, 1  ;;  %v15230_v21 = vld [vmem:[#allocation130_spill] sm:$0xff]  ;;  %v15232_v62 = vld [vmem:[#allocation131_spill] sm:$0xff] }
 0xba9   :  { %v4900_v36 = vrot.slane %v4876_v48, 1  ;;  %v4879_v38 = vcombine.low %v4875_v40, %v4876_v48  ;;  %v15231_v40 = vld [vmem:[#allocation38_spill] sm:$0xff]  ;;  %v15233_v48 = vld [vmem:[#allocation39_spill] sm:$0xff] }
 0xbab   :  { %4967 = vmatprep.mubr.f32.mxu0 %v4900_v36  ;;  %5038 = vmatprep.mubr.f32.mxu1 %v4900_v36  ;;  %v4886_v45 = vrot.slane %v4879_v38, %v13635_v9  ;;  %v15235_v38 = vld [vmem:[#allocation40_spill] sm:$0xff] }
 0xbac   :  { %4968 = vmatmul.mubr.f32.vlgmr.msra.gmra.mrb[10].mxu0 %v13795_v49  ;;  %5039 = vmatmul.mubr.f32.vlgmr.msra.gmra.mrb[22].mxu1 %v13795_v49 }
 0xbad   :  { %v4887_v58 = vcombine.high %v4886_v45, %v4886_v45  ;;  %9697 = vmatpush1.bf16.msra.mxu0 %v13098_v23  ;;  %9761 = vmatpush1.bf16.msra.mxu1 %v13441_v4  ;;  %v15236_v45 = vld [vmem:[#allocation133_spill] sm:$0xff] }
 0xbae   :  { %5109 = vmatprep.mubr.f32.mxu0 %v4900_v36  ;;  %5180 = vmatprep.mubr.f32.mxu1 %v4900_v36  ;;  %v15234_v36 = vld [vmem:[#allocation132_spill] sm:$0xff] }
 0xbaf   :  { %v4894_v0 = vrot.slane %v4887_v58, %v13635_v9  ;;  %9699 = vmatprep.subr.bf16.mxu0 %v13103_v29  ;;  %9763 = vmatprep.subr.bf16.mxu1 %v13444_v41  ;;  %v15237_v58 = vld [vmem:[#allocation41_spill] sm:$0xff] }
 0xbb1   :  { %4897 = vst.msk [vmem:[#allocation2 + $0x1] ss:$8 sm:$0x3] %vm13644_vm6, %v4894_v0  ;;  %9701 = vmatpush1.bf16.msra.mxu0 %v13106_v32  ;;  %9765 = vmatpush1.bf16.msra.mxu1 %v13448_v47  ;;  %v15238_v0 = vld [vmem:[#allocation134_spill] sm:$0xff] }
 0xbb2   :  { %9703 = vmatprep.subr.bf16.mxu0 %v15131_v60  ;;  %9767 = vmatprep.subr.bf16.mxu1 %v15132_v30 }
 0xbb5   :  { %9705 = vmatpush1.bf16.msra.mxu0 %v15133_v31  ;;  %9769 = vmatpush1.bf16.msra.mxu1 %v15222_v59 }
 0xbb6   :  { %9707 = vmatprep.subr.bf16.mxu0 %v15223_v3  ;;  %9771 = vmatprep.subr.bf16.mxu1 %v15224_v46 }
 0xbb9   :  { %9709 = vmatpush1.bf16.msra.mxu0 %v15225_v35  ;;  %9773 = vmatpush1.bf16.msra.mxu1 %v15226_v22 }
 0xbba   :  { %9711 = vmatprep.subr.bf16.mxu0 %v15227_v16  ;;  %9775 = vmatprep.subr.bf16.mxu1 %v15228_v63  ;;  %v15239_v63 = vld [vmem:[#allocation42_spill] sm:$0xff] }
 0xbbd   :  { %9713 = vmatpush1.bf16.msra.mxu0 %v15229_v42  ;;  %9777 = vmatpush1.bf16.msra.mxu1 %v15230_v21  ;;  %v15240_v42 = vld [vmem:[#allocation135_spill] sm:$0xff] }
 0xbbe   :  { %9715 = vmatprep.subr.bf16.mxu0 %v15231_v40  ;;  %9779 = vmatprep.subr.bf16.mxu1 %v15232_v62  ;;  %v15241_v21 = vld [vmem:[#allocation43_spill] sm:$0xff]  ;;  %v15242_v40 = vld [vmem:[#allocation136_spill] sm:$0xff] }
 0xbbf   :  { %v15243_v62 = vld [vmem:[#allocation44_spill] sm:$0xff] }
 0xbc1   :  { %9717 = vmatpush1.bf16.msra.mxu0 %v15233_v48  ;;  %9781 = vmatpush1.bf16.msra.mxu1 %v15234_v36  ;;  %v15244_v48 = vld [vmem:[#allocation137_spill] sm:$0xff] }
 0xbc2   :  { %9719 = vmatprep.subr.bf16.mxu0 %v15235_v38  ;;  %9783 = vmatprep.subr.bf16.mxu1 %v15236_v45  ;;  %v15245_v36 = vld [vmem:[#allocation45_spill] sm:$0xff]  ;;  %v15246_v38 = vld [vmem:[#allocation138_spill] sm:$0xff] }
 0xbc3   :  { %v15247_v45 = vld [vmem:[#allocation46_spill] sm:$0xff] }
 0xbc5   :  { %9721 = vmatpush1.bf16.msra.mxu0 %v15237_v58  ;;  %9785 = vmatpush1.bf16.msra.mxu1 %v15238_v0  ;;  %v15248_v58 = vld [vmem:[#allocation139_spill] sm:$0xff] }
 0xbc6   :  { %9723 = vmatprep.subr.bf16.mxu0 %v15239_v63  ;;  %9787 = vmatprep.subr.bf16.mxu1 %v15240_v42  ;;  %v15249_v0 = vld [vmem:[#allocation47_spill] sm:$0xff]  ;;  %v15250_v63 = vld [vmem:[#allocation140_spill] sm:$0xff] }
 0xbc7   :  { %v15251_v42 = vld [vmem:[#allocation48_spill] sm:$0xff] }
 0xbc9   :  { %9725 = vmatpush1.bf16.msra.mxu0 %v15241_v21  ;;  %9789 = vmatpush1.bf16.msra.mxu1 %v15242_v40  ;;  %v15252_v21 = vld [vmem:[#allocation141_spill] sm:$0xff] }
 0xbca   :  { %9727 = vmatprep.subr.bf16.mxu0 %v15243_v62  ;;  %9791 = vmatprep.subr.bf16.mxu1 %v15244_v48  ;;  %v15253_v62 = vld [vmem:[#allocation142_spill] sm:$0xff] }
 0xbcd   :  { %9729 = vmatpush1.bf16.msra.mxu0 %v15245_v36  ;;  %9793 = vmatpush1.bf16.msra.mxu1 %v15246_v38  ;;  %v15254_v36 = vld [vmem:[#allocation143_spill] sm:$0xff] }
 0xbce   :  { %9731 = vmatprep.subr.bf16.mxu0 %v15247_v45  ;;  %9795 = vmatprep.subr.bf16.mxu1 %v15248_v58  ;;  %v15255_v45 = vld [vmem:[#allocation144_spill] sm:$0xff] }
 0xbd1   :  { %9733 = vmatpush1.bf16.msra.mxu0 %v15249_v0  ;;  %9797 = vmatpush1.bf16.msra.mxu1 %v15250_v63  ;;  %v15256_v0 = vld [vmem:[#allocation145_spill] sm:$0xff] }
 0xbd2   :  { %9735 = vmatprep.subr.bf16.mxu0 %v15251_v42  ;;  %9799 = vmatprep.subr.bf16.mxu1 %v15252_v21  ;;  %v15257_v42 = vld [vmem:[#allocation146_spill] sm:$0xff] }
 0xbd5   :  { %9737 = vmatpush1.bf16.msra.mxu0 %v15165_v52  ;;  %9801 = vmatpush1.bf16.msra.mxu1 %v15253_v62  ;;  %v15258_v52 = vld [vmem:[#allocation147_spill] sm:$0xff] }
 0xbd6   :  { %9739 = vmatprep.subr.bf16.mxu0 %v15167_v7  ;;  %9803 = vmatprep.subr.bf16.mxu1 %v15254_v36 }
 0xbd9   :  { %9741 = vmatpush1.bf16.msra.mxu0 %v15169_v43  ;;  %9805 = vmatpush1.bf16.msra.mxu1 %v15255_v45  ;;  %v15259_v43 = vld [vmem:[#allocation149_spill] sm:$0xff] }
 0xbda   :  { %9743 = vmatprep.subr.bf16.mxu0 %v15171_v51  ;;  %9807 = vmatprep.subr.bf16.mxu1 %v15256_v0  ;;  %v15260_v51 = vld [vmem:[#allocation150_spill] sm:$0xff] }
 0xbdd   :  { %9745 = vmatpush1.bf16.msra.mxu0 %v15173_v20  ;;  %9809 = vmatpush1.bf16.msra.mxu1 %v15257_v42  ;;  %v15261_v20 = vld [vmem:[#allocation151_spill] sm:$0xff] }
 0xbde   :  { %9747 = vmatprep.subr.bf16.mxu0 %v15175_v37  ;;  %9811 = vmatprep.subr.bf16.mxu1 %v15258_v52  ;;  %v15262_v37 = vld [vmem:[#allocation152_spill] sm:$0xff] }
 0xbe1   :  { %9749 = vmatpush1.bf16.msra.mxu0 %v15176_v1  ;;  %9813 = vmatpush1.bf16.msra.mxu1 %v13521_v57  ;;  %v15263_v1 = vld [vmem:[#allocation92_spill] sm:$0xff] }
 0xbe2   :  { %9751 = vmatprep.subr.bf16.mxu0 %v15177_v27  ;;  %9815 = vmatprep.subr.bf16.mxu1 %v15259_v43 }
 0xbe5   :  { %9753 = vmatpush1.bf16.msra.mxu0 %v15178_v2  ;;  %9817 = vmatpush1.bf16.msra.mxu1 %v15260_v51  ;;  %v15264_v2 = vld [vmem:[#allocation93_spill] sm:$0xff] }
 0xbe6   :  { %9755 = vmatprep.subr.bf16.mxu0 %v15179_v61  ;;  %9819 = vmatprep.subr.bf16.mxu1 %v15261_v20  ;;  %v15265_v61 = vld [vmem:[#allocation94_spill] sm:$0xff] }
 0xbe9   :  { %9757 = vmatpush1.bf16.msra.mxu0 %v15180_v25  ;;  %9821 = vmatpush1.bf16.msra.mxu1 %v15262_v37  ;;  %v15266_v25 = vld [vmem:[#allocation95_spill] sm:$0xff] }
 0xbea   :  { %9823 = vmatprep.subr.bf16.mxu0 %v15181_v50  ;;  %9887 = vmatprep.subr.bf16.mxu1 %v15263_v1  ;;  %v15267_v50 = vld [vmem:[#allocation96_spill] sm:$0xff]  ;;  %v15268_v1 = vld [vmem:[#allocation97_spill] sm:$0xff] }
 0xbec   :  { %5110 = vmatmul.mubr.f32.vlgmr.msra.gmra.mrb[12].mxu0 %v13795_v49  ;;  %5181 = vmatmul.mubr.f32.vlgmr.msra.gmra.mrb[24].mxu1 %v13795_v49  ;;  %v15269_v49 = vld [vmem:[#allocation98_spill] sm:$0xff] }
 0xbed   :  { %9825 = vmatpush1.bf16.msra.mxu0 %v15182_v34  ;;  %9889 = vmatpush1.bf16.msra.mxu1 %v15264_v2 }
 0xbee   :  { %9827 = vmatprep.subr.bf16.mxu0 %v15183_v6  ;;  %9891 = vmatprep.subr.bf16.mxu1 %v15265_v61  ;;  %v15270_v6 = vld [vmem:[#allocation99_spill] sm:$0xff]  ;;  %v5260_v61 = vrot.slane %v13791_v8, 7 }
 0xbf1   :  { %9829 = vmatpush1.bf16.msra.mxu0 %v15184_v11  ;;  %9893 = vmatpush1.bf16.msra.mxu1 %v15266_v25  ;;  %v15271_v11 = vld [vmem:[#allocation100_spill] sm:$0xff] }
 0xbf2   :  { %9831 = vmatprep.subr.bf16.mxu0 %v15185_v33  ;;  %9895 = vmatprep.subr.bf16.mxu1 %v15267_v50  ;;  %v15272_v33 = vld [vmem:[#allocation101_spill] sm:$0xff] }
 0xbf5   :  { %9833 = vmatpush1.bf16.msra.mxu0 %v15186_v12  ;;  %9897 = vmatpush1.bf16.msra.mxu1 %v15268_v1  ;;  %v15273_v12 = vld [vmem:[#allocation102_spill] sm:$0xff]  ;;  %v15315_v1 = vld [vmem:[#allocation156_spill] sm:$0xff] }
 0xbf6   :  { %9835 = vmatprep.subr.bf16.mxu0 %v15187_v55  ;;  %9899 = vmatprep.subr.bf16.mxu1 %v15269_v49  ;;  %v15274_v55 = vld [vmem:[#allocation103_spill] sm:$0xff] }
 0xbf7   :  { %v15314_v49 = vld [vmem:[#allocation155_spill] sm:$0xff] }
 0xbf9   :  { %9837 = vmatpush1.bf16.msra.mxu0 %v15188_v15  ;;  %9901 = vmatpush1.bf16.msra.mxu1 %v15270_v6  ;;  %v15275_v15 = vld [vmem:[#allocation104_spill] sm:$0xff] }
 0xbfa   :  { %9839 = vmatprep.subr.bf16.mxu0 %v15189_v28  ;;  %9903 = vmatprep.subr.bf16.mxu1 %v15271_v11  ;;  %v15276_v28 = vld [vmem:[#allocation105_spill] sm:$0xff] }
 0xbfd   :  { %9841 = vmatpush1.bf16.msra.mxu0 %v15190_v17  ;;  %9905 = vmatpush1.bf16.msra.mxu1 %v15272_v33  ;;  %v15277_v17 = vld [vmem:[#allocation106_spill] sm:$0xff]  ;;  %v15278_v33 = vld [vmem:[#allocation75_spill] sm:$0xff] }
 0xbfe   :  { %9843 = vmatprep.subr.bf16.mxu0 %v15191_v39  ;;  %9907 = vmatprep.subr.bf16.mxu1 %v15273_v12  ;;  %v15279_v39 = vld [vmem:[#allocation107_spill] sm:$0xff]  ;;  %v15280_v12 = vld [vmem:[#allocation76_spill] sm:$0xff] }
 0xc01   :  { %9845 = vmatpush1.bf16.msra.mxu0 %v15192_v53  ;;  %9909 = vmatpush1.bf16.msra.mxu1 %v15274_v55  ;;  %v15281_v53 = vld [vmem:[#allocation108_spill] sm:$0xff]  ;;  %v15282_v55 = vld [vmem:[#allocation77_spill] sm:$0xff] }
 0xc02   :  { %9847 = vmatprep.subr.bf16.mxu0 %v15193_v24  ;;  %9911 = vmatprep.subr.bf16.mxu1 %v15275_v15  ;;  %v15283_v24 = vld [vmem:[#allocation109_spill] sm:$0xff]  ;;  %v15284_v15 = vld [vmem:[#allocation78_spill] sm:$0xff] }
 0xc05   :  { %9849 = vmatpush1.bf16.msra.mxu0 %v15194_v44  ;;  %9913 = vmatpush1.bf16.msra.mxu1 %v15276_v28  ;;  %v15285_v44 = vld [vmem:[#allocation110_spill] sm:$0xff]  ;;  %v15286_v28 = vld [vmem:[#allocation79_spill] sm:$0xff] }
 0xc06   :  { %9851 = vmatprep.subr.bf16.mxu0 %v15195_v18  ;;  %9915 = vmatprep.subr.bf16.mxu1 %v15277_v17  ;;  %v15287_v18 = vld [vmem:[#allocation111_spill] sm:$0xff]  ;;  %v15288_v17 = vld [vmem:[#allocation80_spill] sm:$0xff] }
 0xc09   :  { %9853 = vmatpush1.bf16.msra.mxu0 %v15278_v33  ;;  %9917 = vmatpush1.bf16.msra.mxu1 %v15279_v39  ;;  %v15289_v33 = vld [vmem:[#allocation112_spill] sm:$0xff]  ;;  %v15290_v39 = vld [vmem:[#allocation81_spill] sm:$0xff] }
 0xc0a   :  { %9855 = vmatprep.subr.bf16.mxu0 %v15280_v12  ;;  %9919 = vmatprep.subr.bf16.mxu1 %v15281_v53  ;;  %v15291_v12 = vld [vmem:[#allocation113_spill] sm:$0xff]  ;;  %v15292_v53 = vld [vmem:[#allocation82_spill] sm:$0xff] }
 0xc0d   :  { %9857 = vmatpush1.bf16.msra.mxu0 %v15282_v55  ;;  %9921 = vmatpush1.bf16.msra.mxu1 %v15283_v24  ;;  %v15293_v55 = vld [vmem:[#allocation114_spill] sm:$0xff]  ;;  %v15294_v24 = vld [vmem:[#allocation83_spill] sm:$0xff] }
 0xc0e   :  { %9859 = vmatprep.subr.bf16.mxu0 %v15284_v15  ;;  %9923 = vmatprep.subr.bf16.mxu1 %v15285_v44  ;;  %v15295_v15 = vld [vmem:[#allocation115_spill] sm:$0xff]  ;;  %v15296_v44 = vld [vmem:[#allocation84_spill] sm:$0xff] }
 0xc11   :  { %9861 = vmatpush1.bf16.msra.mxu0 %v15286_v28  ;;  %9925 = vmatpush1.bf16.msra.mxu1 %v15287_v18  ;;  %v15297_v28 = vld [vmem:[#allocation116_spill] sm:$0xff]  ;;  %v15298_v18 = vld [vmem:[#allocation85_spill] sm:$0xff] }
 0xc12   :  { %9863 = vmatprep.subr.bf16.mxu0 %v15288_v17  ;;  %9927 = vmatprep.subr.bf16.mxu1 %v15289_v33  ;;  %v15299_v17 = vld [vmem:[#allocation117_spill] sm:$0xff]  ;;  %v15300_v33 = vld [vmem:[#allocation86_spill] sm:$0xff] }
 0xc15   :  { %9865 = vmatpush1.bf16.msra.mxu0 %v15290_v39  ;;  %9929 = vmatpush1.bf16.msra.mxu1 %v15291_v12  ;;  %v15301_v39 = vld [vmem:[#allocation118_spill] sm:$0xff]  ;;  %v15302_v12 = vld [vmem:[#allocation87_spill] sm:$0xff] }
 0xc16   :  { %9867 = vmatprep.subr.bf16.mxu0 %v15292_v53  ;;  %9931 = vmatprep.subr.bf16.mxu1 %v15293_v55  ;;  %v15303_v53 = vld [vmem:[#allocation119_spill] sm:$0xff]  ;;  %v15304_v55 = vld [vmem:[#allocation88_spill] sm:$0xff] }
 0xc19   :  { %9869 = vmatpush1.bf16.msra.mxu0 %v15294_v24  ;;  %9933 = vmatpush1.bf16.msra.mxu1 %v15295_v15  ;;  %v15305_v24 = vld [vmem:[#allocation120_spill] sm:$0xff]  ;;  %v15306_v15 = vld [vmem:[#allocation89_spill] sm:$0xff] }
 0xc1a   :  { %9871 = vmatprep.subr.bf16.mxu0 %v15296_v44  ;;  %9935 = vmatprep.subr.bf16.mxu1 %v15297_v28  ;;  %v15307_v44 = vld [vmem:[#allocation121_spill] sm:$0xff]  ;;  %v15308_v28 = vld [vmem:[#allocation90_spill] sm:$0xff] }
 0xc1d   :  { %9873 = vmatpush1.bf16.msra.mxu0 %v15298_v18  ;;  %9937 = vmatpush1.bf16.msra.mxu1 %v15299_v17  ;;  %v15309_v18 = vld [vmem:[#allocation122_spill] sm:$0xff]  ;;  %v15310_v17 = vld [vmem:[#allocation91_spill] sm:$0xff] }
 0xc1e   :  { %9875 = vmatprep.subr.bf16.mxu0 %v15300_v33  ;;  %9939 = vmatprep.subr.bf16.mxu1 %v15301_v39  ;;  %v15311_v33 = vld [vmem:[#allocation123_spill] sm:$0xff] }
 0xc1f   :  { %v15312_v39 = vld [vmem:[#allocation31_spill] sm:$0xff] }
 0xc21   :  { %9877 = vmatpush1.bf16.msra.mxu0 %v15302_v12  ;;  %9941 = vmatpush1.bf16.msra.mxu1 %v15303_v53  ;;  %v15313_v12 = vld [vmem:[#allocation124_spill] sm:$0xff] }
 0xc22   :  { %9879 = vmatprep.subr.bf16.mxu0 %v15304_v55  ;;  %9943 = vmatprep.subr.bf16.mxu1 %v15305_v24 }
 0xc25   :  { %9881 = vmatpush1.bf16.msra.mxu0 %v15306_v15  ;;  %9945 = vmatpush1.bf16.msra.mxu1 %v15307_v44 }
 0xc26   :  { %9883 = vmatprep.subr.bf16.mxu0 %v15308_v28  ;;  %9947 = vmatprep.subr.bf16.mxu1 %v15309_v18 }
 0xc29   :  { %9885 = vmatpush1.bf16.msra.mxu0 %v15310_v17  ;;  %9949 = vmatpush1.bf16.msra.mxu1 %v15311_v33 }
 0xc2a   :  { %9951 = vmatprep.subr.bf16.mxu0 %v15312_v39  ;;  %10015 = vmatprep.subr.bf16.mxu1 %v15313_v12  ;;  %v5259_v12 = vrot.slane %v13789_v13, 7 }
 0xc7f   :  { %v4969_v53 = vpop.f32.mrb[10].mxu0  ;;  %v5040_v55 = vpop.f32.mrb[22].mxu1 }
 0xc80   :  { %v5197_v11 = vrot.slane %v5040_v55, 6  ;;  %v4971_v24 = vpop.f32.mrb[11].mxu0  ;;  %v5042_v6 = vpop.f32.mrb[23].mxu1 }
 0xc81   :  { %v5198_v15 = vrot.slane %v5042_v6, 6 }
 0xc82   :  { %v5213_v44 = vadd.f32 %v15314_v49, %v5197_v11  ;;  %v5195_v49 = vrot.slane %v4969_v53, 6 }
 0xc83   :  { %v5214_v28 = vadd.f32 %v15315_v1, %v5198_v15  ;;  %v5196_v15 = vrot.slane %v4971_v24, 6 }
 0xc84   :  { %v7608_v50 = vmul.f32 -1.442695, %v5213_v44 }
 0xc85   :  { %v7609_v18 = vmul.f32 -1.442695, %v5214_v28  ;;  %v5211_v28 = vadd.f32 %v15220_v54, %v5195_v49  ;;  %v5212_v44 = vadd.f32 %v13586_v5, %v5196_v15 }
 0xc86   :  { %12299 = vpow2.f32 %v7608_v50 }
 0xc87   :  { %12301 = vpow2.f32 %v7609_v18  ;;  %v7606_v18 = vmul.f32 -1.442695, %v5211_v28 }
 0xc90   :  { %v12300_v17 = vpop.eup %12299 }
 0xc91   :  { %v5237_v33 = vadd.f32 1.0, %v12300_v17  ;;  %v12302_v25 = vpop.eup %12301  ;;  %v7607_v17 = vmul.f32 -1.442695, %v5212_v44 }
 0xc92   :  { %v5238_v39 = vadd.f32 1.0, %v12302_v25 }
 0xc93   :  { %12303 = vrcp.f32 %v5237_v33 }
 0xc94   :  { %12305 = vrcp.f32 %v5238_v39 }
 0xc95   :  { %12307 = vpow2.f32 %v7606_v18 }
 0xc96   :  { %12309 = vpow2.f32 %v7607_v17 }
 0xc9d   :  { %v12304_v55 = vpop.eup %12303 }
 0xc9e   :  { %v5263_v6 = vmul.f32 %v12304_v55, %v5259_v12  ;;  %v12306_v2 = vpop.eup %12305 }
 0xc9f   :  { %v5264_v11 = vmul.f32 %v12306_v2, %v5260_v61  ;;  %v12308_v50 = vpop.eup %12307 }
 0xca0   :  { %v12310_v39 = vpop.eup %12309  ;;  %v5225_v33 = vadd.f32 1.0, %v12308_v50 }
 0xca1   :  { %v5226_v25 = vadd.f32 1.0, %v12310_v39 }
 0xca2   :  { %12311 = vrcp.f32 %v5225_v33 }
 0xca3   :  { %12313 = vrcp.f32 %v5226_v25 }
 0xcbf   :  { %v5111_v13 = vpop.f32.mrb[12].mxu0  ;;  %v5182_v1 = vpop.f32.mrb[24].mxu1 }
 0xcc0   :  { %v5199_v8 = vrot.slane %v5111_v13, 6  ;;  %v5201_v12 = vrot.slane %v5182_v1, 6  ;;  %v5113_v55 = vpop.f32.mrb[13].mxu0  ;;  %v5184_v2 = vpop.f32.mrb[25].mxu1 }
 0xcc1   :  { %v5200_v53 = vrot.slane %v5113_v55, 6  ;;  %v5202_v24 = vrot.slane %v5184_v2, 6  ;;  %v12312_v1 = vpop.eup %12311 }
 0xcc2   :  { %v5215_v61 = vadd.f32 %v13594_v10, %v5199_v8  ;;  %v5217_v49 = vadd.f32 %v13623_v14, %v5201_v12  ;;  %v12314_v17 = vpop.eup %12313 }
 0xcc3   :  { %v5216_v15 = vadd.f32 %v15221_v19, %v5200_v53  ;;  %v5218_v28 = vadd.f32 %v13626_v26, %v5202_v24 }
 0xcc4   :  { %12315 = vtanh.f32 %v5215_v61  ;;  %v7610_v44 = vmul.f32 -1.442695, %v5217_v49 }
 0xcc5   :  { %12317 = vtanh.f32 %v5216_v15  ;;  %v7611_v18 = vmul.f32 -1.442695, %v5218_v28 }
 0xcc6   :  { %12319 = vpow2.f32 %v7610_v44 }
 0xcc7   :  { %12321 = vpow2.f32 %v7611_v18 }
 0xcce   :  { %v12316_v50 = vpop.eup %12315 }
 0xccf   :  { %v12318_v39 = vpop.eup %12317  ;;  %v5265_v33 = vmul.f32 %v12316_v50, %v12312_v1 }
 0xcd0   :  { %v12320_v13 = vpop.eup %12319  ;;  %v5266_v8 = vmul.f32 %v12318_v39, %v12314_v17  ;;  %v15316_v39 = vld [vmem:[#allocation129_spill] sm:$0xff] }
 0xcd1   :  { %v12322_v55 = vpop.eup %12321  ;;  %v13943_v12 = vadd.f32 %v5265_v33, %v5263_v6  ;;  %v5251_v25 = vadd.f32 1.0, %v12320_v13  ;;  %v15317_v33 = vld [vmem:[#allocation37_spill] sm:$0xff]  ;;  %v15318_v13 = vld [vmem:[#allocation130_spill] sm:$0xff] }
 0xcd2   :  { %v13945_v2 = vadd.f32 %v5266_v8, %v5264_v11  ;;  %v5252_v53 = vadd.f32 1.0, %v12322_v55  ;;  %v15319_v8 = vld [vmem:[#allocation38_spill] sm:$0xff]  ;;  %v15320_v55 = vld [vmem:[#allocation131_spill] sm:$0xff] }
 0xcd3   :  { %12323 = vtanh.f32 %v13943_v12 }
 0xcd4   :  { %12325 = vrcp.f32 %v5251_v25  ;;  %v15321_v25 = vld [vmem:[#allocation39_spill] sm:$0xff] }
 0xcd5   :  { %12327 = vtanh.f32 %v13945_v2 }
 0xcd6   :  { %12329 = vrcp.f32 %v5252_v53  ;;  %v15322_v53 = vld [vmem:[#allocation132_spill] sm:$0xff] }
 0xcdd   :  { %v12324_v24 = vpop.eup %12323 }
 0xcde   :  { %v12326_v61 = vpop.eup %12325 }
 0xcdf   :  { %v12328_v49 = vpop.eup %12327  ;;  %v5271_v15 = vmul.f32 %v12326_v61, %v12324_v24  ;;  %v15323_v24 = vld [vmem:[#allocation40_spill] sm:$0xff]  ;;  %v15324_v61 = vld [vmem:[#allocation133_spill] sm:$0xff] }
 0xce0   :  { %v12330_v28 = vpop.eup %12329 }
 0xce1   :  { %v5272_v44 = vmul.f32 %v12330_v28, %v12328_v49  ;;  %v13949_v6 = vrot.slane %v5271_v15, 2  ;;  %v15325_v49 = vld [vmem:[#allocation41_spill] sm:$0xff]  ;;  %v15327_v28 = vld [vmem:[#allocation42_spill] sm:$0xff] }
 0xce3   :  { %v5296_v18 = vrot.slane %v5272_v44, 2  ;;  %v5275_v1 = vcombine.low %v5271_v15, %v5272_v44  ;;  %v15326_v15 = vld [vmem:[#allocation134_spill] sm:$0xff]  ;;  %v15328_v44 = vld [vmem:[#allocation135_spill] sm:$0xff] }
 0xce5   :  { %5363 = vmatprep.mubr.f32.mxu0 %v5296_v18  ;;  %5434 = vmatprep.mubr.f32.mxu1 %v5296_v18  ;;  %v5282_v11 = vrot.slane %v5275_v1, %v13635_v9  ;;  %v15330_v1 = vld [vmem:[#allocation44_spill] sm:$0xff] }
 0xce6   :  { %5364 = vmatmul.mubr.f32.vlgmr.msra.gmra.mrb[14].mxu0 %v13949_v6  ;;  %5435 = vmatmul.mubr.f32.vlgmr.msra.gmra.mrb[26].mxu1 %v13949_v6 }
 0xce7   :  { %v5289_v17 = vrot.slane %v5282_v11, %v13635_v9  ;;  %9953 = vmatpush1.bf16.msra.mxu0 %v13098_v23  ;;  %10017 = vmatpush1.bf16.msra.mxu1 %v13441_v4  ;;  %v15331_v11 = vld [vmem:[#allocation45_spill] sm:$0xff] }
 0xce8   :  { %5505 = vmatprep.mubr.f32.mxu0 %v5296_v18  ;;  %5576 = vmatprep.mubr.f32.mxu1 %v5296_v18  ;;  %v15329_v18 = vld [vmem:[#allocation43_spill] sm:$0xff] }
 0xce9   :  { %v5290_v50 = vcombine.high %v5289_v17, %v5289_v17  ;;  %9955 = vmatprep.subr.bf16.mxu0 %v13103_v29  ;;  %10019 = vmatprep.subr.bf16.mxu1 %v13444_v41  ;;  %v15332_v17 = vld [vmem:[#allocation46_spill] sm:$0xff] }
 0xceb   :  { %5293 = vst.msk [vmem:[#allocation2 + $0x2] ss:$8 sm:$0x3] %vm13644_vm6, %v5290_v50  ;;  %9957 = vmatpush1.bf16.msra.mxu0 %v13106_v32  ;;  %10021 = vmatpush1.bf16.msra.mxu1 %v13448_v47  ;;  %v15333_v50 = vld [vmem:[#allocation47_spill] sm:$0xff] }
 0xcec   :  { %9959 = vmatprep.subr.bf16.mxu0 %v15131_v60  ;;  %10023 = vmatprep.subr.bf16.mxu1 %v15132_v30 }
 0xcef   :  { %9961 = vmatpush1.bf16.msra.mxu0 %v15133_v31  ;;  %10025 = vmatpush1.bf16.msra.mxu1 %v15222_v59 }
 0xcf0   :  { %9963 = vmatprep.subr.bf16.mxu0 %v15223_v3  ;;  %10027 = vmatprep.subr.bf16.mxu1 %v15224_v46 }
 0xcf3   :  { %9965 = vmatpush1.bf16.msra.mxu0 %v15225_v35  ;;  %10029 = vmatpush1.bf16.msra.mxu1 %v15226_v22 }
 0xcf4   :  { %9967 = vmatprep.subr.bf16.mxu0 %v15227_v16  ;;  %10031 = vmatprep.subr.bf16.mxu1 %v15316_v39 }
 0xcf7   :  { %9969 = vmatpush1.bf16.msra.mxu0 %v15317_v33  ;;  %10033 = vmatpush1.bf16.msra.mxu1 %v15318_v13 }
 0xcf8   :  { %9971 = vmatprep.subr.bf16.mxu0 %v15319_v8  ;;  %10035 = vmatprep.subr.bf16.mxu1 %v15320_v55 }
 0xcfb   :  { %9973 = vmatpush1.bf16.msra.mxu0 %v15321_v25  ;;  %10037 = vmatpush1.bf16.msra.mxu1 %v15322_v53 }
 0xcfc   :  { %9975 = vmatprep.subr.bf16.mxu0 %v15323_v24  ;;  %10039 = vmatprep.subr.bf16.mxu1 %v15324_v61 }
 0xcff   :  { %9977 = vmatpush1.bf16.msra.mxu0 %v15325_v49  ;;  %10041 = vmatpush1.bf16.msra.mxu1 %v15326_v15 }
 0xd00   :  { %9979 = vmatprep.subr.bf16.mxu0 %v15327_v28  ;;  %10043 = vmatprep.subr.bf16.mxu1 %v15328_v44  ;;  %v15334_v44 = vld [vmem:[#allocation48_spill] sm:$0xff] }
 0xd03   :  { %9981 = vmatpush1.bf16.msra.mxu0 %v15329_v18  ;;  %10045 = vmatpush1.bf16.msra.mxu1 %v15242_v40  ;;  %v15335_v40 = vld [vmem:[#allocation49_spill] sm:$0xff] }
 0xd04   :  { %9983 = vmatprep.subr.bf16.mxu0 %v15330_v1  ;;  %10047 = vmatprep.subr.bf16.mxu1 %v15244_v48 }
 0xd07   :  { %9985 = vmatpush1.bf16.msra.mxu0 %v15331_v11  ;;  %10049 = vmatpush1.bf16.msra.mxu1 %v15246_v38  ;;  %v15336_v38 = vld [vmem:[#allocation51_spill] sm:$0xff] }
 0xd08   :  { %9987 = vmatprep.subr.bf16.mxu0 %v15332_v17  ;;  %10051 = vmatprep.subr.bf16.mxu1 %v15248_v58  ;;  %v15337_v58 = vld [vmem:[#allocation52_spill] sm:$0xff] }
 0xd0b   :  { %9989 = vmatpush1.bf16.msra.mxu0 %v15333_v50  ;;  %10053 = vmatpush1.bf16.msra.mxu1 %v15250_v63  ;;  %v15338_v63 = vld [vmem:[#allocation53_spill] sm:$0xff] }
 0xd0c   :  { %9991 = vmatprep.subr.bf16.mxu0 %v15334_v44  ;;  %10055 = vmatprep.subr.bf16.mxu1 %v15252_v21  ;;  %v15339_v21 = vld [vmem:[#allocation54_spill] sm:$0xff] }
 0xd0f   :  { %9993 = vmatpush1.bf16.msra.mxu0 %v15335_v40  ;;  %10057 = vmatpush1.bf16.msra.mxu1 %v15253_v62  ;;  %v15340_v62 = vld [vmem:[#allocation55_spill] sm:$0xff] }
 0xd10   :  { %9995 = vmatprep.subr.bf16.mxu0 %v15167_v7  ;;  %10059 = vmatprep.subr.bf16.mxu1 %v15254_v36  ;;  %v5656_v36 = vrot.slane %v13945_v2, 7 }
 0xd13   :  { %9997 = vmatpush1.bf16.msra.mxu0 %v15336_v38  ;;  %10061 = vmatpush1.bf16.msra.mxu1 %v15255_v45  ;;  %v15341_v45 = vld [vmem:[#allocation57_spill] sm:$0xff] }
 0xd14   :  { %9999 = vmatprep.subr.bf16.mxu0 %v15337_v58  ;;  %10063 = vmatprep.subr.bf16.mxu1 %v15256_v0  ;;  %v15342_v0 = vld [vmem:[#allocation58_spill] sm:$0xff] }
 0xd17   :  { %10001 = vmatpush1.bf16.msra.mxu0 %v15338_v63  ;;  %10065 = vmatpush1.bf16.msra.mxu1 %v15257_v42  ;;  %v15343_v42 = vld [vmem:[#allocation59_spill] sm:$0xff]  ;;  %v15410_v63 = vld [vmem:[#allocation156_spill] sm:$0xff] }
 0xd18   :  { %10003 = vmatprep.subr.bf16.mxu0 %v15339_v21  ;;  %10067 = vmatprep.subr.bf16.mxu1 %v15258_v52  ;;  %v15344_v52 = vld [vmem:[#allocation60_spill] sm:$0xff]  ;;  %v15409_v21 = vld [vmem:[#allocation155_spill] sm:$0xff] }
 0xd1b   :  { %10005 = vmatpush1.bf16.msra.mxu0 %v15340_v62  ;;  %10069 = vmatpush1.bf16.msra.mxu1 %v13521_v57  ;;  %v15345_v62 = vld [vmem:[#allocation92_spill] sm:$0xff] }
 0xd1c   :  { %10007 = vmatprep.subr.bf16.mxu0 %v15177_v27  ;;  %10071 = vmatprep.subr.bf16.mxu1 %v15259_v43  ;;  %v15354_v43 = vld [vmem:[#allocation97_spill] sm:$0xff] }
 0xd1f   :  { %10009 = vmatpush1.bf16.msra.mxu0 %v15341_v45  ;;  %10073 = vmatpush1.bf16.msra.mxu1 %v15260_v51  ;;  %v15346_v45 = vld [vmem:[#allocation93_spill] sm:$0xff]  ;;  %v15347_v51 = vld [vmem:[#allocation62_spill] sm:$0xff] }
 0xd20   :  { %10011 = vmatprep.subr.bf16.mxu0 %v15342_v0  ;;  %10075 = vmatprep.subr.bf16.mxu1 %v15261_v20  ;;  %v15348_v0 = vld [vmem:[#allocation94_spill] sm:$0xff]  ;;  %v15349_v20 = vld [vmem:[#allocation63_spill] sm:$0xff] }
 0xd23   :  { %10013 = vmatpush1.bf16.msra.mxu0 %v15343_v42  ;;  %10077 = vmatpush1.bf16.msra.mxu1 %v15262_v37  ;;  %v15350_v42 = vld [vmem:[#allocation95_spill] sm:$0xff]  ;;  %v15351_v37 = vld [vmem:[#allocation64_spill] sm:$0xff] }
 0xd24   :  { %10079 = vmatprep.subr.bf16.mxu0 %v15344_v52  ;;  %10143 = vmatprep.subr.bf16.mxu1 %v15345_v62  ;;  %v15352_v52 = vld [vmem:[#allocation96_spill] sm:$0xff]  ;;  %v15353_v62 = vld [vmem:[#allocation65_spill] sm:$0xff] }
 0xd26   :  { %5506 = vmatmul.mubr.f32.vlgmr.msra.gmra.mrb[16].mxu0 %v13949_v6  ;;  %5577 = vmatmul.mubr.f32.vlgmr.msra.gmra.mrb[28].mxu1 %v13949_v6  ;;  %v15355_v6 = vld [vmem:[#allocation66_spill] sm:$0xff] }
 0xd27   :  { %10081 = vmatpush1.bf16.msra.mxu0 %v15182_v34  ;;  %10145 = vmatpush1.bf16.msra.mxu1 %v15346_v45  ;;  %v15356_v34 = vld [vmem:[#allocation98_spill] sm:$0xff]  ;;  %v15357_v45 = vld [vmem:[#allocation67_spill] sm:$0xff] }
 0xd28   :  { %10083 = vmatprep.subr.bf16.mxu0 %v15347_v51  ;;  %10147 = vmatprep.subr.bf16.mxu1 %v15348_v0  ;;  %v15358_v51 = vld [vmem:[#allocation99_spill] sm:$0xff]  ;;  %v15359_v0 = vld [vmem:[#allocation68_spill] sm:$0xff] }
 0xd2b   :  { %10085 = vmatpush1.bf16.msra.mxu0 %v15349_v20  ;;  %10149 = vmatpush1.bf16.msra.mxu1 %v15350_v42  ;;  %v15360_v20 = vld [vmem:[#allocation100_spill] sm:$0xff]  ;;  %v15361_v42 = vld [vmem:[#allocation69_spill] sm:$0xff] }
 0xd2c   :  { %10087 = vmatprep.subr.bf16.mxu0 %v15351_v37  ;;  %10151 = vmatprep.subr.bf16.mxu1 %v15352_v52  ;;  %v15362_v37 = vld [vmem:[#allocation101_spill] sm:$0xff]  ;;  %v15363_v52 = vld [vmem:[#allocation70_spill] sm:$0xff] }
 0xd2f   :  { %10089 = vmatpush1.bf16.msra.mxu0 %v15353_v62  ;;  %10153 = vmatpush1.bf16.msra.mxu1 %v15354_v43  ;;  %v15364_v62 = vld [vmem:[#allocation102_spill] sm:$0xff]  ;;  %v15365_v43 = vld [vmem:[#allocation71_spill] sm:$0xff] }
 0xd30   :  { %10091 = vmatprep.subr.bf16.mxu0 %v15355_v6  ;;  %10155 = vmatprep.subr.bf16.mxu1 %v15356_v34  ;;  %v15366_v6 = vld [vmem:[#allocation103_spill] sm:$0xff]  ;;  %v15367_v34 = vld [vmem:[#allocation72_spill] sm:$0xff] }
 0xd33   :  { %10093 = vmatpush1.bf16.msra.mxu0 %v15357_v45  ;;  %10157 = vmatpush1.bf16.msra.mxu1 %v15358_v51  ;;  %v15368_v45 = vld [vmem:[#allocation104_spill] sm:$0xff]  ;;  %v15369_v51 = vld [vmem:[#allocation73_spill] sm:$0xff] }
 0xd34   :  { %10095 = vmatprep.subr.bf16.mxu0 %v15359_v0  ;;  %10159 = vmatprep.subr.bf16.mxu1 %v15360_v20  ;;  %v15370_v0 = vld [vmem:[#allocation105_spill] sm:$0xff]  ;;  %v15371_v20 = vld [vmem:[#allocation74_spill] sm:$0xff] }
 0xd37   :  { %10097 = vmatpush1.bf16.msra.mxu0 %v15361_v42  ;;  %10161 = vmatpush1.bf16.msra.mxu1 %v15362_v37  ;;  %v15372_v42 = vld [vmem:[#allocation106_spill] sm:$0xff]  ;;  %v15373_v37 = vld [vmem:[#allocation75_spill] sm:$0xff] }
 0xd38   :  { %10099 = vmatprep.subr.bf16.mxu0 %v15363_v52  ;;  %10163 = vmatprep.subr.bf16.mxu1 %v15364_v62  ;;  %v15374_v52 = vld [vmem:[#allocation107_spill] sm:$0xff]  ;;  %v15375_v62 = vld [vmem:[#allocation76_spill] sm:$0xff] }
 0xd3b   :  { %10101 = vmatpush1.bf16.msra.mxu0 %v15365_v43  ;;  %10165 = vmatpush1.bf16.msra.mxu1 %v15366_v6  ;;  %v15376_v43 = vld [vmem:[#allocation108_spill] sm:$0xff]  ;;  %v15377_v6 = vld [vmem:[#allocation77_spill] sm:$0xff] }
 0xd3c   :  { %10103 = vmatprep.subr.bf16.mxu0 %v15367_v34  ;;  %10167 = vmatprep.subr.bf16.mxu1 %v15368_v45  ;;  %v15378_v34 = vld [vmem:[#allocation109_spill] sm:$0xff]  ;;  %v15379_v45 = vld [vmem:[#allocation78_spill] sm:$0xff] }
 0xd3f   :  { %10105 = vmatpush1.bf16.msra.mxu0 %v15369_v51  ;;  %10169 = vmatpush1.bf16.msra.mxu1 %v15370_v0  ;;  %v15380_v51 = vld [vmem:[#allocation110_spill] sm:$0xff]  ;;  %v15381_v0 = vld [vmem:[#allocation79_spill] sm:$0xff] }
 0xd40   :  { %10107 = vmatprep.subr.bf16.mxu0 %v15371_v20  ;;  %10171 = vmatprep.subr.bf16.mxu1 %v15372_v42  ;;  %v15382_v20 = vld [vmem:[#allocation111_spill] sm:$0xff]  ;;  %v15383_v42 = vld [vmem:[#allocation80_spill] sm:$0xff] }
 0xd43   :  { %10109 = vmatpush1.bf16.msra.mxu0 %v15373_v37  ;;  %10173 = vmatpush1.bf16.msra.mxu1 %v15374_v52  ;;  %v15384_v37 = vld [vmem:[#allocation112_spill] sm:$0xff]  ;;  %v15385_v52 = vld [vmem:[#allocation81_spill] sm:$0xff] }
 0xd44   :  { %10111 = vmatprep.subr.bf16.mxu0 %v15375_v62  ;;  %10175 = vmatprep.subr.bf16.mxu1 %v15376_v43  ;;  %v15386_v62 = vld [vmem:[#allocation113_spill] sm:$0xff]  ;;  %v15387_v43 = vld [vmem:[#allocation82_spill] sm:$0xff] }
 0xd47   :  { %10113 = vmatpush1.bf16.msra.mxu0 %v15377_v6  ;;  %10177 = vmatpush1.bf16.msra.mxu1 %v15378_v34  ;;  %v15388_v6 = vld [vmem:[#allocation114_spill] sm:$0xff]  ;;  %v15389_v34 = vld [vmem:[#allocation83_spill] sm:$0xff] }
 0xd48   :  { %10115 = vmatprep.subr.bf16.mxu0 %v15379_v45  ;;  %10179 = vmatprep.subr.bf16.mxu1 %v15380_v51  ;;  %v15390_v45 = vld [vmem:[#allocation115_spill] sm:$0xff]  ;;  %v15391_v51 = vld [vmem:[#allocation84_spill] sm:$0xff] }
 0xd4b   :  { %10117 = vmatpush1.bf16.msra.mxu0 %v15381_v0  ;;  %10181 = vmatpush1.bf16.msra.mxu1 %v15382_v20  ;;  %v15392_v0 = vld [vmem:[#allocation116_spill] sm:$0xff]  ;;  %v15393_v20 = vld [vmem:[#allocation85_spill] sm:$0xff] }
 0xd4c   :  { %10119 = vmatprep.subr.bf16.mxu0 %v15383_v42  ;;  %10183 = vmatprep.subr.bf16.mxu1 %v15384_v37  ;;  %v15394_v42 = vld [vmem:[#allocation117_spill] sm:$0xff]  ;;  %v15395_v37 = vld [vmem:[#allocation86_spill] sm:$0xff] }
 0xd4f   :  { %10121 = vmatpush1.bf16.msra.mxu0 %v15385_v52  ;;  %10185 = vmatpush1.bf16.msra.mxu1 %v15386_v62  ;;  %v15396_v52 = vld [vmem:[#allocation118_spill] sm:$0xff]  ;;  %v15397_v62 = vld [vmem:[#allocation87_spill] sm:$0xff] }
 0xd50   :  { %10123 = vmatprep.subr.bf16.mxu0 %v15387_v43  ;;  %10187 = vmatprep.subr.bf16.mxu1 %v15388_v6  ;;  %v15398_v43 = vld [vmem:[#allocation119_spill] sm:$0xff]  ;;  %v15399_v6 = vld [vmem:[#allocation88_spill] sm:$0xff] }
 0xd53   :  { %10125 = vmatpush1.bf16.msra.mxu0 %v15389_v34  ;;  %10189 = vmatpush1.bf16.msra.mxu1 %v15390_v45  ;;  %v15400_v34 = vld [vmem:[#allocation120_spill] sm:$0xff]  ;;  %v15401_v45 = vld [vmem:[#allocation89_spill] sm:$0xff] }
 0xd54   :  { %10127 = vmatprep.subr.bf16.mxu0 %v15391_v51  ;;  %10191 = vmatprep.subr.bf16.mxu1 %v15392_v0  ;;  %v15402_v51 = vld [vmem:[#allocation121_spill] sm:$0xff]  ;;  %v15403_v0 = vld [vmem:[#allocation90_spill] sm:$0xff] }
 0xd57   :  { %10129 = vmatpush1.bf16.msra.mxu0 %v15393_v20  ;;  %10193 = vmatpush1.bf16.msra.mxu1 %v15394_v42  ;;  %v15404_v20 = vld [vmem:[#allocation122_spill] sm:$0xff]  ;;  %v15405_v42 = vld [vmem:[#allocation91_spill] sm:$0xff] }
 0xd58   :  { %10131 = vmatprep.subr.bf16.mxu0 %v15395_v37  ;;  %10195 = vmatprep.subr.bf16.mxu1 %v15396_v52  ;;  %v15406_v37 = vld [vmem:[#allocation123_spill] sm:$0xff] }
 0xd59   :  { %v15407_v52 = vld [vmem:[#allocation31_spill] sm:$0xff] }
 0xd5b   :  { %10133 = vmatpush1.bf16.msra.mxu0 %v15397_v62  ;;  %10197 = vmatpush1.bf16.msra.mxu1 %v15398_v43  ;;  %v15408_v62 = vld [vmem:[#allocation124_spill] sm:$0xff] }
 0xd5c   :  { %10135 = vmatprep.subr.bf16.mxu0 %v15399_v6  ;;  %10199 = vmatprep.subr.bf16.mxu1 %v15400_v34 }
 0xd5f   :  { %10137 = vmatpush1.bf16.msra.mxu0 %v15401_v45  ;;  %10201 = vmatpush1.bf16.msra.mxu1 %v15402_v51 }
 0xd60   :  { %10139 = vmatprep.subr.bf16.mxu0 %v15403_v0  ;;  %10203 = vmatprep.subr.bf16.mxu1 %v15404_v20 }
 0xd63   :  { %10141 = vmatpush1.bf16.msra.mxu0 %v15405_v42  ;;  %10205 = vmatpush1.bf16.msra.mxu1 %v15406_v37 }
 0xd64   :  { %10207 = vmatprep.subr.bf16.mxu0 %v15407_v52  ;;  %10271 = vmatprep.subr.bf16.mxu1 %v15408_v62  ;;  %v5655_v62 = vrot.slane %v13943_v12, 7 }
 0xdb9   :  { %v5365_v43 = vpop.f32.mrb[14].mxu0  ;;  %v5436_v6 = vpop.f32.mrb[26].mxu1 }
 0xdba   :  { %v5593_v27 = vrot.slane %v5436_v6, 5  ;;  %v5367_v34 = vpop.f32.mrb[15].mxu0  ;;  %v5438_v57 = vpop.f32.mrb[27].mxu1 }
 0xdbb   :  { %v5594_v45 = vrot.slane %v5438_v57, 5 }
 0xdbc   :  { %v5609_v51 = vadd.f32 %v15409_v21, %v5593_v27  ;;  %v5591_v21 = vrot.slane %v5365_v43, 5 }
 0xdbd   :  { %v5610_v0 = vadd.f32 %v15410_v63, %v5594_v45  ;;  %v5592_v45 = vrot.slane %v5367_v34, 5 }
 0xdbe   :  { %v7614_v58 = vmul.f32 -1.442695, %v5609_v51  ;;  %v5607_v51 = vadd.f32 %v15220_v54, %v5591_v21 }
 0xdbf   :  { %v7615_v20 = vmul.f32 -1.442695, %v5610_v0 }
 0xdc0   :  { %12331 = vpow2.f32 %v7614_v58  ;;  %v7612_v58 = vmul.f32 -1.442695, %v5607_v51 }
 0xdc1   :  { %12333 = vpow2.f32 %v7615_v20  ;;  %v5608_v20 = vadd.f32 %v13586_v5, %v5592_v45 }
 0xdca   :  { %v12332_v42 = vpop.eup %12331 }
 0xdcb   :  { %v5633_v37 = vadd.f32 1.0, %v12332_v42  ;;  %v12334_v38 = vpop.eup %12333  ;;  %v7613_v42 = vmul.f32 -1.442695, %v5608_v20 }
 0xdcc   :  { %v5634_v52 = vadd.f32 1.0, %v12334_v38 }
 0xdcd   :  { %12335 = vrcp.f32 %v5633_v37 }
 0xdce   :  { %12337 = vrcp.f32 %v5634_v52 }
 0xdcf   :  { %12339 = vpow2.f32 %v7612_v58 }
 0xdd0   :  { %12341 = vpow2.f32 %v7613_v42 }
 0xdd7   :  { %v12336_v6 = vpop.eup %12335 }
 0xdd8   :  { %v5659_v57 = vmul.f32 %v12336_v6, %v5655_v62  ;;  %v12338_v7 = vpop.eup %12337 }
 0xdd9   :  { %v5660_v27 = vmul.f32 %v12338_v7, %v5656_v36  ;;  %v12340_v37 = vpop.eup %12339 }
 0xdda   :  { %v12342_v52 = vpop.eup %12341  ;;  %v5621_v38 = vadd.f32 1.0, %v12340_v37 }
 0xddb   :  { %v5622_v0 = vadd.f32 1.0, %v12342_v52 }
 0xddc   :  { %12343 = vrcp.f32 %v5621_v38 }
 0xddd   :  { %12345 = vrcp.f32 %v5622_v0 }
 0xdf9   :  { %v5507_v12 = vpop.f32.mrb[16].mxu0  ;;  %v5578_v63 = vpop.f32.mrb[28].mxu1 }
 0xdfa   :  { %v5595_v2 = vrot.slane %v5507_v12, 5  ;;  %v5597_v62 = vrot.slane %v5578_v63, 5  ;;  %v5509_v6 = vpop.f32.mrb[17].mxu0  ;;  %v5580_v7 = vpop.f32.mrb[29].mxu1 }
 0xdfb   :  { %v5596_v43 = vrot.slane %v5509_v6, 5  ;;  %v5598_v34 = vrot.slane %v5580_v7, 5  ;;  %v12344_v63 = vpop.eup %12343 }
 0xdfc   :  { %v5611_v21 = vadd.f32 %v13594_v10, %v5595_v2  ;;  %v5613_v36 = vadd.f32 %v13623_v14, %v5597_v62  ;;  %v12346_v42 = vpop.eup %12345 }
 0xdfd   :  { %v5612_v45 = vadd.f32 %v15221_v19, %v5596_v43  ;;  %v5614_v51 = vadd.f32 %v13626_v26, %v5598_v34 }
 0xdfe   :  { %12347 = vtanh.f32 %v5611_v21  ;;  %v7616_v20 = vmul.f32 -1.442695, %v5613_v36 }
 0xdff   :  { %12349 = vtanh.f32 %v5612_v45  ;;  %v7617_v58 = vmul.f32 -1.442695, %v5614_v51 }
 0xe00   :  { %12351 = vpow2.f32 %v7616_v20 }
 0xe01   :  { %12353 = vpow2.f32 %v7617_v58 }
 0xe08   :  { %v12348_v37 = vpop.eup %12347 }
 0xe09   :  { %v12350_v52 = vpop.eup %12349  ;;  %v5661_v38 = vmul.f32 %v12348_v37, %v12344_v63 }
 0xe0a   :  { %v12352_v12 = vpop.eup %12351  ;;  %v5662_v2 = vmul.f32 %v12350_v52, %v12346_v42 }
 0xe0b   :  { %v12354_v6 = vpop.eup %12353  ;;  %v14097_v62 = vadd.f32 %v5661_v38, %v5659_v57  ;;  %v5647_v0 = vadd.f32 1.0, %v12352_v12  ;;  %v15411_v38 = vld [vmem:[#allocation135_spill] sm:$0xff]  ;;  %v15412_v12 = vld [vmem:[#allocation136_spill] sm:$0xff] }
 0xe0c   :  { %v14099_v7 = vadd.f32 %v5662_v2, %v5660_v27  ;;  %v5648_v43 = vadd.f32 1.0, %v12354_v6  ;;  %v15413_v2 = vld [vmem:[#allocation138_spill] sm:$0xff]  ;;  %v15414_v6 = vld [vmem:[#allocation139_spill] sm:$0xff] }
 0xe0d   :  { %12355 = vtanh.f32 %v14097_v62 }
 0xe0e   :  { %12357 = vrcp.f32 %v5647_v0  ;;  %v15415_v0 = vld [vmem:[#allocation140_spill] sm:$0xff] }
 0xe0f   :  { %12359 = vtanh.f32 %v14099_v7 }
 0xe10   :  { %12361 = vrcp.f32 %v5648_v43  ;;  %v15416_v43 = vld [vmem:[#allocation141_spill] sm:$0xff] }
 0xe17   :  { %v12356_v34 = vpop.eup %12355 }
 0xe18   :  { %v12358_v21 = vpop.eup %12357 }
 0xe19   :  { %v12360_v36 = vpop.eup %12359  ;;  %v5667_v45 = vmul.f32 %v12358_v21, %v12356_v34  ;;  %v15417_v34 = vld [vmem:[#allocation142_spill] sm:$0xff] }
 0xe1a   :  { %v12362_v51 = vpop.eup %12361  ;;  %v15418_v21 = vld [vmem:[#allocation50_spill] sm:$0xff] }
 0xe1b   :  { %v5668_v20 = vmul.f32 %v12362_v51, %v12360_v36  ;;  %v14103_v57 = vrot.slane %v5667_v45, 3  ;;  %v15419_v36 = vld [vmem:[#allocation143_spill] sm:$0xff]  ;;  %v15421_v51 = vld [vmem:[#allocation144_spill] sm:$0xff] }
 0xe1d   :  { %v5693_v58 = vrot.slane %v5668_v20, 3  ;;  %v5671_v63 = vcombine.low %v5667_v45, %v5668_v20  ;;  %v15420_v45 = vld [vmem:[#allocation51_spill] sm:$0xff]  ;;  %v15422_v20 = vld [vmem:[#allocation52_spill] sm:$0xff] }
 0xe1f   :  { %5760 = vmatprep.mubr.f32.mxu0 %v5693_v58  ;;  %5831 = vmatprep.mubr.f32.mxu1 %v5693_v58  ;;  %v5678_v27 = vrot.slane %v5671_v63, %v13635_v9  ;;  %v15424_v63 = vld [vmem:[#allocation53_spill] sm:$0xff] }
 0xe20   :  { %5761 = vmatmul.mubr.f32.vlgmr.msra.gmra.mrb[18].mxu0 %v14103_v57  ;;  %5832 = vmatmul.mubr.f32.vlgmr.msra.gmra.mrb[30].mxu1 %v14103_v57 }
 0xe21   :  { %v5679_v42 = vcombine.high %v5678_v27, %v5678_v27  ;;  %10209 = vmatpush1.bf16.msra.mxu0 %v13098_v23  ;;  %10273 = vmatpush1.bf16.msra.mxu1 %v13441_v4  ;;  %v15425_v27 = vld [vmem:[#allocation146_spill] sm:$0xff] }
 0xe22   :  { %5902 = vmatprep.mubr.f32.mxu0 %v5693_v58  ;;  %5973 = vmatprep.mubr.f32.mxu1 %v5693_v58  ;;  %v15423_v58 = vld [vmem:[#allocation145_spill] sm:$0xff] }
 0xe23   :  { %v5686_v37 = vrot.slane %v5679_v42, %v13635_v9  ;;  %10211 = vmatprep.subr.bf16.mxu0 %v13103_v29  ;;  %10275 = vmatprep.subr.bf16.mxu1 %v13444_v41  ;;  %v15426_v42 = vld [vmem:[#allocation54_spill] sm:$0xff] }
 0xe25   :  { %v5687_v52 = vcombine.high %v5686_v37, %v5686_v37  ;;  %10213 = vmatpush1.bf16.msra.mxu0 %v13106_v32  ;;  %10277 = vmatpush1.bf16.msra.mxu1 %v13448_v47  ;;  %v15427_v37 = vld [vmem:[#allocation147_spill] sm:$0xff] }
 0xe26   :  { %10215 = vmatprep.subr.bf16.mxu0 %v15131_v60  ;;  %10279 = vmatprep.subr.bf16.mxu1 %v15132_v30 }
 0xe27   :  { %5690 = vst.msk [vmem:[#allocation2 + $0x3] ss:$8 sm:$0x3] %vm13644_vm6, %v5687_v52  ;;  %v15428_v52 = vld [vmem:[#allocation55_spill] sm:$0xff] }
 0xe29   :  { %10217 = vmatpush1.bf16.msra.mxu0 %v15133_v31  ;;  %10281 = vmatpush1.bf16.msra.mxu1 %v15222_v59 }
 0xe2a   :  { %10219 = vmatprep.subr.bf16.mxu0 %v15223_v3  ;;  %10283 = vmatprep.subr.bf16.mxu1 %v15224_v46 }
 0xe2d   :  { %10221 = vmatpush1.bf16.msra.mxu0 %v15225_v35  ;;  %10285 = vmatpush1.bf16.msra.mxu1 %v15226_v22 }
 0xe2e   :  { %10223 = vmatprep.subr.bf16.mxu0 %v15227_v16  ;;  %10287 = vmatprep.subr.bf16.mxu1 %v15316_v39 }
 0xe31   :  { %10225 = vmatpush1.bf16.msra.mxu0 %v15317_v33  ;;  %10289 = vmatpush1.bf16.msra.mxu1 %v15318_v13 }
 0xe32   :  { %10227 = vmatprep.subr.bf16.mxu0 %v15319_v8  ;;  %10291 = vmatprep.subr.bf16.mxu1 %v15320_v55 }
 0xe35   :  { %10229 = vmatpush1.bf16.msra.mxu0 %v15321_v25  ;;  %10293 = vmatpush1.bf16.msra.mxu1 %v15322_v53 }
 0xe36   :  { %10231 = vmatprep.subr.bf16.mxu0 %v15323_v24  ;;  %10295 = vmatprep.subr.bf16.mxu1 %v15324_v61 }
 0xe39   :  { %10233 = vmatpush1.bf16.msra.mxu0 %v15325_v49  ;;  %10297 = vmatpush1.bf16.msra.mxu1 %v15326_v15 }
 0xe3a   :  { %10235 = vmatprep.subr.bf16.mxu0 %v15327_v28  ;;  %10299 = vmatprep.subr.bf16.mxu1 %v15411_v38 }
 0xe3d   :  { %10237 = vmatpush1.bf16.msra.mxu0 %v15329_v18  ;;  %10301 = vmatpush1.bf16.msra.mxu1 %v15412_v12 }
 0xe3e   :  { %10239 = vmatprep.subr.bf16.mxu0 %v15330_v1  ;;  %10303 = vmatprep.subr.bf16.mxu1 %v15244_v48 }
 0xe41   :  { %10241 = vmatpush1.bf16.msra.mxu0 %v15331_v11  ;;  %10305 = vmatpush1.bf16.msra.mxu1 %v15413_v2 }
 0xe42   :  { %10243 = vmatprep.subr.bf16.mxu0 %v15332_v17  ;;  %10307 = vmatprep.subr.bf16.mxu1 %v15414_v6 }
 0xe45   :  { %10245 = vmatpush1.bf16.msra.mxu0 %v15333_v50  ;;  %10309 = vmatpush1.bf16.msra.mxu1 %v15415_v0  ;;  %v6053_v50 = vrot.slane %v14099_v7, 7 }
 0xe46   :  { %10247 = vmatprep.subr.bf16.mxu0 %v15334_v44  ;;  %10311 = vmatprep.subr.bf16.mxu1 %v15416_v43  ;;  %v15505_v43 = vld [vmem:[#allocation156_spill] sm:$0xff] }
 0xe49   :  { %10249 = vmatpush1.bf16.msra.mxu0 %v15335_v40  ;;  %10313 = vmatpush1.bf16.msra.mxu1 %v15417_v34  ;;  %v15504_v40 = vld [vmem:[#allocation155_spill] sm:$0xff] }
 0xe4a   :  { %10251 = vmatprep.subr.bf16.mxu0 %v15418_v21  ;;  %10315 = vmatprep.subr.bf16.mxu1 %v15419_v36  ;;  %v15429_v21 = vld [vmem:[#allocation148_spill] sm:$0xff] }
 0xe4b   :  { %v15430_v36 = vld [vmem:[#allocation56_spill] sm:$0xff] }
 0xe4d   :  { %10253 = vmatpush1.bf16.msra.mxu0 %v15420_v45  ;;  %10317 = vmatpush1.bf16.msra.mxu1 %v15421_v51  ;;  %v15431_v45 = vld [vmem:[#allocation149_spill] sm:$0xff] }
 0xe4e   :  { %10255 = vmatprep.subr.bf16.mxu0 %v15422_v20  ;;  %10319 = vmatprep.subr.bf16.mxu1 %v15423_v58  ;;  %v15432_v51 = vld [vmem:[#allocation57_spill] sm:$0xff]  ;;  %v15433_v20 = vld [vmem:[#allocation150_spill] sm:$0xff] }
 0xe4f   :  { %v15434_v58 = vld [vmem:[#allocation58_spill] sm:$0xff] }
 0xe51   :  { %10257 = vmatpush1.bf16.msra.mxu0 %v15424_v63  ;;  %10321 = vmatpush1.bf16.msra.mxu1 %v15425_v27  ;;  %v15435_v63 = vld [vmem:[#allocation151_spill] sm:$0xff] }
 0xe52   :  { %10259 = vmatprep.subr.bf16.mxu0 %v15426_v42  ;;  %10323 = vmatprep.subr.bf16.mxu1 %v15427_v37  ;;  %v15436_v27 = vld [vmem:[#allocation59_spill] sm:$0xff]  ;;  %v15437_v42 = vld [vmem:[#allocation152_spill] sm:$0xff] }
 0xe53   :  { %v15438_v37 = vld [vmem:[#allocation60_spill] sm:$0xff] }
 0xe55   :  { %10261 = vmatpush1.bf16.msra.mxu0 %v15428_v52  ;;  %10325 = vmatpush1.bf16.msra.mxu1 %v15429_v21  ;;  %v15439_v52 = vld [vmem:[#allocation92_spill] sm:$0xff] }
 0xe56   :  { %10263 = vmatprep.subr.bf16.mxu0 %v15430_v36  ;;  %10327 = vmatprep.subr.bf16.mxu1 %v15431_v45  ;;  %v15440_v45 = vld [vmem:[#allocation61_spill] sm:$0xff] }
 0xe57   :  { %v15449_v36 = vld [vmem:[#allocation97_spill] sm:$0xff] }
 0xe59   :  { %10265 = vmatpush1.bf16.msra.mxu0 %v15432_v51  ;;  %10329 = vmatpush1.bf16.msra.mxu1 %v15433_v20  ;;  %v15441_v51 = vld [vmem:[#allocation93_spill] sm:$0xff]  ;;  %v15442_v20 = vld [vmem:[#allocation62_spill] sm:$0xff] }
 0xe5a   :  { %10267 = vmatprep.subr.bf16.mxu0 %v15434_v58  ;;  %10331 = vmatprep.subr.bf16.mxu1 %v15435_v63  ;;  %v15443_v58 = vld [vmem:[#allocation94_spill] sm:$0xff]  ;;  %v15444_v63 = vld [vmem:[#allocation63_spill] sm:$0xff] }
 0xe5d   :  { %10269 = vmatpush1.bf16.msra.mxu0 %v15436_v27  ;;  %10333 = vmatpush1.bf16.msra.mxu1 %v15437_v42  ;;  %v15445_v27 = vld [vmem:[#allocation95_spill] sm:$0xff]  ;;  %v15446_v42 = vld [vmem:[#allocation64_spill] sm:$0xff] }
 0xe5e   :  { %10335 = vmatprep.subr.bf16.mxu0 %v15438_v37  ;;  %10399 = vmatprep.subr.bf16.mxu1 %v15439_v52  ;;  %v15447_v37 = vld [vmem:[#allocation96_spill] sm:$0xff]  ;;  %v15448_v52 = vld [vmem:[#allocation65_spill] sm:$0xff] }
 0xe60   :  { %5903 = vmatmul.mubr.f32.vlgmr.msra.gmra.mrb[20].mxu0 %v14103_v57  ;;  %5974 = vmatmul.mubr.f32.vlgmr.msra.gmra.mrb[32].mxu1 %v14103_v57  ;;  %v15450_v57 = vld [vmem:[#allocation66_spill] sm:$0xff] }
 0xe61   :  { %10337 = vmatpush1.bf16.msra.mxu0 %v15440_v45  ;;  %10401 = vmatpush1.bf16.msra.mxu1 %v15441_v51  ;;  %v15451_v45 = vld [vmem:[#allocation98_spill] sm:$0xff]  ;;  %v15452_v51 = vld [vmem:[#allocation67_spill] sm:$0xff] }
 0xe62   :  { %10339 = vmatprep.subr.bf16.mxu0 %v15442_v20  ;;  %10403 = vmatprep.subr.bf16.mxu1 %v15443_v58  ;;  %v15453_v20 = vld [vmem:[#allocation99_spill] sm:$0xff]  ;;  %v15454_v58 = vld [vmem:[#allocation68_spill] sm:$0xff] }
 0xe65   :  { %10341 = vmatpush1.bf16.msra.mxu0 %v15444_v63  ;;  %10405 = vmatpush1.bf16.msra.mxu1 %v15445_v27  ;;  %v15455_v63 = vld [vmem:[#allocation100_spill] sm:$0xff]  ;;  %v15456_v27 = vld [vmem:[#allocation69_spill] sm:$0xff] }
 0xe66   :  { %10343 = vmatprep.subr.bf16.mxu0 %v15446_v42  ;;  %10407 = vmatprep.subr.bf16.mxu1 %v15447_v37  ;;  %v15457_v42 = vld [vmem:[#allocation101_spill] sm:$0xff]  ;;  %v15458_v37 = vld [vmem:[#allocation70_spill] sm:$0xff] }
 0xe69   :  { %10345 = vmatpush1.bf16.msra.mxu0 %v15448_v52  ;;  %10409 = vmatpush1.bf16.msra.mxu1 %v15449_v36  ;;  %v15459_v52 = vld [vmem:[#allocation102_spill] sm:$0xff]  ;;  %v15460_v36 = vld [vmem:[#allocation71_spill] sm:$0xff] }
 0xe6a   :  { %10347 = vmatprep.subr.bf16.mxu0 %v15450_v57  ;;  %10411 = vmatprep.subr.bf16.mxu1 %v15451_v45  ;;  %v15461_v57 = vld [vmem:[#allocation103_spill] sm:$0xff]  ;;  %v15462_v45 = vld [vmem:[#allocation72_spill] sm:$0xff] }
 0xe6d   :  { %10349 = vmatpush1.bf16.msra.mxu0 %v15452_v51  ;;  %10413 = vmatpush1.bf16.msra.mxu1 %v15453_v20  ;;  %v15463_v51 = vld [vmem:[#allocation104_spill] sm:$0xff]  ;;  %v15464_v20 = vld [vmem:[#allocation73_spill] sm:$0xff] }
 0xe6e   :  { %10351 = vmatprep.subr.bf16.mxu0 %v15454_v58  ;;  %10415 = vmatprep.subr.bf16.mxu1 %v15455_v63  ;;  %v15465_v58 = vld [vmem:[#allocation105_spill] sm:$0xff]  ;;  %v15466_v63 = vld [vmem:[#allocation74_spill] sm:$0xff] }
 0xe71   :  { %10353 = vmatpush1.bf16.msra.mxu0 %v15456_v27  ;;  %10417 = vmatpush1.bf16.msra.mxu1 %v15457_v42  ;;  %v15467_v27 = vld [vmem:[#allocation106_spill] sm:$0xff]  ;;  %v15468_v42 = vld [vmem:[#allocation75_spill] sm:$0xff] }
 0xe72   :  { %10355 = vmatprep.subr.bf16.mxu0 %v15458_v37  ;;  %10419 = vmatprep.subr.bf16.mxu1 %v15459_v52  ;;  %v15469_v37 = vld [vmem:[#allocation107_spill] sm:$0xff]  ;;  %v15470_v52 = vld [vmem:[#allocation76_spill] sm:$0xff] }
 0xe75   :  { %10357 = vmatpush1.bf16.msra.mxu0 %v15460_v36  ;;  %10421 = vmatpush1.bf16.msra.mxu1 %v15461_v57  ;;  %v15471_v36 = vld [vmem:[#allocation108_spill] sm:$0xff]  ;;  %v15472_v57 = vld [vmem:[#allocation77_spill] sm:$0xff] }
 0xe76   :  { %10359 = vmatprep.subr.bf16.mxu0 %v15462_v45  ;;  %10423 = vmatprep.subr.bf16.mxu1 %v15463_v51  ;;  %v15473_v45 = vld [vmem:[#allocation109_spill] sm:$0xff]  ;;  %v15474_v51 = vld [vmem:[#allocation78_spill] sm:$0xff] }
 0xe79   :  { %10361 = vmatpush1.bf16.msra.mxu0 %v15464_v20  ;;  %10425 = vmatpush1.bf16.msra.mxu1 %v15465_v58  ;;  %v15475_v20 = vld [vmem:[#allocation110_spill] sm:$0xff]  ;;  %v15476_v58 = vld [vmem:[#allocation79_spill] sm:$0xff] }
 0xe7a   :  { %10363 = vmatprep.subr.bf16.mxu0 %v15466_v63  ;;  %10427 = vmatprep.subr.bf16.mxu1 %v15467_v27  ;;  %v15477_v63 = vld [vmem:[#allocation111_spill] sm:$0xff]  ;;  %v15478_v27 = vld [vmem:[#allocation80_spill] sm:$0xff] }
 0xe7d   :  { %10365 = vmatpush1.bf16.msra.mxu0 %v15468_v42  ;;  %10429 = vmatpush1.bf16.msra.mxu1 %v15469_v37  ;;  %v15479_v42 = vld [vmem:[#allocation112_spill] sm:$0xff]  ;;  %v15480_v37 = vld [vmem:[#allocation81_spill] sm:$0xff] }
 0xe7e   :  { %10367 = vmatprep.subr.bf16.mxu0 %v15470_v52  ;;  %10431 = vmatprep.subr.bf16.mxu1 %v15471_v36  ;;  %v15481_v52 = vld [vmem:[#allocation113_spill] sm:$0xff]  ;;  %v15482_v36 = vld [vmem:[#allocation82_spill] sm:$0xff] }
 0xe81   :  { %10369 = vmatpush1.bf16.msra.mxu0 %v15472_v57  ;;  %10433 = vmatpush1.bf16.msra.mxu1 %v15473_v45  ;;  %v15483_v57 = vld [vmem:[#allocation114_spill] sm:$0xff]  ;;  %v15484_v45 = vld [vmem:[#allocation83_spill] sm:$0xff] }
 0xe82   :  { %10371 = vmatprep.subr.bf16.mxu0 %v15474_v51  ;;  %10435 = vmatprep.subr.bf16.mxu1 %v15475_v20  ;;  %v15485_v51 = vld [vmem:[#allocation115_spill] sm:$0xff]  ;;  %v15486_v20 = vld [vmem:[#allocation84_spill] sm:$0xff] }
 0xe85   :  { %10373 = vmatpush1.bf16.msra.mxu0 %v15476_v58  ;;  %10437 = vmatpush1.bf16.msra.mxu1 %v15477_v63  ;;  %v15487_v58 = vld [vmem:[#allocation116_spill] sm:$0xff]  ;;  %v15488_v63 = vld [vmem:[#allocation85_spill] sm:$0xff] }
 0xe86   :  { %10375 = vmatprep.subr.bf16.mxu0 %v15478_v27  ;;  %10439 = vmatprep.subr.bf16.mxu1 %v15479_v42  ;;  %v15489_v27 = vld [vmem:[#allocation117_spill] sm:$0xff]  ;;  %v15490_v42 = vld [vmem:[#allocation86_spill] sm:$0xff] }
 0xe89   :  { %10377 = vmatpush1.bf16.msra.mxu0 %v15480_v37  ;;  %10441 = vmatpush1.bf16.msra.mxu1 %v15481_v52  ;;  %v15491_v37 = vld [vmem:[#allocation118_spill] sm:$0xff]  ;;  %v15492_v52 = vld [vmem:[#allocation87_spill] sm:$0xff] }
 0xe8a   :  { %10379 = vmatprep.subr.bf16.mxu0 %v15482_v36  ;;  %10443 = vmatprep.subr.bf16.mxu1 %v15483_v57  ;;  %v15493_v36 = vld [vmem:[#allocation119_spill] sm:$0xff]  ;;  %v15494_v57 = vld [vmem:[#allocation88_spill] sm:$0xff] }
 0xe8d   :  { %10381 = vmatpush1.bf16.msra.mxu0 %v15484_v45  ;;  %10445 = vmatpush1.bf16.msra.mxu1 %v15485_v51  ;;  %v15495_v45 = vld [vmem:[#allocation120_spill] sm:$0xff]  ;;  %v15496_v51 = vld [vmem:[#allocation89_spill] sm:$0xff] }
 0xe8e   :  { %10383 = vmatprep.subr.bf16.mxu0 %v15486_v20  ;;  %10447 = vmatprep.subr.bf16.mxu1 %v15487_v58  ;;  %v15497_v20 = vld [vmem:[#allocation121_spill] sm:$0xff]  ;;  %v15498_v58 = vld [vmem:[#allocation90_spill] sm:$0xff] }
 0xe91   :  { %10385 = vmatpush1.bf16.msra.mxu0 %v15488_v63  ;;  %10449 = vmatpush1.bf16.msra.mxu1 %v15489_v27  ;;  %v15499_v63 = vld [vmem:[#allocation122_spill] sm:$0xff]  ;;  %v15500_v27 = vld [vmem:[#allocation91_spill] sm:$0xff] }
 0xe92   :  { %10387 = vmatprep.subr.bf16.mxu0 %v15490_v42  ;;  %10451 = vmatprep.subr.bf16.mxu1 %v15491_v37  ;;  %v15501_v42 = vld [vmem:[#allocation123_spill] sm:$0xff] }
 0xe93   :  { %v15502_v37 = vld [vmem:[#allocation31_spill] sm:$0xff] }
 0xe95   :  { %10389 = vmatpush1.bf16.msra.mxu0 %v15492_v52  ;;  %10453 = vmatpush1.bf16.msra.mxu1 %v15493_v36  ;;  %v15503_v52 = vld [vmem:[#allocation124_spill] sm:$0xff] }
 0xe96   :  { %10391 = vmatprep.subr.bf16.mxu0 %v15494_v57  ;;  %10455 = vmatprep.subr.bf16.mxu1 %v15495_v45 }
 0xe99   :  { %10393 = vmatpush1.bf16.msra.mxu0 %v15496_v51  ;;  %10457 = vmatpush1.bf16.msra.mxu1 %v15497_v20 }
 0xe9a   :  { %10395 = vmatprep.subr.bf16.mxu0 %v15498_v58  ;;  %10459 = vmatprep.subr.bf16.mxu1 %v15499_v63 }
 0xe9d   :  { %10397 = vmatpush1.bf16.msra.mxu0 %v15500_v27  ;;  %10461 = vmatpush1.bf16.msra.mxu1 %v15501_v42 }
 0xe9e   :  { %10463 = vmatprep.subr.bf16.mxu0 %v15502_v37  ;;  %10527 = vmatprep.subr.bf16.mxu1 %v15503_v52  ;;  %v6052_v52 = vrot.slane %v14097_v62, 7 }
 0xef3   :  { %v5762_v36 = vpop.f32.mrb[18].mxu0  ;;  %v5833_v57 = vpop.f32.mrb[30].mxu1 }
 0xef4   :  { %v5990_v21 = vrot.slane %v5833_v57, 4  ;;  %v5764_v45 = vpop.f32.mrb[19].mxu0  ;;  %v5835_v34 = vpop.f32.mrb[31].mxu1 }
 0xef5   :  { %v5991_v51 = vrot.slane %v5835_v34, 4 }
 0xef6   :  { %v6006_v20 = vadd.f32 %v15504_v40, %v5990_v21  ;;  %v5988_v40 = vrot.slane %v5762_v36, 4 }
 0xef7   :  { %v6007_v58 = vadd.f32 %v15505_v43, %v5991_v51  ;;  %v5989_v51 = vrot.slane %v5764_v45, 4 }
 0xef8   :  { %v7620_v44 = vmul.f32 -1.442695, %v6006_v20  ;;  %v6004_v20 = vadd.f32 %v15220_v54, %v5988_v40 }
 0xef9   :  { %v7621_v63 = vmul.f32 -1.442695, %v6007_v58 }
 0xefa   :  { %12363 = vpow2.f32 %v7620_v44  ;;  %v6005_v44 = vadd.f32 %v13586_v5, %v5989_v51  ;;  %v7618_v58 = vmul.f32 -1.442695, %v6004_v20 }
 0xefb   :  { %12365 = vpow2.f32 %v7621_v63 }
 0xefc   :  { %v7619_v63 = vmul.f32 -1.442695, %v6005_v44 }
 0xf04   :  { %v12364_v27 = vpop.eup %12363 }
 0xf05   :  { %v6030_v42 = vadd.f32 1.0, %v12364_v27  ;;  %v12366_v0 = vpop.eup %12365 }
 0xf06   :  { %v6031_v37 = vadd.f32 1.0, %v12366_v0 }
 0xf07   :  { %12367 = vrcp.f32 %v6030_v42 }
 0xf08   :  { %12369 = vrcp.f32 %v6031_v37 }
 0xf09   :  { %12371 = vpow2.f32 %v7618_v58 }
 0xf0a   :  { %12373 = vpow2.f32 %v7619_v63 }
 0xf11   :  { %v12368_v57 = vpop.eup %12367 }
 0xf12   :  { %v6056_v34 = vmul.f32 %v12368_v57, %v6052_v52  ;;  %v12370_v6 = vpop.eup %12369 }
 0xf13   :  { %v6057_v21 = vmul.f32 %v12370_v6, %v6053_v50  ;;  %v12372_v0 = vpop.eup %12371 }
 0xf14   :  { %v12374_v27 = vpop.eup %12373  ;;  %v6018_v42 = vadd.f32 1.0, %v12372_v0 }
 0xf15   :  { %v6019_v62 = vadd.f32 1.0, %v12374_v27 }
 0xf16   :  { %12375 = vrcp.f32 %v6018_v42 }
 0xf17   :  { %12377 = vrcp.f32 %v6019_v62 }
 0xf33   :  { %v5904_v37 = vpop.f32.mrb[20].mxu0  ;;  %v5975_v43 = vpop.f32.mrb[32].mxu1 }
 0xf34   :  { %v5992_v7 = vrot.slane %v5904_v37, 4  ;;  %v5994_v52 = vrot.slane %v5975_v43, 4  ;;  %v5906_v57 = vpop.f32.mrb[21].mxu0  ;;  %v5977_v50 = vpop.f32.mrb[33].mxu1 }
 0xf35   :  { %v5993_v6 = vrot.slane %v5906_v57, 4  ;;  %v5995_v36 = vrot.slane %v5977_v50, 4  ;;  %v12376_v43 = vpop.eup %12375 }
 0xf36   :  { %v6008_v40 = vadd.f32 %v13594_v10, %v5992_v7  ;;  %v6010_v45 = vadd.f32 %v13623_v14, %v5994_v52  ;;  %v12378_v63 = vpop.eup %12377 }
 0xf37   :  { %v6009_v51 = vadd.f32 %v15221_v19, %v5993_v6  ;;  %v6011_v20 = vadd.f32 %v13626_v26, %v5995_v36 }
 0xf38   :  { %12379 = vtanh.f32 %v6008_v40  ;;  %v7622_v44 = vmul.f32 -1.442695, %v6010_v45 }
 0xf39   :  { %12381 = vtanh.f32 %v6009_v51  ;;  %v7623_v58 = vmul.f32 -1.442695, %v6011_v20 }
 0xf3a   :  { %12383 = vpow2.f32 %v7622_v44 }
 0xf3b   :  { %12385 = vpow2.f32 %v7623_v58 }
 0xf42   :  { %v12380_v0 = vpop.eup %12379 }
 0xf43   :  { %v12382_v27 = vpop.eup %12381  ;;  %v6058_v42 = vmul.f32 %v12380_v0, %v12376_v43  ;;  %v15506_v0 = vld [vmem:[#allocation139_spill] sm:$0xff] }
 0xf44   :  { %v12384_v37 = vpop.eup %12383  ;;  %v6059_v7 = vmul.f32 %v12382_v27, %v12378_v63  ;;  %v15507_v27 = vld [vmem:[#allocation47_spill] sm:$0xff] }
 0xf45   :  { %v12386_v57 = vpop.eup %12385  ;;  %v14251_v52 = vadd.f32 %v6058_v42, %v6056_v34  ;;  %v6044_v62 = vadd.f32 1.0, %v12384_v37  ;;  %v15508_v42 = vld [vmem:[#allocation140_spill] sm:$0xff] }
 0xf46   :  { %v14253_v50 = vadd.f32 %v6059_v7, %v6057_v21  ;;  %v6045_v6 = vadd.f32 1.0, %v12386_v57  ;;  %v15509_v37 = vld [vmem:[#allocation48_spill] sm:$0xff]  ;;  %v15510_v7 = vld [vmem:[#allocation141_spill] sm:$0xff] }
 0xf47   :  { %12387 = vtanh.f32 %v14251_v52  ;;  %v15511_v57 = vld [vmem:[#allocation49_spill] sm:$0xff] }
 0xf48   :  { %12389 = vrcp.f32 %v6044_v62  ;;  %v15512_v62 = vld [vmem:[#allocation142_spill] sm:$0xff] }
 0xf49   :  { %12391 = vtanh.f32 %v14253_v50 }
 0xf4a   :  { %12393 = vrcp.f32 %v6045_v6  ;;  %v15513_v6 = vld [vmem:[#allocation50_spill] sm:$0xff] }
 0xf51   :  { %v12388_v36 = vpop.eup %12387 }
 0xf52   :  { %v12390_v40 = vpop.eup %12389 }
 0xf53   :  { %v12392_v45 = vpop.eup %12391  ;;  %v6064_v51 = vmul.f32 %v12390_v40, %v12388_v36  ;;  %v15514_v36 = vld [vmem:[#allocation143_spill] sm:$0xff] }
 0xf54   :  { %v12394_v20 = vpop.eup %12393  ;;  %v15515_v40 = vld [vmem:[#allocation51_spill] sm:$0xff] }
 0xf55   :  { %v6065_v44 = vmul.f32 %v12394_v20, %v12392_v45  ;;  %v14257_v34 = vrot.slane %v6064_v51, 4  ;;  %v15516_v45 = vld [vmem:[#allocation144_spill] sm:$0xff]  ;;  %v15518_v20 = vld [vmem:[#allocation145_spill] sm:$0xff] }
 0xf57   :  { %v6088_v58 = vrot.slane %v6065_v44, 4  ;;  %v6068_v43 = vcombine.high %v6064_v51, %v6065_v44  ;;  %v15517_v51 = vld [vmem:[#allocation52_spill] sm:$0xff]  ;;  %v15519_v44 = vld [vmem:[#allocation53_spill] sm:$0xff] }
 0xf59   :  { %6155 = vmatprep.mubr.f32.mxu0 %v6088_v58  ;;  %6226 = vmatprep.mubr.f32.mxu1 %v6088_v58  ;;  %v6075_v21 = vrot.slane %v6068_v43, %v13635_v9  ;;  %v15521_v43 = vld [vmem:[#allocation54_spill] sm:$0xff] }
 0xf5a   :  { %6156 = vmatmul.mubr.f32.vlgmr.msra.gmra.mrb[22].mxu0 %v14257_v34  ;;  %6227 = vmatmul.mubr.f32.vlgmr.msra.gmra.mrb[34].mxu1 %v14257_v34 }
 0xf5b   :  { %v6082_v63 = vrot.slane %v6075_v21, %v13635_v9  ;;  %10465 = vmatpush1.bf16.msra.mxu0 %v13098_v23  ;;  %10529 = vmatpush1.bf16.msra.mxu1 %v13441_v4  ;;  %v15522_v21 = vld [vmem:[#allocation147_spill] sm:$0xff] }
 0xf5c   :  { %6297 = vmatprep.mubr.f32.mxu0 %v6088_v58  ;;  %6368 = vmatprep.mubr.f32.mxu1 %v6088_v58  ;;  %v15520_v58 = vld [vmem:[#allocation146_spill] sm:$0xff] }
 0xf5d   :  { %6085 = vst.msk [vmem:[#allocation2 + $0x4] ss:$8 sm:$0x3] %vm13644_vm6, %v6082_v63  ;;  %10467 = vmatprep.subr.bf16.mxu0 %v13103_v29  ;;  %10531 = vmatprep.subr.bf16.mxu1 %v13444_v41  ;;  %v15523_v63 = vld [vmem:[#allocation55_spill] sm:$0xff] }
 0xf5f   :  { %10469 = vmatpush1.bf16.msra.mxu0 %v13106_v32  ;;  %10533 = vmatpush1.bf16.msra.mxu1 %v13448_v47 }
 0xf60   :  { %10471 = vmatprep.subr.bf16.mxu0 %v15131_v60  ;;  %10535 = vmatprep.subr.bf16.mxu1 %v15132_v30 }
 0xf63   :  { %10473 = vmatpush1.bf16.msra.mxu0 %v15133_v31  ;;  %10537 = vmatpush1.bf16.msra.mxu1 %v15222_v59 }
 0xf64   :  { %10475 = vmatprep.subr.bf16.mxu0 %v15223_v3  ;;  %10539 = vmatprep.subr.bf16.mxu1 %v15224_v46 }
 0xf67   :  { %10477 = vmatpush1.bf16.msra.mxu0 %v15225_v35  ;;  %10541 = vmatpush1.bf16.msra.mxu1 %v15226_v22 }
 0xf68   :  { %10479 = vmatprep.subr.bf16.mxu0 %v15227_v16  ;;  %10543 = vmatprep.subr.bf16.mxu1 %v15316_v39 }
 0xf6b   :  { %10481 = vmatpush1.bf16.msra.mxu0 %v15317_v33  ;;  %10545 = vmatpush1.bf16.msra.mxu1 %v15318_v13 }
 0xf6c   :  { %10483 = vmatprep.subr.bf16.mxu0 %v15319_v8  ;;  %10547 = vmatprep.subr.bf16.mxu1 %v15320_v55 }
 0xf6f   :  { %10485 = vmatpush1.bf16.msra.mxu0 %v15321_v25  ;;  %10549 = vmatpush1.bf16.msra.mxu1 %v15322_v53 }
 0xf70   :  { %10487 = vmatprep.subr.bf16.mxu0 %v15323_v24  ;;  %10551 = vmatprep.subr.bf16.mxu1 %v15324_v61 }
 0xf73   :  { %10489 = vmatpush1.bf16.msra.mxu0 %v15325_v49  ;;  %10553 = vmatpush1.bf16.msra.mxu1 %v15326_v15 }
 0xf74   :  { %10491 = vmatprep.subr.bf16.mxu0 %v15327_v28  ;;  %10555 = vmatprep.subr.bf16.mxu1 %v15411_v38 }
 0xf77   :  { %10493 = vmatpush1.bf16.msra.mxu0 %v15329_v18  ;;  %10557 = vmatpush1.bf16.msra.mxu1 %v15412_v12 }
 0xf78   :  { %10495 = vmatprep.subr.bf16.mxu0 %v15330_v1  ;;  %10559 = vmatprep.subr.bf16.mxu1 %v15244_v48 }
 0xf7b   :  { %10497 = vmatpush1.bf16.msra.mxu0 %v15331_v11  ;;  %10561 = vmatpush1.bf16.msra.mxu1 %v15413_v2 }
 0xf7c   :  { %10499 = vmatprep.subr.bf16.mxu0 %v15332_v17  ;;  %10563 = vmatprep.subr.bf16.mxu1 %v15506_v0 }
 0xf7f   :  { %10501 = vmatpush1.bf16.msra.mxu0 %v15507_v27  ;;  %10565 = vmatpush1.bf16.msra.mxu1 %v15508_v42  ;;  %v6448_v27 = vrot.slane %v14253_v50, 7 }
 0xf80   :  { %10503 = vmatprep.subr.bf16.mxu0 %v15509_v37  ;;  %10567 = vmatprep.subr.bf16.mxu1 %v15510_v7  ;;  %v15600_v7 = vld [vmem:[#allocation156_spill] sm:$0xff] }
 0xf83   :  { %10505 = vmatpush1.bf16.msra.mxu0 %v15511_v57  ;;  %10569 = vmatpush1.bf16.msra.mxu1 %v15512_v62  ;;  %v15599_v57 = vld [vmem:[#allocation155_spill] sm:$0xff] }
 0xf84   :  { %10507 = vmatprep.subr.bf16.mxu0 %v15513_v6  ;;  %10571 = vmatprep.subr.bf16.mxu1 %v15514_v36  ;;  %v15524_v6 = vld [vmem:[#allocation148_spill] sm:$0xff] }
 0xf85   :  { %v15525_v36 = vld [vmem:[#allocation56_spill] sm:$0xff] }
 0xf87   :  { %10509 = vmatpush1.bf16.msra.mxu0 %v15515_v40  ;;  %10573 = vmatpush1.bf16.msra.mxu1 %v15516_v45  ;;  %v15526_v40 = vld [vmem:[#allocation149_spill] sm:$0xff] }
 0xf88   :  { %10511 = vmatprep.subr.bf16.mxu0 %v15517_v51  ;;  %10575 = vmatprep.subr.bf16.mxu1 %v15518_v20  ;;  %v15527_v45 = vld [vmem:[#allocation57_spill] sm:$0xff]  ;;  %v15528_v51 = vld [vmem:[#allocation150_spill] sm:$0xff] }
 0xf89   :  { %v15529_v20 = vld [vmem:[#allocation58_spill] sm:$0xff] }
 0xf8b   :  { %10513 = vmatpush1.bf16.msra.mxu0 %v15519_v44  ;;  %10577 = vmatpush1.bf16.msra.mxu1 %v15520_v58  ;;  %v15530_v44 = vld [vmem:[#allocation151_spill] sm:$0xff] }
 0xf8c   :  { %10515 = vmatprep.subr.bf16.mxu0 %v15521_v43  ;;  %10579 = vmatprep.subr.bf16.mxu1 %v15522_v21  ;;  %v15531_v58 = vld [vmem:[#allocation59_spill] sm:$0xff]  ;;  %v15532_v43 = vld [vmem:[#allocation152_spill] sm:$0xff] }
 0xf8d   :  { %v15533_v21 = vld [vmem:[#allocation60_spill] sm:$0xff] }
 0xf8f   :  { %10517 = vmatpush1.bf16.msra.mxu0 %v15523_v63  ;;  %10581 = vmatpush1.bf16.msra.mxu1 %v15524_v6  ;;  %v15534_v63 = vld [vmem:[#allocation92_spill] sm:$0xff] }
 0xf90   :  { %10519 = vmatprep.subr.bf16.mxu0 %v15525_v36  ;;  %10583 = vmatprep.subr.bf16.mxu1 %v15526_v40  ;;  %v15535_v40 = vld [vmem:[#allocation61_spill] sm:$0xff] }
 0xf91   :  { %v15544_v36 = vld [vmem:[#allocation97_spill] sm:$0xff] }
 0xf93   :  { %10521 = vmatpush1.bf16.msra.mxu0 %v15527_v45  ;;  %10585 = vmatpush1.bf16.msra.mxu1 %v15528_v51  ;;  %v15536_v45 = vld [vmem:[#allocation93_spill] sm:$0xff]  ;;  %v15537_v51 = vld [vmem:[#allocation62_spill] sm:$0xff] }
 0xf94   :  { %10523 = vmatprep.subr.bf16.mxu0 %v15529_v20  ;;  %10587 = vmatprep.subr.bf16.mxu1 %v15530_v44  ;;  %v15538_v20 = vld [vmem:[#allocation94_spill] sm:$0xff]  ;;  %v15539_v44 = vld [vmem:[#allocation63_spill] sm:$0xff] }
 0xf97   :  { %10525 = vmatpush1.bf16.msra.mxu0 %v15531_v58  ;;  %10589 = vmatpush1.bf16.msra.mxu1 %v15532_v43  ;;  %v15540_v58 = vld [vmem:[#allocation95_spill] sm:$0xff]  ;;  %v15541_v43 = vld [vmem:[#allocation64_spill] sm:$0xff] }
 0xf98   :  { %10591 = vmatprep.subr.bf16.mxu0 %v15533_v21  ;;  %10655 = vmatprep.subr.bf16.mxu1 %v15534_v63  ;;  %v15542_v21 = vld [vmem:[#allocation96_spill] sm:$0xff]  ;;  %v15543_v63 = vld [vmem:[#allocation65_spill] sm:$0xff] }
 0xf9a   :  { %6298 = vmatmul.mubr.f32.vlgmr.msra.gmra.mrb[24].mxu0 %v14257_v34  ;;  %6369 = vmatmul.mubr.f32.vlgmr.msra.gmra.mrb[36].mxu1 %v14257_v34  ;;  %v15545_v34 = vld [vmem:[#allocation66_spill] sm:$0xff] }
 0xf9b   :  { %10593 = vmatpush1.bf16.msra.mxu0 %v15535_v40  ;;  %10657 = vmatpush1.bf16.msra.mxu1 %v15536_v45  ;;  %v15546_v40 = vld [vmem:[#allocation98_spill] sm:$0xff]  ;;  %v15547_v45 = vld [vmem:[#allocation67_spill] sm:$0xff] }
 0xf9c   :  { %10595 = vmatprep.subr.bf16.mxu0 %v15537_v51  ;;  %10659 = vmatprep.subr.bf16.mxu1 %v15538_v20  ;;  %v15548_v51 = vld [vmem:[#allocation99_spill] sm:$0xff]  ;;  %v15549_v20 = vld [vmem:[#allocation68_spill] sm:$0xff] }
 0xf9f   :  { %10597 = vmatpush1.bf16.msra.mxu0 %v15539_v44  ;;  %10661 = vmatpush1.bf16.msra.mxu1 %v15540_v58  ;;  %v15550_v44 = vld [vmem:[#allocation100_spill] sm:$0xff]  ;;  %v15551_v58 = vld [vmem:[#allocation69_spill] sm:$0xff] }
 0xfa0   :  { %10599 = vmatprep.subr.bf16.mxu0 %v15541_v43  ;;  %10663 = vmatprep.subr.bf16.mxu1 %v15542_v21  ;;  %v15552_v43 = vld [vmem:[#allocation101_spill] sm:$0xff]  ;;  %v15553_v21 = vld [vmem:[#allocation70_spill] sm:$0xff] }
 0xfa3   :  { %10601 = vmatpush1.bf16.msra.mxu0 %v15543_v63  ;;  %10665 = vmatpush1.bf16.msra.mxu1 %v15544_v36  ;;  %v15554_v63 = vld [vmem:[#allocation102_spill] sm:$0xff]  ;;  %v15555_v36 = vld [vmem:[#allocation71_spill] sm:$0xff] }
 0xfa4   :  { %10603 = vmatprep.subr.bf16.mxu0 %v15545_v34  ;;  %10667 = vmatprep.subr.bf16.mxu1 %v15546_v40  ;;  %v15556_v34 = vld [vmem:[#allocation103_spill] sm:$0xff]  ;;  %v15557_v40 = vld [vmem:[#allocation72_spill] sm:$0xff] }
 0xfa7   :  { %10605 = vmatpush1.bf16.msra.mxu0 %v15547_v45  ;;  %10669 = vmatpush1.bf16.msra.mxu1 %v15548_v51  ;;  %v15558_v45 = vld [vmem:[#allocation104_spill] sm:$0xff]  ;;  %v15559_v51 = vld [vmem:[#allocation73_spill] sm:$0xff] }
 0xfa8   :  { %10607 = vmatprep.subr.bf16.mxu0 %v15549_v20  ;;  %10671 = vmatprep.subr.bf16.mxu1 %v15550_v44  ;;  %v15560_v20 = vld [vmem:[#allocation105_spill] sm:$0xff]  ;;  %v15561_v44 = vld [vmem:[#allocation74_spill] sm:$0xff] }
 0xfab   :  { %10609 = vmatpush1.bf16.msra.mxu0 %v15551_v58  ;;  %10673 = vmatpush1.bf16.msra.mxu1 %v15552_v43  ;;  %v15562_v58 = vld [vmem:[#allocation106_spill] sm:$0xff]  ;;  %v15563_v43 = vld [vmem:[#allocation75_spill] sm:$0xff] }
 0xfac   :  { %10611 = vmatprep.subr.bf16.mxu0 %v15553_v21  ;;  %10675 = vmatprep.subr.bf16.mxu1 %v15554_v63  ;;  %v15564_v21 = vld [vmem:[#allocation107_spill] sm:$0xff]  ;;  %v15565_v63 = vld [vmem:[#allocation76_spill] sm:$0xff] }
 0xfaf   :  { %10613 = vmatpush1.bf16.msra.mxu0 %v15555_v36  ;;  %10677 = vmatpush1.bf16.msra.mxu1 %v15556_v34  ;;  %v15566_v36 = vld [vmem:[#allocation108_spill] sm:$0xff]  ;;  %v15567_v34 = vld [vmem:[#allocation77_spill] sm:$0xff] }
 0xfb0   :  { %10615 = vmatprep.subr.bf16.mxu0 %v15557_v40  ;;  %10679 = vmatprep.subr.bf16.mxu1 %v15558_v45  ;;  %v15568_v40 = vld [vmem:[#allocation109_spill] sm:$0xff]  ;;  %v15569_v45 = vld [vmem:[#allocation78_spill] sm:$0xff] }
 0xfb3   :  { %10617 = vmatpush1.bf16.msra.mxu0 %v15559_v51  ;;  %10681 = vmatpush1.bf16.msra.mxu1 %v15560_v20  ;;  %v15570_v51 = vld [vmem:[#allocation110_spill] sm:$0xff]  ;;  %v15571_v20 = vld [vmem:[#allocation79_spill] sm:$0xff] }
 0xfb4   :  { %10619 = vmatprep.subr.bf16.mxu0 %v15561_v44  ;;  %10683 = vmatprep.subr.bf16.mxu1 %v15562_v58  ;;  %v15572_v44 = vld [vmem:[#allocation111_spill] sm:$0xff]  ;;  %v15573_v58 = vld [vmem:[#allocation80_spill] sm:$0xff] }
 0xfb7   :  { %10621 = vmatpush1.bf16.msra.mxu0 %v15563_v43  ;;  %10685 = vmatpush1.bf16.msra.mxu1 %v15564_v21  ;;  %v15574_v43 = vld [vmem:[#allocation112_spill] sm:$0xff]  ;;  %v15575_v21 = vld [vmem:[#allocation81_spill] sm:$0xff] }
 0xfb8   :  { %10623 = vmatprep.subr.bf16.mxu0 %v15565_v63  ;;  %10687 = vmatprep.subr.bf16.mxu1 %v15566_v36  ;;  %v15576_v63 = vld [vmem:[#allocation113_spill] sm:$0xff]  ;;  %v15577_v36 = vld [vmem:[#allocation82_spill] sm:$0xff] }
 0xfbb   :  { %10625 = vmatpush1.bf16.msra.mxu0 %v15567_v34  ;;  %10689 = vmatpush1.bf16.msra.mxu1 %v15568_v40  ;;  %v15578_v34 = vld [vmem:[#allocation114_spill] sm:$0xff]  ;;  %v15579_v40 = vld [vmem:[#allocation83_spill] sm:$0xff] }
 0xfbc   :  { %10627 = vmatprep.subr.bf16.mxu0 %v15569_v45  ;;  %10691 = vmatprep.subr.bf16.mxu1 %v15570_v51  ;;  %v15580_v45 = vld [vmem:[#allocation115_spill] sm:$0xff]  ;;  %v15581_v51 = vld [vmem:[#allocation84_spill] sm:$0xff] }
 0xfbf   :  { %10629 = vmatpush1.bf16.msra.mxu0 %v15571_v20  ;;  %10693 = vmatpush1.bf16.msra.mxu1 %v15572_v44  ;;  %v15582_v20 = vld [vmem:[#allocation116_spill] sm:$0xff]  ;;  %v15583_v44 = vld [vmem:[#allocation85_spill] sm:$0xff] }
 0xfc0   :  { %10631 = vmatprep.subr.bf16.mxu0 %v15573_v58  ;;  %10695 = vmatprep.subr.bf16.mxu1 %v15574_v43  ;;  %v15584_v58 = vld [vmem:[#allocation117_spill] sm:$0xff]  ;;  %v15585_v43 = vld [vmem:[#allocation86_spill] sm:$0xff] }
 0xfc3   :  { %10633 = vmatpush1.bf16.msra.mxu0 %v15575_v21  ;;  %10697 = vmatpush1.bf16.msra.mxu1 %v15576_v63  ;;  %v15586_v21 = vld [vmem:[#allocation118_spill] sm:$0xff]  ;;  %v15587_v63 = vld [vmem:[#allocation87_spill] sm:$0xff] }
 0xfc4   :  { %10635 = vmatprep.subr.bf16.mxu0 %v15577_v36  ;;  %10699 = vmatprep.subr.bf16.mxu1 %v15578_v34  ;;  %v15588_v36 = vld [vmem:[#allocation119_spill] sm:$0xff]  ;;  %v15589_v34 = vld [vmem:[#allocation88_spill] sm:$0xff] }
 0xfc7   :  { %10637 = vmatpush1.bf16.msra.mxu0 %v15579_v40  ;;  %10701 = vmatpush1.bf16.msra.mxu1 %v15580_v45  ;;  %v15590_v40 = vld [vmem:[#allocation120_spill] sm:$0xff]  ;;  %v15591_v45 = vld [vmem:[#allocation89_spill] sm:$0xff] }
 0xfc8   :  { %10639 = vmatprep.subr.bf16.mxu0 %v15581_v51  ;;  %10703 = vmatprep.subr.bf16.mxu1 %v15582_v20  ;;  %v15592_v51 = vld [vmem:[#allocation121_spill] sm:$0xff]  ;;  %v15593_v20 = vld [vmem:[#allocation90_spill] sm:$0xff] }
 0xfcb   :  { %10641 = vmatpush1.bf16.msra.mxu0 %v15583_v44  ;;  %10705 = vmatpush1.bf16.msra.mxu1 %v15584_v58  ;;  %v15594_v44 = vld [vmem:[#allocation122_spill] sm:$0xff]  ;;  %v15595_v58 = vld [vmem:[#allocation91_spill] sm:$0xff] }
 0xfcc   :  { %10643 = vmatprep.subr.bf16.mxu0 %v15585_v43  ;;  %10707 = vmatprep.subr.bf16.mxu1 %v15586_v21  ;;  %v15596_v43 = vld [vmem:[#allocation123_spill] sm:$0xff] }
 0xfcd   :  { %v15597_v21 = vld [vmem:[#allocation31_spill] sm:$0xff] }
 0xfcf   :  { %10645 = vmatpush1.bf16.msra.mxu0 %v15587_v63  ;;  %10709 = vmatpush1.bf16.msra.mxu1 %v15588_v36  ;;  %v15598_v63 = vld [vmem:[#allocation124_spill] sm:$0xff] }
 0xfd0   :  { %10647 = vmatprep.subr.bf16.mxu0 %v15589_v34  ;;  %10711 = vmatprep.subr.bf16.mxu1 %v15590_v40 }
 0xfd3   :  { %10649 = vmatpush1.bf16.msra.mxu0 %v15591_v45  ;;  %10713 = vmatpush1.bf16.msra.mxu1 %v15592_v51 }
 0xfd4   :  { %10651 = vmatprep.subr.bf16.mxu0 %v15593_v20  ;;  %10715 = vmatprep.subr.bf16.mxu1 %v15594_v44 }
 0xfd7   :  { %10653 = vmatpush1.bf16.msra.mxu0 %v15595_v58  ;;  %10717 = vmatpush1.bf16.msra.mxu1 %v15596_v43 }
 0xfd8   :  { %10719 = vmatprep.subr.bf16.mxu0 %v15597_v21  ;;  %10783 = vmatprep.subr.bf16.mxu1 %v15598_v63  ;;  %v6447_v63 = vrot.slane %v14251_v52, 7 }
0x102d   :  { %v6157_v36 = vpop.f32.mrb[22].mxu0  ;;  %v6228_v34 = vpop.f32.mrb[34].mxu1 }
0x102e   :  { %v6385_v6 = vrot.slane %v6228_v34, 3  ;;  %v6159_v40 = vpop.f32.mrb[23].mxu0  ;;  %v6230_v62 = vpop.f32.mrb[35].mxu1 }
0x102f   :  { %v6386_v45 = vrot.slane %v6230_v62, 3 }
0x1030   :  { %v6401_v51 = vadd.f32 %v15599_v57, %v6385_v6  ;;  %v6383_v57 = vrot.slane %v6157_v36, 3 }
0x1031   :  { %v6402_v20 = vadd.f32 %v15600_v7, %v6386_v45  ;;  %v6384_v45 = vrot.slane %v6159_v40, 3 }
0x1032   :  { %v7626_v37 = vmul.f32 -1.442695, %v6401_v51  ;;  %v6399_v51 = vadd.f32 %v15220_v54, %v6383_v57 }
0x1033   :  { %v7627_v44 = vmul.f32 -1.442695, %v6402_v20 }
0x1034   :  { %12395 = vpow2.f32 %v7626_v37  ;;  %v6400_v37 = vadd.f32 %v13586_v5, %v6384_v45  ;;  %v7624_v20 = vmul.f32 -1.442695, %v6399_v51 }
0x1035   :  { %12397 = vpow2.f32 %v7627_v44 }
0x1036   :  { %v7625_v44 = vmul.f32 -1.442695, %v6400_v37 }
0x103e   :  { %v12396_v58 = vpop.eup %12395 }
0x103f   :  { %v6425_v43 = vadd.f32 1.0, %v12396_v58  ;;  %v12398_v42 = vpop.eup %12397 }
0x1040   :  { %v6426_v21 = vadd.f32 1.0, %v12398_v42 }
0x1041   :  { %12399 = vrcp.f32 %v6425_v43 }
0x1042   :  { %12401 = vrcp.f32 %v6426_v21 }
0x1043   :  { %12403 = vpow2.f32 %v7624_v20 }
0x1044   :  { %12405 = vpow2.f32 %v7625_v44 }
0x104b   :  { %v12400_v34 = vpop.eup %12399 }
0x104c   :  { %v6451_v62 = vmul.f32 %v12400_v34, %v6447_v63  ;;  %v12402_v0 = vpop.eup %12401 }
0x104d   :  { %v6452_v6 = vmul.f32 %v12402_v0, %v6448_v27  ;;  %v12404_v42 = vpop.eup %12403 }
0x104e   :  { %v12406_v58 = vpop.eup %12405  ;;  %v6413_v43 = vadd.f32 1.0, %v12404_v42 }
0x104f   :  { %v6414_v52 = vadd.f32 1.0, %v12406_v58 }
0x1050   :  { %12407 = vrcp.f32 %v6413_v43 }
0x1051   :  { %12409 = vrcp.f32 %v6414_v52 }
0x106d   :  { %v6299_v21 = vpop.f32.mrb[24].mxu0  ;;  %v6370_v7 = vpop.f32.mrb[36].mxu1 }
0x106e   :  { %v6387_v50 = vrot.slane %v6299_v21, 3  ;;  %v6389_v63 = vrot.slane %v6370_v7, 3  ;;  %v6301_v34 = vpop.f32.mrb[25].mxu0  ;;  %v6372_v0 = vpop.f32.mrb[37].mxu1 }
0x106f   :  { %v6388_v27 = vrot.slane %v6301_v34, 3  ;;  %v6390_v36 = vrot.slane %v6372_v0, 3  ;;  %v12408_v7 = vpop.eup %12407 }
0x1070   :  { %v6403_v57 = vadd.f32 %v13594_v10, %v6387_v50  ;;  %v6405_v40 = vadd.f32 %v13623_v14, %v6389_v63  ;;  %v12410_v44 = vpop.eup %12409 }
0x1071   :  { %v6404_v45 = vadd.f32 %v15221_v19, %v6388_v27  ;;  %v6406_v51 = vadd.f32 %v13626_v26, %v6390_v36 }
0x1072   :  { %12411 = vtanh.f32 %v6403_v57  ;;  %v7628_v37 = vmul.f32 -1.442695, %v6405_v40 }
0x1073   :  { %12413 = vtanh.f32 %v6404_v45  ;;  %v7629_v20 = vmul.f32 -1.442695, %v6406_v51 }
0x1074   :  { %12415 = vpow2.f32 %v7628_v37 }
0x1075   :  { %12417 = vpow2.f32 %v7629_v20 }
0x107c   :  { %v12412_v42 = vpop.eup %12411 }
0x107d   :  { %v12414_v58 = vpop.eup %12413  ;;  %v6453_v43 = vmul.f32 %v12412_v42, %v12408_v7 }
0x107e   :  { %v12416_v21 = vpop.eup %12415  ;;  %v6454_v50 = vmul.f32 %v12414_v58, %v12410_v44  ;;  %v15601_v58 = vld [vmem:[#allocation139_spill] sm:$0xff] }
0x107f   :  { %v12418_v34 = vpop.eup %12417  ;;  %v14405_v63 = vadd.f32 %v6453_v43, %v6451_v62  ;;  %v6439_v52 = vadd.f32 1.0, %v12416_v21  ;;  %v15602_v43 = vld [vmem:[#allocation47_spill] sm:$0xff]  ;;  %v15603_v21 = vld [vmem:[#allocation140_spill] sm:$0xff] }
0x1080   :  { %v14407_v0 = vadd.f32 %v6454_v50, %v6452_v6  ;;  %v6440_v27 = vadd.f32 1.0, %v12418_v34  ;;  %v15604_v50 = vld [vmem:[#allocation48_spill] sm:$0xff]  ;;  %v15605_v34 = vld [vmem:[#allocation141_spill] sm:$0xff] }
0x1081   :  { %12419 = vtanh.f32 %v14405_v63 }
0x1082   :  { %12421 = vrcp.f32 %v6439_v52  ;;  %v15606_v52 = vld [vmem:[#allocation49_spill] sm:$0xff] }
0x1083   :  { %12423 = vtanh.f32 %v14407_v0 }
0x1084   :  { %12425 = vrcp.f32 %v6440_v27  ;;  %v15607_v27 = vld [vmem:[#allocation142_spill] sm:$0xff] }
0x108b   :  { %v12420_v36 = vpop.eup %12419 }
0x108c   :  { %v12422_v57 = vpop.eup %12421 }
0x108d   :  { %v12424_v40 = vpop.eup %12423  ;;  %v6459_v45 = vmul.f32 %v12422_v57, %v12420_v36  ;;  %v15608_v36 = vld [vmem:[#allocation50_spill] sm:$0xff]  ;;  %v15609_v57 = vld [vmem:[#allocation143_spill] sm:$0xff] }
0x108e   :  { %v12426_v51 = vpop.eup %12425 }
0x108f   :  { %v6460_v37 = vmul.f32 %v12426_v51, %v12424_v40  ;;  %v14411_v62 = vrot.slane %v6459_v45, 5  ;;  %v15610_v40 = vld [vmem:[#allocation51_spill] sm:$0xff]  ;;  %v15612_v51 = vld [vmem:[#allocation52_spill] sm:$0xff] }
0x1091   :  { %v6484_v20 = vrot.slane %v6460_v37, 5  ;;  %v6463_v7 = vcombine.high %v6459_v45, %v6460_v37  ;;  %v15611_v45 = vld [vmem:[#allocation144_spill] sm:$0xff]  ;;  %v15613_v37 = vld [vmem:[#allocation145_spill] sm:$0xff] }
0x1093   :  { %6551 = vmatprep.mubr.f32.mxu0 %v6484_v20  ;;  %6622 = vmatprep.mubr.f32.mxu1 %v6484_v20  ;;  %v6470_v6 = vrot.slane %v6463_v7, %v13635_v9  ;;  %v15615_v7 = vld [vmem:[#allocation146_spill] sm:$0xff] }
0x1094   :  { %6552 = vmatmul.mubr.f32.vlgmr.msra.gmra.mrb[26].mxu0 %v14411_v62  ;;  %6623 = vmatmul.mubr.f32.vlgmr.msra.gmra.mrb[38].mxu1 %v14411_v62 }
0x1095   :  { %v6471_v44 = vcombine.high %v6470_v6, %v6470_v6  ;;  %10721 = vmatpush1.bf16.msra.mxu0 %v13098_v23  ;;  %10785 = vmatpush1.bf16.msra.mxu1 %v13441_v4  ;;  %v15616_v6 = vld [vmem:[#allocation54_spill] sm:$0xff] }
0x1096   :  { %6693 = vmatprep.mubr.f32.mxu0 %v6484_v20  ;;  %6764 = vmatprep.mubr.f32.mxu1 %v6484_v20  ;;  %v15614_v20 = vld [vmem:[#allocation53_spill] sm:$0xff] }
0x1097   :  { %v6478_v42 = vrot.slane %v6471_v44, %v13635_v9  ;;  %10723 = vmatprep.subr.bf16.mxu0 %v13103_v29  ;;  %10787 = vmatprep.subr.bf16.mxu1 %v13444_v41  ;;  %v15617_v44 = vld [vmem:[#allocation147_spill] sm:$0xff] }
0x1099   :  { %6481 = vst.msk [vmem:[#allocation2 + $0x5] ss:$8 sm:$0x3] %vm13644_vm6, %v6478_v42  ;;  %10725 = vmatpush1.bf16.msra.mxu0 %v13106_v32  ;;  %10789 = vmatpush1.bf16.msra.mxu1 %v13448_v47  ;;  %v15618_v42 = vld [vmem:[#allocation55_spill] sm:$0xff] }
0x109a   :  { %10727 = vmatprep.subr.bf16.mxu0 %v15131_v60  ;;  %10791 = vmatprep.subr.bf16.mxu1 %v15132_v30 }
0x109d   :  { %10729 = vmatpush1.bf16.msra.mxu0 %v15133_v31  ;;  %10793 = vmatpush1.bf16.msra.mxu1 %v15222_v59 }
0x109e   :  { %10731 = vmatprep.subr.bf16.mxu0 %v15223_v3  ;;  %10795 = vmatprep.subr.bf16.mxu1 %v15224_v46 }
0x10a1   :  { %10733 = vmatpush1.bf16.msra.mxu0 %v15225_v35  ;;  %10797 = vmatpush1.bf16.msra.mxu1 %v15226_v22 }
0x10a2   :  { %10735 = vmatprep.subr.bf16.mxu0 %v15227_v16  ;;  %10799 = vmatprep.subr.bf16.mxu1 %v15316_v39 }
0x10a5   :  { %10737 = vmatpush1.bf16.msra.mxu0 %v15317_v33  ;;  %10801 = vmatpush1.bf16.msra.mxu1 %v15318_v13 }
0x10a6   :  { %10739 = vmatprep.subr.bf16.mxu0 %v15319_v8  ;;  %10803 = vmatprep.subr.bf16.mxu1 %v15320_v55 }
0x10a9   :  { %10741 = vmatpush1.bf16.msra.mxu0 %v15321_v25  ;;  %10805 = vmatpush1.bf16.msra.mxu1 %v15322_v53 }
0x10aa   :  { %10743 = vmatprep.subr.bf16.mxu0 %v15323_v24  ;;  %10807 = vmatprep.subr.bf16.mxu1 %v15324_v61 }
0x10ad   :  { %10745 = vmatpush1.bf16.msra.mxu0 %v15325_v49  ;;  %10809 = vmatpush1.bf16.msra.mxu1 %v15326_v15 }
0x10ae   :  { %10747 = vmatprep.subr.bf16.mxu0 %v15327_v28  ;;  %10811 = vmatprep.subr.bf16.mxu1 %v15411_v38 }
0x10b1   :  { %10749 = vmatpush1.bf16.msra.mxu0 %v15329_v18  ;;  %10813 = vmatpush1.bf16.msra.mxu1 %v15412_v12 }
0x10b2   :  { %10751 = vmatprep.subr.bf16.mxu0 %v15330_v1  ;;  %10815 = vmatprep.subr.bf16.mxu1 %v15244_v48 }
0x10b5   :  { %10753 = vmatpush1.bf16.msra.mxu0 %v15331_v11  ;;  %10817 = vmatpush1.bf16.msra.mxu1 %v15413_v2 }
0x10b6   :  { %10755 = vmatprep.subr.bf16.mxu0 %v15332_v17  ;;  %10819 = vmatprep.subr.bf16.mxu1 %v15601_v58 }
0x10b9   :  { %10757 = vmatpush1.bf16.msra.mxu0 %v15602_v43  ;;  %10821 = vmatpush1.bf16.msra.mxu1 %v15603_v21  ;;  %v6844_v43 = vrot.slane %v14407_v0, 7 }
0x10ba   :  { %10759 = vmatprep.subr.bf16.mxu0 %v15604_v50  ;;  %10823 = vmatprep.subr.bf16.mxu1 %v15605_v34  ;;  %v15695_v34 = vld [vmem:[#allocation156_spill] sm:$0xff] }
0x10bd   :  { %10761 = vmatpush1.bf16.msra.mxu0 %v15606_v52  ;;  %10825 = vmatpush1.bf16.msra.mxu1 %v15607_v27  ;;  %v15694_v52 = vld [vmem:[#allocation155_spill] sm:$0xff] }
0x10be   :  { %10763 = vmatprep.subr.bf16.mxu0 %v15608_v36  ;;  %10827 = vmatprep.subr.bf16.mxu1 %v15609_v57  ;;  %v15619_v36 = vld [vmem:[#allocation148_spill] sm:$0xff] }
0x10bf   :  { %v15620_v57 = vld [vmem:[#allocation56_spill] sm:$0xff] }
0x10c1   :  { %10765 = vmatpush1.bf16.msra.mxu0 %v15610_v40  ;;  %10829 = vmatpush1.bf16.msra.mxu1 %v15611_v45  ;;  %v15621_v40 = vld [vmem:[#allocation149_spill] sm:$0xff] }
0x10c2   :  { %10767 = vmatprep.subr.bf16.mxu0 %v15612_v51  ;;  %10831 = vmatprep.subr.bf16.mxu1 %v15613_v37  ;;  %v15622_v45 = vld [vmem:[#allocation57_spill] sm:$0xff]  ;;  %v15623_v51 = vld [vmem:[#allocation150_spill] sm:$0xff] }
0x10c3   :  { %v15624_v37 = vld [vmem:[#allocation58_spill] sm:$0xff] }
0x10c5   :  { %10769 = vmatpush1.bf16.msra.mxu0 %v15614_v20  ;;  %10833 = vmatpush1.bf16.msra.mxu1 %v15615_v7  ;;  %v15625_v20 = vld [vmem:[#allocation151_spill] sm:$0xff] }
0x10c6   :  { %10771 = vmatprep.subr.bf16.mxu0 %v15616_v6  ;;  %10835 = vmatprep.subr.bf16.mxu1 %v15617_v44  ;;  %v15626_v7 = vld [vmem:[#allocation59_spill] sm:$0xff]  ;;  %v15627_v6 = vld [vmem:[#allocation152_spill] sm:$0xff] }
0x10c7   :  { %v15628_v44 = vld [vmem:[#allocation60_spill] sm:$0xff] }
0x10c9   :  { %10773 = vmatpush1.bf16.msra.mxu0 %v15618_v42  ;;  %10837 = vmatpush1.bf16.msra.mxu1 %v15619_v36  ;;  %v15629_v42 = vld [vmem:[#allocation92_spill] sm:$0xff] }
0x10ca   :  { %10775 = vmatprep.subr.bf16.mxu0 %v15620_v57  ;;  %10839 = vmatprep.subr.bf16.mxu1 %v15621_v40  ;;  %v15630_v40 = vld [vmem:[#allocation61_spill] sm:$0xff] }
0x10cb   :  { %v15639_v57 = vld [vmem:[#allocation97_spill] sm:$0xff] }
0x10cd   :  { %10777 = vmatpush1.bf16.msra.mxu0 %v15622_v45  ;;  %10841 = vmatpush1.bf16.msra.mxu1 %v15623_v51  ;;  %v15631_v45 = vld [vmem:[#allocation93_spill] sm:$0xff]  ;;  %v15632_v51 = vld [vmem:[#allocation62_spill] sm:$0xff] }
0x10ce   :  { %10779 = vmatprep.subr.bf16.mxu0 %v15624_v37  ;;  %10843 = vmatprep.subr.bf16.mxu1 %v15625_v20  ;;  %v15633_v37 = vld [vmem:[#allocation94_spill] sm:$0xff]  ;;  %v15634_v20 = vld [vmem:[#allocation63_spill] sm:$0xff] }
0x10d1   :  { %10781 = vmatpush1.bf16.msra.mxu0 %v15626_v7  ;;  %10845 = vmatpush1.bf16.msra.mxu1 %v15627_v6  ;;  %v15635_v7 = vld [vmem:[#allocation95_spill] sm:$0xff]  ;;  %v15636_v6 = vld [vmem:[#allocation64_spill] sm:$0xff] }
0x10d2   :  { %10847 = vmatprep.subr.bf16.mxu0 %v15628_v44  ;;  %10911 = vmatprep.subr.bf16.mxu1 %v15629_v42  ;;  %v15637_v44 = vld [vmem:[#allocation96_spill] sm:$0xff]  ;;  %v15638_v42 = vld [vmem:[#allocation65_spill] sm:$0xff] }
0x10d4   :  { %6694 = vmatmul.mubr.f32.vlgmr.msra.gmra.mrb[28].mxu0 %v14411_v62  ;;  %6765 = vmatmul.mubr.f32.vlgmr.msra.gmra.mrb[40].mxu1 %v14411_v62  ;;  %v15640_v62 = vld [vmem:[#allocation66_spill] sm:$0xff] }
0x10d5   :  { %10849 = vmatpush1.bf16.msra.mxu0 %v15630_v40  ;;  %10913 = vmatpush1.bf16.msra.mxu1 %v15631_v45  ;;  %v15641_v40 = vld [vmem:[#allocation98_spill] sm:$0xff]  ;;  %v15642_v45 = vld [vmem:[#allocation67_spill] sm:$0xff] }
0x10d6   :  { %10851 = vmatprep.subr.bf16.mxu0 %v15632_v51  ;;  %10915 = vmatprep.subr.bf16.mxu1 %v15633_v37  ;;  %v15643_v51 = vld [vmem:[#allocation99_spill] sm:$0xff]  ;;  %v15644_v37 = vld [vmem:[#allocation68_spill] sm:$0xff] }
0x10d9   :  { %10853 = vmatpush1.bf16.msra.mxu0 %v15634_v20  ;;  %10917 = vmatpush1.bf16.msra.mxu1 %v15635_v7  ;;  %v15645_v20 = vld [vmem:[#allocation100_spill] sm:$0xff]  ;;  %v15646_v7 = vld [vmem:[#allocation69_spill] sm:$0xff] }
0x10da   :  { %10855 = vmatprep.subr.bf16.mxu0 %v15636_v6  ;;  %10919 = vmatprep.subr.bf16.mxu1 %v15637_v44  ;;  %v15647_v6 = vld [vmem:[#allocation101_spill] sm:$0xff]  ;;  %v15648_v44 = vld [vmem:[#allocation70_spill] sm:$0xff] }
0x10dd   :  { %10857 = vmatpush1.bf16.msra.mxu0 %v15638_v42  ;;  %10921 = vmatpush1.bf16.msra.mxu1 %v15639_v57  ;;  %v15649_v42 = vld [vmem:[#allocation102_spill] sm:$0xff]  ;;  %v15650_v57 = vld [vmem:[#allocation71_spill] sm:$0xff] }
0x10de   :  { %10859 = vmatprep.subr.bf16.mxu0 %v15640_v62  ;;  %10923 = vmatprep.subr.bf16.mxu1 %v15641_v40  ;;  %v15651_v62 = vld [vmem:[#allocation103_spill] sm:$0xff]  ;;  %v15652_v40 = vld [vmem:[#allocation72_spill] sm:$0xff] }
0x10e1   :  { %10861 = vmatpush1.bf16.msra.mxu0 %v15642_v45  ;;  %10925 = vmatpush1.bf16.msra.mxu1 %v15643_v51  ;;  %v15653_v45 = vld [vmem:[#allocation104_spill] sm:$0xff]  ;;  %v15654_v51 = vld [vmem:[#allocation73_spill] sm:$0xff] }
0x10e2   :  { %10863 = vmatprep.subr.bf16.mxu0 %v15644_v37  ;;  %10927 = vmatprep.subr.bf16.mxu1 %v15645_v20  ;;  %v15655_v37 = vld [vmem:[#allocation105_spill] sm:$0xff]  ;;  %v15656_v20 = vld [vmem:[#allocation74_spill] sm:$0xff] }
0x10e5   :  { %10865 = vmatpush1.bf16.msra.mxu0 %v15646_v7  ;;  %10929 = vmatpush1.bf16.msra.mxu1 %v15647_v6  ;;  %v15657_v7 = vld [vmem:[#allocation106_spill] sm:$0xff]  ;;  %v15658_v6 = vld [vmem:[#allocation75_spill] sm:$0xff] }
0x10e6   :  { %10867 = vmatprep.subr.bf16.mxu0 %v15648_v44  ;;  %10931 = vmatprep.subr.bf16.mxu1 %v15649_v42  ;;  %v15659_v44 = vld [vmem:[#allocation107_spill] sm:$0xff]  ;;  %v15660_v42 = vld [vmem:[#allocation76_spill] sm:$0xff] }
0x10e9   :  { %10869 = vmatpush1.bf16.msra.mxu0 %v15650_v57  ;;  %10933 = vmatpush1.bf16.msra.mxu1 %v15651_v62  ;;  %v15661_v57 = vld [vmem:[#allocation108_spill] sm:$0xff]  ;;  %v15662_v62 = vld [vmem:[#allocation77_spill] sm:$0xff] }
0x10ea   :  { %10871 = vmatprep.subr.bf16.mxu0 %v15652_v40  ;;  %10935 = vmatprep.subr.bf16.mxu1 %v15653_v45  ;;  %v15663_v40 = vld [vmem:[#allocation109_spill] sm:$0xff]  ;;  %v15664_v45 = vld [vmem:[#allocation78_spill] sm:$0xff] }
0x10ed   :  { %10873 = vmatpush1.bf16.msra.mxu0 %v15654_v51  ;;  %10937 = vmatpush1.bf16.msra.mxu1 %v15655_v37  ;;  %v15665_v51 = vld [vmem:[#allocation110_spill] sm:$0xff]  ;;  %v15666_v37 = vld [vmem:[#allocation79_spill] sm:$0xff] }
0x10ee   :  { %10875 = vmatprep.subr.bf16.mxu0 %v15656_v20  ;;  %10939 = vmatprep.subr.bf16.mxu1 %v15657_v7  ;;  %v15667_v20 = vld [vmem:[#allocation111_spill] sm:$0xff]  ;;  %v15668_v7 = vld [vmem:[#allocation80_spill] sm:$0xff] }
0x10f1   :  { %10877 = vmatpush1.bf16.msra.mxu0 %v15658_v6  ;;  %10941 = vmatpush1.bf16.msra.mxu1 %v15659_v44  ;;  %v15669_v6 = vld [vmem:[#allocation112_spill] sm:$0xff]  ;;  %v15670_v44 = vld [vmem:[#allocation81_spill] sm:$0xff] }
0x10f2   :  { %10879 = vmatprep.subr.bf16.mxu0 %v15660_v42  ;;  %10943 = vmatprep.subr.bf16.mxu1 %v15661_v57  ;;  %v15671_v42 = vld [vmem:[#allocation113_spill] sm:$0xff]  ;;  %v15672_v57 = vld [vmem:[#allocation82_spill] sm:$0xff] }
0x10f5   :  { %10881 = vmatpush1.bf16.msra.mxu0 %v15662_v62  ;;  %10945 = vmatpush1.bf16.msra.mxu1 %v15663_v40  ;;  %v15673_v62 = vld [vmem:[#allocation114_spill] sm:$0xff]  ;;  %v15674_v40 = vld [vmem:[#allocation83_spill] sm:$0xff] }
0x10f6   :  { %10883 = vmatprep.subr.bf16.mxu0 %v15664_v45  ;;  %10947 = vmatprep.subr.bf16.mxu1 %v15665_v51  ;;  %v15675_v45 = vld [vmem:[#allocation115_spill] sm:$0xff]  ;;  %v15676_v51 = vld [vmem:[#allocation84_spill] sm:$0xff] }
0x10f9   :  { %10885 = vmatpush1.bf16.msra.mxu0 %v15666_v37  ;;  %10949 = vmatpush1.bf16.msra.mxu1 %v15667_v20  ;;  %v15677_v37 = vld [vmem:[#allocation116_spill] sm:$0xff]  ;;  %v15678_v20 = vld [vmem:[#allocation85_spill] sm:$0xff] }
0x10fa   :  { %10887 = vmatprep.subr.bf16.mxu0 %v15668_v7  ;;  %10951 = vmatprep.subr.bf16.mxu1 %v15669_v6  ;;  %v15679_v7 = vld [vmem:[#allocation117_spill] sm:$0xff]  ;;  %v15680_v6 = vld [vmem:[#allocation86_spill] sm:$0xff] }
0x10fd   :  { %10889 = vmatpush1.bf16.msra.mxu0 %v15670_v44  ;;  %10953 = vmatpush1.bf16.msra.mxu1 %v15671_v42  ;;  %v15681_v44 = vld [vmem:[#allocation118_spill] sm:$0xff]  ;;  %v15682_v42 = vld [vmem:[#allocation87_spill] sm:$0xff] }
0x10fe   :  { %10891 = vmatprep.subr.bf16.mxu0 %v15672_v57  ;;  %10955 = vmatprep.subr.bf16.mxu1 %v15673_v62  ;;  %v15683_v57 = vld [vmem:[#allocation119_spill] sm:$0xff]  ;;  %v15684_v62 = vld [vmem:[#allocation88_spill] sm:$0xff] }
0x1101   :  { %10893 = vmatpush1.bf16.msra.mxu0 %v15674_v40  ;;  %10957 = vmatpush1.bf16.msra.mxu1 %v15675_v45  ;;  %v15685_v40 = vld [vmem:[#allocation120_spill] sm:$0xff]  ;;  %v15686_v45 = vld [vmem:[#allocation89_spill] sm:$0xff] }
0x1102   :  { %10895 = vmatprep.subr.bf16.mxu0 %v15676_v51  ;;  %10959 = vmatprep.subr.bf16.mxu1 %v15677_v37  ;;  %v15687_v51 = vld [vmem:[#allocation121_spill] sm:$0xff]  ;;  %v15688_v37 = vld [vmem:[#allocation90_spill] sm:$0xff] }
0x1105   :  { %10897 = vmatpush1.bf16.msra.mxu0 %v15678_v20  ;;  %10961 = vmatpush1.bf16.msra.mxu1 %v15679_v7  ;;  %v15689_v20 = vld [vmem:[#allocation122_spill] sm:$0xff]  ;;  %v15690_v7 = vld [vmem:[#allocation91_spill] sm:$0xff] }
0x1106   :  { %10899 = vmatprep.subr.bf16.mxu0 %v15680_v6  ;;  %10963 = vmatprep.subr.bf16.mxu1 %v15681_v44  ;;  %v15691_v6 = vld [vmem:[#allocation123_spill] sm:$0xff] }
0x1107   :  { %v15692_v44 = vld [vmem:[#allocation31_spill] sm:$0xff] }
0x1109   :  { %10901 = vmatpush1.bf16.msra.mxu0 %v15682_v42  ;;  %10965 = vmatpush1.bf16.msra.mxu1 %v15683_v57  ;;  %v15693_v42 = vld [vmem:[#allocation124_spill] sm:$0xff] }
0x110a   :  { %10903 = vmatprep.subr.bf16.mxu0 %v15684_v62  ;;  %10967 = vmatprep.subr.bf16.mxu1 %v15685_v40 }
0x110d   :  { %10905 = vmatpush1.bf16.msra.mxu0 %v15686_v45  ;;  %10969 = vmatpush1.bf16.msra.mxu1 %v15687_v51 }
0x110e   :  { %10907 = vmatprep.subr.bf16.mxu0 %v15688_v37  ;;  %10971 = vmatprep.subr.bf16.mxu1 %v15689_v20 }
0x1111   :  { %10909 = vmatpush1.bf16.msra.mxu0 %v15690_v7  ;;  %10973 = vmatpush1.bf16.msra.mxu1 %v15691_v6 }
0x1112   :  { %10975 = vmatprep.subr.bf16.mxu0 %v15692_v44  ;;  %11039 = vmatprep.subr.bf16.mxu1 %v15693_v42  ;;  %v6843_v42 = vrot.slane %v14405_v63, 7 }
0x1167   :  { %v6553_v57 = vpop.f32.mrb[26].mxu0  ;;  %v6624_v62 = vpop.f32.mrb[38].mxu1 }
0x1168   :  { %v6781_v36 = vrot.slane %v6624_v62, 2  ;;  %v6555_v40 = vpop.f32.mrb[27].mxu0  ;;  %v6626_v27 = vpop.f32.mrb[39].mxu1 }
0x1169   :  { %v6782_v45 = vrot.slane %v6626_v27, 2 }
0x116a   :  { %v6797_v51 = vadd.f32 %v15694_v52, %v6781_v36  ;;  %v6779_v52 = vrot.slane %v6553_v57, 2 }
0x116b   :  { %v6798_v37 = vadd.f32 %v15695_v34, %v6782_v45  ;;  %v6780_v45 = vrot.slane %v6555_v40, 2 }
0x116c   :  { %v7632_v50 = vmul.f32 -1.442695, %v6797_v51  ;;  %v6795_v51 = vadd.f32 %v15220_v54, %v6779_v52 }
0x116d   :  { %v7633_v20 = vmul.f32 -1.442695, %v6798_v37 }
0x116e   :  { %12427 = vpow2.f32 %v7632_v50  ;;  %v6796_v50 = vadd.f32 %v13586_v5, %v6780_v45  ;;  %v7630_v37 = vmul.f32 -1.442695, %v6795_v51 }
0x116f   :  { %12429 = vpow2.f32 %v7633_v20 }
0x1170   :  { %v7631_v20 = vmul.f32 -1.442695, %v6796_v50 }
0x1178   :  { %v12428_v7 = vpop.eup %12427 }
0x1179   :  { %v6821_v6 = vadd.f32 1.0, %v12428_v7  ;;  %v12430_v21 = vpop.eup %12429 }
0x117a   :  { %v6822_v44 = vadd.f32 1.0, %v12430_v21 }
0x117b   :  { %12431 = vrcp.f32 %v6821_v6 }
0x117c   :  { %12433 = vrcp.f32 %v6822_v44 }
0x117d   :  { %12435 = vpow2.f32 %v7630_v37 }
0x117e   :  { %12437 = vpow2.f32 %v7631_v20 }
0x1185   :  { %v12432_v62 = vpop.eup %12431 }
0x1186   :  { %v6847_v27 = vmul.f32 %v12432_v62, %v6843_v42  ;;  %v12434_v58 = vpop.eup %12433 }
0x1187   :  { %v6848_v36 = vmul.f32 %v12434_v58, %v6844_v43  ;;  %v12436_v21 = vpop.eup %12435 }
0x1188   :  { %v12438_v7 = vpop.eup %12437  ;;  %v6809_v6 = vadd.f32 1.0, %v12436_v21 }
0x1189   :  { %v6810_v63 = vadd.f32 1.0, %v12438_v7 }
0x118a   :  { %12439 = vrcp.f32 %v6809_v6 }
0x118b   :  { %12441 = vrcp.f32 %v6810_v63 }
0x11a7   :  { %v6695_v44 = vpop.f32.mrb[28].mxu0  ;;  %v6766_v34 = vpop.f32.mrb[40].mxu1 }
0x11a8   :  { %v6783_v0 = vrot.slane %v6695_v44, 2  ;;  %v6785_v42 = vrot.slane %v6766_v34, 2  ;;  %v6697_v62 = vpop.f32.mrb[29].mxu0  ;;  %v6768_v58 = vpop.f32.mrb[41].mxu1 }
0x11a9   :  { %v6784_v43 = vrot.slane %v6697_v62, 2  ;;  %v6786_v57 = vrot.slane %v6768_v58, 2  ;;  %v12440_v34 = vpop.eup %12439 }
0x11aa   :  { %v6799_v52 = vadd.f32 %v13594_v10, %v6783_v0  ;;  %v6801_v40 = vadd.f32 %v13623_v14, %v6785_v42  ;;  %v12442_v20 = vpop.eup %12441 }
0x11ab   :  { %v6800_v45 = vadd.f32 %v15221_v19, %v6784_v43  ;;  %v6802_v51 = vadd.f32 %v13626_v26, %v6786_v57 }
0x11ac   :  { %12443 = vtanh.f32 %v6799_v52  ;;  %v7634_v50 = vmul.f32 -1.442695, %v6801_v40 }
0x11ad   :  { %12445 = vtanh.f32 %v6800_v45  ;;  %v7635_v37 = vmul.f32 -1.442695, %v6802_v51 }
0x11ae   :  { %12447 = vpow2.f32 %v7634_v50 }
0x11af   :  { %12449 = vpow2.f32 %v7635_v37 }
0x11b6   :  { %v12444_v21 = vpop.eup %12443 }
0x11b7   :  { %v12446_v7 = vpop.eup %12445  ;;  %v6849_v6 = vmul.f32 %v12444_v21, %v12440_v34 }
0x11b8   :  { %v12448_v44 = vpop.eup %12447  ;;  %v6850_v0 = vmul.f32 %v12446_v7, %v12442_v20 }
0x11b9   :  { %v12450_v62 = vpop.eup %12449  ;;  %v14559_v42 = vadd.f32 %v6849_v6, %v6847_v27  ;;  %v6835_v63 = vadd.f32 1.0, %v12448_v44  ;;  %v7280_v6 = vld [vmem:[#allocation11 + $0x10] sm:$0xff]  ;;  %v7281_v44 = vld [vmem:[#allocation11 + $0x18] sm:$0xff] }
0x11ba   :  { %v14561_v58 = vadd.f32 %v6850_v0, %v6848_v36  ;;  %v6836_v43 = vadd.f32 1.0, %v12450_v62  ;;  %v11108_v0 = vpack.c.bf16 %v7281_v44, %v7280_v6  ;;  %v7298_v62 = vld [vmem:[#allocation11 + $0xa0] sm:$0xff] }
0x11bb   :  { %12451 = vtanh.f32 %v14559_v42 }
0x11bc   :  { %12453 = vrcp.f32 %v6835_v63  ;;  %v7299_v63 = vld [vmem:[#allocation11 + $0xa8] sm:$0xff] }
0x11bd   :  { %12455 = vtanh.f32 %v14561_v58 }
0x11be   :  { %12457 = vrcp.f32 %v6836_v43  ;;  %v11110_v43 = vpack.c.bf16 %v7299_v63, %v7298_v62  ;;  %v7240_v63 = vrot.slane %v14561_v58, 7 }
0x11c5   :  { %v12452_v57 = vpop.eup %12451 }
0x11c6   :  { %v12454_v52 = vpop.eup %12453 }
0x11c7   :  { %v12456_v40 = vpop.eup %12455  ;;  %v6855_v45 = vmul.f32 %v12454_v52, %v12452_v57  ;;  %v7282_v57 = vld [vmem:[#allocation11 + $0x20] sm:$0xff]  ;;  %v7283_v52 = vld [vmem:[#allocation11 + $0x28] sm:$0xff] }
0x11c8   :  { %v12458_v51 = vpop.eup %12457 }
0x11c9   :  { %v6856_v50 = vmul.f32 %v12458_v51, %v12456_v40  ;;  %v14565_v27 = vrot.slane %v6855_v45, 6  ;;  %v11112_v40 = vpack.c.bf16 %v7283_v52, %v7282_v57  ;;  %v7301_v51 = vld [vmem:[#allocation11 + $0xb8] sm:$0xff] }
0x11cb   :  { %v6880_v37 = vrot.slane %v6856_v50, 6  ;;  %v6859_v34 = vcombine.high %v6855_v45, %v6856_v50  ;;  %v7300_v45 = vld [vmem:[#allocation11 + $0xb0] sm:$0xff] }
0x11cc   :  { %v11114_v50 = vpack.c.bf16 %v7301_v51, %v7300_v45 }
0x11cd   :  { %6947 = vmatprep.mubr.f32.mxu0 %v6880_v37  ;;  %7018 = vmatprep.mubr.f32.mxu1 %v6880_v37  ;;  %v6866_v36 = vrot.slane %v6859_v34, %v13635_v9  ;;  %v7285_v34 = vld [vmem:[#allocation11 + $0x38] sm:$0xff] }
0x11ce   :  { %6948 = vmatmul.mubr.f32.vlgmr.msra.gmra.mrb[30].mxu0 %v14565_v27  ;;  %7019 = vmatmul.mubr.f32.vlgmr.msra.gmra.mrb[42].mxu1 %v14565_v27 }
0x11cf   :  { %v6873_v20 = vrot.slane %v6866_v36, %v13635_v9  ;;  %10977 = vmatpush1.bf16.msra.mxu0 %v13098_v23  ;;  %11041 = vmatpush1.bf16.msra.mxu1 %v13441_v4  ;;  %v15696_v23 = vld [vmem:[#allocation139_spill] sm:$0xff]  ;;  %v15699_v4 = vld [vmem:[#allocation48_spill] sm:$0xff] }
0x11d0   :  { %7089 = vmatprep.mubr.f32.mxu0 %v6880_v37  ;;  %7160 = vmatprep.mubr.f32.mxu1 %v6880_v37  ;;  %v7284_v37 = vld [vmem:[#allocation11 + $0x30] sm:$0xff]  ;;  %v7302_v36 = vld [vmem:[#allocation11 + $0xc0] sm:$0xff] }
0x11d1   :  { %v6874_v21 = vcombine.high %v6873_v20, %v6873_v20  ;;  %10979 = vmatprep.subr.bf16.mxu0 %v13103_v29  ;;  %11043 = vmatprep.subr.bf16.mxu1 %v13444_v41  ;;  %v15697_v29 = vld [vmem:[#allocation47_spill] sm:$0xff]  ;;  %v15700_v41 = vld [vmem:[#allocation141_spill] sm:$0xff] }
0x11d2   :  { %v7303_v20 = vld [vmem:[#allocation11 + $0xc8] sm:$0xff] }
0x11d3   :  { %6877 = vst.msk [vmem:[#allocation2 + $0x6] ss:$8 sm:$0x3] %vm13644_vm6, %v6874_v21  ;;  %10981 = vmatpush1.bf16.msra.mxu0 %v13106_v32  ;;  %11045 = vmatpush1.bf16.msra.mxu1 %v13448_v47  ;;  %v15698_v32 = vld [vmem:[#allocation140_spill] sm:$0xff]  ;;  %v15701_v47 = vld [vmem:[#allocation49_spill] sm:$0xff]  ;;  %v11118_v21 = vpack.c.bf16 %v7303_v20, %v7302_v36 }
0x11d4   :  { %10983 = vmatprep.subr.bf16.mxu0 %v15131_v60  ;;  %11047 = vmatprep.subr.bf16.mxu1 %v15132_v30  ;;  %v15702_v60 = vld [vmem:[#allocation142_spill] sm:$0xff] }
0x11d5   :  { %v15703_v30 = vld [vmem:[#allocation50_spill] sm:$0xff] }
0x11d7   :  { %10985 = vmatpush1.bf16.msra.mxu0 %v15133_v31  ;;  %11049 = vmatpush1.bf16.msra.mxu1 %v15222_v59  ;;  %v15704_v31 = vld [vmem:[#allocation143_spill] sm:$0xff] }
0x11d8   :  { %10987 = vmatprep.subr.bf16.mxu0 %v15223_v3  ;;  %11051 = vmatprep.subr.bf16.mxu1 %v15224_v46  ;;  %v15705_v59 = vld [vmem:[#allocation51_spill] sm:$0xff]  ;;  %v15706_v3 = vld [vmem:[#allocation144_spill] sm:$0xff] }
0x11d9   :  { %v15707_v46 = vld [vmem:[#allocation52_spill] sm:$0xff] }
0x11db   :  { %10989 = vmatpush1.bf16.msra.mxu0 %v15225_v35  ;;  %11053 = vmatpush1.bf16.msra.mxu1 %v15226_v22  ;;  %v15708_v35 = vld [vmem:[#allocation145_spill] sm:$0xff] }
0x11dc   :  { %10991 = vmatprep.subr.bf16.mxu0 %v15227_v16  ;;  %11055 = vmatprep.subr.bf16.mxu1 %v15316_v39  ;;  %v15709_v22 = vld [vmem:[#allocation53_spill] sm:$0xff]  ;;  %v15710_v16 = vld [vmem:[#allocation146_spill] sm:$0xff]  ;;  %v15712_v39 = vld [vmem:[#allocation147_spill] sm:$0xff] }
0x11df   :  { %10993 = vmatpush1.bf16.msra.mxu0 %v15317_v33  ;;  %11057 = vmatpush1.bf16.msra.mxu1 %v15318_v13  ;;  %v15713_v33 = vld [vmem:[#allocation55_spill] sm:$0xff]  ;;  %v15714_v13 = vld [vmem:[#allocation148_spill] sm:$0xff] }
0x11e0   :  { %10995 = vmatprep.subr.bf16.mxu0 %v15319_v8  ;;  %11059 = vmatprep.subr.bf16.mxu1 %v15320_v55  ;;  %v15715_v8 = vld [vmem:[#allocation56_spill] sm:$0xff]  ;;  %v15716_v55 = vld [vmem:[#allocation149_spill] sm:$0xff] }
0x11e3   :  { %10997 = vmatpush1.bf16.msra.mxu0 %v15321_v25  ;;  %11061 = vmatpush1.bf16.msra.mxu1 %v15322_v53  ;;  %v15717_v25 = vld [vmem:[#allocation57_spill] sm:$0xff]  ;;  %v15718_v53 = vld [vmem:[#allocation150_spill] sm:$0xff] }
0x11e4   :  { %10999 = vmatprep.subr.bf16.mxu0 %v15323_v24  ;;  %11063 = vmatprep.subr.bf16.mxu1 %v15324_v61  ;;  %v15719_v24 = vld [vmem:[#allocation58_spill] sm:$0xff]  ;;  %v15720_v61 = vld [vmem:[#allocation151_spill] sm:$0xff] }
0x11e7   :  { %11001 = vmatpush1.bf16.msra.mxu0 %v15325_v49  ;;  %11065 = vmatpush1.bf16.msra.mxu1 %v15326_v15  ;;  %v15721_v49 = vld [vmem:[#allocation59_spill] sm:$0xff]  ;;  %v15722_v15 = vld [vmem:[#allocation152_spill] sm:$0xff] }
0x11e8   :  { %11003 = vmatprep.subr.bf16.mxu0 %v15327_v28  ;;  %11067 = vmatprep.subr.bf16.mxu1 %v15411_v38  ;;  %v7294_v28 = vld [vmem:[#allocation11 + $0x80] sm:$0xff] }
0x11eb   :  { %11005 = vmatpush1.bf16.msra.mxu0 %v15329_v18  ;;  %11069 = vmatpush1.bf16.msra.mxu1 %v15412_v12  ;;  %v7295_v18 = vld [vmem:[#allocation11 + $0x88] sm:$0xff]  ;;  %v7296_v12 = vld [vmem:[#allocation11 + $0x90] sm:$0xff] }
0x11ec   :  { %11007 = vmatprep.subr.bf16.mxu0 %v15330_v1  ;;  %11071 = vmatprep.subr.bf16.mxu1 %v15244_v48  ;;  %v15711_v48 = vld [vmem:[#allocation54_spill] sm:$0xff]  ;;  %v11102_v1 = vpack.c.bf16 %v7295_v18, %v7294_v28  ;;  %v15724_v18 = vld [vmem:[#allocation155_spill] sm:$0xff] }
0x11ef   :  { %11009 = vmatpush1.bf16.msra.mxu0 %v15331_v11  ;;  %11073 = vmatpush1.bf16.msra.mxu1 %v15413_v2  ;;  %v7278_v11 = vld [vmem:[#allocation11] sm:$0xff]  ;;  %v7297_v2 = vld [vmem:[#allocation11 + $0x98] sm:$0xff] }
0x11f0   :  { %11011 = vmatprep.subr.bf16.mxu0 %v15332_v17  ;;  %11075 = vmatprep.subr.bf16.mxu1 %v15696_v23  ;;  %v7279_v17 = vld [vmem:[#allocation11 + $0x8] sm:$0xff]  ;;  %v11106_v7 = vpack.c.bf16 %v7297_v2, %v7296_v12  ;;  %v7286_v23 = vld [vmem:[#allocation11 + $0x40] sm:$0xff] }
0x11f1   :  { %v11104_v38 = vpack.c.bf16 %v7279_v17, %v7278_v11  ;;  %v15725_v11 = vld [vmem:[#allocation156_spill] sm:$0xff] }
0x11f3   :  { %11013 = vmatpush1.bf16.msra.mxu0 %v15697_v29  ;;  %11077 = vmatpush1.bf16.msra.mxu1 %v15698_v32  ;;  %v7287_v29 = vld [vmem:[#allocation11 + $0x48] sm:$0xff] }
0x11f4   :  { %11015 = vmatprep.subr.bf16.mxu0 %v15699_v4  ;;  %11079 = vmatprep.subr.bf16.mxu1 %v15700_v41  ;;  %v11120_v32 = vpack.c.bf16 %v7287_v29, %v7286_v23  ;;  %v7304_v4 = vld [vmem:[#allocation11 + $0xd0] sm:$0xff]  ;;  %v7305_v41 = vld [vmem:[#allocation11 + $0xd8] sm:$0xff] }
0x11f7   :  { %11017 = vmatpush1.bf16.msra.mxu0 %v15701_v47  ;;  %11081 = vmatpush1.bf16.msra.mxu1 %v15702_v60  ;;  %v11122_v47 = vpack.c.bf16 %v7305_v41, %v7304_v4  ;;  %v7288_v60 = vld [vmem:[#allocation11 + $0x50] sm:$0xff] }
0x11f8   :  { %11019 = vmatprep.subr.bf16.mxu0 %v15703_v30  ;;  %11083 = vmatprep.subr.bf16.mxu1 %v15704_v31  ;;  %v7289_v30 = vld [vmem:[#allocation11 + $0x58] sm:$0xff] }
0x11f9   :  { %v11124_v31 = vpack.c.bf16 %v7289_v30, %v7288_v60 }
0x11fb   :  { %11021 = vmatpush1.bf16.msra.mxu0 %v15705_v59  ;;  %11085 = vmatpush1.bf16.msra.mxu1 %v15706_v3  ;;  %v7306_v59 = vld [vmem:[#allocation11 + $0xe0] sm:$0xff]  ;;  %v7307_v3 = vld [vmem:[#allocation11 + $0xe8] sm:$0xff] }
0x11fc   :  { %11023 = vmatprep.subr.bf16.mxu0 %v15707_v46  ;;  %11087 = vmatprep.subr.bf16.mxu1 %v15708_v35  ;;  %v11126_v46 = vpack.c.bf16 %v7307_v3, %v7306_v59  ;;  %v7290_v35 = vld [vmem:[#allocation11 + $0x60] sm:$0xff] }
0x11ff   :  { %11025 = vmatpush1.bf16.msra.mxu0 %v15709_v22  ;;  %11089 = vmatpush1.bf16.msra.mxu1 %v15710_v16  ;;  %v7291_v22 = vld [vmem:[#allocation11 + $0x68] sm:$0xff] }
0x1200   :  { %11027 = vmatprep.subr.bf16.mxu0 %v15711_v48  ;;  %11091 = vmatprep.subr.bf16.mxu1 %v15712_v39  ;;  %v11128_v16 = vpack.c.bf16 %v7291_v22, %v7290_v35  ;;  %v7308_v48 = vld [vmem:[#allocation11 + $0xf0] sm:$0xff]  ;;  %v7309_v39 = vld [vmem:[#allocation11 + $0xf8] sm:$0xff] }
0x1203   :  { %11029 = vmatpush1.bf16.msra.mxu0 %v15713_v33  ;;  %11093 = vmatpush1.bf16.msra.mxu1 %v15714_v13  ;;  %v7292_v33 = vld [vmem:[#allocation11 + $0x70] sm:$0xff]  ;;  %v11130_v13 = vpack.c.bf16 %v7309_v39, %v7308_v48 }
0x1204   :  { %11031 = vmatprep.subr.bf16.mxu0 %v15715_v8  ;;  %11095 = vmatprep.subr.bf16.mxu1 %v15716_v55  ;;  %v7293_v8 = vld [vmem:[#allocation11 + $0x78] sm:$0xff] }
0x1205   :  { %v11132_v55 = vpack.c.bf16 %v7293_v8, %v7292_v33 }
0x1207   :  { %11033 = vmatpush1.bf16.msra.mxu0 %v15717_v25  ;;  %11097 = vmatpush1.bf16.msra.mxu1 %v15718_v53  ;;  %v15723_v25 = vmov 0.0  }
0x1208   :  { %11035 = vmatprep.subr.bf16.mxu0 %v15719_v24  ;;  %11099 = vmatprep.subr.bf16.mxu1 %v15720_v61 }
0x120b   :  { %11037 = vmatpush1.bf16.msra.mxu0 %v15721_v49  ;;  %11101 = vmatpush1.bf16.msra.mxu1 %v15722_v15 }
0x120c   :  { %11103 = vmatprep.subr.bf16.mxu0 %v11102_v1 }
0x120e   :  { %7090 = vmatmul.mubr.f32.vlgmr.msra.gmra.mrb[32].mxu0 %v14565_v27  ;;  %7161 = vmatmul.mubr.f32.vlgmr.msra.gmra.mrb[44].mxu1 %v14565_v27  ;;  %v11116_v27 = vpack.c.bf16 %v7285_v34, %v7284_v37 }
0x120f   :  { %11105 = vmatpush3.bf16.msra.mxu0 %v11104_v38 }
0x1210   :  { %11107 = vmatprep.subr.bf16.mxu0 %v11106_v7 }
0x1213   :  { %11109 = vmatpush3.bf16.msra.mxu0 %v11108_v0  ;;  %v7239_v0 = vrot.slane %v14559_v42, 7 }
0x1214   :  { %11111 = vmatprep.subr.bf16.mxu0 %v11110_v43 }
0x1217   :  { %11113 = vmatpush3.bf16.msra.mxu0 %v11112_v40 }
0x1218   :  { %11115 = vmatprep.subr.bf16.mxu0 %v11114_v50 }
0x121b   :  { %11117 = vmatpush3.bf16.msra.mxu0 %v11116_v27 }
0x121c   :  { %11119 = vmatprep.subr.bf16.mxu0 %v11118_v21 }
0x121f   :  { %11121 = vmatpush3.bf16.msra.mxu0 %v11120_v32 }
0x1220   :  { %11123 = vmatprep.subr.bf16.mxu0 %v11122_v47 }
0x1223   :  { %11125 = vmatpush3.bf16.msra.mxu0 %v11124_v31 }
0x1224   :  { %11127 = vmatprep.subr.bf16.mxu0 %v11126_v46 }
0x1227   :  { %11129 = vmatpush3.bf16.msra.mxu0 %v11128_v16 }
0x1228   :  { %11131 = vmatprep.subr.bf16.mxu0 %v11130_v13 }
0x122b   :  { %11133 = vmatpush3.bf16.msra.mxu0 %v11132_v55 }
0x122c   :  { %7732 = vmatprep.subr.mxu0 %v15723_v25 }
0x12a1   :  { %v6949_v53 = vpop.f32.mrb[30].mxu0  ;;  %v7020_v24 = vpop.f32.mrb[42].mxu1 }
0x12a2   :  { %v7177_v61 = vrot.slane %v7020_v24, 1  ;;  %v6951_v49 = vpop.f32.mrb[31].mxu0  ;;  %v7022_v15 = vpop.f32.mrb[43].mxu1  ;;  %v7175_v40 = vrot.slane %v6949_v53, 1 }
0x12a3   :  { %v7178_v28 = vrot.slane %v7022_v15, 1  ;;  %v7176_v45 = vrot.slane %v6951_v49, 1 }
0x12a4   :  { %v7193_v1 = vadd.f32 %v15724_v18, %v7177_v61  ;;  %v7191_v51 = vadd.f32 %v15220_v54, %v7175_v40 }
0x12a5   :  { %v7194_v17 = vadd.f32 %v15725_v11, %v7178_v28  ;;  %v7192_v50 = vadd.f32 %v13586_v5, %v7176_v45 }
0x12a6   :  { %v7638_v38 = vmul.f32 -1.442695, %v7193_v1  ;;  %v7636_v37 = vmul.f32 -1.442695, %v7191_v51 }
0x12a7   :  { %v7639_v12 = vmul.f32 -1.442695, %v7194_v17  ;;  %v7637_v34 = vmul.f32 -1.442695, %v7192_v50 }
0x12a8   :  { %12459 = vpow2.f32 %v7638_v38 }
0x12a9   :  { %12461 = vpow2.f32 %v7639_v12  ;;  %v7642_v12 = vld [vmem:[#allocation12] ss:$0 sm:$0xff] }
0x12b2   :  { %v12460_v2 = vpop.eup %12459 }
0x12b3   :  { %v7217_v7 = vadd.f32 1.0, %v12460_v2  ;;  %v12462_v6 = vpop.eup %12461 }
0x12b4   :  { %v7218_v44 = vadd.f32 1.0, %v12462_v6 }
0x12b5   :  { %12463 = vrcp.f32 %v7217_v7 }
0x12b6   :  { %12465 = vrcp.f32 %v7218_v44 }
0x12b7   :  { %12467 = vpow2.f32 %v7636_v37 }
0x12b8   :  { %12469 = vpow2.f32 %v7637_v34 }
0x12bf   :  { %v12464_v62 = vpop.eup %12463 }
0x12c0   :  { %v7243_v43 = vmul.f32 %v12464_v62, %v7239_v0  ;;  %v12466_v57 = vpop.eup %12465 }
0x12c1   :  { %v7244_v52 = vmul.f32 %v12466_v57, %v7240_v63  ;;  %v12468_v27 = vpop.eup %12467 }
0x12c2   :  { %v12470_v36 = vpop.eup %12469  ;;  %v7205_v20 = vadd.f32 1.0, %v12468_v27 }
0x12c3   :  { %v7206_v42 = vadd.f32 1.0, %v12470_v36 }
0x12c4   :  { %12471 = vrcp.f32 %v7205_v20 }
0x12c5   :  { %12473 = vrcp.f32 %v7206_v42 }
0x12ce   :  { %v12472_v3 = vpop.eup %12471 }
0x12cf   :  { %v12474_v46 = vpop.eup %12473 }
0x12e1   :  { %v7091_v21 = vpop.f32.mrb[32].mxu0  ;;  %v7162_v23 = vpop.f32.mrb[44].mxu1 }
0x12e2   :  { %v7179_v58 = vrot.slane %v7091_v21, 1  ;;  %v7181_v29 = vrot.slane %v7162_v23, 1  ;;  %v7093_v32 = vpop.f32.mrb[33].mxu0  ;;  %v7164_v4 = vpop.f32.mrb[45].mxu1 }
0x12e3   :  { %v7180_v41 = vrot.slane %v7093_v32, 1  ;;  %v7182_v47 = vrot.slane %v7164_v4, 1 }
0x12e4   :  { %v7195_v54 = vadd.f32 %v13594_v10, %v7179_v58  ;;  %v7197_v5 = vadd.f32 %v13623_v14, %v7181_v29 }
0x12e5   :  { %v7196_v60 = vadd.f32 %v15221_v19, %v7180_v41  ;;  %v7198_v30 = vadd.f32 %v13626_v26, %v7182_v47 }
0x12e6   :  { %12475 = vtanh.f32 %v7195_v54  ;;  %v7640_v31 = vmul.f32 -1.442695, %v7197_v5 }
0x12e7   :  { %12477 = vtanh.f32 %v7196_v60  ;;  %v7641_v59 = vmul.f32 -1.442695, %v7198_v30 }
0x12e8   :  { %12479 = vpow2.f32 %v7640_v31 }
0x12e9   :  { %12481 = vpow2.f32 %v7641_v59 }
0x12f0   :  { %v12476_v35 = vpop.eup %12475 }
0x12f1   :  { %v12478_v22 = vpop.eup %12477  ;;  %v7245_v16 = vmul.f32 %v12476_v35, %v12472_v3 }
0x12f2   :  { %v12480_v48 = vpop.eup %12479  ;;  %v7246_v10 = vmul.f32 %v12478_v22, %v12474_v46 }
0x12f3   :  { %v12482_v39 = vpop.eup %12481  ;;  %v7247_v14 = vadd.f32 %v7245_v16, %v7243_v43  ;;  %v7231_v33 = vadd.f32 1.0, %v12480_v48 }
0x12f4   :  { %v7248_v13 = vadd.f32 %v7246_v10, %v7244_v52  ;;  %v7232_v19 = vadd.f32 1.0, %v12482_v39 }
0x12f5   :  { %12483 = vtanh.f32 %v7247_v14 }
0x12f6   :  { %12485 = vrcp.f32 %v7231_v33 }
0x12f7   :  { %12487 = vtanh.f32 %v7248_v13 }
0x12f8   :  { %12489 = vrcp.f32 %v7232_v19 }
0x12ff   :  { %v12484_v26 = vpop.eup %12483 }
0x1300   :  { %v12486_v8 = vpop.eup %12485 }
0x1301   :  { %v12488_v55 = vpop.eup %12487  ;;  %v7251_v53 = vmul.f32 %v12486_v8, %v12484_v26 }
0x1302   :  { %v12490_v24 = vpop.eup %12489 }
0x1303   :  { %v7252_v61 = vmul.f32 %v12490_v24, %v12488_v55 }
0x1305   :  { %v7255_v49 = vcombine.high %v7251_v53, %v7252_v61 }
0x1307   :  { %v7262_v15 = vrot.slane %v7255_v49, %v13635_v9 }
0x1309   :  { %v7263_v28 = vcombine.high %v7262_v15, %v7262_v15 }
0x130b   :  { %v7270_v18 = vrot.slane %v7263_v28, %v13635_v9 }
0x130d   :  { %v7271_v1 = vcombine.high %v7270_v18, %v7270_v18 }
0x130f   :  { %7274 = vst.msk [vmem:[#allocation2 + $0x7] ss:$8 sm:$0x3] %vm13644_vm6, %v7271_v1 }
0x1316   :  { %v7277_v11 = vld [vmem:[#allocation2 + $0x8] sm:$0xff]  ;;  %v7276_v17 = vld [vmem:[#allocation2] sm:$0xff] }
0x1317   :  { %7381 = vmatprep.mubr.f32.mxu0 %v7277_v11 }
0x1318   :  { %7382 = vmatmul.mubr.f32.vlgmr.msra.gmra.mrb[34].mxu0 %v7276_v17 }
0x1319   :  { %7734 = vmatprep.mubr.msk.f32.mxu0 %vm12805_vm0, %v15723_v25 }
0x13eb   :  { %v7715_v38 = vpop.f32.mrb[34].mxu0 }
0x13ec   :  { %v7716_v2 = vpop.f32.mrb[35].mxu0 }
0x13ed   :  { %v7717_v7 = vadd.f32 %v7716_v2, %v7715_v38 }
0x13ef   :  { %v7384_v6 = vadd.f32 %v7717_v7, %v7642_v12 }
0x13f1   :  { %v7387_v44 = vmax.f32 %v7384_v6, 0.0 }
0x13f3   :  { %7733 = vmatpush3.xpose.msra.mxu0 %v7387_v44 }
0x13f4   :  { %7737 = vmatprep.subr.mxu0 %v15723_v25 }
0x13f6   :  { %7735 = vmatmul.mubr.f32.vlgmr.msra.gmra.mrb[36].mxu0 %v7387_v44 }
0x13f7   :  { %7738 = vmatpush3.msra.mxu0 %v7387_v44  ;;  %7739 = vmatprep.mubr.msk.f32.mxu0 %vm12805_vm0, %v15723_v25 }
0x14c9   :  { %v7454_v9 = vpop.f32.mrb[36].mxu0 }
0x14ca   :  { %v7736_v56 = vpop.f32.mrb[37].mxu0  ;;  %v7459_v0 = vsel %vm7458_vm7, %v7454_v9, -inf }
0x14cb   :  { %7460 = vmax.xlane.f32.xlu1 %v7459_v0 }
0x1558   :  { %v7461_v62 = vpop.xlane.xlu1 %7460 }
0x1559   :  { %v7462_v63 = vsub.f32 %v7454_v9, %v7461_v62 }
0x155b   :  { %v7463_v43 = vmul.f32 1.442695, %v7462_v63 }
0x155d   :  { %12491 = vpow2.f32 %v7463_v43 }
0x1567   :  { %v12492_v57 = vpop.eup %12491 }
0x1568   :  { %v7465_v52 = vsel %vm7458_vm7, %v12492_v57, 0.0 }
0x1569   :  { %7466 = vadd.xlane.f32.xlu1 %v7465_v52 }
0x15f6   :  { %v7467_v40 = vpop.xlane.xlu1 %7466 }
0x15f7   :  { %12493 = vrcp.f32 %v7467_v40 }
0x1601   :  { %v12494_v45 = vpop.eup %12493 }
0x1602   :  { %v7469_v51 = vmul.f32 %v12494_v45, %v12492_v57 }
0x1604   :  { %7740 = vmatmul.mubr.msk.f32.vlgmr.msra.gmra.mrb[38].mxu0 %vm7458_vm7, %v7469_v51 }
0x16d7   :  { %v7539_v25 = vpop.f32.mrb[38].mxu0 }
0x16d8   :  { %v7741_v50 = vpop.f32.mrb[39].mxu0  ;;  %v7543_v37 = vmul.f32 %v7539_v25, %v7539_v25 }
0x16da   :  { %7544 = vadd.xlane.f32.xlu1 %v7543_v37 }
0x16db   :  { %12739 = shalt.err (!%p12736_p0)
}
0x16dc   :  { %s12740_s23 = scalar_lea.hbm %s14695_s11, 64 }
0x16dd   :  { %p12741_p1 = scmp.ne.s32.totalorder %s14695_s11, %s12740_s23  ;;  %p12744_p2 = scmp.lt.u32.totalorder %s12740_s23, %s14695_s11 }
0x16df   :  { %p12746_p3 = pnand %p12744_p2, %p12741_p1 }
0x16e1   :  { %12749 = shalt.err (!%p12746_p3)
}
0x16e2   :  { %7566 = dma.vmem_to_hbm [thread:$0]  %s7564_s5, 64, %s14695_s11, [#allocation5]  }
0x16e3   :  { %s12808_s7 = smov [#allocation21]  }
0x16e4   :  { %s7573_s27 = sshll.u32 %s12808_s7, 4  ;;  %s7574_s27 = int_to_ptr.vmem [resolvable:$true] %s7573_s27 }
0x16e5   :  { %s12750_s28 = scalar_lea.vmem %s7574_s27, 128  ;;  %p12755_p5 = scmp.lt.s32.totalorder %s7574_s27, %s7574_s27 }
0x16e6   :  { %p12751_p4 = scmp.ne.s32.totalorder %s7574_s27, %s12750_s28  ;;  %p12756_p6 = scmp.lt.s32.totalorder %s12750_s28, %s12750_s28 }
0x16e8   :  { %p12757_p7 = por %p12756_p6, %p12755_p5 }
0x16ea   :  { %p12758_p8 = pnand %p12757_p7, %p12751_p4 }
0x1767   :  { %v7545_v34 = vpop.xlane.xlu1 %7544 }
0x1768   :  { %12495 = vrsqrt.f32 %v7545_v34  ;;  %vm7548_vm8 = vcmp.eq.f32.partialorder %v7545_v34, inf  ;;  %v7551_v20 = vand.u32 2147483648, %v7545_v34  ;;  %vm7550_vm9 = vcmp.eq.f32.partialorder %v7545_v34, 0.0 }
0x1772   :  { %v12496_v27 = vpop.eup %12495 }
0x1773   :  { %v7547_v36 = vmul.f32 %v12496_v27, %v7545_v34 }
0x1775   :  { %v7549_v42 = vsel %vm7548_vm8, %v7545_v34, %v7547_v36 }
0x1776   :  { %v7552_v21 = vsel %vm7550_vm9, %v7551_v20, %v7549_v42 }
0x1777   :  { %v7553_v23 = vadd.f32 1e-08, %v7552_v21 }
0x1779   :  { %12497 = vrcp.f32 %v7553_v23 }
0x1783   :  { %v12498_v58 = vpop.eup %12497 }
0x1784   :  { %v7555_v29 = vmul.f32 %v12498_v58, %v7539_v25 }
0x1786   :  { %7556 = vst [vmem:[#allocation21] sm:$0xff] %v7555_v29 }
0x1787   :  { %12761 = shalt.err (!%p12758_p8)
}
0x1788   :  { %s12762_s13 = scalar_lea.hbm %s14696_s12, 128 }
0x1789   :  { %p12763_p9 = scmp.ne.s32.totalorder %s14696_s12, %s12762_s13  ;;  %p12766_p10 = scmp.lt.u32.totalorder %s12762_s13, %s14696_s12 }
0x178b   :  { %p12768_p11 = pnand %p12766_p10, %p12763_p9 }
0x178d   :  { %12771 = shalt.err (!%p12768_p11)
}
0x178e   :  { %7576 = dma.vmem_to_hbm [thread:$0]  %s7574_s27, 128, %s14696_s12, [#allocation22]  }
0x178f   :  { %12784 = dma.done.wait [#allocation5], 64  }
0x1790   :  { %12785 = vsyncadd [#allocation5], 4294967232 }
0x1791   :  { %12786 = dma.done.wait [#allocation22], 128  }
0x1792   :  { %12787 = vsyncadd [#allocation22], 4294967168 }
0x1793   :  { %7583 = vsyncpa [#allocation4], 1 }
0x1794   :  { %7584 = vsyncpa [#allocation7], 1 }
0x1795   :  { %7585 = vsyncpa [#allocation10], 1 }
0x1796   :  { %7586 = vsyncpa [#allocation13], 1 }
0x1797   :  { %7587 = vsyncpa [#allocation16], 1 }
0x1798   :  { %7588 = vsyncpa [#allocation19], 1 }
0x1799   :  { %7589 = vsyncpa [#allocation5], 1 }
0x179a   :  { %7590 = vsyncpa [#allocation22], 1 }

</bundles_post_ra>
